<compile_context>
chip_gen: v7x
topology: tpu7x:2x2x1
jax: 0.10.0
libtpu: 0.0.40
codegen_flags: <defaults>
</compile_context>

<pallas_src>
import functools

import numpy as np
import jax
import jax.numpy as jnp
from jax.experimental import pallas as pl
from jax.experimental.pallas import tpu as pltpu


def _round_up(x, m):
    return ((x + m - 1) // m) * m


def _default_vmem_limit():
    # Generation-aware scoped-VMEM budget: ~3/4 of physical, capped at 96 MB
    # (v5e/v6e have 128 MiB, v7x has 64 MiB).  Conservative fallback 32 MB.
    try:
        cap = int(pltpu.get_tpu_info().vmem_capacity_bytes)
        return int(min(96 * 1024 * 1024, (cap * 3) // 4))
    except Exception:
        return 32 * 1024 * 1024


_VMEM_LIMIT = _default_vmem_limit()


# ----------------------------------------------------------------------------
# Kernel 1: fused stride-1 KxK conv + bias + ReLU (+ optional MaxPool2d(3, 2)).
#
# Wrapper pre-builds a kw-channel-concatenated input (rows, ksz*Cin) with a
# sublane-aligned row pitch Wpp; the kernel then does ksz chained MXU matmuls
# (K = ksz*Cin) over kh*Wpp-shifted row windows, applies bias+ReLU, and (when
# pool=True) reduces the VMEM-resident result to the full-resolution 3x3
# window-max map via two shifted-max passes.  The stride-2 subsample is a
# single strided slice in the wrapper.  The flattened-shift trick computes a
# few throwaway rows that are never selected by the wrapper slices.
# ----------------------------------------------------------------------------
def conv_relu_pool_pallas(x_nhwc, w_kh, b, *, ksz, pad, pool, out_hw=None,
                          out_dtype=jnp.bfloat16):
    """x_nhwc: (N,H,W,Cin); w_kh: (ksz, ksz*Cin, Cout) with
    w_kh[kh, kw*Cin+cin, co] = w[kh, kw, cin, co]; b: (Cout,).
    Returns (N, OH, OW, Cout) if pool=False else (N, PH, PW, Cout)."""
    N, H, W, Cin = x_nhwc.shape
    Cout = w_kh.shape[2]
    K = ksz * Cin
    Hp, Wp = H + 2 * pad, W + 2 * pad
    OH = (Hp - ksz + 1) if out_hw is None else out_hw[0]
    OW = (Wp - ksz + 1) if out_hw is None else out_hw[1]
    Wpp = _round_up(Wp, 8)                        # sublane-aligned row pitch

    if pool:
        PH, PW = (OH - 3) // 2 + 1, (OW - 3) // 2 + 1
        RH = 2 * (PH - 1) + 1                     # padded-grid rows the pool reads
        G_out = RH * Wpp                          # vmax rows emitted (full-res map)
        GH = G_out + 2 * Wpp                      # hmax rows needed
        GA = GH + 8                               # conv rows computed (8-aligned slack)
    else:
        G_out = OH * Wpp
        GA = G_out
    R_cat = GA + (ksz - 1) * Wpp                  # xcat rows read by the kernel

    # Padded image, flattened to (rows, Cin) with pitch Wpp (extra right/bottom
    # zeros are never read by the valid outputs kept below).
    xp = jnp.pad(x_nhwc.astype(jnp.bfloat16),
                 ((0, 0), (pad, pad), (pad, pad + Wpp - Wp), (0, 0)))
    x_flat = xp.reshape(N, Hp * Wpp, Cin)
    need = R_cat + (ksz - 1)
    if need > Hp * Wpp:
        x_flat = jnp.pad(x_flat, ((0, 0), (0, need - Hp * Wpp), (0, 0)))
    # kw taps concatenated on the lane axis (small feature maps -> cheap copy):
    # xcat[:, r, kw*Cin:(kw+1)*Cin] = x_flat[:, r + kw, :]
    xcat = jnp.concatenate([x_flat[:, kw:kw + R_cat, :] for kw in range(ksz)],
                           axis=-1)               # (N, R_cat, ksz*Cin)
    b2 = b.astype(jnp.float32).reshape(1, Cout)

    if pool:
        def kernel(x_ref, w_ref, b_ref, o_ref, ybuf, hbuf):
            # ksz chained MXU matmuls with deep K = ksz*Cin; value-carried
            # accumulator (no per-tap VMEM RMW), f32 accumulation.
            acc = jnp.dot(x_ref[pl.ds(0, GA), :], w_ref[0],
                          preferred_element_type=jnp.float32)
            for kh in range(1, ksz):
                acc = acc + jnp.dot(x_ref[pl.ds(kh * Wpp, GA), :], w_ref[kh],
                                    preferred_element_type=jnp.float32)
            ybuf[...] = jnp.maximum(acc + b_ref[...], 0.0).astype(out_dtype)
            # fused MaxPool2d(3, stride=2): horizontal then vertical 3-window
            # max (exact in bf16); subsample happens in the wrapper.
            hbuf[...] = jnp.maximum(
                jnp.maximum(ybuf[pl.ds(0, GH), :], ybuf[pl.ds(1, GH), :]),
                ybuf[pl.ds(2, GH), :])
            o_ref[...] = jnp.maximum(
                jnp.maximum(hbuf[pl.ds(0, G_out), :],
                            hbuf[pl.ds(Wpp, G_out), :]),
                hbuf[pl.ds(2 * Wpp, G_out), :])
        scratch = [pltpu.VMEM((GA, Cout), out_dtype),
                   pltpu.VMEM((GH, Cout), out_dtype)]
    else:
        def kernel(x_ref, w_ref, b_ref, o_ref):
            acc = jnp.dot(x_ref[pl.ds(0, GA), :], w_ref[0],
                          preferred_element_type=jnp.float32)
            for kh in range(1, ksz):
                acc = acc + jnp.dot(x_ref[pl.ds(kh * Wpp, GA), :], w_ref[kh],
                                    preferred_element_type=jnp.float32)
            o_ref[...] = jnp.maximum(acc + b_ref[...], 0.0).astype(out_dtype)
        scratch = []

    out = pl.pallas_call(
        kernel,
        out_shape=jax.ShapeDtypeStruct((N, G_out, Cout), out_dtype),
        grid=(N,),
        in_specs=[pl.BlockSpec((None, R_cat, K), lambda n: (n, 0, 0)),
                  pl.BlockSpec((ksz, K, Cout), lambda n: (0, 0, 0)),
                  pl.BlockSpec((1, Cout), lambda n: (0, 0))],
        out_specs=pl.BlockSpec((None, G_out, Cout), lambda n: (n, 0, 0)),
        scratch_shapes=scratch,
        compiler_params=pltpu.CompilerParams(
            dimension_semantics=("parallel",),
            vmem_limit_bytes=_VMEM_LIMIT),
    )(xcat, w_kh, b2)

    if pool:
        # stride-2 subsample of the full-resolution max map -> (N, PH, PW, C)
        return out.reshape(N, RH, Wpp, Cout)[:, ::2, :2 * PW:2, :]
    return out.reshape(N, OH, Wpp, Cout)[:, :, :OW, :]


def _pack_conv_kw(w_hwio):
    """(kh, kw, cin, cout) -> (kh, kw*cin, cout) bf16 for conv_relu_pool_pallas."""
    kh, kw, cin, cout = w_hwio.shape
    return w_hwio.astype(jnp.bfloat16).reshape(kh, kw * cin, cout)


# ----------------------------------------------------------------------------
# conv1 = Conv2d(3, 64, 11, stride=4, padding=2) + ReLU + MaxPool(3,2),
# lowered as space-to-depth (4x4 block -> 48ch) + 3x3/stride-1 conv with the
# fused pool epilogue.  Exact: the 11x11 kernel is zero-padded to 12x12.
# ----------------------------------------------------------------------------
def alexnet_conv1_s2d(x_nhwc, w1_hwio, b1):
    N, H, W, _ = x_nhwc.shape
    OH1 = (H + 4 - 11) // 4 + 1
    OW1 = (W + 4 - 11) // 4 + 1
    Hp4 = _round_up(H + 4, 4)
    Wp4 = _round_up(W + 4, 4)
    xp = jnp.pad(x_nhwc.astype(jnp.bfloat16),
                 ((0, 0), (2, Hp4 - H - 2), (2, Wp4 - W - 2), (0, 0)))
    xs2d = xp.reshape(N, Hp4 // 4, 4, Wp4 // 4, 4, 3)
    xs2d = xs2d.transpose(0, 1, 3, 2, 4, 5).reshape(N, Hp4 // 4, Wp4 // 4, 48)
    # weights: pad kernel 11->12 and regroup into 3x3 taps of (4,4,3)=48 channels,
    # matching the space-to-depth channel order (dh, dw, cin).
    w1p = jnp.pad(w1_hwio.astype(jnp.bfloat16), ((0, 1), (0, 1), (0, 0), (0, 0)))
    w1r = (w1p.reshape(3, 4, 3, 4, 3, 64).transpose(0, 2, 1, 3, 4, 5)
           .reshape(3, 3 * 48, 64))
    return conv_relu_pool_pallas(xs2d, w1r, b1, ksz=3, pad=0, pool=True,
                                 out_hw=(OH1, OW1))


# ----------------------------------------------------------------------------
# Kernel 2: tiled matmul + bias (+ReLU) — used only by the no-bottleneck head.
# ----------------------------------------------------------------------------
def _tiled_matmul_kernel(relu, x_ref, w_ref, b_ref, o_ref, acc_ref):
    k = pl.program_id(2)

    @pl.when(k == 0)
    def _():
        acc_ref[...] = jnp.zeros_like(acc_ref)

    acc_ref[...] += jnp.dot(x_ref[...], w_ref[...],
                            preferred_element_type=jnp.float32)

    @pl.when(k == pl.num_programs(2) - 1)
    def _():
        y = acc_ref[...] + b_ref[...]
        if relu:
            y = jnp.maximum(y, 0.0)
        o_ref[...] = y.astype(o_ref.dtype)


def linear_pallas(x, w, b, *, relu, out_dtype=jnp.bfloat16,
                  tm=1024, tn=256, tk=512):
    """y = x @ w + b (optional ReLU).  bf16 MXU operands, f32 accumulation."""
    M, K = x.shape
    Ncols = w.shape[1]
    tm = min(tm, _round_up(M, 8))
    tn = min(tn, _round_up(Ncols, 128))
    tk = min(tk, _round_up(K, 128))
    Mp, Np, Kp = _round_up(M, tm), _round_up(Ncols, tn), _round_up(K, tk)
    xp = jnp.pad(x.astype(jnp.bfloat16), ((0, Mp - M), (0, Kp - K)))
    wp = jnp.pad(w.astype(jnp.bfloat16), ((0, Kp - K), (0, Np - Ncols)))
    bp = jnp.pad(b.astype(jnp.float32), (0, Np - Ncols)).reshape(1, Np)
    out = pl.pallas_call(
        functools.partial(_tiled_matmul_kernel, relu),
        out_shape=jax.ShapeDtypeStruct((Mp, Np), out_dtype),
        grid=(Mp // tm, Np // tn, Kp // tk),
        in_specs=[pl.BlockSpec((tm, tk), lambda i, j, k: (i, k)),
                  pl.BlockSpec((tk, tn), lambda i, j, k: (k, j)),
                  pl.BlockSpec((1, tn), lambda i, j, k: (0, j))],
        out_specs=pl.BlockSpec((tm, tn), lambda i, j, k: (i, j)),
        scratch_shapes=[pltpu.VMEM((tm, tn), jnp.float32)],
        compiler_params=pltpu.CompilerParams(
            dimension_semantics=("parallel", "parallel", "arbitrary"),
            vmem_limit_bytes=_VMEM_LIMIT),
    )(xp, wp, bp)
    return out[:M, :Ncols]


# ----------------------------------------------------------------------------
# Kernel 3: fused head — bottleneck Linear(+ReLU) and fc Linear in a single
# pallas_call; the 128-wide intermediate stays in VMEM and the logits tile is
# 128-lane padded (lane-dense stores), sliced to n_classes in the wrapper.
# ----------------------------------------------------------------------------
def head_pallas(h, w1, b1, w2, b2, n_classes):
    M, K = h.shape
    D = w1.shape[1]
    Ncp = _round_up(n_classes, 128)
    tm = min(256, _round_up(M, 8))
    Mp = _round_up(M, tm)
    hp = jnp.pad(h.astype(jnp.bfloat16), ((0, Mp - M), (0, 0)))
    w1p = w1.astype(jnp.bfloat16)
    b1p = b1.astype(jnp.float32).reshape(1, D)
    w2p = jnp.pad(w2.astype(jnp.bfloat16), ((0, 0), (0, Ncp - n_classes)))
    b2p = jnp.pad(b2.astype(jnp.float32), (0, Ncp - n_classes)).reshape(1, Ncp)

    def kernel(x_ref, w1_ref, b1_ref, w2_ref, b2_ref, o_ref):
        z = jnp.dot(x_ref[...], w1_ref[...],
                    preferred_element_type=jnp.float32) + b1_ref[...]
        z = jnp.maximum(z, 0.0).astype(jnp.bfloat16)          # bottleneck ReLU
        y = jnp.dot(z, w2_ref[...],
                    preferred_element_type=jnp.float32) + b2_ref[...]
        o_ref[...] = y

    out = pl.pallas_call(
        kernel,
        out_shape=jax.ShapeDtypeStruct((Mp, Ncp), jnp.float32),
        grid=(Mp // tm,),
        in_specs=[pl.BlockSpec((tm, K), lambda i: (i, 0)),
                  pl.BlockSpec((K, D), lambda i: (0, 0)),
                  pl.BlockSpec((1, D), lambda i: (0, 0)),
                  pl.BlockSpec((D, Ncp), lambda i: (0, 0)),
                  pl.BlockSpec((1, Ncp), lambda i: (0, 0))],
        out_specs=pl.BlockSpec((tm, Ncp), lambda i: (i, 0)),
        compiler_params=pltpu.CompilerParams(
            dimension_semantics=("parallel",),
            vmem_limit_bytes=_VMEM_LIMIT),
    )(hp, w1p, b1p, w2p, b2p)
    return out[:M, :n_classes]


# ----------------------------------------------------------------------------
# AdaptiveAvgPool2d((6,6)) + NCHW flatten folded into the following Linear
# weight (exact PyTorch floor/ceil bin edges; avg-pool -> linear commutes).
# ----------------------------------------------------------------------------
def _fold_adaptive_pool(w_flat, c, out_hw, ph, pw):
    n_out = w_flat.shape[1]
    wr = w_flat.astype(jnp.float32).reshape(c, out_hw, out_hw, n_out)

    def bin_matrix(in_sz):
        m = np.zeros((in_sz, out_hw), np.float32)
        for i in range(out_hw):
            lo = (i * in_sz) // out_hw
            hi = -(-((i + 1) * in_sz) // out_hw)
            m[lo:hi, i] = 1.0 / (hi - lo)
        return jnp.asarray(m)

    mh, mw = bin_matrix(ph), bin_matrix(pw)
    w_eff = jnp.einsum('cijo,hi,wj->hwco', wr, mh, mw)    # (ph, pw, c, n_out)
    return w_eff.reshape(ph * pw * c, n_out)


# ----------------------------------------------------------------------------
# FinetuneNet (AlexNet backbone, use_bottleneck=True)
# ----------------------------------------------------------------------------
def init_params(key, n_classes, use_bottleneck=True):
    def conv(k, ksz, cin, cout):
        kw_, kb_ = jax.random.split(k)
        s = 1.0 / jnp.sqrt(jnp.float32(ksz * ksz * cin))
        return (jax.random.normal(kw_, (ksz, ksz, cin, cout), jnp.float32) * s,
                jax.random.normal(kb_, (cout,), jnp.float32) * s)

    def dense(k, kin, nout):
        kw_, kb_ = jax.random.split(k)
        s = 1.0 / jnp.sqrt(jnp.float32(kin))
        return (jax.random.normal(kw_, (kin, nout), jnp.float32) * s,
                jax.random.normal(kb_, (nout,), jnp.float32) * s)

    keys = jax.random.split(key, 7)
    p = {}
    p["c1w"], p["c1b"] = conv(keys[0], 11, 3, 64)      # Conv(3,64,11,s4,p2)
    p["c2w"], p["c2b"] = conv(keys[1], 5, 64, 192)     # Conv(64,192,5,p2)
    p["c3w"], p["c3b"] = conv(keys[2], 3, 192, 384)    # Conv(192,384,3,p1)
    p["c4w"], p["c4b"] = conv(keys[3], 3, 384, 256)    # Conv(384,256,3,p1)
    p["c5w"], p["c5b"] = conv(keys[4], 3, 256, 256)    # Conv(256,256,3,p1)
    if use_bottleneck:
        p["bw"], p["bb"] = dense(keys[5], 256 * 6 * 6, 128)   # Linear(9216,128)
        p["fw"], p["fb"] = dense(keys[6], 128, n_classes)     # Linear(128,ncls)
    else:
        p["fw"], p["fb"] = dense(keys[6], 256 * 6 * 6, n_classes)
    return p


def finetune_net_forward(params, xs_nchw, use_bottleneck=True):
    x = jnp.transpose(xs_nchw, (0, 2, 3, 1)).astype(jnp.bfloat16)   # NHWC, bf16 once
    N = x.shape[0]

    # conv1 + ReLU + maxpool (fused, via space-to-depth)
    y = alexnet_conv1_s2d(x, params["c1w"], params["c1b"])           # (N,·,·,64)
    # conv2 (5x5 p2) + ReLU + maxpool (fused)
    y = conv_relu_pool_pallas(y, _pack_conv_kw(params["c2w"]), params["c2b"],
                              ksz=5, pad=2, pool=True)               # (N,·,·,192)
    # conv3 / conv4 (3x3 p1) + ReLU
    y = conv_relu_pool_pallas(y, _pack_conv_kw(params["c3w"]), params["c3b"],
                              ksz=3, pad=1, pool=False)              # (N,·,·,384)
    y = conv_relu_pool_pallas(y, _pack_conv_kw(params["c4w"]), params["c4b"],
                              ksz=3, pad=1, pool=False)              # (N,·,·,256)
    # conv5 (3x3 p1) + ReLU + maxpool (fused)
    y = conv_relu_pool_pallas(y, _pack_conv_kw(params["c5w"]), params["c5b"],
                              ksz=3, pad=1, pool=True)               # (N,Ph,Pw,256)

    # AdaptiveAvgPool2d((6,6)) + torch.flatten(.,1) folded into the head weight.
    Ph, Pw, C5 = y.shape[1], y.shape[2], y.shape[3]
    hs = y.reshape(N, Ph * Pw * C5)
    n_classes = params["fb"].shape[0]
    if use_bottleneck:
        w_bneck = _fold_adaptive_pool(params["bw"], C5, 6, Ph, Pw)   # (Ph*Pw*256,128)
        logits = head_pallas(hs, w_bneck, params["bb"],
                             params["fw"], params["fb"], n_classes)
    else:
        w_fc = _fold_adaptive_pool(params["fw"], C5, 6, Ph, Pw)
        logits = linear_pallas(hs, w_fc, params["fb"], relu=False,
                               out_dtype=jnp.float32)
    return logits


if __name__ == "__main__":
    class Args:
        backbone = "AlexNet"
        pretrain = False
        use_bottleneck = True
        n_classes = 10

    key = jax.random.PRNGKey(0)
    k_param, k_x = jax.random.split(key)
    params = init_params(k_param, Args.n_classes, use_bottleneck=Args.use_bottleneck)
    # Small AlexNet-compatible input; 64x64 reaches a 1x1 feature map that the
    # (folded) AdaptiveAvgPool2d((6,6)) handles with exact PyTorch semantics.
    xs = jax.random.normal(k_x, (2, 3, 64, 64), jnp.float32)   # NCHW

    fwd = jax.jit(functools.partial(finetune_net_forward,
                                    use_bottleneck=Args.use_bottleneck))
    logits = jax.block_until_ready(fwd(params, xs))
    assert logits.shape == (2, Args.n_classes)
    assert bool(jnp.all(jnp.isfinite(logits)))
    print("KERNEL_OK")
</pallas_src>

<mosaic_0001>
module attributes {stable_mosaic.version = 11 : i64} {
  func.func @kernel(%arg0: i32, %arg1: memref<1x416x144xbf16, #tpu.memory_space<vmem>>, %arg2: memref<3x144x64xbf16, #tpu.memory_space<vmem>>, %arg3: memref<1x64xf32, #tpu.memory_space<vmem>>, %arg4: memref<1x312x64xbf16, #tpu.memory_space<vmem>>, %arg5: memref<368x64xbf16, #tpu.memory_space<vmem>>, %arg6: memref<360x64xbf16, #tpu.memory_space<vmem>>) attributes {dimension_semantics = [#tpu.dimension_semantics<parallel>], iteration_bounds = array<i64: 2>, scalar_prefetch = 0 : i64, scratch_operands = 2 : i64, tpu.core_type = #tpu.core_type<tc>, window_params = [{transform_indices = @transform_0, window_bounds = array<i64: 1, 416, 144>}, {pipeline_mode = #tpu.pipeline_mode<synchronous>, transform_indices = @transform_1, window_bounds = array<i64: 3, 144, 64>}, {pipeline_mode = #tpu.pipeline_mode<synchronous>, transform_indices = @transform_2, window_bounds = array<i64: 1, 64>}, {transform_indices = @transform_3, window_bounds = array<i64: 1, 312, 64>}]} {
    %c0 = arith.constant 0 : index
    %c0_0 = arith.constant 0 : index
    %c0_1 = arith.constant 0 : index
    %0 = vector.load %arg1[%c0, %c0_0, %c0_1] : memref<1x416x144xbf16, #tpu.memory_space<vmem>>, vector<1x368x144xbf16>
    %1 = vector.shape_cast %0 : vector<1x368x144xbf16> to vector<368x144xbf16>
    %c0_2 = arith.constant 0 : index
    %c0_3 = arith.constant 0 : index
    %c0_4 = arith.constant 0 : index
    %2 = vector.load %arg2[%c0_2, %c0_3, %c0_4] : memref<3x144x64xbf16, #tpu.memory_space<vmem>>, vector<1x144x64xbf16>
    %3 = vector.shape_cast %2 : vector<1x144x64xbf16> to vector<144x64xbf16>
    %cst = arith.constant dense<0.000000e+00> : vector<368x64xf32>
    %4 = tpu.matmul %1, %3, %cst {dimension_numbers = #tpu.dot_dimension_numbers<[1], [0], [0], [1], [0, 0, 1, 1], [], []>} : vector<368x144xbf16>, vector<144x64xbf16>, vector<368x64xf32> -> vector<368x64xf32>
    %c0_5 = arith.constant 0 : index
    %c24 = arith.constant 24 : index
    %c0_6 = arith.constant 0 : index
    %5 = vector.load %arg1[%c0_5, %c24, %c0_6] : memref<1x416x144xbf16, #tpu.memory_space<vmem>>, vector<1x368x144xbf16>
    %6 = vector.shape_cast %5 : vector<1x368x144xbf16> to vector<368x144xbf16>
    %c1 = arith.constant 1 : index
    %c0_7 = arith.constant 0 : index
    %c0_8 = arith.constant 0 : index
    %7 = vector.load %arg2[%c1, %c0_7, %c0_8] : memref<3x144x64xbf16, #tpu.memory_space<vmem>>, vector<1x144x64xbf16>
    %8 = vector.shape_cast %7 : vector<1x144x64xbf16> to vector<144x64xbf16>
    %cst_9 = arith.constant dense<0.000000e+00> : vector<368x64xf32>
    %9 = tpu.matmul %6, %8, %cst_9 {dimension_numbers = #tpu.dot_dimension_numbers<[1], [0], [0], [1], [0, 0, 1, 1], [], []>} : vector<368x144xbf16>, vector<144x64xbf16>, vector<368x64xf32> -> vector<368x64xf32>
    %10 = arith.addf %4, %9 : vector<368x64xf32>
    %c0_10 = arith.constant 0 : index
    %c48 = arith.constant 48 : index
    %c0_11 = arith.constant 0 : index
    %11 = vector.load %arg1[%c0_10, %c48, %c0_11] : memref<1x416x144xbf16, #tpu.memory_space<vmem>>, vector<1x368x144xbf16>
    %12 = vector.shape_cast %11 : vector<1x368x144xbf16> to vector<368x144xbf16>
    %c2 = arith.constant 2 : index
    %c0_12 = arith.constant 0 : index
    %c0_13 = arith.constant 0 : index
    %13 = vector.load %arg2[%c2, %c0_12, %c0_13] : memref<3x144x64xbf16, #tpu.memory_space<vmem>>, vector<1x144x64xbf16>
    %14 = vector.shape_cast %13 : vector<1x144x64xbf16> to vector<144x64xbf16>
    %cst_14 = arith.constant dense<0.000000e+00> : vector<368x64xf32>
    %15 = tpu.matmul %12, %14, %cst_14 {dimension_numbers = #tpu.dot_dimension_numbers<[1], [0], [0], [1], [0, 0, 1, 1], [], []>} : vector<368x144xbf16>, vector<144x64xbf16>, vector<368x64xf32> -> vector<368x64xf32>
    %16 = arith.addf %10, %15 : vector<368x64xf32>
    %c0_15 = arith.constant 0 : index
    %c0_16 = arith.constant 0 : index
    %17 = vector.load %arg3[%c0_15, %c0_16] : memref<1x64xf32, #tpu.memory_space<vmem>>, vector<1x64xf32>
    %18 = vector.broadcast %17 : vector<1x64xf32> to vector<368x64xf32>
    %19 = arith.addf %16, %18 : vector<368x64xf32>
    %cst_17 = arith.constant 0.000000e+00 : f32
    %20 = vector.broadcast %cst_17 : f32 to vector<368x64xf32>
    %21 = arith.maximumf %19, %20 : vector<368x64xf32>
    %22 = arith.truncf %21 : vector<368x64xf32> to vector<368x64xbf16>
    %c0_18 = arith.constant 0 : index
    %c0_19 = arith.constant 0 : index
    %23 = vector.load %arg5[%c0_18, %c0_19] : memref<368x64xbf16, #tpu.memory_space<vmem>>, vector<368x64xbf16>
    tpu.vector_store %arg5[%c0_18, %c0_19], %22 {strides = array<i32>} : memref<368x64xbf16, #tpu.memory_space<vmem>>, vector<368x64xbf16>,
    %c0_20 = arith.constant 0 : index
    %c0_21 = arith.constant 0 : index
    %24 = vector.load %arg5[%c0_20, %c0_21] : memref<368x64xbf16, #tpu.memory_space<vmem>>, vector<360x64xbf16>
    %c1_22 = arith.constant 1 : index
    %c0_23 = arith.constant 0 : index
    %25 = vector.load %arg5[%c1_22, %c0_23] : memref<368x64xbf16, #tpu.memory_space<vmem>>, vector<360x64xbf16>
    %26 = arith.maximumf %24, %25 : vector<360x64xbf16>
    %c2_24 = arith.constant 2 : index
    %c0_25 = arith.constant 0 : index
    %27 = vector.load %arg5[%c2_24, %c0_25] : memref<368x64xbf16, #tpu.memory_space<vmem>>, vector<360x64xbf16>
    %28 = arith.maximumf %26, %27 : vector<360x64xbf16>
    %c0_26 = arith.constant 0 : index
    %c0_27 = arith.constant 0 : index
    %29 = vector.load %arg6[%c0_26, %c0_27] : memref<360x64xbf16, #tpu.memory_space<vmem>>, vector<360x64xbf16>
    tpu.vector_store %arg6[%c0_26, %c0_27], %28 {strides = array<i32>} : memref<360x64xbf16, #tpu.memory_space<vmem>>, vector<360x64xbf16>,
    %c0_28 = arith.constant 0 : index
    %c0_29 = arith.constant 0 : index
    %30 = vector.load %arg6[%c0_28, %c0_29] : memref<360x64xbf16, #tpu.memory_space<vmem>>, vector<312x64xbf16>
    %c24_30 = arith.constant 24 : index
    %c0_31 = arith.constant 0 : index
    %31 = vector.load %arg6[%c24_30, %c0_31] : memref<360x64xbf16, #tpu.memory_space<vmem>>, vector<312x64xbf16>
    %32 = arith.maximumf %30, %31 : vector<312x64xbf16>
    %c48_32 = arith.constant 48 : index
    %c0_33 = arith.constant 0 : index
    %33 = vector.load %arg6[%c48_32, %c0_33] : memref<360x64xbf16, #tpu.memory_space<vmem>>, vector<312x64xbf16>
    %34 = arith.maximumf %32, %33 : vector<312x64xbf16>
    %c0_34 = arith.constant 0 : index
    %c0_35 = arith.constant 0 : index
    %c0_36 = arith.constant 0 : index
    %35 = vector.load %arg4[%c0_34, %c0_35, %c0_36] : memref<1x312x64xbf16, #tpu.memory_space<vmem>>, vector<1x312x64xbf16>
    %36 = vector.shape_cast %35 : vector<1x312x64xbf16> to vector<312x64xbf16>
    %37 = vector.shape_cast %34 : vector<312x64xbf16> to vector<1x312x64xbf16>
    tpu.vector_store %arg4[%c0_34, %c0_35, %c0_36], %37 {strides = array<i32>} : memref<1x312x64xbf16, #tpu.memory_space<vmem>>, vector<1x312x64xbf16>,
    return
  }
  func.func @transform_0(%arg0: i32) -> (i32, i32, i32) {
    %c0_i32 = arith.constant 0 : i32
    %c0_i32_0 = arith.constant 0 : i32
    %c0_i32_1 = arith.constant 0 : i32
    return %arg0, %c0_i32, %c0_i32_0 : i32, i32, i32
  }
  func.func @transform_1(%arg0: i32) -> (i32, i32, i32) {
    %c0_i32 = arith.constant 0 : i32
    %c0_i32_0 = arith.constant 0 : i32
    %c0_i32_1 = arith.constant 0 : i32
    %c0_i32_2 = arith.constant 0 : i32
    return %c0_i32, %c0_i32_0, %c0_i32_1 : i32, i32, i32
  }
  func.func @transform_2(%arg0: i32) -> (i32, i32) {
    %c0_i32 = arith.constant 0 : i32
    %c0_i32_0 = arith.constant 0 : i32
    %c0_i32_1 = arith.constant 0 : i32
    return %c0_i32, %c0_i32_0 : i32, i32
  }
  func.func @transform_3(%arg0: i32) -> (i32, i32, i32) {
    %c0_i32 = arith.constant 0 : i32
    %c0_i32_0 = arith.constant 0 : i32
    %c0_i32_1 = arith.constant 0 : i32
    return %arg0, %c0_i32, %c0_i32_0 : i32, i32, i32
  }
}

module attributes {stable_mosaic.version = 11 : i64} {
  func.func @kernel(%arg0: i32, %arg1: memref<1x184x320xbf16, #tpu.memory_space<vmem>>, %arg2: memref<5x320x192xbf16, #tpu.memory_space<vmem>>, %arg3: memref<1x192xf32, #tpu.memory_space<vmem>>, %arg4: memref<1x80x192xbf16, #tpu.memory_space<vmem>>, %arg5: memref<120x192xbf16, #tpu.memory_space<vmem>>, %arg6: memref<112x192xbf16, #tpu.memory_space<vmem>>) attributes {dimension_semantics = [#tpu.dimension_semantics<parallel>], iteration_bounds = array<i64: 2>, scalar_prefetch = 0 : i64, scratch_operands = 2 : i64, tpu.core_type = #tpu.core_type<tc>, window_params = [{transform_indices = @transform_0, window_bounds = array<i64: 1, 184, 320>}, {pipeline_mode = #tpu.pipeline_mode<synchronous>, transform_indices = @transform_1, window_bounds = array<i64: 5, 320, 192>}, {pipeline_mode = #tpu.pipeline_mode<synchronous>, transform_indices = @transform_2, window_bounds = array<i64: 1, 192>}, {transform_indices = @transform_3, window_bounds = array<i64: 1, 80, 192>}]} {
    %c0 = arith.constant 0 : index
    %c0_0 = arith.constant 0 : index
    %c0_1 = arith.constant 0 : index
    %0 = vector.load %arg1[%c0, %c0_0, %c0_1] : memref<1x184x320xbf16, #tpu.memory_space<vmem>>, vector<1x120x320xbf16>
    %1 = vector.shape_cast %0 : vector<1x120x320xbf16> to vector<120x320xbf16>
    %c0_2 = arith.constant 0 : index
    %c0_3 = arith.constant 0 : index
    %c0_4 = arith.constant 0 : index
    %2 = vector.load %arg2[%c0_2, %c0_3, %c0_4] : memref<5x320x192xbf16, #tpu.memory_space<vmem>>, vector<1x320x192xbf16>
    %3 = vector.shape_cast %2 : vector<1x320x192xbf16> to vector<320x192xbf16>
    %cst = arith.constant dense<0.000000e+00> : vector<120x192xf32>
    %4 = tpu.matmul %1, %3, %cst {dimension_numbers = #tpu.dot_dimension_numbers<[1], [0], [0], [1], [0, 0, 1, 1], [], []>} : vector<120x320xbf16>, vector<320x192xbf16>, vector<120x192xf32> -> vector<120x192xf32>
    %c0_5 = arith.constant 0 : index
    %c16 = arith.constant 16 : index
    %c0_6 = arith.constant 0 : index
    %5 = vector.load %arg1[%c0_5, %c16, %c0_6] : memref<1x184x320xbf16, #tpu.memory_space<vmem>>, vector<1x120x320xbf16>
    %6 = vector.shape_cast %5 : vector<1x120x320xbf16> to vector<120x320xbf16>
    %c1 = arith.constant 1 : index
    %c0_7 = arith.constant 0 : index
    %c0_8 = arith.constant 0 : index
    %7 = vector.load %arg2[%c1, %c0_7, %c0_8] : memref<5x320x192xbf16, #tpu.memory_space<vmem>>, vector<1x320x192xbf16>
    %8 = vector.shape_cast %7 : vector<1x320x192xbf16> to vector<320x192xbf16>
    %cst_9 = arith.constant dense<0.000000e+00> : vector<120x192xf32>
    %9 = tpu.matmul %6, %8, %cst_9 {dimension_numbers = #tpu.dot_dimension_numbers<[1], [0], [0], [1], [0, 0, 1, 1], [], []>} : vector<120x320xbf16>, vector<320x192xbf16>, vector<120x192xf32> -> vector<120x192xf32>
    %10 = arith.addf %4, %9 : vector<120x192xf32>
    %c0_10 = arith.constant 0 : index
    %c32 = arith.constant 32 : index
    %c0_11 = arith.constant 0 : index
    %11 = vector.load %arg1[%c0_10, %c32, %c0_11] : memref<1x184x320xbf16, #tpu.memory_space<vmem>>, vector<1x120x320xbf16>
    %12 = vector.shape_cast %11 : vector<1x120x320xbf16> to vector<120x320xbf16>
    %c2 = arith.constant 2 : index
    %c0_12 = arith.constant 0 : index
    %c0_13 = arith.constant 0 : index
    %13 = vector.load %arg2[%c2, %c0_12, %c0_13] : memref<5x320x192xbf16, #tpu.memory_space<vmem>>, vector<1x320x192xbf16>
    %14 = vector.shape_cast %13 : vector<1x320x192xbf16> to vector<320x192xbf16>
    %cst_14 = arith.constant dense<0.000000e+00> : vector<120x192xf32>
    %15 = tpu.matmul %12, %14, %cst_14 {dimension_numbers = #tpu.dot_dimension_numbers<[1], [0], [0], [1], [0, 0, 1, 1], [], []>} : vector<120x320xbf16>, vector<320x192xbf16>, vector<120x192xf32> -> vector<120x192xf32>
    %16 = arith.addf %10, %15 : vector<120x192xf32>
    %c0_15 = arith.constant 0 : index
    %c48 = arith.constant 48 : index
    %c0_16 = arith.constant 0 : index
    %17 = vector.load %arg1[%c0_15, %c48, %c0_16] : memref<1x184x320xbf16, #tpu.memory_space<vmem>>, vector<1x120x320xbf16>
    %18 = vector.shape_cast %17 : vector<1x120x320xbf16> to vector<120x320xbf16>
    %c3 = arith.constant 3 : index
    %c0_17 = arith.constant 0 : index
    %c0_18 = arith.constant 0 : index
    %19 = vector.load %arg2[%c3, %c0_17, %c0_18] : memref<5x320x192xbf16, #tpu.memory_space<vmem>>, vector<1x320x192xbf16>
    %20 = vector.shape_cast %19 : vector<1x320x192xbf16> to vector<320x192xbf16>
    %cst_19 = arith.constant dense<0.000000e+00> : vector<120x192xf32>
    %21 = tpu.matmul %18, %20, %cst_19 {dimension_numbers = #tpu.dot_dimension_numbers<[1], [0], [0], [1], [0, 0, 1, 1], [], []>} : vector<120x320xbf16>, vector<320x192xbf16>, vector<120x192xf32> -> vector<120x192xf32>
    %22 = arith.addf %16, %21 : vector<120x192xf32>
    %c0_20 = arith.constant 0 : index
    %c64 = arith.constant 64 : index
    %c0_21 = arith.constant 0 : index
    %23 = vector.load %arg1[%c0_20, %c64, %c0_21] : memref<1x184x320xbf16, #tpu.memory_space<vmem>>, vector<1x120x320xbf16>
    %24 = vector.shape_cast %23 : vector<1x120x320xbf16> to vector<120x320xbf16>
    %c4 = arith.constant 4 : index
    %c0_22 = arith.constant 0 : index
    %c0_23 = arith.constant 0 : index
    %25 = vector.load %arg2[%c4, %c0_22, %c0_23] : memref<5x320x192xbf16, #tpu.memory_space<vmem>>, vector<1x320x192xbf16>
    %26 = vector.shape_cast %25 : vector<1x320x192xbf16> to vector<320x192xbf16>
    %cst_24 = arith.constant dense<0.000000e+00> : vector<120x192xf32>
    %27 = tpu.matmul %24, %26, %cst_24 {dimension_numbers = #tpu.dot_dimension_numbers<[1], [0], [0], [1], [0, 0, 1, 1], [], []>} : vector<120x320xbf16>, vector<320x192xbf16>, vector<120x192xf32> -> vector<120x192xf32>
    %28 = arith.addf %22, %27 : vector<120x192xf32>
    %c0_25 = arith.constant 0 : index
    %c0_26 = arith.constant 0 : index
    %29 = vector.load %arg3[%c0_25, %c0_26] : memref<1x192xf32, #tpu.memory_space<vmem>>, vector<1x192xf32>
    %30 = vector.broadcast %29 : vector<1x192xf32> to vector<120x192xf32>
    %31 = arith.addf %28, %30 : vector<120x192xf32>
    %cst_27 = arith.constant 0.000000e+00 : f32
    %32 = vector.broadcast %cst_27 : f32 to vector<120x192xf32>
    %33 = arith.maximumf %31, %32 : vector<120x192xf32>
    %34 = arith.truncf %33 : vector<120x192xf32> to vector<120x192xbf16>
    %c0_28 = arith.constant 0 : index
    %c0_29 = arith.constant 0 : index
    %35 = vector.load %arg5[%c0_28, %c0_29] : memref<120x192xbf16, #tpu.memory_space<vmem>>, vector<120x192xbf16>
    tpu.vector_store %arg5[%c0_28, %c0_29], %34 {strides = array<i32>} : memref<120x192xbf16, #tpu.memory_space<vmem>>, vector<120x192xbf16>,
    %c0_30 = arith.constant 0 : index
    %c0_31 = arith.constant 0 : index
    %36 = vector.load %arg5[%c0_30, %c0_31] : memref<120x192xbf16, #tpu.memory_space<vmem>>, vector<112x192xbf16>
    %c1_32 = arith.constant 1 : index
    %c0_33 = arith.constant 0 : index
    %37 = vector.load %arg5[%c1_32, %c0_33] : memref<120x192xbf16, #tpu.memory_space<vmem>>, vector<112x192xbf16>
    %38 = arith.maximumf %36, %37 : vector<112x192xbf16>
    %c2_34 = arith.constant 2 : index
    %c0_35 = arith.constant 0 : index
    %39 = vector.load %arg5[%c2_34, %c0_35] : memref<120x192xbf16, #tpu.memory_space<vmem>>, vector<112x192xbf16>
    %40 = arith.maximumf %38, %39 : vector<112x192xbf16>
    %c0_36 = arith.constant 0 : index
    %c0_37 = arith.constant 0 : index
    %41 = vector.load %arg6[%c0_36, %c0_37] : memref<112x192xbf16, #tpu.memory_space<vmem>>, vector<112x192xbf16>
    tpu.vector_store %arg6[%c0_36, %c0_37], %40 {strides = array<i32>} : memref<112x192xbf16, #tpu.memory_space<vmem>>, vector<112x192xbf16>,
    %c0_38 = arith.constant 0 : index
    %c0_39 = arith.constant 0 : index
    %42 = vector.load %arg6[%c0_38, %c0_39] : memref<112x192xbf16, #tpu.memory_space<vmem>>, vector<80x192xbf16>
    %c16_40 = arith.constant 16 : index
    %c0_41 = arith.constant 0 : index
    %43 = vector.load %arg6[%c16_40, %c0_41] : memref<112x192xbf16, #tpu.memory_space<vmem>>, vector<80x192xbf16>
    %44 = arith.maximumf %42, %43 : vector<80x192xbf16>
    %c32_42 = arith.constant 32 : index
    %c0_43 = arith.constant 0 : index
    %45 = vector.load %arg6[%c32_42, %c0_43] : memref<112x192xbf16, #tpu.memory_space<vmem>>, vector<80x192xbf16>
    %46 = arith.maximumf %44, %45 : vector<80x192xbf16>
    %c0_44 = arith.constant 0 : index
    %c0_45 = arith.constant 0 : index
    %c0_46 = arith.constant 0 : index
    %47 = vector.load %arg4[%c0_44, %c0_45, %c0_46] : memref<1x80x192xbf16, #tpu.memory_space<vmem>>, vector<1x80x192xbf16>
    %48 = vector.shape_cast %47 : vector<1x80x192xbf16> to vector<80x192xbf16>
    %49 = vector.shape_cast %46 : vector<80x192xbf16> to vector<1x80x192xbf16>
    tpu.vector_store %arg4[%c0_44, %c0_45, %c0_46], %49 {strides = array<i32>} : memref<1x80x192xbf16, #tpu.memory_space<vmem>>, vector<1x80x192xbf16>,
    return
  }
  func.func @transform_0(%arg0: i32) -> (i32, i32, i32) {
    %c0_i32 = arith.constant 0 : i32
    %c0_i32_0 = arith.constant 0 : i32
    %c0_i32_1 = arith.constant 0 : i32
    return %arg0, %c0_i32, %c0_i32_0 : i32, i32, i32
  }
  func.func @transform_1(%arg0: i32) -> (i32, i32, i32) {
    %c0_i32 = arith.constant 0 : i32
    %c0_i32_0 = arith.constant 0 : i32
    %c0_i32_1 = arith.constant 0 : i32
    %c0_i32_2 = arith.constant 0 : i32
    return %c0_i32, %c0_i32_0, %c0_i32_1 : i32, i32, i32
  }
  func.func @transform_2(%arg0: i32) -> (i32, i32) {
    %c0_i32 = arith.constant 0 : i32
    %c0_i32_0 = arith.constant 0 : i32
    %c0_i32_1 = arith.constant 0 : i32
    return %c0_i32, %c0_i32_0 : i32, i32
  }
  func.func @transform_3(%arg0: i32) -> (i32, i32, i32) {
    %c0_i32 = arith.constant 0 : i32
    %c0_i32_0 = arith.constant 0 : i32
    %c0_i32_1 = arith.constant 0 : i32
    return %arg0, %c0_i32, %c0_i32_0 : i32, i32, i32
  }
}

module attributes {stable_mosaic.version = 11 : i64} {
  func.func @kernel(%arg0: i32, %arg1: memref<1x40x576xbf16, #tpu.memory_space<vmem>>, %arg2: memref<3x576x384xbf16, #tpu.memory_space<vmem>>, %arg3: memref<1x384xf32, #tpu.memory_space<vmem>>, %arg4: memref<1x24x384xbf16, #tpu.memory_space<vmem>>) attributes {dimension_semantics = [#tpu.dimension_semantics<parallel>], iteration_bounds = array<i64: 2>, scalar_prefetch = 0 : i64, scratch_operands = 0 : i64, tpu.core_type = #tpu.core_type<tc>, window_params = [{transform_indices = @transform_0, window_bounds = array<i64: 1, 40, 576>}, {pipeline_mode = #tpu.pipeline_mode<synchronous>, transform_indices = @transform_1, window_bounds = array<i64: 3, 576, 384>}, {pipeline_mode = #tpu.pipeline_mode<synchronous>, transform_indices = @transform_2, window_bounds = array<i64: 1, 384>}, {transform_indices = @transform_3, window_bounds = array<i64: 1, 24, 384>}]} {
    %c0 = arith.constant 0 : index
    %c0_0 = arith.constant 0 : index
    %c0_1 = arith.constant 0 : index
    %0 = vector.load %arg1[%c0, %c0_0, %c0_1] : memref<1x40x576xbf16, #tpu.memory_space<vmem>>, vector<1x24x576xbf16>
    %1 = vector.shape_cast %0 : vector<1x24x576xbf16> to vector<24x576xbf16>
    %c0_2 = arith.constant 0 : index
    %c0_3 = arith.constant 0 : index
    %c0_4 = arith.constant 0 : index
    %2 = vector.load %arg2[%c0_2, %c0_3, %c0_4] : memref<3x576x384xbf16, #tpu.memory_space<vmem>>, vector<1x576x384xbf16>
    %3 = vector.shape_cast %2 : vector<1x576x384xbf16> to vector<576x384xbf16>
    %cst = arith.constant dense<0.000000e+00> : vector<24x384xf32>
    %4 = tpu.matmul %1, %3, %cst {dimension_numbers = #tpu.dot_dimension_numbers<[1], [0], [0], [1], [0, 0, 1, 1], [], []>} : vector<24x576xbf16>, vector<576x384xbf16>, vector<24x384xf32> -> vector<24x384xf32>
    %c0_5 = arith.constant 0 : index
    %c8 = arith.constant 8 : index
    %c0_6 = arith.constant 0 : index
    %5 = vector.load %arg1[%c0_5, %c8, %c0_6] : memref<1x40x576xbf16, #tpu.memory_space<vmem>>, vector<1x24x576xbf16>
    %6 = vector.shape_cast %5 : vector<1x24x576xbf16> to vector<24x576xbf16>
    %c1 = arith.constant 1 : index
    %c0_7 = arith.constant 0 : index
    %c0_8 = arith.constant 0 : index
    %7 = vector.load %arg2[%c1, %c0_7, %c0_8] : memref<3x576x384xbf16, #tpu.memory_space<vmem>>, vector<1x576x384xbf16>
    %8 = vector.shape_cast %7 : vector<1x576x384xbf16> to vector<576x384xbf16>
    %cst_9 = arith.constant dense<0.000000e+00> : vector<24x384xf32>
    %9 = tpu.matmul %6, %8, %cst_9 {dimension_numbers = #tpu.dot_dimension_numbers<[1], [0], [0], [1], [0, 0, 1, 1], [], []>} : vector<24x576xbf16>, vector<576x384xbf16>, vector<24x384xf32> -> vector<24x384xf32>
    %10 = arith.addf %4, %9 : vector<24x384xf32>
    %c0_10 = arith.constant 0 : index
    %c16 = arith.constant 16 : index
    %c0_11 = arith.constant 0 : index
    %11 = vector.load %arg1[%c0_10, %c16, %c0_11] : memref<1x40x576xbf16, #tpu.memory_space<vmem>>, vector<1x24x576xbf16>
    %12 = vector.shape_cast %11 : vector<1x24x576xbf16> to vector<24x576xbf16>
    %c2 = arith.constant 2 : index
    %c0_12 = arith.constant 0 : index
    %c0_13 = arith.constant 0 : index
    %13 = vector.load %arg2[%c2, %c0_12, %c0_13] : memref<3x576x384xbf16, #tpu.memory_space<vmem>>, vector<1x576x384xbf16>
    %14 = vector.shape_cast %13 : vector<1x576x384xbf16> to vector<576x384xbf16>
    %cst_14 = arith.constant dense<0.000000e+00> : vector<24x384xf32>
    %15 = tpu.matmul %12, %14, %cst_14 {dimension_numbers = #tpu.dot_dimension_numbers<[1], [0], [0], [1], [0, 0, 1, 1], [], []>} : vector<24x576xbf16>, vector<576x384xbf16>, vector<24x384xf32> -> vector<24x384xf32>
    %16 = arith.addf %10, %15 : vector<24x384xf32>
    %c0_15 = arith.constant 0 : index
    %c0_16 = arith.constant 0 : index
    %17 = vector.load %arg3[%c0_15, %c0_16] : memref<1x384xf32, #tpu.memory_space<vmem>>, vector<1x384xf32>
    %18 = vector.broadcast %17 : vector<1x384xf32> to vector<24x384xf32>
    %19 = arith.addf %16, %18 : vector<24x384xf32>
    %cst_17 = arith.constant 0.000000e+00 : f32
    %20 = vector.broadcast %cst_17 : f32 to vector<24x384xf32>
    %21 = arith.maximumf %19, %20 : vector<24x384xf32>
    %22 = arith.truncf %21 : vector<24x384xf32> to vector<24x384xbf16>
    %c0_18 = arith.constant 0 : index
    %c0_19 = arith.constant 0 : index
    %c0_20 = arith.constant 0 : index
    %23 = vector.load %arg4[%c0_18, %c0_19, %c0_20] : memref<1x24x384xbf16, #tpu.memory_space<vmem>>, vector<1x24x384xbf16>
    %24 = vector.shape_cast %23 : vector<1x24x384xbf16> to vector<24x384xbf16>
    %25 = vector.shape_cast %22 : vector<24x384xbf16> to vector<1x24x384xbf16>
    tpu.vector_store %arg4[%c0_18, %c0_19, %c0_20], %25 {strides = array<i32>} : memref<1x24x384xbf16, #tpu.memory_space<vmem>>, vector<1x24x384xbf16>,
    return
  }
  func.func @transform_0(%arg0: i32) -> (i32, i32, i32) {
    %c0_i32 = arith.constant 0 : i32
    %c0_i32_0 = arith.constant 0 : i32
    %c0_i32_1 = arith.constant 0 : i32
    return %arg0, %c0_i32, %c0_i32_0 : i32, i32, i32
  }
  func.func @transform_1(%arg0: i32) -> (i32, i32, i32) {
    %c0_i32 = arith.constant 0 : i32
    %c0_i32_0 = arith.constant 0 : i32
    %c0_i32_1 = arith.constant 0 : i32
    %c0_i32_2 = arith.constant 0 : i32
    return %c0_i32, %c0_i32_0, %c0_i32_1 : i32, i32, i32
  }
  func.func @transform_2(%arg0: i32) -> (i32, i32) {
    %c0_i32 = arith.constant 0 : i32
    %c0_i32_0 = arith.constant 0 : i32
    %c0_i32_1 = arith.constant 0 : i32
    return %c0_i32, %c0_i32_0 : i32, i32
  }
  func.func @transform_3(%arg0: i32) -> (i32, i32, i32) {
    %c0_i32 = arith.constant 0 : i32
    %c0_i32_0 = arith.constant 0 : i32
    %c0_i32_1 = arith.constant 0 : i32
    return %arg0, %c0_i32, %c0_i32_0 : i32, i32, i32
  }
}

module attributes {stable_mosaic.version = 11 : i64} {
  func.func @kernel(%arg0: i32, %arg1: memref<1x40x1152xbf16, #tpu.memory_space<vmem>>, %arg2: memref<3x1152x256xbf16, #tpu.memory_space<vmem>>, %arg3: memref<1x256xf32, #tpu.memory_space<vmem>>, %arg4: memref<1x24x256xbf16, #tpu.memory_space<vmem>>) attributes {dimension_semantics = [#tpu.dimension_semantics<parallel>], iteration_bounds = array<i64: 2>, scalar_prefetch = 0 : i64, scratch_operands = 0 : i64, tpu.core_type = #tpu.core_type<tc>, window_params = [{transform_indices = @transform_0, window_bounds = array<i64: 1, 40, 1152>}, {pipeline_mode = #tpu.pipeline_mode<synchronous>, transform_indices = @transform_1, window_bounds = array<i64: 3, 1152, 256>}, {pipeline_mode = #tpu.pipeline_mode<synchronous>, transform_indices = @transform_2, window_bounds = array<i64: 1, 256>}, {transform_indices = @transform_3, window_bounds = array<i64: 1, 24, 256>}]} {
    %c0 = arith.constant 0 : index
    %c0_0 = arith.constant 0 : index
    %c0_1 = arith.constant 0 : index
    %0 = vector.load %arg1[%c0, %c0_0, %c0_1] : memref<1x40x1152xbf16, #tpu.memory_space<vmem>>, vector<1x24x1152xbf16>
    %1 = vector.shape_cast %0 : vector<1x24x1152xbf16> to vector<24x1152xbf16>
    %c0_2 = arith.constant 0 : index
    %c0_3 = arith.constant 0 : index
    %c0_4 = arith.constant 0 : index
    %2 = vector.load %arg2[%c0_2, %c0_3, %c0_4] : memref<3x1152x256xbf16, #tpu.memory_space<vmem>>, vector<1x1152x256xbf16>
    %3 = vector.shape_cast %2 : vector<1x1152x256xbf16> to vector<1152x256xbf16>
    %cst = arith.constant dense<0.000000e+00> : vector<24x256xf32>
    %4 = tpu.matmul %1, %3, %cst {dimension_numbers = #tpu.dot_dimension_numbers<[1], [0], [0], [1], [0, 0, 1, 1], [], []>} : vector<24x1152xbf16>, vector<1152x256xbf16>, vector<24x256xf32> -> vector<24x256xf32>
    %c0_5 = arith.constant 0 : index
    %c8 = arith.constant 8 : index
    %c0_6 = arith.constant 0 : index
    %5 = vector.load %arg1[%c0_5, %c8, %c0_6] : memref<1x40x1152xbf16, #tpu.memory_space<vmem>>, vector<1x24x1152xbf16>
    %6 = vector.shape_cast %5 : vector<1x24x1152xbf16> to vector<24x1152xbf16>
    %c1 = arith.constant 1 : index
    %c0_7 = arith.constant 0 : index
    %c0_8 = arith.constant 0 : index
    %7 = vector.load %arg2[%c1, %c0_7, %c0_8] : memref<3x1152x256xbf16, #tpu.memory_space<vmem>>, vector<1x1152x256xbf16>
    %8 = vector.shape_cast %7 : vector<1x1152x256xbf16> to vector<1152x256xbf16>
    %cst_9 = arith.constant dense<0.000000e+00> : vector<24x256xf32>
    %9 = tpu.matmul %6, %8, %cst_9 {dimension_numbers = #tpu.dot_dimension_numbers<[1], [0], [0], [1], [0, 0, 1, 1], [], []>} : vector<24x1152xbf16>, vector<1152x256xbf16>, vector<24x256xf32> -> vector<24x256xf32>
    %10 = arith.addf %4, %9 : vector<24x256xf32>
    %c0_10 = arith.constant 0 : index
    %c16 = arith.constant 16 : index
    %c0_11 = arith.constant 0 : index
    %11 = vector.load %arg1[%c0_10, %c16, %c0_11] : memref<1x40x1152xbf16, #tpu.memory_space<vmem>>, vector<1x24x1152xbf16>
    %12 = vector.shape_cast %11 : vector<1x24x1152xbf16> to vector<24x1152xbf16>
    %c2 = arith.constant 2 : index
    %c0_12 = arith.constant 0 : index
    %c0_13 = arith.constant 0 : index
    %13 = vector.load %arg2[%c2, %c0_12, %c0_13] : memref<3x1152x256xbf16, #tpu.memory_space<vmem>>, vector<1x1152x256xbf16>
    %14 = vector.shape_cast %13 : vector<1x1152x256xbf16> to vector<1152x256xbf16>
    %cst_14 = arith.constant dense<0.000000e+00> : vector<24x256xf32>
    %15 = tpu.matmul %12, %14, %cst_14 {dimension_numbers = #tpu.dot_dimension_numbers<[1], [0], [0], [1], [0, 0, 1, 1], [], []>} : vector<24x1152xbf16>, vector<1152x256xbf16>, vector<24x256xf32> -> vector<24x256xf32>
    %16 = arith.addf %10, %15 : vector<24x256xf32>
    %c0_15 = arith.constant 0 : index
    %c0_16 = arith.constant 0 : index
    %17 = vector.load %arg3[%c0_15, %c0_16] : memref<1x256xf32, #tpu.memory_space<vmem>>, vector<1x256xf32>
    %18 = vector.broadcast %17 : vector<1x256xf32> to vector<24x256xf32>
    %19 = arith.addf %16, %18 : vector<24x256xf32>
    %cst_17 = arith.constant 0.000000e+00 : f32
    %20 = vector.broadcast %cst_17 : f32 to vector<24x256xf32>
    %21 = arith.maximumf %19, %20 : vector<24x256xf32>
    %22 = arith.truncf %21 : vector<24x256xf32> to vector<24x256xbf16>
    %c0_18 = arith.constant 0 : index
    %c0_19 = arith.constant 0 : index
    %c0_20 = arith.constant 0 : index
    %23 = vector.load %arg4[%c0_18, %c0_19, %c0_20] : memref<1x24x256xbf16, #tpu.memory_space<vmem>>, vector<1x24x256xbf16>
    %24 = vector.shape_cast %23 : vector<1x24x256xbf16> to vector<24x256xbf16>
    %25 = vector.shape_cast %22 : vector<24x256xbf16> to vector<1x24x256xbf16>
    tpu.vector_store %arg4[%c0_18, %c0_19, %c0_20], %25 {strides = array<i32>} : memref<1x24x256xbf16, #tpu.memory_space<vmem>>, vector<1x24x256xbf16>,
    return
  }
  func.func @transform_0(%arg0: i32) -> (i32, i32, i32) {
    %c0_i32 = arith.constant 0 : i32
    %c0_i32_0 = arith.constant 0 : i32
    %c0_i32_1 = arith.constant 0 : i32
    return %arg0, %c0_i32, %c0_i32_0 : i32, i32, i32
  }
  func.func @transform_1(%arg0: i32) -> (i32, i32, i32) {
    %c0_i32 = arith.constant 0 : i32
    %c0_i32_0 = arith.constant 0 : i32
    %c0_i32_1 = arith.constant 0 : i32
    %c0_i32_2 = arith.constant 0 : i32
    return %c0_i32, %c0_i32_0, %c0_i32_1 : i32, i32, i32
  }
  func.func @transform_2(%arg0: i32) -> (i32, i32) {
    %c0_i32 = arith.constant 0 : i32
    %c0_i32_0 = arith.constant 0 : i32
    %c0_i32_1 = arith.constant 0 : i32
    return %c0_i32, %c0_i32_0 : i32, i32
  }
  func.func @transform_3(%arg0: i32) -> (i32, i32, i32) {
    %c0_i32 = arith.constant 0 : i32
    %c0_i32_0 = arith.constant 0 : i32
    %c0_i32_1 = arith.constant 0 : i32
    return %arg0, %c0_i32, %c0_i32_0 : i32, i32, i32
  }
}

module attributes {stable_mosaic.version = 11 : i64} {
  func.func @kernel(%arg0: i32, %arg1: memref<1x48x768xbf16, #tpu.memory_space<vmem>>, %arg2: memref<3x768x256xbf16, #tpu.memory_space<vmem>>, %arg3: memref<1x256xf32, #tpu.memory_space<vmem>>, %arg4: memref<1x8x256xbf16, #tpu.memory_space<vmem>>, %arg5: memref<32x256xbf16, #tpu.memory_space<vmem>>, %arg6: memref<24x256xbf16, #tpu.memory_space<vmem>>) attributes {dimension_semantics = [#tpu.dimension_semantics<parallel>], iteration_bounds = array<i64: 2>, scalar_prefetch = 0 : i64, scratch_operands = 2 : i64, tpu.core_type = #tpu.core_type<tc>, window_params = [{transform_indices = @transform_0, window_bounds = array<i64: 1, 48, 768>}, {pipeline_mode = #tpu.pipeline_mode<synchronous>, transform_indices = @transform_1, window_bounds = array<i64: 3, 768, 256>}, {pipeline_mode = #tpu.pipeline_mode<synchronous>, transform_indices = @transform_2, window_bounds = array<i64: 1, 256>}, {transform_indices = @transform_3, window_bounds = array<i64: 1, 8, 256>}]} {
    %c0 = arith.constant 0 : index
    %c0_0 = arith.constant 0 : index
    %c0_1 = arith.constant 0 : index
    %0 = vector.load %arg1[%c0, %c0_0, %c0_1] : memref<1x48x768xbf16, #tpu.memory_space<vmem>>, vector<1x32x768xbf16>
    %1 = vector.shape_cast %0 : vector<1x32x768xbf16> to vector<32x768xbf16>
    %c0_2 = arith.constant 0 : index
    %c0_3 = arith.constant 0 : index
    %c0_4 = arith.constant 0 : index
    %2 = vector.load %arg2[%c0_2, %c0_3, %c0_4] : memref<3x768x256xbf16, #tpu.memory_space<vmem>>, vector<1x768x256xbf16>
    %3 = vector.shape_cast %2 : vector<1x768x256xbf16> to vector<768x256xbf16>
    %cst = arith.constant dense<0.000000e+00> : vector<32x256xf32>
    %4 = tpu.matmul %1, %3, %cst {dimension_numbers = #tpu.dot_dimension_numbers<[1], [0], [0], [1], [0, 0, 1, 1], [], []>} : vector<32x768xbf16>, vector<768x256xbf16>, vector<32x256xf32> -> vector<32x256xf32>
    %c0_5 = arith.constant 0 : index
    %c8 = arith.constant 8 : index
    %c0_6 = arith.constant 0 : index
    %5 = vector.load %arg1[%c0_5, %c8, %c0_6] : memref<1x48x768xbf16, #tpu.memory_space<vmem>>, vector<1x32x768xbf16>
    %6 = vector.shape_cast %5 : vector<1x32x768xbf16> to vector<32x768xbf16>
    %c1 = arith.constant 1 : index
    %c0_7 = arith.constant 0 : index
    %c0_8 = arith.constant 0 : index
    %7 = vector.load %arg2[%c1, %c0_7, %c0_8] : memref<3x768x256xbf16, #tpu.memory_space<vmem>>, vector<1x768x256xbf16>
    %8 = vector.shape_cast %7 : vector<1x768x256xbf16> to vector<768x256xbf16>
    %cst_9 = arith.constant dense<0.000000e+00> : vector<32x256xf32>
    %9 = tpu.matmul %6, %8, %cst_9 {dimension_numbers = #tpu.dot_dimension_numbers<[1], [0], [0], [1], [0, 0, 1, 1], [], []>} : vector<32x768xbf16>, vector<768x256xbf16>, vector<32x256xf32> -> vector<32x256xf32>
    %10 = arith.addf %4, %9 : vector<32x256xf32>
    %c0_10 = arith.constant 0 : index
    %c16 = arith.constant 16 : index
    %c0_11 = arith.constant 0 : index
    %11 = vector.load %arg1[%c0_10, %c16, %c0_11] : memref<1x48x768xbf16, #tpu.memory_space<vmem>>, vector<1x32x768xbf16>
    %12 = vector.shape_cast %11 : vector<1x32x768xbf16> to vector<32x768xbf16>
    %c2 = arith.constant 2 : index
    %c0_12 = arith.constant 0 : index
    %c0_13 = arith.constant 0 : index
    %13 = vector.load %arg2[%c2, %c0_12, %c0_13] : memref<3x768x256xbf16, #tpu.memory_space<vmem>>, vector<1x768x256xbf16>
    %14 = vector.shape_cast %13 : vector<1x768x256xbf16> to vector<768x256xbf16>
    %cst_14 = arith.constant dense<0.000000e+00> : vector<32x256xf32>
    %15 = tpu.matmul %12, %14, %cst_14 {dimension_numbers = #tpu.dot_dimension_numbers<[1], [0], [0], [1], [0, 0, 1, 1], [], []>} : vector<32x768xbf16>, vector<768x256xbf16>, vector<32x256xf32> -> vector<32x256xf32>
    %16 = arith.addf %10, %15 : vector<32x256xf32>
    %c0_15 = arith.constant 0 : index
    %c0_16 = arith.constant 0 : index
    %17 = vector.load %arg3[%c0_15, %c0_16] : memref<1x256xf32, #tpu.memory_space<vmem>>, vector<1x256xf32>
    %18 = vector.broadcast %17 : vector<1x256xf32> to vector<32x256xf32>
    %19 = arith.addf %16, %18 : vector<32x256xf32>
    %cst_17 = arith.constant 0.000000e+00 : f32
    %20 = vector.broadcast %cst_17 : f32 to vector<32x256xf32>
    %21 = arith.maximumf %19, %20 : vector<32x256xf32>
    %22 = arith.truncf %21 : vector<32x256xf32> to vector<32x256xbf16>
    %c0_18 = arith.constant 0 : index
    %c0_19 = arith.constant 0 : index
    %23 = vector.load %arg5[%c0_18, %c0_19] : memref<32x256xbf16, #tpu.memory_space<vmem>>, vector<32x256xbf16>
    tpu.vector_store %arg5[%c0_18, %c0_19], %22 {strides = array<i32>} : memref<32x256xbf16, #tpu.memory_space<vmem>>, vector<32x256xbf16>,
    %c0_20 = arith.constant 0 : index
    %c0_21 = arith.constant 0 : index
    %24 = vector.load %arg5[%c0_20, %c0_21] : memref<32x256xbf16, #tpu.memory_space<vmem>>, vector<24x256xbf16>
    %c1_22 = arith.constant 1 : index
    %c0_23 = arith.constant 0 : index
    %25 = vector.load %arg5[%c1_22, %c0_23] : memref<32x256xbf16, #tpu.memory_space<vmem>>, vector<24x256xbf16>
    %26 = arith.maximumf %24, %25 : vector<24x256xbf16>
    %c2_24 = arith.constant 2 : index
    %c0_25 = arith.constant 0 : index
    %27 = vector.load %arg5[%c2_24, %c0_25] : memref<32x256xbf16, #tpu.memory_space<vmem>>, vector<24x256xbf16>
    %28 = arith.maximumf %26, %27 : vector<24x256xbf16>
    %c0_26 = arith.constant 0 : index
    %c0_27 = arith.constant 0 : index
    %29 = vector.load %arg6[%c0_26, %c0_27] : memref<24x256xbf16, #tpu.memory_space<vmem>>, vector<24x256xbf16>
    tpu.vector_store %arg6[%c0_26, %c0_27], %28 {strides = array<i32>} : memref<24x256xbf16, #tpu.memory_space<vmem>>, vector<24x256xbf16>,
    %c0_28 = arith.constant 0 : index
    %c0_29 = arith.constant 0 : index
    %30 = vector.load %arg6[%c0_28, %c0_29] : memref<24x256xbf16, #tpu.memory_space<vmem>>, vector<8x256xbf16>
    %c8_30 = arith.constant 8 : index
    %c0_31 = arith.constant 0 : index
    %31 = vector.load %arg6[%c8_30, %c0_31] : memref<24x256xbf16, #tpu.memory_space<vmem>>, vector<8x256xbf16>
    %32 = arith.maximumf %30, %31 : vector<8x256xbf16>
    %c16_32 = arith.constant 16 : index
    %c0_33 = arith.constant 0 : index
    %33 = vector.load %arg6[%c16_32, %c0_33] : memref<24x256xbf16, #tpu.memory_space<vmem>>, vector<8x256xbf16>
    %34 = arith.maximumf %32, %33 : vector<8x256xbf16>
    %c0_34 = arith.constant 0 : index
    %c0_35 = arith.constant 0 : index
    %c0_36 = arith.constant 0 : index
    %35 = vector.load %arg4[%c0_34, %c0_35, %c0_36] : memref<1x8x256xbf16, #tpu.memory_space<vmem>>, vector<1x8x256xbf16>
    %36 = vector.shape_cast %35 : vector<1x8x256xbf16> to vector<8x256xbf16>
    %37 = vector.shape_cast %34 : vector<8x256xbf16> to vector<1x8x256xbf16>
    tpu.vector_store %arg4[%c0_34, %c0_35, %c0_36], %37 {strides = array<i32>} : memref<1x8x256xbf16, #tpu.memory_space<vmem>>, vector<1x8x256xbf16>,
    return
  }
  func.func @transform_0(%arg0: i32) -> (i32, i32, i32) {
    %c0_i32 = arith.constant 0 : i32
    %c0_i32_0 = arith.constant 0 : i32
    %c0_i32_1 = arith.constant 0 : i32
    return %arg0, %c0_i32, %c0_i32_0 : i32, i32, i32
  }
  func.func @transform_1(%arg0: i32) -> (i32, i32, i32) {
    %c0_i32 = arith.constant 0 : i32
    %c0_i32_0 = arith.constant 0 : i32
    %c0_i32_1 = arith.constant 0 : i32
    %c0_i32_2 = arith.constant 0 : i32
    return %c0_i32, %c0_i32_0, %c0_i32_1 : i32, i32, i32
  }
  func.func @transform_2(%arg0: i32) -> (i32, i32) {
    %c0_i32 = arith.constant 0 : i32
    %c0_i32_0 = arith.constant 0 : i32
    %c0_i32_1 = arith.constant 0 : i32
    return %c0_i32, %c0_i32_0 : i32, i32
  }
  func.func @transform_3(%arg0: i32) -> (i32, i32, i32) {
    %c0_i32 = arith.constant 0 : i32
    %c0_i32_0 = arith.constant 0 : i32
    %c0_i32_1 = arith.constant 0 : i32
    return %arg0, %c0_i32, %c0_i32_0 : i32, i32, i32
  }
}

module attributes {stable_mosaic.version = 11 : i64} {
  func.func @kernel(%arg0: i32, %arg1: memref<8x256xbf16, #tpu.memory_space<vmem>>, %arg2: memref<256x128xbf16, #tpu.memory_space<vmem>>, %arg3: memref<1x128xf32, #tpu.memory_space<vmem>>, %arg4: memref<128x128xbf16, #tpu.memory_space<vmem>>, %arg5: memref<1x128xf32, #tpu.memory_space<vmem>>, %arg6: memref<8x128xf32, #tpu.memory_space<vmem>>) attributes {dimension_semantics = [#tpu.dimension_semantics<parallel>], iteration_bounds = array<i64: 1>, scalar_prefetch = 0 : i64, scratch_operands = 0 : i64, tpu.core_type = #tpu.core_type<tc>, window_params = [{transform_indices = @transform_0, window_bounds = array<i64: 8, 256>}, {pipeline_mode = #tpu.pipeline_mode<synchronous>, transform_indices = @transform_1, window_bounds = array<i64: 256, 128>}, {pipeline_mode = #tpu.pipeline_mode<synchronous>, transform_indices = @transform_2, window_bounds = array<i64: 1, 128>}, {pipeline_mode = #tpu.pipeline_mode<synchronous>, transform_indices = @transform_3, window_bounds = array<i64: 128, 128>}, {pipeline_mode = #tpu.pipeline_mode<synchronous>, transform_indices = @transform_4, window_bounds = array<i64: 1, 128>}, {transform_indices = @transform_5, window_bounds = array<i64: 8, 128>}]} {
    %c0 = arith.constant 0 : index
    %c0_0 = arith.constant 0 : index
    %0 = vector.load %arg1[%c0, %c0_0] : memref<8x256xbf16, #tpu.memory_space<vmem>>, vector<8x256xbf16>
    %c0_1 = arith.constant 0 : index
    %c0_2 = arith.constant 0 : index
    %1 = vector.load %arg2[%c0_1, %c0_2] : memref<256x128xbf16, #tpu.memory_space<vmem>>, vector<256x128xbf16>
    %cst = arith.constant dense<0.000000e+00> : vector<8x128xf32>
    %2 = tpu.matmul %0, %1, %cst {dimension_numbers = #tpu.dot_dimension_numbers<[1], [0], [0], [1], [0, 0, 1, 1], [], []>} : vector<8x256xbf16>, vector<256x128xbf16>, vector<8x128xf32> -> vector<8x128xf32>
    %c0_3 = arith.constant 0 : index
    %c0_4 = arith.constant 0 : index
    %3 = vector.load %arg3[%c0_3, %c0_4] : memref<1x128xf32, #tpu.memory_space<vmem>>, vector<1x128xf32>
    %4 = vector.broadcast %3 : vector<1x128xf32> to vector<8x128xf32>
    %5 = arith.addf %2, %4 : vector<8x128xf32>
    %cst_5 = arith.constant 0.000000e+00 : f32
    %6 = vector.broadcast %cst_5 : f32 to vector<8x128xf32>
    %7 = arith.maximumf %5, %6 : vector<8x128xf32>
    %8 = arith.truncf %7 : vector<8x128xf32> to vector<8x128xbf16>
    %c0_6 = arith.constant 0 : index
    %c0_7 = arith.constant 0 : index
    %9 = vector.load %arg4[%c0_6, %c0_7] : memref<128x128xbf16, #tpu.memory_space<vmem>>, vector<128x128xbf16>
    %cst_8 = arith.constant dense<0.000000e+00> : vector<8x128xf32>
    %10 = tpu.matmul %8, %9, %cst_8 {dimension_numbers = #tpu.dot_dimension_numbers<[1], [0], [0], [1], [0, 0, 1, 1], [], []>} : vector<8x128xbf16>, vector<128x128xbf16>, vector<8x128xf32> -> vector<8x128xf32>
    %c0_9 = arith.constant 0 : index
    %c0_10 = arith.constant 0 : index
    %11 = vector.load %arg5[%c0_9, %c0_10] : memref<1x128xf32, #tpu.memory_space<vmem>>, vector<1x128xf32>
    %12 = vector.broadcast %11 : vector<1x128xf32> to vector<8x128xf32>
    %13 = arith.addf %10, %12 : vector<8x128xf32>
    %c0_11 = arith.constant 0 : index
    %c0_12 = arith.constant 0 : index
    %14 = vector.load %arg6[%c0_11, %c0_12] : memref<8x128xf32, #tpu.memory_space<vmem>>, vector<8x128xf32>
    tpu.vector_store %arg6[%c0_11, %c0_12], %13 {strides = array<i32>} : memref<8x128xf32, #tpu.memory_space<vmem>>, vector<8x128xf32>,
    return
  }
  func.func @transform_0(%arg0: i32) -> (i32, i32) {
    %c0_i32 = arith.constant 0 : i32
    %c0_i32_0 = arith.constant 0 : i32
    return %arg0, %c0_i32 : i32, i32
  }
  func.func @transform_1(%arg0: i32) -> (i32, i32) {
    %c0_i32 = arith.constant 0 : i32
    %c0_i32_0 = arith.constant 0 : i32
    %c0_i32_1 = arith.constant 0 : i32
    return %c0_i32, %c0_i32_0 : i32, i32
  }
  func.func @transform_2(%arg0: i32) -> (i32, i32) {
    %c0_i32 = arith.constant 0 : i32
    %c0_i32_0 = arith.constant 0 : i32
    %c0_i32_1 = arith.constant 0 : i32
    return %c0_i32, %c0_i32_0 : i32, i32
  }
  func.func @transform_3(%arg0: i32) -> (i32, i32) {
    %c0_i32 = arith.constant 0 : i32
    %c0_i32_0 = arith.constant 0 : i32
    %c0_i32_1 = arith.constant 0 : i32
    return %c0_i32, %c0_i32_0 : i32, i32
  }
  func.func @transform_4(%arg0: i32) -> (i32, i32) {
    %c0_i32 = arith.constant 0 : i32
    %c0_i32_0 = arith.constant 0 : i32
    %c0_i32_1 = arith.constant 0 : i32
    return %c0_i32, %c0_i32_0 : i32, i32
  }
  func.func @transform_5(%arg0: i32) -> (i32, i32) {
    %c0_i32 = arith.constant 0 : i32
    %c0_i32_0 = arith.constant 0 : i32
    return %arg0, %c0_i32 : i32, i32
  }
}

</mosaic_0001>

<bundles_post_ra>
// kernel: finetune_net_forward.6
= control target key start
LH: loop header
LB: loop body
LE: loop exit
PB: predicated region body
PF: predicated region fallthrough
CT: control target
= control target key end

     0   :  { %s3330_s12 = smov 0   ;;  %s4627_s0 = inlined_call_operand.vmem [shape: bf16[2,416,144], index: 0, kind: input, shape index: {}]   ;;  %s4628_s1 = inlined_call_operand.vmem [shape: bf16[3,144,64], index: 1, kind: input, shape index: {}]   ;;  %s4629_s2 = inlined_call_operand.vmem [shape: f32[1,64], index: 2, kind: input, shape index: {}]   ;;  %s4630_s3 = inlined_call_operand.vmem [shape: bf16[2,312,64], index: 3, kind: output, shape index: {}]  }
   0x1 LB: > { %s2819_s13 = sadd.s32 4294967295, %s3307_s12   ;;  %p2823_p0 = scmp.ge.s32.totalorder %s3307_s12, 1  ;;  %s3307_s12 = sphi %s3330_s12, %s13_s12  }
   0x2   : > { %p137_p1 = scmp.lt.s32.totalorder %s3307_s12, 3 }
   0x4   : > { %p138_p2 = pnand %p2823_p0, %p137_p1 }
   0x6   : > { %141 = sbr.rel (%p138_p2) target bundleno = 575 (0x23f), region = 32 }
   0xd   : > { %v3173_v0 = vld [vmem:[%s4628_s1 + $0x48] sm:$0xff]   ;;  %v3309_v1 = vmov 0   ;;  %p161_p3 = scmp.lt.s32.totalorder %s2819_s13, 1  ;;  %v3174_v2 = vld [vmem:[%s4628_s1 + $0x50] sm:$0xff]   ;;  %v3175_v3 = vld [vmem:[%s4628_s1 + $0x58] sm:$0xff]   ;;  %vm519_vm0 = vcmask 130048  }
   0xe   : > { %589 = vmatprep.subr.bf16.mxu0 %v3309_v1  ;;  %3144 = vmatprep.subr.bf16.mxu1 %v3309_v1  ;;  %v3176_v4 = vld [vmem:[%s4628_s1 + $0x60] sm:$0xff]   ;;  %v3177_v14 = vld [vmem:[%s4628_s1 + $0x68] sm:$0xff]   ;;  %v3178_v21 = vld [vmem:[%s4628_s1 + $0x70] sm:$0xff]   ;;  %vm2004_vm1 = vcmask 523264   ;;  %vm2052_vm2 = vsmask.f32 7424 }
   0xf   : > { %590 = vmatpush1.bf16.msra.mxu0 %v3173_v0  ;;  %3153 = vmatpush1.bf16.msra.mxu1 %v3173_v0  ;;  %s4634_s13 = smov (!%p161_p3, %s2819_s13), 1  ;;  %v3179_v28 = vld [vmem:[%s4628_s1 + $0x78] sm:$0xff]   ;;  %v3180_v32 = vld [vmem:[%s4628_s1 + $0x80] sm:$0xff]   ;;  %v3181_v36 = vld [vmem:[%s4628_s1 + $0x88] sm:$0xff]   ;;  %vm2306_vm3 = vcmask 1046528   ;;  %vm2556_vm4 = vcmask 519168  }
  0x10   : > { %591 = vmatprep.subr.bf16.mxu0 %v3309_v1  ;;  %3145 = vmatprep.subr.bf16.mxu1 %v3309_v1  ;;  %s3162_s18 = smul.u32 416, %s4634_s13  ;;  %v3186_v42 = vld [vmem:[%s4628_s1 + $0x90] sm:$0xff]   ;;  %v3189_v45 = vld [vmem:[%s4628_s1] sm:$0xff]   ;;  %v3192_v49 = vld [vmem:[%s4628_s1 + $0x98] sm:$0xff]  }
  0x11   : > { %v3197_v53 = vld [vmem:[%s4628_s1 + $0x8] sm:$0xff]   ;;  %v3200_v58 = vld [vmem:[%s4628_s1 + $0xa0] sm:$0xff]   ;;  %v3203_v59 = vld [vmem:[%s4628_s1 + $0x10] sm:$0xff]   ;;  %s3163_s25 = smul.u32 156, %s4634_s13 }
  0x12   : > { %s3359_s23 = scalar_lea.vmem %s4627_s0, %s3162_s18 }
  0x13   : > { %592 = vmatpush1.bf16.msra.mxu0 %v3174_v2  ;;  %3154 = vmatpush1.bf16.msra.mxu1 %v3174_v2  ;;  %v3365_v5 = vld [vmem:[%s3359_s23 + $0x18] sm:$0xff]  ;;  %v3368_v6 = vld [vmem:[%s3359_s23 + $0x20] sm:$0xff]  ;;  %v3383_v11 = vld [vmem:[%s3359_s23 + $0x28] sm:$0xff]  ;;  %s4140_s28 = scalar_lea.vmem %s4630_s3, %s3163_s25 }
  0x14   : > { %593 = vmatprep.subr.bf16.mxu0 %v3309_v1  ;;  %3146 = vmatprep.subr.bf16.mxu1 %v3309_v1  ;;  %v3371_v7 = vld [vmem:[%s3359_s23 + $0xd8] sm:$0xff]  ;;  %v2845_v8 = vcombine.high %v3365_v5, %v3368_v6  ;;  %v3376_v9 = vld [vmem:[%s3359_s23 + $0xe0] sm:$0xff]  ;;  %v2927_v12 = vcombine.high %v3368_v6, %v3383_v11  ;;  %v2926_v13 = vcombine.low %v3368_v6, %v3383_v11  ;;  %v3395_v15 = vld [vmem:[%s3359_s23 + $0x30] sm:$0xff] }
  0x15   : > { %v2869_v10 = vcombine.high %v3371_v7, %v3376_v9  ;;  %v3398_v16 = vld [vmem:[%s3359_s23 + $0x38] sm:$0xff]  ;;  %v3411_v19 = vld [vmem:[%s3359_s23 + $0x40] sm:$0xff]  ;;  %v3414_v20 = vld [vmem:[%s3359_s23 + $0x48] sm:$0xff]  ;;  %v2844_v40 = vcombine.low %v3365_v5, %v3368_v6  ;;  %v2868_v41 = vcombine.low %v3371_v7, %v3376_v9  ;;  %v2847_v43 = vcombine.high %v3383_v11, %v3395_v15 }
  0x16   : > { %2899 = vmatprep.mubr.msk.bf16.mxu0 %vm519_vm0, %v2845_v8  ;;  %v3404_v17 = vcombine.low %v3395_v15, %v3398_v16  ;;  %v3408_v18 = vcombine.high %v3395_v15, %v3398_v16  ;;  %v3421_v22 = vcombine.high %v3411_v19, %v3414_v20  ;;  %v3427_v23 = vcombine.low %v3411_v19, %v3414_v20  ;;  %v3430_v24 = vld [vmem:[%s3359_s23 + $0x50] sm:$0xff]  ;;  %v3433_v25 = vld [vmem:[%s3359_s23 + $0x58] sm:$0xff]  ;;  %v3449_v29 = vld [vmem:[%s3359_s23 + $0x60] sm:$0xff] }
  0x17   : > { %594 = vmatpush1.bf16.msra.mxu0 %v3175_v3  ;;  %3155 = vmatpush1.bf16.msra.mxu1 %v3175_v3  ;;  %v3437_v26 = vcombine.high %v3430_v24, %v3433_v25  ;;  %v3441_v27 = vcombine.low %v3430_v24, %v3433_v25  ;;  %v3452_v30 = vld [vmem:[%s3359_s23 + $0x68] sm:$0xff]  ;;  %v3468_v34 = vld [vmem:[%s3359_s23 + $0x70] sm:$0xff]  ;;  %v3471_v35 = vld [vmem:[%s3359_s23 + $0x78] sm:$0xff]  ;;  %v2846_v54 = vcombine.low %v3383_v11, %v3395_v15 }
  0x18   : > { %595 = vmatprep.subr.bf16.mxu0 %v3309_v1  ;;  %3147 = vmatprep.subr.bf16.mxu1 %v3309_v1  ;;  %v3456_v31 = vcombine.high %v3449_v29, %v3452_v30  ;;  %v3465_v33 = vcombine.low %v3449_v29, %v3452_v30  ;;  %v3478_v37 = vcombine.high %v3468_v34, %v3471_v35  ;;  %v3483_v38 = vld [vmem:[%s3359_s23 + $0xe8] sm:$0xff]  ;;  %v3486_v39 = vld [vmem:[%s3359_s23 + $0xf0] sm:$0xff]  ;;  %v3509_v47 = vld [vmem:[%s3359_s23 + $0x80] sm:$0xff] }
  0x19   : > { %2911 = vmatprep.mubr.msk.bf16.mxu1 %vm519_vm0, %v2869_v10  ;;  %v2871_v44 = vcombine.high %v3483_v38, %v3486_v39  ;;  %v3506_v46 = vcombine.low %v3468_v34, %v3471_v35  ;;  %v3512_v48 = vld [vmem:[%s3359_s23 + $0x88] sm:$0xff]  ;;  %v3519_v50 = vld [vmem:[%s3359_s23 + $0xf8] sm:$0xff]  ;;  %v3527_v52 = vld [vmem:[%s3359_s23 + $0x100] sm:$0xff]  ;;  %v2870_v55 = vcombine.low %v3483_v38, %v3486_v39  ;;  %v2849_v56 = vcombine.high %v3398_v16, %v3411_v19 }
  0x1a   : > { %v3523_v51 = vcombine.high %v3509_v47, %v3512_v48  ;;  %v2873_v57 = vcombine.high %v3519_v50, %v3527_v52  ;;  %v3551_v60 = vcombine.low %v3509_v47, %v3512_v48  ;;  %v3555_v61 = vld [vmem:[%s3359_s23 + $0x90] sm:$0xff]  ;;  %v3558_v62 = vld [vmem:[%s3359_s23 + $0x98] sm:$0xff]  ;;  %v3563_v63 = vld [vmem:[%s3359_s23 + $0x108] sm:$0xff]  ;;  %v2848_v8 = vcombine.low %v3398_v16, %v3411_v19 }
  0x1b   : > { %596 = vmatpush1.bf16.msra.mxu0 %v3176_v4  ;;  %3156 = vmatpush1.bf16.msra.mxu1 %v3176_v4  ;;  %v3567_v0 = vcombine.high %v3555_v61, %v3558_v62  ;;  %v3570_v2 = vld [vmem:[%s3359_s23 + $0x110] sm:$0xff]  ;;  %v3208_v3 = vld [vmem:[%s4628_s1 + $0xa8] sm:$0xff]   ;;  %v3209_v4 = vld [vmem:[%s4628_s1 + $0x18] sm:$0xff]   ;;  %v2872_v10 = vcombine.low %v3519_v50, %v3527_v52  ;;  %v3596_v19 = vcombine.low %v3555_v61, %v3558_v62 }
  0x1c   : > { %597 = vmatprep.subr.bf16.mxu0 %v3309_v1  ;;  %3148 = vmatprep.subr.bf16.mxu1 %v3309_v1  ;;  %v2875_v15 = vcombine.high %v3563_v63, %v3570_v2  ;;  %v3217_v16 = vld [vmem:[%s4628_s1 + $0x20] sm:$0xff]   ;;  %v3041_v11 = vcombine.high %v3376_v9, %v3483_v38 }
  0x1f   : > { %598 = vmatpush1.bf16.msra.mxu0 %v3177_v14  ;;  %3157 = vmatpush1.bf16.msra.mxu1 %v3177_v14  ;;  %v2851_v14 = vcombine.high %v3414_v20, %v3430_v24 }
  0x20   : > { %599 = vmatprep.subr.bf16.mxu0 %v3309_v1  ;;  %3149 = vmatprep.subr.bf16.mxu1 %v3309_v1 }
  0x23   : > { %600 = vmatpush1.bf16.msra.mxu0 %v3178_v21  ;;  %3158 = vmatpush1.bf16.msra.mxu1 %v3178_v21  ;;  %v3214_v21 = vld [vmem:[%s4628_s1 + $0xb0] sm:$0xff]  }
  0x24   : > { %601 = vmatprep.subr.bf16.mxu0 %v3309_v1  ;;  %3150 = vmatprep.subr.bf16.mxu1 %v3309_v1 }
  0x27   : > { %602 = vmatpush1.bf16.msra.mxu0 %v3179_v28  ;;  %3159 = vmatpush1.bf16.msra.mxu1 %v3179_v28  ;;  %v3601_v28 = vld [vmem:[%s3359_s23 + $0xa0] sm:$0xff] }
  0x28   : > { %603 = vmatprep.subr.bf16.mxu0 %v3309_v1  ;;  %3151 = vmatprep.subr.bf16.mxu1 %v3309_v1 }
  0x2b   : > { %604 = vmatpush1.bf16.msra.mxu0 %v3180_v32  ;;  %3160 = vmatpush1.bf16.msra.mxu1 %v3180_v32  ;;  %v3604_v32 = vld [vmem:[%s3359_s23 + $0xa8] sm:$0xff] }
  0x2c   : > { %605 = vmatprep.subr.bf16.mxu0 %v3309_v1  ;;  %3152 = vmatprep.subr.bf16.mxu1 %v3309_v1 }
  0x2f   : > { %606 = vmatpush1.bf16.msra.mxu0 %v3181_v36  ;;  %3161 = vmatpush1.bf16.msra.mxu1 %v3181_v36  ;;  %v3609_v36 = vld [vmem:[%s3359_s23 + $0x118] sm:$0xff] }
  0x30   : > { %1619 = vmatprep.subr.bf16.mxu0 %v3309_v1  ;;  %1007 = vmatprep.subr.bf16.mxu1 %v3309_v1 }
  0x32   : > { %622 = vmatmul.mubr.bf16.vlgmr.msra.gmra.mrb[0].mxu0 %v2844_v40  ;;  %718 = vmatmul.mubr.bf16.vlgmr.msra.gmra.mrb[0].mxu1 %v2868_v41  ;;  %v3613_v40 = vcombine.high %v3601_v28, %v3604_v32  ;;  %v3616_v41 = vld [vmem:[%s3359_s23 + $0x120] sm:$0xff] }
  0x33   : > { %1620 = vmatpush1.bf16.msra.mxu0 %v3186_v42  ;;  %2900 = vmatprep.mubr.msk.bf16.mxu0 %vm519_vm0, %v2847_v43  ;;  %v3222_v42 = vld [vmem:[%s4628_s1 + $0xb8] sm:$0xff]   ;;  %v3225_v43 = vld [vmem:[%s4628_s1 + $0x28] sm:$0xff]  }
  0x34   : > { %2912 = vmatprep.mubr.msk.bf16.mxu1 %vm519_vm0, %v2871_v44  ;;  %1008 = vmatpush1.bf16.msra.mxu1 %v3189_v45  ;;  %v2850_v44 = vcombine.low %v3414_v20, %v3430_v24  ;;  %v2874_v45 = vcombine.low %v3563_v63, %v3570_v2  ;;  %v3231_v20 = vld [vmem:[%s4628_s1 + $0x30] sm:$0xff]   ;;  %v3642_v24 = vcombine.low %v3601_v28, %v3604_v32 }
  0x35   : > { %1621 = vmatprep.subr.bf16.mxu0 %v3309_v1  ;;  %1009 = vmatprep.subr.bf16.mxu1 %v3309_v1 }
  0x37   : > { %1622 = vmatpush1.bf16.msra.mxu0 %v3192_v49  ;;  %v2853_v49 = vcombine.high %v3433_v25, %v3449_v29 }
  0x38   : > { %1010 = vmatpush1.bf16.msra.mxu1 %v3197_v53  ;;  %1623 = vmatprep.subr.bf16.mxu0 %v3309_v1  ;;  %v2877_v53 = vcombine.high %v3609_v36, %v3616_v41 }
  0x39   : > { %1011 = vmatprep.subr.bf16.mxu1 %v3309_v1 }
  0x3a   : > { %630 = vmatmul.mubr.bf16.gmra.mrb[4].mxu0 %v2846_v54  ;;  %726 = vmatmul.mubr.bf16.gmra.mrb[4].mxu1 %v2870_v55  ;;  %v3230_v54 = vld [vmem:[%s4628_s1 + $0xc0] sm:$0xff]   ;;  %v3647_v55 = vld [vmem:[%s3359_s23 + $0xb0] sm:$0xff] }
  0x3b   : > { %2901 = vmatprep.mubr.msk.bf16.mxu0 %vm519_vm0, %v2849_v56  ;;  %2913 = vmatprep.mubr.msk.bf16.mxu1 %vm519_vm0, %v2873_v57  ;;  %v3650_v56 = vld [vmem:[%s3359_s23 + $0xb8] sm:$0xff]  ;;  %v3655_v57 = vld [vmem:[%s3359_s23 + $0x128] sm:$0xff] }
  0x3c   : > { %1624 = vmatpush1.bf16.msra.mxu0 %v3200_v58  ;;  %1012 = vmatpush1.bf16.msra.mxu1 %v3203_v59  ;;  %v3659_v58 = vcombine.high %v3647_v55, %v3650_v56  ;;  %v3662_v59 = vld [vmem:[%s3359_s23 + $0x130] sm:$0xff] }
  0x3d   : > { %1625 = vmatprep.subr.bf16.mxu0 %v3309_v1  ;;  %1013 = vmatprep.subr.bf16.mxu1 %v3309_v1 }
  0x40   : > { %1626 = vmatpush1.bf16.msra.mxu0 %v3208_v3  ;;  %1014 = vmatpush1.bf16.msra.mxu1 %v3209_v4  ;;  %v3236_v3 = vld [vmem:[%s4628_s1 + $0x38] sm:$0xff]   ;;  %v3237_v4 = vld [vmem:[%s4628_s1 + $0xc8] sm:$0xff]  }
  0x41   : > { %1627 = vmatprep.subr.bf16.mxu0 %v3309_v1  ;;  %1015 = vmatprep.subr.bf16.mxu1 %v3309_v1 }
  0x42   : > { %638 = vmatmul.mubr.bf16.gmra.mrb[8].mxu0 %v2848_v8  ;;  %734 = vmatmul.mubr.bf16.gmra.mrb[8].mxu1 %v2872_v10  ;;  %v2852_v8 = vcombine.low %v3433_v25, %v3449_v29  ;;  %v2876_v10 = vcombine.low %v3609_v36, %v3616_v41  ;;  %v3247_v25 = vld [vmem:[%s4628_s1 + $0xd0] sm:$0xff]   ;;  %v3688_v29 = vcombine.low %v3647_v55, %v3650_v56 }
  0x43   : > { %2902 = vmatprep.mubr.msk.bf16.mxu0 %vm519_vm0, %v2851_v14  ;;  %2914 = vmatprep.mubr.msk.bf16.mxu1 %vm519_vm0, %v2875_v15  ;;  %v2855_v14 = vcombine.high %v3452_v30, %v3468_v34  ;;  %v2879_v15 = vcombine.high %v3655_v57, %v3662_v59 }
  0x44   : > { %1628 = vmatpush1.bf16.msra.mxu0 %v3214_v21  ;;  %1016 = vmatpush1.bf16.msra.mxu1 %v3217_v16  ;;  %v3242_v21 = vld [vmem:[%s4628_s1 + $0x40] sm:$0xff]  }
  0x45   : > { %1629 = vmatprep.subr.bf16.mxu0 %v3309_v1  ;;  %1017 = vmatprep.subr.bf16.mxu1 %v3309_v1  ;;  %v3693_v16 = vld [vmem:[%s3359_s23 + $0xc0] sm:$0xff] }
  0x48   : > { %1630 = vmatpush1.bf16.msra.mxu0 %v3222_v42  ;;  %1018 = vmatpush1.bf16.msra.mxu1 %v3225_v43  ;;  %v3696_v42 = vld [vmem:[%s3359_s23 + $0xc8] sm:$0xff] }
  0x49   : > { %1631 = vmatprep.subr.bf16.mxu0 %v3309_v1  ;;  %1019 = vmatprep.subr.bf16.mxu1 %v3309_v1  ;;  %v3702_v43 = vcombine.high %v3693_v16, %v3696_v42 }
  0x4a   : > { %646 = vmatmul.mubr.bf16.gmra.mrb[12].mxu0 %v2850_v44  ;;  %742 = vmatmul.mubr.bf16.gmra.mrb[12].mxu1 %v2874_v45  ;;  %v3705_v44 = vld [vmem:[%s3359_s23 + $0x138] sm:$0xff]  ;;  %v3708_v45 = vld [vmem:[%s3359_s23 + $0x140] sm:$0xff] }
  0x4b   : > { %2903 = vmatprep.mubr.msk.bf16.mxu0 %vm519_vm0, %v2853_v49  ;;  %2915 = vmatprep.mubr.msk.bf16.mxu1 %vm519_vm0, %v2877_v53  ;;  %v2878_v49 = vcombine.low %v3655_v57, %v3662_v59  ;;  %v2857_v53 = vcombine.high %v3471_v35, %v3509_v47 }
  0x4c   : > { %1632 = vmatpush1.bf16.msra.mxu0 %v3230_v54  ;;  %1020 = vmatpush1.bf16.msra.mxu1 %v3231_v20  ;;  %v2881_v54 = vcombine.high %v3705_v44, %v3708_v45  ;;  %v3720_v20 = vcombine.low %v3693_v16, %v3696_v42 }
  0x4d   : > { %1021 = vmatprep.subr.bf16.mxu1 %v3309_v1  ;;  %1633 = vmatprep.subr.bf16.mxu0 %v3309_v1 }
  0x50   : > { %1022 = vmatpush1.bf16.msra.mxu1 %v3236_v3  ;;  %1634 = vmatpush1.bf16.msra.mxu0 %v3237_v4  ;;  %v2856_v3 = vcombine.low %v3471_v35, %v3509_v47  ;;  %v2880_v4 = vcombine.low %v3705_v44, %v3708_v45  ;;  %v3744_v35 = vld [vmem:[%s3359_s23 + $0x160] sm:$0xff]  ;;  %v2858_v47 = vcombine.low %v3512_v48, %v3555_v61 }
  0x51   : > { %1023 = vmatprep.subr.bf16.mxu1 %v3309_v1  ;;  %1635 = vmatprep.subr.bf16.mxu0 %v3309_v1  ;;  %v2854_v1 = vcombine.low %v3452_v30, %v3468_v34  ;;  %v3725_v30 = vld [vmem:[%s3359_s23 + $0x148] sm:$0xff]  ;;  %v3728_v34 = vld [vmem:[%s3359_s23 + $0x150] sm:$0xff] }
  0x52   : > { %654 = vmatmul.mubr.bf16.gmra.mrb[16].mxu0 %v2852_v8  ;;  %750 = vmatmul.mubr.bf16.gmra.mrb[16].mxu1 %v2876_v10  ;;  %v2859_v8 = vcombine.high %v3512_v48, %v3555_v61  ;;  %v2883_v10 = vcombine.high %v3725_v30, %v3728_v34  ;;  %v3760_v48 = vld [vmem:[%s3359_s23 + $0x170] sm:$0xff]  ;;  %v2860_v61 = vcombine.low %v3558_v62, %v3601_v28 }
  0x53   : > { %2904 = vmatprep.mubr.msk.bf16.mxu0 %vm519_vm0, %v2855_v14  ;;  %2916 = vmatprep.mubr.msk.bf16.mxu1 %vm519_vm0, %v2879_v15  ;;  %v3741_v14 = vld [vmem:[%s3359_s23 + $0x158] sm:$0xff]  ;;  %v2882_v15 = vcombine.low %v3725_v30, %v3728_v34 }
  0x54   : > { %1024 = vmatpush1.bf16.msra.mxu1 %v3242_v21  ;;  %1636 = vmatpush1.bf16.msra.mxu0 %v3247_v25  ;;  %v2861_v21 = vcombine.high %v3558_v62, %v3601_v28  ;;  %v2885_v25 = vcombine.high %v3741_v14, %v3744_v35  ;;  %v3776_v62 = vld [vmem:[%s3359_s23 + $0x180] sm:$0xff]  ;;  %v2862_v28 = vcombine.low %v3604_v32, %v3647_v55 }
  0x5a   : > { %662 = vmatmul.mubr.bf16.gmra.mrb[20].mxu0 %v2854_v1  ;;  %758 = vmatmul.mubr.bf16.gmra.mrb[20].mxu1 %v2878_v49  ;;  %v3757_v1 = vld [vmem:[%s3359_s23 + $0x168] sm:$0xff]  ;;  %v2884_v49 = vcombine.low %v3741_v14, %v3744_v35 }
  0x5b   : > { %2905 = vmatprep.mubr.msk.bf16.mxu0 %vm519_vm0, %v2857_v53  ;;  %2917 = vmatprep.mubr.msk.bf16.mxu1 %vm519_vm0, %v2881_v54  ;;  %v2863_v53 = vcombine.high %v3604_v32, %v3647_v55  ;;  %v2887_v54 = vcombine.high %v3757_v1, %v3760_v48  ;;  %v2864_v32 = vcombine.low %v3650_v56, %v3693_v16 }
  0x62   : > { %670 = vmatmul.mubr.bf16.gmra.mrb[24].mxu0 %v2856_v3  ;;  %766 = vmatmul.mubr.bf16.gmra.mrb[24].mxu1 %v2880_v4  ;;  %v3773_v3 = vld [vmem:[%s3359_s23 + $0x178] sm:$0xff]  ;;  %v2886_v4 = vcombine.low %v3757_v1, %v3760_v48 }
  0x63   : > { %2906 = vmatprep.mubr.msk.bf16.mxu0 %vm519_vm0, %v2859_v8  ;;  %2918 = vmatprep.mubr.msk.bf16.mxu1 %vm519_vm0, %v2883_v10  ;;  %v2865_v8 = vcombine.high %v3650_v56, %v3693_v16  ;;  %v2889_v10 = vcombine.high %v3773_v3, %v3776_v62  ;;  %v2888_v55 = vcombine.low %v3773_v3, %v3776_v62 }
  0x64   : > { %v3052_v16 = vcombine.low %v3708_v45, %v3725_v30 }
  0x6a   : > { %678 = vmatmul.mubr.bf16.gmra.mrb[28].mxu0 %v2858_v47  ;;  %774 = vmatmul.mubr.bf16.gmra.mrb[28].mxu1 %v2882_v15  ;;  %v198_v47 = vld [vmem:[%s3359_s23 + $0xd0] sm:$0xff] }
  0x6b   : > { %2907 = vmatprep.mubr.msk.bf16.mxu0 %vm519_vm0, %v2861_v21  ;;  %2919 = vmatprep.mubr.msk.bf16.mxu1 %vm519_vm0, %v2885_v25  ;;  %v2867_v15 = vcombine.high %v3696_v42, %v198_v47  ;;  %v3246_v21 = vld [vmem:[%s3359_s23 + $0x4] ss:$8 sps:$4 sm:$0xff]   ;;  %v174_v25 = vld [vmem:[%s3359_s23 + $0x10] sm:$0xff]  ;;  %v3038_v6 = vcombine.low %v198_v47, %v3371_v7 }
  0x6c   : > { %v2924_v56 = vcombine.low %v174_v25, %v3365_v5 }
  0x72   : > { %686 = vmatmul.mubr.bf16.gmra.mrb[32].mxu0 %v2860_v61  ;;  %782 = vmatmul.mubr.bf16.gmra.mrb[32].mxu1 %v2884_v49  ;;  %v3244_v61 = vld [vmem:[%s3359_s23] ss:$8 sps:$4 sm:$0xff]   ;;  %v2866_v49 = vcombine.low %v3696_v42, %v198_v47 }
  0x73   : > { %2908 = vmatprep.mubr.msk.bf16.mxu0 %vm519_vm0, %v2863_v53  ;;  %2920 = vmatprep.mubr.msk.bf16.mxu1 %vm519_vm0, %v2887_v54  ;;  %v2925_v53 = vcombine.high %v174_v25, %v3365_v5  ;;  %v3039_v5 = vcombine.high %v198_v47, %v3371_v7  ;;  %v3042_v7 = vcombine.low %v3486_v39, %v3519_v50 }
  0x7a   : > { %694 = vmatmul.mubr.bf16.gmra.mrb[36].mxu0 %v2862_v28  ;;  %790 = vmatmul.mubr.bf16.gmra.mrb[36].mxu1 %v2886_v4 }
  0x7b   : > { %2909 = vmatprep.mubr.msk.bf16.mxu0 %vm519_vm0, %v2865_v8  ;;  %2921 = vmatprep.mubr.msk.bf16.mxu1 %vm519_vm0, %v2889_v10  ;;  %v3054_v8 = vcombine.low %v3728_v34, %v3741_v14 }
  0x82   : > { %702 = vmatmul.mubr.bf16.gmra.mrb[40].mxu0 %v2864_v32  ;;  %798 = vmatmul.mubr.bf16.gmra.mrb[40].mxu1 %v2888_v55  ;;  %v3057_v32 = vcombine.high %v3744_v35, %v3757_v1 }
  0x83   : > { %2910 = vmatprep.mubr.msk.bf16.mxu0 %vm519_vm0, %v2867_v15  ;;  %2977 = vmatprep.mubr.msk.bf16.mxu1 %vm519_vm0, %v3246_v21 }
  0x8a   : > { %710 = vmatmul.mubr.bf16.gmra.mrb[44].mxu0 %v2866_v49  ;;  %1040 = vmatmul.mubr.bf16.vlgmr.msra.gmra.mrb[44].mxu1 %v3244_v61  ;;  %v3056_v61 = vcombine.low %v3744_v35, %v3757_v1 }
  0x8b   : > { %2978 = vmatprep.mubr.msk.bf16.mxu1 %vm519_vm0, %v2925_v53  ;;  %3073 = vmatprep.mubr.msk.bf16.mxu0 %vm519_vm0, %v3408_v18 }
  0x92   : > { %1048 = vmatmul.mubr.bf16.gmra.mrb[48].mxu1 %v2924_v56  ;;  %1652 = vmatmul.mubr.bf16.vlgmr.msra.gmra.mrb[48].mxu0 %v3404_v17  ;;  %v3059_v56 = vcombine.high %v3760_v48, %v3773_v3 }
  0x93   : > { %2979 = vmatprep.mubr.msk.bf16.mxu1 %vm519_vm0, %v2927_v12  ;;  %3074 = vmatprep.mubr.msk.bf16.mxu0 %vm519_vm0, %v3421_v22  ;;  %v3040_v12 = vcombine.low %v3376_v9, %v3483_v38  ;;  %v3044_v9 = vcombine.low %v3527_v52, %v3563_v63 }
  0x9a   : > { %1056 = vmatmul.mubr.bf16.gmra.mrb[52].mxu1 %v2926_v13  ;;  %1660 = vmatmul.mubr.bf16.gmra.mrb[52].mxu0 %v3427_v23  ;;  %v3043_v13 = vcombine.high %v3486_v39, %v3519_v50 }
  0x9b   : > { %2980 = vmatprep.mubr.msk.bf16.mxu1 %vm519_vm0, %v3408_v18  ;;  %3075 = vmatprep.mubr.msk.bf16.mxu0 %vm519_vm0, %v3437_v26  ;;  %v3047_v18 = vcombine.high %v3570_v2, %v3609_v36 }
  0xa2   : > { %1064 = vmatmul.mubr.bf16.gmra.mrb[56].mxu1 %v3404_v17  ;;  %1668 = vmatmul.mubr.bf16.gmra.mrb[56].mxu0 %v3441_v27  ;;  %v3045_v17 = vcombine.high %v3527_v52, %v3563_v63 }
  0xa3   : > { %2981 = vmatprep.mubr.msk.bf16.mxu1 %vm519_vm0, %v3421_v22  ;;  %3076 = vmatprep.mubr.msk.bf16.mxu0 %vm519_vm0, %v3456_v31  ;;  %v3046_v22 = vcombine.low %v3570_v2, %v3609_v36  ;;  %v3050_v2 = vcombine.low %v3662_v59, %v3705_v44 }
  0xaa   : > { %1072 = vmatmul.mubr.bf16.gmra.mrb[60].mxu1 %v3427_v23  ;;  %1676 = vmatmul.mubr.bf16.gmra.mrb[60].mxu0 %v3465_v33  ;;  %v3049_v23 = vcombine.high %v3616_v41, %v3655_v57 }
  0xab   : > { %2982 = vmatprep.mubr.msk.bf16.mxu1 %vm519_vm0, %v3437_v26  ;;  %3077 = vmatprep.mubr.msk.bf16.mxu0 %vm519_vm0, %v3478_v37 }
  0xb2   : > { %1080 = vmatmul.mubr.bf16.gmra.mrb[64].mxu1 %v3441_v27  ;;  %1684 = vmatmul.mubr.bf16.gmra.mrb[64].mxu0 %v3506_v46 }
  0xb3   : > { %2983 = vmatprep.mubr.msk.bf16.mxu1 %vm519_vm0, %v3456_v31  ;;  %3078 = vmatprep.mubr.msk.bf16.mxu0 %vm519_vm0, %v3523_v51 }
  0xba   : > { %1088 = vmatmul.mubr.bf16.gmra.mrb[68].mxu1 %v3465_v33  ;;  %1692 = vmatmul.mubr.bf16.gmra.mrb[68].mxu0 %v3551_v60 }
  0xbb   : > { %2984 = vmatprep.mubr.msk.bf16.mxu1 %vm519_vm0, %v3478_v37  ;;  %3079 = vmatprep.mubr.msk.bf16.mxu0 %vm519_vm0, %v3567_v0  ;;  %v3048_v37 = vcombine.low %v3616_v41, %v3655_v57 }
  0xc2   : > { %1096 = vmatmul.mubr.bf16.gmra.mrb[72].mxu1 %v3506_v46  ;;  %1700 = vmatmul.mubr.bf16.gmra.mrb[72].mxu0 %v3596_v19  ;;  %v3051_v46 = vcombine.high %v3662_v59, %v3705_v44  ;;  %v3055_v44 = vcombine.high %v3728_v34, %v3741_v14 }
  0xc3   : > { %2985 = vmatprep.mubr.msk.bf16.mxu1 %vm519_vm0, %v3523_v51  ;;  %3080 = vmatprep.mubr.msk.bf16.mxu0 %vm519_vm0, %v3613_v40 }
  0xca   : > { %1104 = vmatmul.mubr.bf16.gmra.mrb[76].mxu1 %v3551_v60  ;;  %1708 = vmatmul.mubr.bf16.gmra.mrb[76].mxu0 %v3642_v24 }
  0xcb   : > { %2986 = vmatprep.mubr.msk.bf16.mxu1 %vm519_vm0, %v3567_v0  ;;  %3081 = vmatprep.mubr.msk.bf16.mxu0 %vm519_vm0, %v3659_v58 }
  0xd2   : > { %1112 = vmatmul.mubr.bf16.gmra.mrb[80].mxu1 %v3596_v19  ;;  %1716 = vmatmul.mubr.bf16.gmra.mrb[80].mxu0 %v3688_v29 }
  0xd3   : > { %2987 = vmatprep.mubr.msk.bf16.mxu1 %vm519_vm0, %v3613_v40  ;;  %3082 = vmatprep.mubr.msk.bf16.mxu0 %vm519_vm0, %v3702_v43  ;;  %v3053_v40 = vcombine.high %v3708_v45, %v3725_v30 }
  0xda   : > { %1120 = vmatmul.mubr.bf16.gmra.mrb[84].mxu1 %v3642_v24  ;;  %1724 = vmatmul.mubr.bf16.gmra.mrb[84].mxu0 %v3720_v20 }
  0xdb   : > { %2988 = vmatprep.mubr.msk.bf16.mxu1 %vm519_vm0, %v3659_v58  ;;  %3083 = vmatprep.mubr.msk.bf16.mxu0 %vm519_vm0, %v3039_v5 }
  0xe2   : > { %1128 = vmatmul.mubr.bf16.gmra.mrb[88].mxu1 %v3688_v29  ;;  %1732 = vmatmul.mubr.bf16.gmra.mrb[88].mxu0 %v3038_v6 }
  0xe3   : > { %2989 = vmatprep.mubr.msk.bf16.mxu1 %vm519_vm0, %v3702_v43  ;;  %3084 = vmatprep.mubr.msk.bf16.mxu0 %vm519_vm0, %v3041_v11 }
  0xea   : > { %1136 = vmatmul.mubr.bf16.gmra.mrb[92].mxu1 %v3720_v20  ;;  %1740 = vmatmul.mubr.bf16.gmra.mrb[92].mxu0 %v3040_v12 }
  0xeb   : > { %2990 = vmatprep.mubr.msk.bf16.mxu1 %vm519_vm0, %v3039_v5  ;;  %3085 = vmatprep.mubr.msk.bf16.mxu0 %vm519_vm0, %v3043_v13 }
  0xf2   : > { %1144 = vmatmul.mubr.bf16.gmra.mrb[96].mxu1 %v3038_v6  ;;  %1748 = vmatmul.mubr.bf16.gmra.mrb[96].mxu0 %v3042_v7 }
  0xf3   : > { %2991 = vmatprep.mubr.msk.bf16.mxu1 %vm519_vm0, %v3041_v11  ;;  %3086 = vmatprep.mubr.msk.bf16.mxu0 %vm519_vm0, %v3045_v17  ;;  %v1267_v11 = vld [vmem:[%s3359_s23 + $0x188] sm:$0xff] }
  0xfa   : > { %1152 = vmatmul.mubr.bf16.gmra.mrb[100].mxu1 %v3040_v12  ;;  %1756 = vmatmul.mubr.bf16.gmra.mrb[100].mxu0 %v3044_v9 }
  0xfb   : > { %2992 = vmatprep.mubr.msk.bf16.mxu1 %vm519_vm0, %v3043_v13  ;;  %3087 = vmatprep.mubr.msk.bf16.mxu0 %vm519_vm0, %v3047_v18 }
 0x102   : > { %1160 = vmatmul.mubr.bf16.gmra.mrb[104].mxu1 %v3042_v7  ;;  %1764 = vmatmul.mubr.bf16.gmra.mrb[104].mxu0 %v3046_v22  ;;  %v3058_v7 = vcombine.low %v3760_v48, %v3773_v3 }
 0x103   : > { %2993 = vmatprep.mubr.msk.bf16.mxu1 %vm519_vm0, %v3045_v17  ;;  %3088 = vmatprep.mubr.msk.bf16.mxu0 %vm519_vm0, %v3049_v23 }
 0x105   : > { %v3900_v26 = vpop.f32.mrb[0].mxu0  ;;  %v3902_v27 = vpop.f32.mrb[0].mxu1 }
 0x106   : > { %v625_v31 = vpop.f32.mrb[1].mxu0  ;;  %v721_v33 = vpop.f32.mrb[1].mxu1 }
 0x107   : > { %v3906_v38 = vpop.f32.mrb[2].mxu0  ;;  %v3908_v39 = vpop.f32.mrb[2].mxu1 }
 0x108   : > { %v628_v50 = vpop.f32.mrb[3].mxu0  ;;  %v724_v51 = vpop.f32.mrb[3].mxu1 }
 0x109   : > { %v3297_v51 = vld [vmem:[%s3359_s23 + $0x194] ss:$8 sps:$4 sm:$0xff]  }
 0x10a   : > { %1168 = vmatmul.mubr.bf16.gmra.mrb[108].mxu1 %v3044_v9  ;;  %1772 = vmatmul.mubr.bf16.gmra.mrb[108].mxu0 %v3048_v37 }
 0x10b   : > { %2994 = vmatprep.mubr.msk.bf16.mxu1 %vm519_vm0, %v3047_v18  ;;  %3089 = vmatprep.mubr.msk.bf16.mxu0 %vm519_vm0, %v3051_v46  ;;  %v3061_v18 = vcombine.high %v3776_v62, %v1267_v11 }
 0x10d   : > { %v3914_v52 = vpop.f32.mrb[4].mxu0  ;;  %v3916_v60 = vpop.f32.mrb[4].mxu1 }
 0x10e   : > { %v633_v63 = vpop.f32.mrb[5].mxu0  ;;  %v729_v0 = vpop.f32.mrb[5].mxu1 }
 0x10f   : > { %v3920_v19 = vpop.f32.mrb[6].mxu0  ;;  %v3922_v36 = vpop.f32.mrb[6].mxu1 }
 0x110   : > { %v636_v41 = vpop.f32.mrb[7].mxu0  ;;  %v732_v24 = vpop.f32.mrb[7].mxu1 }
 0x112   : > { %1176 = vmatmul.mubr.bf16.gmra.mrb[112].mxu1 %v3046_v22  ;;  %1780 = vmatmul.mubr.bf16.gmra.mrb[112].mxu0 %v3050_v2 }
 0x113   : > { %2995 = vmatprep.mubr.msk.bf16.mxu1 %vm519_vm0, %v3049_v23  ;;  %3090 = vmatprep.mubr.msk.bf16.mxu0 %vm519_vm0, %v3053_v40 }
 0x115   : > { %v3928_v57 = vpop.f32.mrb[8].mxu0  ;;  %v3930_v58 = vpop.f32.mrb[8].mxu1 }
 0x116   : > { %v641_v59 = vpop.f32.mrb[9].mxu0  ;;  %v737_v29 = vpop.f32.mrb[9].mxu1 }
 0x117   : > { %v3934_v42 = vpop.f32.mrb[10].mxu0  ;;  %v3936_v43 = vpop.f32.mrb[10].mxu1  ;;  %v3299_v59 = vld [vmem:[%s3359_s23 + $0x190] ss:$8 sps:$4 sm:$0xff]  }
 0x118   : > { %v644_v20 = vpop.f32.mrb[11].mxu0  ;;  %v740_v54 = vpop.f32.mrb[11].mxu1 }
 0x11a   : > { %1184 = vmatmul.mubr.bf16.gmra.mrb[116].mxu1 %v3048_v37  ;;  %1788 = vmatmul.mubr.bf16.gmra.mrb[116].mxu0 %v3052_v16  ;;  %v3060_v37 = vcombine.low %v3776_v62, %v1267_v11 }
 0x11b   : > { %2996 = vmatprep.mubr.msk.bf16.mxu1 %vm519_vm0, %v3051_v46  ;;  %3091 = vmatprep.mubr.msk.bf16.mxu0 %vm519_vm0, %v3055_v44 }
 0x11d   : > { %v3942_v28 = vpop.f32.mrb[12].mxu0  ;;  %v3944_v4 = vpop.f32.mrb[12].mxu1 }
 0x11e   : > { %v649_v45 = vpop.f32.mrb[13].mxu0  ;;  %v745_v30 = vpop.f32.mrb[13].mxu1 }
 0x11f   : > { %v3948_v10 = vpop.f32.mrb[14].mxu0  ;;  %v3950_v47 = vpop.f32.mrb[14].mxu1 }
 0x120   : > { %v652_v55 = vpop.f32.mrb[15].mxu0  ;;  %v748_v15 = vpop.f32.mrb[15].mxu1 }
 0x122   : > { %1192 = vmatmul.mubr.bf16.gmra.mrb[120].mxu1 %v3050_v2  ;;  %1796 = vmatmul.mubr.bf16.gmra.mrb[120].mxu0 %v3054_v8 }
 0x123   : > { %2997 = vmatprep.mubr.msk.bf16.mxu1 %vm519_vm0, %v3053_v40  ;;  %3092 = vmatprep.mubr.msk.bf16.mxu0 %vm519_vm0, %v3057_v32 }
 0x125   : > { %v3956_v21 = vpop.f32.mrb[16].mxu0  ;;  %v3958_v25 = vpop.f32.mrb[16].mxu1 }
 0x126   : > { %v657_v34 = vpop.f32.mrb[17].mxu0  ;;  %v753_v14 = vpop.f32.mrb[17].mxu1 }
 0x127   : > { %v3962_v49 = vpop.f32.mrb[18].mxu0  ;;  %v3964_v53 = vpop.f32.mrb[18].mxu1 }
 0x128   : > { %v660_v5 = vpop.f32.mrb[19].mxu0  ;;  %v756_v6 = vpop.f32.mrb[19].mxu1 }
 0x12a   : > { %1200 = vmatmul.mubr.bf16.gmra.mrb[124].mxu1 %v3052_v16  ;;  %1804 = vmatmul.mubr.bf16.gmra.mrb[124].mxu0 %v3056_v61 }
 0x12b   : > { %2998 = vmatprep.mubr.msk.bf16.mxu1 %vm519_vm0, %v3055_v44  ;;  %3093 = vmatprep.mubr.msk.bf16.mxu0 %vm519_vm0, %v3059_v56 }
 0x12d   : > { %v3971_v12 = vpop.f32.mrb[20].mxu0  ;;  %v3973_v13 = vpop.f32.mrb[20].mxu1 }
 0x12e   : > { %v665_v35 = vpop.f32.mrb[21].mxu0  ;;  %v761_v1 = vpop.f32.mrb[21].mxu1 }
 0x12f   : > { %v3977_v17 = vpop.f32.mrb[22].mxu0  ;;  %v3979_v9 = vpop.f32.mrb[22].mxu1 }
 0x130   : > { %v668_v22 = vpop.f32.mrb[23].mxu0  ;;  %v764_v23 = vpop.f32.mrb[23].mxu1 }
 0x132   : > { %1208 = vmatmul.mubr.bf16.gmra.mrb[128].mxu1 %v3054_v8  ;;  %1812 = vmatmul.mubr.bf16.gmra.mrb[128].mxu0 %v3058_v7 }
 0x133   : > { %2999 = vmatprep.mubr.msk.bf16.mxu1 %vm519_vm0, %v3057_v32  ;;  %3094 = vmatprep.mubr.msk.bf16.mxu0 %vm519_vm0, %v3061_v18 }
 0x135   : > { %v3984_v31 = vpop.f32.mrb[24].mxu0  ;;  %v3986_v33 = vpop.f32.mrb[24].mxu1 }
 0x136   : > { %v673_v48 = vpop.f32.mrb[25].mxu0  ;;  %v769_v3 = vpop.f32.mrb[25].mxu1 }
 0x137   : > { %v3989_v46 = vpop.f32.mrb[26].mxu0  ;;  %v3991_v50 = vpop.f32.mrb[26].mxu1 }
 0x138   : > { %v676_v63 = vpop.f32.mrb[27].mxu0  ;;  %v772_v0 = vpop.f32.mrb[27].mxu1 }
 0x13a   : > { %1216 = vmatmul.mubr.bf16.gmra.mrb[132].mxu1 %v3056_v61  ;;  %1820 = vmatmul.mubr.bf16.gmra.mrb[132].mxu0 %v3060_v37 }
 0x13b   : > { %3095 = vmatprep.mubr.msk.bf16.mxu0 %vm519_vm0, %v3297_v51 }
 0x13d   : > { %v3995_v2 = vpop.f32.mrb[28].mxu0  ;;  %v3997_v40 = vpop.f32.mrb[28].mxu1 }
 0x13e   : > { %v681_v41 = vpop.f32.mrb[29].mxu0  ;;  %v777_v24 = vpop.f32.mrb[29].mxu1 }
 0x13f   : > { %v4000_v29 = vpop.f32.mrb[30].mxu0  ;;  %v4002_v62 = vpop.f32.mrb[30].mxu1 }
 0x140   : > { %v684_v16 = vpop.f32.mrb[31].mxu0  ;;  %v780_v44 = vpop.f32.mrb[31].mxu1 }
 0x142   : > { %1828 = vmatmul.mubr.bf16.gmra.mrb[136].mxu0 %v3299_v59 }
 0x145   : > { %v4004_v20 = vpop.f32.mrb[32].mxu0  ;;  %v4006_v54 = vpop.f32.mrb[32].mxu1 }
 0x146   : > { %v689_v45 = vpop.f32.mrb[33].mxu0  ;;  %v785_v30 = vpop.f32.mrb[33].mxu1 }
 0x147   : > { %v4008_v8 = vpop.f32.mrb[34].mxu0  ;;  %v4010_v32 = vpop.f32.mrb[34].mxu1 }
 0x148   : > { %v692_v55 = vpop.f32.mrb[35].mxu0  ;;  %v788_v15 = vpop.f32.mrb[35].mxu1 }
 0x14d   : > { %v4012_v34 = vpop.f32.mrb[36].mxu0  ;;  %v4014_v14 = vpop.f32.mrb[36].mxu1 }
 0x14e   : > { %v697_v61 = vpop.f32.mrb[37].mxu0  ;;  %v793_v56 = vpop.f32.mrb[37].mxu1 }
 0x14f   : > { %v4016_v5 = vpop.f32.mrb[38].mxu0  ;;  %v4018_v6 = vpop.f32.mrb[38].mxu1  ;;  %v4037_v61 = vld [vmem:[%s4629_s2] ss:$0 sm:$0xff] }
 0x150   : > { %v700_v11 = vpop.f32.mrb[39].mxu0  ;;  %v796_v35 = vpop.f32.mrb[39].mxu1 }
 0x155   : > { %v4020_v1 = vpop.f32.mrb[40].mxu0  ;;  %v4022_v7 = vpop.f32.mrb[40].mxu1 }
 0x156   : > { %v705_v18 = vpop.f32.mrb[41].mxu0  ;;  %v801_v22 = vpop.f32.mrb[41].mxu1 }
 0x157   : > { %v4024_v23 = vpop.f32.mrb[42].mxu0  ;;  %v4026_v48 = vpop.f32.mrb[42].mxu1 }
 0x158   : > { %4631 = vst [vmem:[#allocation4_spill] sm:$0xff] %v4026_v48  ;;  %v708_v3 = vpop.f32.mrb[43].mxu0  ;;  %v804_v37 = vpop.f32.mrb[43].mxu1 }
 0x15d   : > { %v4028_v51 = vpop.f32.mrb[44].mxu0  ;;  %v1041_v63 = vpop.f32.mrb[44].mxu1 }
 0x15e   : > { %v1042_v0 = vadd.f32 %v1041_v63, %v3900_v26  ;;  %v713_v41 = vpop.f32.mrb[45].mxu0  ;;  %v1043_v24 = vpop.f32.mrb[45].mxu1 }
 0x15f   : > { %v4031_v59 = vpop.f32.mrb[46].mxu0  ;;  %v1044_v16 = vpop.f32.mrb[46].mxu1 }
 0x160   : > { %v1045_v44 = vadd.f32 %v1044_v16, %v3906_v38  ;;  %v716_v45 = vpop.f32.mrb[47].mxu0  ;;  %v1046_v30 = vpop.f32.mrb[47].mxu1 }
 0x165   : > { %v1049_v55 = vpop.f32.mrb[48].mxu1  ;;  %v1653_v15 = vpop.f32.mrb[48].mxu0 }
 0x166   : > { %v1050_v56 = vadd.f32 %v1049_v55, %v3914_v52  ;;  %v1836_v11 = vadd.f32 %v1653_v15, %v1042_v0  ;;  %v1051_v26 = vpop.f32.mrb[49].mxu1  ;;  %v1655_v35 = vpop.f32.mrb[49].mxu0 }
 0x167   : > { %v1052_v18 = vpop.f32.mrb[50].mxu1  ;;  %v1656_v22 = vpop.f32.mrb[50].mxu0 }
 0x168   : > { %v1889_v3 = vadd.f32 %v4037_v61, %v1836_v11  ;;  %v1053_v38 = vadd.f32 %v1052_v18, %v3920_v19  ;;  %v1837_v37 = vadd.f32 %v1656_v22, %v1045_v44  ;;  %v1658_v63 = vpop.f32.mrb[51].mxu0  ;;  %v1054_v41 = vpop.f32.mrb[51].mxu1 }
 0x16a   : > { %v1890_v24 = vadd.f32 %v4037_v61, %v1837_v37  ;;  %v1935_v16 = vmax.f32 %v1889_v3, 0.0 }
 0x16c   : > { %v1936_v45 = vmax.f32 %v1890_v24, 0.0 }
 0x16d   : > { %v1057_v30 = vpop.f32.mrb[52].mxu1  ;;  %v1661_v48 = vpop.f32.mrb[52].mxu0 }
 0x16e   : > { %v1981_v52 = vpack.c.bf16 %v1936_v45, %v1935_v16  ;;  %v1058_v0 = vadd.f32 %v1057_v30, %v3928_v57  ;;  %v1838_v55 = vadd.f32 %v1661_v48, %v1050_v56  ;;  %v1059_v15 = vpop.f32.mrb[53].mxu1  ;;  %v1663_v26 = vpop.f32.mrb[53].mxu0 }
 0x16f   : > { %v1060_v35 = vpop.f32.mrb[54].mxu1  ;;  %v1664_v11 = vpop.f32.mrb[54].mxu0 }
 0x170   : > { %2005 = vst.msk [vmem:[#allocation2] sm:$0xff] %vm2004_vm1, %v1981_v52  ;;  %v1891_v19 = vadd.f32 %v4037_v61, %v1838_v55  ;;  %v1061_v44 = vadd.f32 %v1060_v35, %v3934_v42  ;;  %v1839_v18 = vadd.f32 %v1664_v11, %v1053_v38  ;;  %v1666_v22 = vpop.f32.mrb[55].mxu0  ;;  %v1062_v3 = vpop.f32.mrb[55].mxu1 }
 0x172   : > { %v1892_v37 = vadd.f32 %v4037_v61, %v1839_v18  ;;  %v1937_v63 = vmax.f32 %v1891_v19, 0.0 }
 0x174   : > { %v1938_v41 = vmax.f32 %v1892_v37, 0.0 }
 0x175   : > { %v1065_v24 = vpop.f32.mrb[56].mxu1  ;;  %v1669_v57 = vpop.f32.mrb[56].mxu0 }
 0x176   : > { %v1982_v48 = vpack.c.bf16 %v1938_v41, %v1937_v63  ;;  %v1066_v56 = vadd.f32 %v1065_v24, %v3942_v28  ;;  %v1840_v16 = vadd.f32 %v1669_v57, %v1058_v0  ;;  %v1067_v45 = vpop.f32.mrb[57].mxu1  ;;  %v1671_v30 = vpop.f32.mrb[57].mxu0 }
 0x177   : > { %v2028_v52 = vld [vmem:[#allocation2] sm:$0xff]  ;;  %v1068_v15 = vpop.f32.mrb[58].mxu1  ;;  %v1672_v55 = vpop.f32.mrb[58].mxu0 }
 0x178   : > { %2006 = vst.msk [vmem:[#allocation2 + $0x8] sm:$0xff] %vm2004_vm1, %v1982_v48  ;;  %v1674_v42 = vpop.f32.mrb[59].mxu0  ;;  %v1070_v38 = vpop.f32.mrb[59].mxu1  ;;  %v1893_v26 = vadd.f32 %v4037_v61, %v1840_v16  ;;  %v1069_v35 = vadd.f32 %v1068_v15, %v3948_v10  ;;  %v1841_v11 = vadd.f32 %v1672_v55, %v1061_v44  ;;  %v2056_v19 = vshll.u32 %v2028_v52, 16 }
 0x179   : > { %v2054_v10 = vshrl.u32 %v2028_v52, 16  ;;  %v2282_v42 = vld [vmem:[#allocation2] sm:$0xfe] }
 0x17a   : > { %v1894_v18 = vadd.f32 %v4037_v61, %v1841_v11  ;;  %v1939_v22 = vmax.f32 %v1893_v26, 0.0  ;;  %v2058_v37 = vrot.slane %v2056_v19, 1 }
 0x17c   : > { %v1940_v28 = vmax.f32 %v1894_v18, 0.0  ;;  %v2059_v26 = vor.u32 %v2058_v37, %v2054_v10 }
 0x17d   : > { %v1073_v0 = vpop.f32.mrb[60].mxu1  ;;  %v1677_v3 = vpop.f32.mrb[60].mxu0 }
 0x17e   : > { %v1074_v63 = vadd.f32 %v1073_v0, %v3956_v21  ;;  %v1842_v41 = vadd.f32 %v1677_v3, %v1066_v56  ;;  %v1075_v24 = vpop.f32.mrb[61].mxu1  ;;  %v1679_v57 = vpop.f32.mrb[61].mxu0  ;;  %v1983_v45 = vpack.c.bf16 %v1940_v28, %v1939_v22  ;;  %v2307_v22 = vrot.slane %v2282_v42, 1 }
 0x17f   : > { %v4054_v48 = vld [vmem:[#allocation2 + $0x8] sm:$0xff]  ;;  %v1076_v16 = vpop.f32.mrb[62].mxu1  ;;  %v1680_v30 = vpop.f32.mrb[62].mxu0 }
 0x180   : > { %v2061_v44 = vshll.u32 %v4054_v48, 16  ;;  %v1682_v15 = vpop.f32.mrb[63].mxu0  ;;  %v1078_v55 = vpop.f32.mrb[63].mxu1  ;;  %2007 = vst.msk [vmem:[#allocation2 + $0x10] sm:$0xff] %vm2004_vm1, %v1983_v45  ;;  %v1895_v38 = vadd.f32 %v4037_v61, %v1842_v41  ;;  %v1077_v21 = vadd.f32 %v1076_v16, %v3962_v49  ;;  %v1843_v56 = vadd.f32 %v1680_v30, %v1069_v35 }
 0x181   : > { %v2308_v19 = vrot.slane %v4054_v48, 1 }
 0x182   : > { %v2063_v11 = vrot.slane %v2061_v44, 1  ;;  %v1896_v18 = vadd.f32 %v4037_v61, %v1843_v56  ;;  %v1941_v3 = vmax.f32 %v1895_v38, 0.0 }
 0x183   : > { %v2309_v41 = vsel %vm2306_vm3, %v2307_v22, %v2308_v19 }
 0x184   : > { %v2064_v28 = vsel %vm2052_vm2, %v2059_v26, %v2063_v11  ;;  %v1942_v24 = vmax.f32 %v1896_v18, 0.0  ;;  %v2065_v18 = vshrl.u32 %v4054_v48, 16 }
 0x185   : > { %v2259_v0 = vmax.bf16 %v2064_v28, %v2028_v52  ;;  %v1081_v57 = vpop.f32.mrb[64].mxu1  ;;  %v1685_v45 = vpop.f32.mrb[64].mxu0 }
 0x186   : > { %v1082_v49 = vadd.f32 %v1081_v57, %v3971_v12  ;;  %v1844_v35 = vadd.f32 %v1685_v45, %v1074_v63  ;;  %v1083_v37 = vpop.f32.mrb[65].mxu1  ;;  %v1687_v16 = vpop.f32.mrb[65].mxu0  ;;  %v1984_v10 = vpack.c.bf16 %v1942_v24, %v1941_v3 }
 0x187   : > { %v2375_v30 = vmax.bf16 %v2309_v41, %v2259_v0  ;;  %v1084_v44 = vpop.f32.mrb[66].mxu1  ;;  %v1688_v15 = vpop.f32.mrb[66].mxu0  ;;  %v4065_v55 = vld [vmem:[#allocation2 + $0x10] sm:$0xff]  ;;  %v2067_v0 = vor.u32 %v2065_v18, %v2063_v11 }
 0x188   : > { %v1897_v52 = vadd.f32 %v4037_v61, %v1844_v35  ;;  %v1085_v42 = vadd.f32 %v1084_v44, %v3977_v17  ;;  %v1845_v38 = vadd.f32 %v1688_v15, %v1077_v21  ;;  %v1690_v56 = vpop.f32.mrb[67].mxu0  ;;  %v1086_v26 = vpop.f32.mrb[67].mxu1  ;;  %v2069_v22 = vshll.u32 %v4065_v55, 16  ;;  %2008 = vst.msk [vmem:[#allocation2 + $0x18] sm:$0xff] %vm2004_vm1, %v1984_v10 }
 0x189   : > { %v3097_v12 = vcombine.low %v2375_v30, %v2375_v30  ;;  %v3098_v63 = vcombine.high %v2375_v30, %v2375_v30  ;;  %v2310_v17 = vrot.slane %v4065_v55, 1 }
 0x18a   : > { %v1898_v28 = vadd.f32 %v4037_v61, %v1845_v38  ;;  %v2071_v3 = vrot.slane %v2069_v22, 1  ;;  %v1943_v21 = vmax.f32 %v1897_v52, 0.0 }
 0x18b   : > { %2557 = vst.msk [vmem:[#allocation3] sm:$0xf] %vm2556_vm4, %v3097_v12  ;;  %2558 = vst.msk [vmem:[#allocation3 + $0x4] sm:$0xf] %vm2556_vm4, %v3098_v63  ;;  %v2311_v44 = vsel %vm2306_vm3, %v2308_v19, %v2310_v17 }
 0x18c   : > { %v1944_v24 = vmax.f32 %v1898_v28, 0.0  ;;  %v2072_v57 = vsel %vm2052_vm2, %v2067_v0, %v2071_v3 }
 0x18d   : > { %v1089_v45 = vpop.f32.mrb[68].mxu1  ;;  %v1693_v41 = vpop.f32.mrb[68].mxu0  ;;  %v2260_v35 = vmax.bf16 %v2072_v57, %v4054_v48 }
 0x18e   : > { %v1985_v37 = vpack.c.bf16 %v1944_v24, %v1943_v21  ;;  %v1090_v16 = vadd.f32 %v1089_v45, %v3984_v31  ;;  %v1846_v30 = vadd.f32 %v1693_v41, %v1082_v49  ;;  %v1091_v11 = vpop.f32.mrb[69].mxu1  ;;  %v1695_v10 = vpop.f32.mrb[69].mxu0  ;;  %v2073_v31 = vshrl.u32 %v4065_v55, 16 }
 0x18f   : > { %v1092_v15 = vpop.f32.mrb[70].mxu1  ;;  %v1696_v38 = vpop.f32.mrb[70].mxu0  ;;  %v2376_v56 = vmax.bf16 %v2311_v44, %v2260_v35  ;;  %v2031_v26 = vld [vmem:[#allocation2 + $0x18] sm:$0xff] }
 0x190   : > { %2009 = vst.msk [vmem:[#allocation2 + $0x20] sm:$0xff] %vm2004_vm1, %v1985_v37  ;;  %v1899_v52 = vadd.f32 %v4037_v61, %v1846_v30  ;;  %v1093_v18 = vadd.f32 %v1092_v15, %v3989_v46  ;;  %v1847_v12 = vadd.f32 %v1696_v38, %v1085_v42  ;;  %v1698_v48 = vpop.f32.mrb[71].mxu0  ;;  %v1094_v63 = vpop.f32.mrb[71].mxu1  ;;  %v2077_v49 = vshll.u32 %v2031_v26, 16 }
 0x191   : > { %v3099_v22 = vcombine.low %v2376_v56, %v2376_v56  ;;  %v3100_v28 = vcombine.high %v2376_v56, %v2376_v56  ;;  %v2075_v0 = vor.u32 %v2073_v31, %v2071_v3  ;;  %v2312_v24 = vrot.slane %v2031_v26, 1 }
 0x192   : > { %v1900_v19 = vadd.f32 %v4037_v61, %v1847_v12  ;;  %v2079_v21 = vrot.slane %v2077_v49, 1  ;;  %v1945_v57 = vmax.f32 %v1899_v52, 0.0  ;;  %v2081_v44 = vshrl.u32 %v2031_v26, 16 }
 0x193   : > { %2559 = vst.msk [vmem:[#allocation3 + $0x8] sm:$0xf] %vm2556_vm4, %v3099_v22  ;;  %2560 = vst.msk [vmem:[#allocation3 + $0xc] sm:$0xf] %vm2556_vm4, %v3100_v28  ;;  %v2313_v15 = vsel %vm2306_vm3, %v2310_v17, %v2312_v24 }
 0x194   : > { %v1946_v45 = vmax.f32 %v1900_v19, 0.0  ;;  %v2080_v46 = vsel %vm2052_vm2, %v2075_v0, %v2079_v21  ;;  %v2083_v31 = vor.u32 %v2081_v44, %v2079_v21 }
 0x195   : > { %v1097_v42 = vpop.f32.mrb[72].mxu1  ;;  %v1701_v41 = vpop.f32.mrb[72].mxu0  ;;  %v2261_v35 = vmax.bf16 %v2080_v46, %v4065_v55 }
 0x196   : > { %v1986_v37 = vpack.c.bf16 %v1946_v45, %v1945_v57  ;;  %v1098_v30 = vadd.f32 %v1097_v42, %v3995_v2  ;;  %v1848_v11 = vadd.f32 %v1701_v41, %v1090_v16  ;;  %v1099_v10 = vpop.f32.mrb[73].mxu1  ;;  %v1703_v3 = vpop.f32.mrb[73].mxu0 }
 0x197   : > { %v4091_v38 = vld [vmem:[#allocation2 + $0x20] sm:$0xff]  ;;  %v1100_v56 = vpop.f32.mrb[74].mxu1  ;;  %v1704_v52 = vpop.f32.mrb[74].mxu0  ;;  %v2377_v12 = vmax.bf16 %v2313_v15, %v2261_v35 }
 0x198   : > { %v2085_v48 = vshll.u32 %v4091_v38, 16  ;;  %2010 = vst.msk [vmem:[#allocation2 + $0x28] sm:$0xff] %vm2004_vm1, %v1986_v37  ;;  %v1706_v63 = vpop.f32.mrb[75].mxu0  ;;  %v1102_v55 = vpop.f32.mrb[75].mxu1  ;;  %v1901_v2 = vadd.f32 %v4037_v61, %v1848_v11  ;;  %v1101_v16 = vadd.f32 %v1100_v56, %v4000_v29  ;;  %v1849_v49 = vadd.f32 %v1704_v52, %v1093_v18 }
 0x199   : > { %v3101_v22 = vcombine.low %v2377_v12, %v2377_v12  ;;  %v3102_v28 = vcombine.high %v2377_v12, %v2377_v12  ;;  %v2314_v19 = vrot.slane %v4091_v38, 1  ;;  %v2089_v52 = vshrl.u32 %v4091_v38, 16 }
 0x19a   : > { %v2087_v17 = vrot.slane %v2085_v48, 1  ;;  %v1902_v0 = vadd.f32 %v4037_v61, %v1849_v49  ;;  %v1947_v21 = vmax.f32 %v1901_v2, 0.0 }
 0x19b   : > { %2561 = vst.msk [vmem:[#allocation3 + $0x10] sm:$0xf] %vm2556_vm4, %v3101_v22  ;;  %2562 = vst.msk [vmem:[#allocation3 + $0x14] sm:$0xf] %vm2556_vm4, %v3102_v28  ;;  %v2315_v29 = vsel %vm2306_vm3, %v2312_v24, %v2314_v19  ;;  %v4115_v28 = vld [vmem:[#allocation3 + $0xc] sm:$0xf] }
 0x19c   : > { %v2088_v57 = vsel %vm2052_vm2, %v2083_v31, %v2087_v17  ;;  %v1948_v46 = vmax.f32 %v1902_v0, 0.0  ;;  %v2091_v31 = vor.u32 %v2089_v52, %v2087_v17 }
 0x19d   : > { %v2262_v45 = vmax.bf16 %v2088_v57, %v2031_v26  ;;  %v1105_v42 = vpop.f32.mrb[76].mxu1  ;;  %v1709_v41 = vpop.f32.mrb[76].mxu0 }
 0x19e   : > { %v1106_v18 = vadd.f32 %v1105_v42, %v4004_v20  ;;  %v1850_v35 = vadd.f32 %v1709_v41, %v1098_v30  ;;  %v1107_v37 = vpop.f32.mrb[77].mxu1  ;;  %v1711_v11 = vpop.f32.mrb[77].mxu0  ;;  %v1987_v44 = vpack.c.bf16 %v1948_v46, %v1947_v21  ;;  %v2602_v21 = vld [vmem:[#allocation3] sm:$0xf] }
 0x19f   : > { %v2378_v10 = vmax.bf16 %v2315_v29, %v2262_v45  ;;  %v4104_v3 = vld [vmem:[#allocation2 + $0x28] sm:$0xff]  ;;  %v1108_v15 = vpop.f32.mrb[78].mxu1  ;;  %v1712_v56 = vpop.f32.mrb[78].mxu0  ;;  %v2644_v11 = vmax.bf16 %v4115_v28, %v2602_v21 }
 0x1a0   : > { %v2093_v26 = vshll.u32 %v4104_v3, 16  ;;  %v1903_v12 = vadd.f32 %v4037_v61, %v1850_v35  ;;  %v1714_v48 = vpop.f32.mrb[79].mxu0  ;;  %v1110_v24 = vpop.f32.mrb[79].mxu1  ;;  %2011 = vst.msk [vmem:[#allocation2 + $0x30] sm:$0xff] %vm2004_vm1, %v1987_v44  ;;  %v1109_v30 = vadd.f32 %v1108_v15, %v4008_v8  ;;  %v1851_v55 = vadd.f32 %v1712_v56, %v1101_v16  ;;  %v2603_v56 = vld [vmem:[#allocation3 + $0x4] sm:$0xf] }
 0x1a1   : > { %v3103_v63 = vcombine.low %v2378_v10, %v2378_v10  ;;  %v3104_v20 = vcombine.high %v2378_v10, %v2378_v10  ;;  %v2316_v49 = vrot.slane %v4104_v3, 1  ;;  %v2097_v52 = vshrl.u32 %v4104_v3, 16 }
 0x1a2   : > { %v2095_v2 = vrot.slane %v2093_v26, 1  ;;  %v1904_v22 = vadd.f32 %v4037_v61, %v1851_v55  ;;  %v1949_v45 = vmax.f32 %v1903_v12, 0.0  ;;  %v4120_v46 = vld [vmem:[#allocation3 + $0x10] sm:$0xf]  ;;  %v4152_v21 = vld [vmem:[#allocation3 + $0x14] sm:$0xf] }
 0x1a3   : > { %2563 = vst.msk [vmem:[#allocation3 + $0x18] sm:$0xf] %vm2556_vm4, %v3103_v63  ;;  %2564 = vst.msk [vmem:[#allocation3 + $0x1c] sm:$0xf] %vm2556_vm4, %v3104_v20  ;;  %v2317_v42 = vsel %vm2306_vm3, %v2314_v19, %v2316_v49  ;;  %v2645_v24 = vmax.bf16 %v4120_v46, %v2603_v56 }
 0x1a4   : > { %v2096_v0 = vsel %vm2052_vm2, %v2091_v31, %v2095_v2  ;;  %v1950_v8 = vmax.f32 %v1904_v22, 0.0 }
 0x1a5   : > { %v2263_v57 = vmax.bf16 %v2096_v0, %v4091_v38  ;;  %v1113_v16 = vpop.f32.mrb[80].mxu1  ;;  %v1717_v17 = vpop.f32.mrb[80].mxu0 }
 0x1a6   : > { %v1114_v41 = vadd.f32 %v1113_v16, %v4012_v34  ;;  %v1852_v29 = vadd.f32 %v1717_v17, %v1106_v18  ;;  %v1115_v35 = vpop.f32.mrb[81].mxu1  ;;  %v1719_v37 = vpop.f32.mrb[81].mxu0  ;;  %v1988_v38 = vpack.c.bf16 %v1950_v8, %v1949_v45 }
 0x1a7   : > { %v2379_v10 = vmax.bf16 %v2317_v42, %v2263_v57  ;;  %v1116_v44 = vpop.f32.mrb[82].mxu1  ;;  %v1720_v15 = vpop.f32.mrb[82].mxu0  ;;  %v4128_v26 = vld [vmem:[#allocation2 + $0x30] sm:$0xff]  ;;  %v2099_v57 = vor.u32 %v2097_v52, %v2095_v2 }
 0x1a8   : > { %v1905_v12 = vadd.f32 %v4037_v61, %v1852_v29  ;;  %v1117_v19 = vadd.f32 %v1116_v44, %v4016_v5  ;;  %v1853_v34 = vadd.f32 %v1720_v15, %v1109_v30  ;;  %v1722_v18 = vpop.f32.mrb[83].mxu0  ;;  %v1118_v48 = vpop.f32.mrb[83].mxu1  ;;  %v2101_v55 = vshll.u32 %v4128_v26, 16  ;;  %2012 = vst.msk [vmem:[#allocation2 + $0x38] sm:$0xff] %vm2004_vm1, %v1988_v38  ;;  %v2604_v38 = vld [vmem:[#allocation3 + $0x8] sm:$0xf] }
 0x1a9   : > { %v3105_v63 = vcombine.low %v2379_v10, %v2379_v10  ;;  %v3106_v20 = vcombine.high %v2379_v10, %v2379_v10  ;;  %v2318_v8 = vrot.slane %v4128_v26, 1 }
 0x1aa   : > { %v4142_v5 = vld [vmem:[#allocation3 + $0x18] sm:$0xf]  ;;  %v4144_v30 = vld [vmem:[#allocation3 + $0x1c] sm:$0xf]  ;;  %v1906_v31 = vadd.f32 %v4037_v61, %v1853_v34  ;;  %v2103_v45 = vrot.slane %v2101_v55, 1  ;;  %v1951_v16 = vmax.f32 %v1905_v12, 0.0  ;;  %v2646_v12 = vmax.bf16 %v4152_v21, %v2604_v38 }
 0x1ab   : > { %v2686_v22 = vmax.bf16 %v2644_v11, %v4142_v5  ;;  %v2687_v0 = vmax.bf16 %v2645_v24, %v4144_v30  ;;  %2565 = vst.msk [vmem:[#allocation3 + $0x20] sm:$0xf] %vm2556_vm4, %v3105_v63  ;;  %2566 = vst.msk [vmem:[#allocation3 + $0x24] sm:$0xf] %vm2556_vm4, %v3106_v20  ;;  %v2319_v34 = vsel %vm2306_vm3, %v2316_v49, %v2318_v8  ;;  %v2105_v20 = vshrl.u32 %v4128_v26, 16 }
 0x1ac   : > { %v1952_v17 = vmax.f32 %v1906_v31, 0.0  ;;  %v2104_v35 = vsel %vm2052_vm2, %v2099_v57, %v2103_v45 }
 0x1ad   : > { %2725 = vst.msk [vmem:[%s4140_s28] sm:$0xf] %vm2556_vm4, %v2686_v22  ;;  %2726 = vst.msk [vmem:[%s4140_s28 + $0x4] sm:$0xf] %vm2556_vm4, %v2687_v0  ;;  %v1121_v42 = vpop.f32.mrb[84].mxu1  ;;  %v1725_v29 = vpop.f32.mrb[84].mxu0  ;;  %v2264_v44 = vmax.bf16 %v2104_v35, %v4104_v3  ;;  %v2107_v57 = vor.u32 %v2105_v20, %v2103_v45 }
 0x1ae   : > { %v1989_v2 = vpack.c.bf16 %v1952_v17, %v1951_v16  ;;  %v1122_v37 = vadd.f32 %v1121_v42, %v4020_v1  ;;  %v1123_v11 = vpop.f32.mrb[85].mxu1  ;;  %v1727_v10 = vpop.f32.mrb[85].mxu0  ;;  %v1854_v15 = vadd.f32 %v1725_v29, %v1114_v41  ;;  %v2647_v41 = vmax.bf16 %v4142_v5, %v4115_v28 }
 0x1af   : > { %v1124_v56 = vpop.f32.mrb[86].mxu1  ;;  %v1728_v52 = vpop.f32.mrb[86].mxu0  ;;  %v4165_v18 = vld [vmem:[#allocation2 + $0x38] sm:$0xff]  ;;  %v2380_v55 = vmax.bf16 %v2319_v34, %v2264_v44 }
 0x1b0   : > { %2013 = vst.msk [vmem:[#allocation2 + $0x40] sm:$0xff] %vm2004_vm1, %v1989_v2  ;;  %v1125_v1 = vadd.f32 %v1124_v56, %v4024_v23  ;;  %v1855_v48 = vadd.f32 %v1728_v52, %v1117_v19  ;;  %v1730_v24 = vpop.f32.mrb[87].mxu0  ;;  %v1126_v63 = vpop.f32.mrb[87].mxu1  ;;  %v2109_v3 = vshll.u32 %v4165_v18, 16  ;;  %v1907_v22 = vadd.f32 %v4037_v61, %v1854_v15 }
 0x1b1   : > { %v3107_v28 = vcombine.low %v2380_v55, %v2380_v55  ;;  %v3108_v16 = vcombine.high %v2380_v55, %v2380_v55  ;;  %v2320_v42 = vrot.slane %v4165_v18, 1  ;;  %v2113_v24 = vshrl.u32 %v4165_v18, 16 }
 0x1b2   : > { %v4173_v49 = vld [vmem:[#allocation3 + $0x20] sm:$0xf]  ;;  %v4175_v31 = vld [vmem:[#allocation3 + $0x24] sm:$0xf]  ;;  %v1908_v23 = vadd.f32 %v4037_v61, %v1855_v48  ;;  %v2111_v17 = vrot.slane %v2109_v3, 1  ;;  %v1953_v29 = vmax.f32 %v1907_v22, 0.0 }
 0x1b3   : > { %v2688_v19 = vmax.bf16 %v2646_v12, %v4173_v49  ;;  %v2689_v0 = vmax.bf16 %v2647_v41, %v4175_v31  ;;  %2567 = vst.msk [vmem:[#allocation3 + $0x28] sm:$0xf] %vm2556_vm4, %v3107_v28  ;;  %2568 = vst.msk [vmem:[#allocation3 + $0x2c] sm:$0xf] %vm2556_vm4, %v3108_v16  ;;  %v2321_v63 = vsel %vm2306_vm3, %v2318_v8, %v2320_v42 }
 0x1b4   : > { %v1954_v35 = vmax.f32 %v1908_v23, 0.0  ;;  %v2112_v10 = vsel %vm2052_vm2, %v2107_v57, %v2111_v17  ;;  %v2115_v22 = vor.u32 %v2113_v24, %v2111_v17  ;;  %v2648_v28 = vmax.bf16 %v4144_v30, %v4120_v46 }
 0x1b5   : > { %2727 = vst.msk [vmem:[%s4140_s28 + $0x8] sm:$0xf] %vm2556_vm4, %v2688_v19  ;;  %2728 = vst.msk [vmem:[%s4140_s28 + $0xc] sm:$0xf] %vm2556_vm4, %v2689_v0  ;;  %v1129_v2 = vpop.f32.mrb[88].mxu1  ;;  %v1733_v11 = vpop.f32.mrb[88].mxu0  ;;  %v2265_v56 = vmax.bf16 %v2112_v10, %v4128_v26  ;;  %v2649_v16 = vmax.bf16 %v4173_v49, %v4152_v21 }
 0x1b6   : > { %v1130_v45 = vadd.f32 %v1129_v2, %v4028_v51  ;;  %v1856_v38 = vadd.f32 %v1733_v11, %v1122_v37  ;;  %v1131_v44 = vpop.f32.mrb[89].mxu1  ;;  %v1735_v15 = vpop.f32.mrb[89].mxu0  ;;  %v1990_v12 = vpack.c.bf16 %v1954_v35, %v1953_v29 }
 0x1b7   : > { %v4191_v52 = vld [vmem:[#allocation2 + $0x40] sm:$0xff]  ;;  %v1132_v34 = vpop.f32.mrb[90].mxu1  ;;  %v1736_v48 = vpop.f32.mrb[90].mxu0  ;;  %v2381_v37 = vmax.bf16 %v2321_v63, %v2265_v56 }
 0x1b8   : > { %v2117_v41 = vshll.u32 %v4191_v52, 16  ;;  %v1909_v20 = vadd.f32 %v4037_v61, %v1856_v38  ;;  %v1738_v55 = vpop.f32.mrb[91].mxu0  ;;  %v1134_v51 = vpop.f32.mrb[91].mxu1  ;;  %2014 = vst.msk [vmem:[#allocation2 + $0x48] sm:$0xff] %vm2004_vm1, %v1990_v12  ;;  %v1133_v26 = vadd.f32 %v1132_v34, %v4031_v59  ;;  %v1857_v3 = vadd.f32 %v1736_v48, %v1125_v1 }
 0x1b9   : > { %v2322_v19 = vrot.slane %v4191_v52, 1  ;;  %v3109_v0 = vcombine.low %v2381_v37, %v2381_v37  ;;  %v3110_v57 = vcombine.high %v2381_v37, %v2381_v37 }
 0x1ba   : > { %v2119_v23 = vrot.slane %v2117_v41, 1  ;;  %v1910_v8 = vadd.f32 %v4037_v61, %v1857_v3  ;;  %v1955_v35 = vmax.f32 %v1909_v20, 0.0  ;;  %v4206_v2 = vld [vmem:[#allocation3 + $0x28] sm:$0xf]  ;;  %v4208_v59 = vld [vmem:[#allocation3 + $0x2c] sm:$0xf] }
 0x1bb   : > { %2569 = vst.msk [vmem:[#allocation3 + $0x30] sm:$0xf] %vm2556_vm4, %v3109_v0  ;;  %2570 = vst.msk [vmem:[#allocation3 + $0x34] sm:$0xf] %vm2556_vm4, %v3110_v57  ;;  %v2690_v11 = vmax.bf16 %v2648_v28, %v4206_v2  ;;  %v2691_v21 = vmax.bf16 %v2649_v16, %v4208_v59  ;;  %v2323_v10 = vsel %vm2306_vm3, %v2320_v42, %v2322_v19 }
 0x1bc   : > { %v2120_v29 = vsel %vm2052_vm2, %v2115_v22, %v2119_v23  ;;  %v1956_v17 = vmax.f32 %v1910_v8, 0.0  ;;  %v2650_v22 = vmax.bf16 %v4175_v31, %v4142_v5 }
 0x1bd   : > { %v2266_v1 = vmax.bf16 %v2120_v29, %v4165_v18  ;;  %v1137_v46 = vpop.f32.mrb[92].mxu1  ;;  %v1741_v38 = vpop.f32.mrb[92].mxu0  ;;  %2729 = vst.msk [vmem:[%s4140_s28 + $0x10] sm:$0xf] %vm2556_vm4, %v2690_v11  ;;  %2730 = vst.msk [vmem:[%s4140_s28 + $0x14] sm:$0xf] %vm2556_vm4, %v2691_v21 }
 0x1be   : > { %v1139_v44 = vpop.f32.mrb[93].mxu1  ;;  %v1991_v56 = vpack.c.bf16 %v1956_v17, %v1955_v35  ;;  %v1138_v12 = vadd.f32 %v1137_v46, %v3902_v27  ;;  %v1858_v34 = vadd.f32 %v1741_v38, %v1130_v45  ;;  %v1743_v48 = vpop.f32.mrb[93].mxu0  ;;  %v2121_v45 = vshrl.u32 %v4191_v52, 16 }
 0x1bf   : > { %v2382_v15 = vmax.bf16 %v2323_v10, %v2266_v1  ;;  %v1140_v24 = vpop.f32.mrb[94].mxu1  ;;  %v4223_v18 = vld [vmem:[#allocation2 + $0x48] sm:$0xff]  ;;  %v1744_v41 = vpop.f32.mrb[94].mxu0 }
 0x1c0   : > { %v1141_v63 = vadd.f32 %v1140_v24, %v3908_v39  ;;  %v1142_v20 = vpop.f32.mrb[95].mxu1  ;;  %v2125_v51 = vshll.u32 %v4223_v18, 16  ;;  %2015 = vst.msk [vmem:[#allocation2 + $0x50] sm:$0xff] %vm2004_vm1, %v1991_v56  ;;  %v1746_v27 = vpop.f32.mrb[95].mxu0  ;;  %v1911_v37 = vadd.f32 %v4037_v61, %v1858_v34  ;;  %v1859_v3 = vadd.f32 %v1744_v41, %v1133_v26 }
 0x1c1   : > { %v3111_v42 = vcombine.low %v2382_v15, %v2382_v15  ;;  %v3112_v55 = vcombine.high %v2382_v15, %v2382_v15  ;;  %v2651_v39 = vmax.bf16 %v4206_v2, %v4144_v30  ;;  %v2123_v28 = vor.u32 %v2121_v45, %v2119_v23 }
 0x1c2   : > { %v2127_v0 = vrot.slane %v2125_v51, 1  ;;  %v4236_v57 = vld [vmem:[#allocation3 + $0x30] sm:$0xf]  ;;  %v4238_v8 = vld [vmem:[#allocation3 + $0x34] sm:$0xf]  ;;  %v2324_v26 = vrot.slane %v4223_v18, 1  ;;  %v1912_v16 = vadd.f32 %v4037_v61, %v1859_v3  ;;  %v2652_v23 = vmax.bf16 %v4208_v59, %v4173_v49 }
 0x1c3   : > { %2571 = vst.msk [vmem:[#allocation3 + $0x38] sm:$0xf] %vm2556_vm4, %v3111_v42  ;;  %2572 = vst.msk [vmem:[#allocation3 + $0x3c] sm:$0xf] %vm2556_vm4, %v3112_v55  ;;  %v2692_v5 = vmax.bf16 %v2650_v22, %v4236_v57  ;;  %v2693_v30 = vmax.bf16 %v2651_v39, %v4238_v8  ;;  %v1957_v17 = vmax.f32 %v1911_v37, 0.0  ;;  %v2653_v42 = vmax.bf16 %v4236_v57, %v4175_v31 }
 0x1c4   : > { %v2128_v1 = vsel %vm2052_vm2, %v2123_v28, %v2127_v0  ;;  %v1958_v46 = vmax.f32 %v1912_v16, 0.0  ;;  %v2325_v34 = vsel %vm2306_vm3, %v2322_v19, %v2324_v26 }
 0x1c5   : > { %v1145_v29 = vpop.f32.mrb[96].mxu1  ;;  %v1749_v35 = vpop.f32.mrb[96].mxu0  ;;  %2731 = vst.msk [vmem:[%s4140_s28 + $0x18] sm:$0xf] %vm2556_vm4, %v2692_v5  ;;  %2732 = vst.msk [vmem:[%s4140_s28 + $0x1c] sm:$0xf] %vm2556_vm4, %v2693_v30  ;;  %v2267_v38 = vmax.bf16 %v2128_v1, %v4191_v52 }
 0x1c6   : > { %v1146_v11 = vadd.f32 %v1145_v29, %v3916_v60  ;;  %v1147_v21 = vpop.f32.mrb[97].mxu1  ;;  %v1751_v10 = vpop.f32.mrb[97].mxu0  ;;  %v1860_v44 = vadd.f32 %v1749_v35, %v1138_v12  ;;  %v1992_v60 = vpack.c.bf16 %v1958_v46, %v1957_v17  ;;  %v2129_v12 = vshrl.u32 %v4223_v18, 16 }
 0x1c7   : > { %v1148_v15 = vpop.f32.mrb[98].mxu1  ;;  %v1752_v56 = vpop.f32.mrb[98].mxu0  ;;  %v4256_v48 = vld [vmem:[#allocation2 + $0x50] sm:$0xff]  ;;  %v2383_v55 = vmax.bf16 %v2325_v34, %v2267_v38 }
 0x1c8   : > { %v1149_v24 = vadd.f32 %v1148_v15, %v3922_v36  ;;  %v1861_v41 = vadd.f32 %v1752_v56, %v1141_v63  ;;  %v1754_v49 = vpop.f32.mrb[99].mxu0  ;;  %v1150_v20 = vpop.f32.mrb[99].mxu1  ;;  %v2133_v52 = vshll.u32 %v4256_v48, 16  ;;  %2016 = vst.msk [vmem:[#allocation2 + $0x58] sm:$0xff] %vm2004_vm1, %v1992_v60  ;;  %v1913_v36 = vadd.f32 %v4037_v61, %v1860_v44 }
 0x1c9   : > { %v2131_v45 = vor.u32 %v2129_v12, %v2127_v0  ;;  %v3113_v37 = vcombine.low %v2383_v55, %v2383_v55  ;;  %v3114_v3 = vcombine.high %v2383_v55, %v2383_v55  ;;  %v2326_v39 = vrot.slane %v4256_v48, 1 }
 0x1ca   : > { %v4263_v51 = vld [vmem:[#allocation3 + $0x38] sm:$0xf]  ;;  %v4265_v19 = vld [vmem:[#allocation3 + $0x3c] sm:$0xf]  ;;  %v1914_v63 = vadd.f32 %v4037_v61, %v1861_v41  ;;  %v2135_v22 = vrot.slane %v2133_v52, 1  ;;  %v1959_v28 = vmax.f32 %v1913_v36, 0.0 }
 0x1cb   : > { %v2694_v27 = vmax.bf16 %v2652_v23, %v4263_v51  ;;  %v2695_v31 = vmax.bf16 %v2653_v42, %v4265_v19  ;;  %2573 = vst.msk [vmem:[#allocation3 + $0x40] sm:$0xf] %vm2556_vm4, %v3113_v37  ;;  %2574 = vst.msk [vmem:[#allocation3 + $0x44] sm:$0xf] %vm2556_vm4, %v3114_v3  ;;  %v2327_v38 = vsel %vm2306_vm3, %v2324_v26, %v2326_v39 }
 0x1cc   : > { %v1960_v16 = vmax.f32 %v1914_v63, 0.0  ;;  %v2136_v29 = vsel %vm2052_vm2, %v2131_v45, %v2135_v22 }
 0x1cd   : > { %2733 = vst.msk [vmem:[%s4140_s28 + $0x20] sm:$0xf] %vm2556_vm4, %v2694_v27  ;;  %2734 = vst.msk [vmem:[%s4140_s28 + $0x24] sm:$0xf] %vm2556_vm4, %v2695_v31  ;;  %v1153_v5 = vpop.f32.mrb[100].mxu1  ;;  %v1757_v30 = vpop.f32.mrb[100].mxu0  ;;  %v2268_v46 = vmax.bf16 %v2136_v29, %v4223_v18 }
 0x1ce   : > { %v1154_v0 = vadd.f32 %v1153_v5, %v3930_v58  ;;  %v1862_v35 = vadd.f32 %v1757_v30, %v1146_v11  ;;  %v1155_v1 = vpop.f32.mrb[101].mxu1  ;;  %v1759_v17 = vpop.f32.mrb[101].mxu0  ;;  %v1993_v21 = vpack.c.bf16 %v1960_v16, %v1959_v28  ;;  %v2654_v58 = vmax.bf16 %v4238_v8, %v4206_v2 }
 0x1cf   : > { %v1156_v10 = vpop.f32.mrb[102].mxu1  ;;  %v1760_v23 = vpop.f32.mrb[102].mxu0  ;;  %v2384_v41 = vmax.bf16 %v2327_v38, %v2268_v46  ;;  %v4285_v49 = vld [vmem:[#allocation2 + $0x58] sm:$0xff]  ;;  %v2137_v11 = vshrl.u32 %v4256_v48, 16 }
 0x1d0   : > { %v1915_v44 = vadd.f32 %v4037_v61, %v1862_v35  ;;  %v1157_v15 = vadd.f32 %v1156_v10, %v3936_v43  ;;  %v1863_v56 = vadd.f32 %v1760_v23, %v1149_v24  ;;  %v1762_v34 = vpop.f32.mrb[103].mxu0  ;;  %v1158_v60 = vpop.f32.mrb[103].mxu1  ;;  %2017 = vst.msk [vmem:[#allocation2 + $0x60] sm:$0xff] %vm2004_vm1, %v1993_v21  ;;  %v2141_v18 = vshll.u32 %v4285_v49, 16 }
 0x1d1   : > { %v3115_v26 = vcombine.low %v2384_v41, %v2384_v41  ;;  %v3116_v20 = vcombine.high %v2384_v41, %v2384_v41  ;;  %v2655_v43 = vmax.bf16 %v4263_v51, %v4208_v59  ;;  %v2328_v12 = vrot.slane %v4285_v49, 1 }
 0x1d2   : > { %v1916_v42 = vadd.f32 %v4037_v61, %v1863_v56  ;;  %v2143_v24 = vrot.slane %v2141_v18, 1  ;;  %v1961_v55 = vmax.f32 %v1915_v44, 0.0  ;;  %v4296_v52 = vld [vmem:[#allocation3 + $0x40] sm:$0xf]  ;;  %v4298_v36 = vld [vmem:[#allocation3 + $0x44] sm:$0xf]  ;;  %v2139_v2 = vor.u32 %v2137_v11, %v2135_v22 }
 0x1d3   : > { %2575 = vst.msk [vmem:[#allocation3 + $0x48] sm:$0xf] %vm2556_vm4, %v3115_v26  ;;  %2576 = vst.msk [vmem:[#allocation3 + $0x4c] sm:$0xf] %vm2556_vm4, %v3116_v20  ;;  %v2696_v31 = vmax.bf16 %v2654_v58, %v4296_v52  ;;  %v2697_v59 = vmax.bf16 %v2655_v43, %v4298_v36  ;;  %v2329_v21 = vsel %vm2306_vm3, %v2326_v39, %v2328_v12  ;;  %v2145_v38 = vshrl.u32 %v4285_v49, 16 }
 0x1d4   : > { %v1962_v63 = vmax.f32 %v1916_v42, 0.0  ;;  %v2144_v3 = vsel %vm2052_vm2, %v2139_v2, %v2143_v24 }
 0x1d5   : > { %v1161_v27 = vpop.f32.mrb[104].mxu1  ;;  %v1765_v45 = vpop.f32.mrb[104].mxu0  ;;  %2735 = vst.msk [vmem:[%s4140_s28 + $0x28] sm:$0xf] %vm2556_vm4, %v2696_v31  ;;  %2736 = vst.msk [vmem:[%s4140_s28 + $0x2c] sm:$0xf] %vm2556_vm4, %v2697_v59  ;;  %v2269_v22 = vmax.bf16 %v2144_v3, %v4256_v48 }
 0x1d6   : > { %v1163_v37 = vpop.f32.mrb[105].mxu1  ;;  %v1994_v28 = vpack.c.bf16 %v1962_v63, %v1961_v55  ;;  %v1162_v16 = vadd.f32 %v1161_v27, %v3944_v4  ;;  %v1767_v5 = vpop.f32.mrb[105].mxu0  ;;  %v1864_v35 = vadd.f32 %v1765_v45, %v1154_v0  ;;  %v2657_v0 = vmax.bf16 %v4296_v52, %v4238_v8 }
 0x1d7   : > { %v1164_v30 = vpop.f32.mrb[106].mxu1  ;;  %v4311_v29 = vld [vmem:[#allocation2 + $0x60] sm:$0xff]  ;;  %v1768_v17 = vpop.f32.mrb[106].mxu0  ;;  %v2385_v48 = vmax.bf16 %v2329_v21, %v2269_v22 }
 0x1d8   : > { %v1165_v1 = vadd.f32 %v1164_v30, %v3950_v47  ;;  %v1166_v46 = vpop.f32.mrb[107].mxu1  ;;  %v2149_v4 = vshll.u32 %v4311_v29, 16  ;;  %2018 = vst.msk [vmem:[#allocation2 + $0x68] sm:$0xff] %vm2004_vm1, %v1994_v28  ;;  %v1865_v10 = vadd.f32 %v1768_v17, %v1157_v15  ;;  %v1770_v23 = vpop.f32.mrb[107].mxu0  ;;  %v1917_v44 = vadd.f32 %v4037_v61, %v1864_v35 }
 0x1d9   : > { %v2656_v47 = vmax.bf16 %v4265_v19, %v4236_v57  ;;  %v2147_v15 = vor.u32 %v2145_v38, %v2143_v24  ;;  %v3117_v41 = vcombine.low %v2385_v48, %v2385_v48  ;;  %v3118_v58 = vcombine.high %v2385_v48, %v2385_v48 }
 0x1da   : > { %v2151_v56 = vrot.slane %v2149_v4, 1  ;;  %v1918_v39 = vadd.f32 %v4037_v61, %v1865_v10  ;;  %v4326_v34 = vld [vmem:[#allocation3 + $0x48] sm:$0xf]  ;;  %v4328_v60 = vld [vmem:[#allocation3 + $0x4c] sm:$0xf]  ;;  %v2330_v18 = vrot.slane %v4311_v29, 1 }
 0x1db   : > { %v2698_v11 = vmax.bf16 %v2656_v47, %v4326_v34  ;;  %v2699_v57 = vmax.bf16 %v2657_v0, %v4328_v60  ;;  %2577 = vst.msk [vmem:[#allocation3 + $0x50] sm:$0xf] %vm2556_vm4, %v3117_v41  ;;  %2578 = vst.msk [vmem:[#allocation3 + $0x54] sm:$0xf] %vm2556_vm4, %v3118_v58  ;;  %v1963_v20 = vmax.f32 %v1917_v44, 0.0  ;;  %v2153_v30 = vshrl.u32 %v4311_v29, 16 }
 0x1dc   : > { %v2152_v61 = vsel %vm2052_vm2, %v2147_v15, %v2151_v56  ;;  %v1964_v42 = vmax.f32 %v1918_v39, 0.0  ;;  %v2331_v59 = vsel %vm2306_vm3, %v2328_v12, %v2330_v18  ;;  %v2659_v4 = vmax.bf16 %v4326_v34, %v4265_v19 }
 0x1dd   : > { %v1169_v26 = vpop.f32.mrb[108].mxu1  ;;  %v1773_v8 = vpop.f32.mrb[108].mxu0  ;;  %2737 = vst.msk [vmem:[%s4140_s28 + $0x30] sm:$0xf] %vm2556_vm4, %v2698_v11  ;;  %2738 = vst.msk [vmem:[%s4140_s28 + $0x34] sm:$0xf] %vm2556_vm4, %v2699_v57  ;;  %v2270_v2 = vmax.bf16 %v2152_v61, %v4285_v49 }
 0x1de   : > { %v1170_v43 = vadd.f32 %v1169_v26, %v3958_v25  ;;  %v1171_v24 = vpop.f32.mrb[109].mxu1  ;;  %v1775_v55 = vpop.f32.mrb[109].mxu0  ;;  %v1866_v63 = vadd.f32 %v1773_v8, %v1162_v16  ;;  %v1995_v37 = vpack.c.bf16 %v1964_v42, %v1963_v20  ;;  %v2658_v16 = vmax.bf16 %v4298_v36, %v4263_v51  ;;  %v4356_v49 = vld [vmem:[%s4629_s2] ss:$0 sm:$0xff] }
 0x1df   : > { %v1172_v27 = vpop.f32.mrb[110].mxu1  ;;  %v1776_v31 = vpop.f32.mrb[110].mxu0  ;;  %v4345_v45 = vld [vmem:[#allocation2 + $0x68] sm:$0xff]  ;;  %v2386_v22 = vmax.bf16 %v2331_v59, %v2270_v2 }
 0x1e0   : > { %v1173_v25 = vadd.f32 %v1172_v27, %v3964_v53  ;;  %v1867_v3 = vadd.f32 %v1776_v31, %v1165_v1  ;;  %v1778_v28 = vpop.f32.mrb[111].mxu0  ;;  %v1174_v5 = vpop.f32.mrb[111].mxu1  ;;  %v2157_v35 = vshll.u32 %v4345_v45, 16  ;;  %2019 = vst.msk [vmem:[#allocation2 + $0x70] sm:$0xff] %vm2004_vm1, %v1995_v37  ;;  %v1919_v53 = vadd.f32 %v4356_v49, %v1866_v63 }
 0x1e1   : > { %v2155_v1 = vor.u32 %v2153_v30, %v2151_v56  ;;  %v3119_v17 = vcombine.low %v2386_v22, %v2386_v22  ;;  %v3120_v46 = vcombine.high %v2386_v22, %v2386_v22  ;;  %v2332_v51 = vrot.slane %v4345_v45, 1 }
 0x1e2   : > { %v1920_v12 = vadd.f32 %v4356_v49, %v1867_v3  ;;  %v2159_v21 = vrot.slane %v2157_v35, 1  ;;  %v1965_v10 = vmax.f32 %v1919_v53, 0.0  ;;  %v4363_v38 = vld [vmem:[#allocation3 + $0x50] sm:$0xf]  ;;  %v4365_v48 = vld [vmem:[#allocation3 + $0x54] sm:$0xf] }
 0x1e3   : > { %2579 = vst.msk [vmem:[#allocation3 + $0x58] sm:$0xf] %vm2556_vm4, %v3119_v17  ;;  %2580 = vst.msk [vmem:[#allocation3 + $0x5c] sm:$0xf] %vm2556_vm4, %v3120_v46  ;;  %v2700_v19 = vmax.bf16 %v2658_v16, %v4363_v38  ;;  %v2701_v56 = vmax.bf16 %v2659_v4, %v4365_v48  ;;  %v2333_v61 = vsel %vm2306_vm3, %v2330_v18, %v2332_v51  ;;  %v2161_v18 = vshrl.u32 %v4345_v45, 16 }
 0x1e4   : > { %v1966_v23 = vmax.f32 %v1920_v12, 0.0  ;;  %v2160_v44 = vsel %vm2052_vm2, %v2155_v1, %v2159_v21  ;;  %v2661_v63 = vmax.bf16 %v4363_v38, %v4298_v36 }
 0x1e5   : > { %v1177_v47 = vpop.f32.mrb[112].mxu1  ;;  %v1781_v0 = vpop.f32.mrb[112].mxu0  ;;  %v2271_v41 = vmax.bf16 %v2160_v44, %v4311_v29  ;;  %2739 = vst.msk [vmem:[%s4140_s28 + $0x38] sm:$0xf] %vm2556_vm4, %v2700_v19  ;;  %2740 = vst.msk [vmem:[%s4140_s28 + $0x3c] sm:$0xf] %vm2556_vm4, %v2701_v56  ;;  %v2660_v29 = vmax.bf16 %v4328_v60, %v4296_v52  ;;  %v2163_v28 = vor.u32 %v2161_v18, %v2159_v21 }
 0x1e6   : > { %v1179_v39 = vpop.f32.mrb[113].mxu1  ;;  %v1783_v15 = vpop.f32.mrb[113].mxu0  ;;  %v1996_v58 = vpack.c.bf16 %v1966_v23, %v1965_v10  ;;  %v1178_v11 = vadd.f32 %v1177_v47, %v3973_v13  ;;  %v1868_v57 = vadd.f32 %v1781_v0, %v1170_v43 }
 0x1e7   : > { %v1180_v26 = vpop.f32.mrb[114].mxu1  ;;  %v1784_v8 = vpop.f32.mrb[114].mxu0  ;;  %v2387_v13 = vmax.bf16 %v2333_v61, %v2271_v41  ;;  %v4384_v43 = vld [vmem:[#allocation2 + $0x70] sm:$0xff]  ;;  %v2662_v39 = vmax.bf16 %v4365_v48, %v4326_v34 }
 0x1e8   : > { %v1181_v20 = vadd.f32 %v1180_v26, %v3979_v9  ;;  %v1869_v42 = vadd.f32 %v1784_v8, %v1173_v25  ;;  %v1786_v24 = vpop.f32.mrb[115].mxu0  ;;  %v1182_v55 = vpop.f32.mrb[115].mxu1  ;;  %2020 = vst.msk [vmem:[#allocation2 + $0x78] sm:$0xff] %vm2004_vm1, %v1996_v58  ;;  %v1921_v2 = vadd.f32 %v4356_v49, %v1868_v57  ;;  %v2165_v9 = vshll.u32 %v4384_v43, 16 }
 0x1e9   : > { %v3121_v31 = vcombine.low %v2387_v13, %v2387_v13  ;;  %v3122_v59 = vcombine.high %v2387_v13, %v2387_v13  ;;  %v2334_v52 = vrot.slane %v4384_v43, 1 }
 0x1ea   : > { %v1922_v27 = vadd.f32 %v4356_v49, %v1869_v42  ;;  %v1967_v37 = vmax.f32 %v1921_v2, 0.0  ;;  %v4394_v25 = vld [vmem:[#allocation3 + $0x58] sm:$0xf]  ;;  %v4396_v3 = vld [vmem:[#allocation3 + $0x5c] sm:$0xf]  ;;  %v2167_v5 = vrot.slane %v2165_v9, 1 }
 0x1eb   : > { %v2702_v30 = vmax.bf16 %v2660_v29, %v4394_v25  ;;  %v2703_v22 = vmax.bf16 %v2661_v63, %v4396_v3  ;;  %2581 = vst.msk [vmem:[#allocation3 + $0x60] sm:$0xf] %vm2556_vm4, %v3121_v31  ;;  %2582 = vst.msk [vmem:[#allocation3 + $0x64] sm:$0xf] %vm2556_vm4, %v3122_v59  ;;  %v2335_v44 = vsel %vm2306_vm3, %v2332_v51, %v2334_v52  ;;  %v2169_v51 = vshrl.u32 %v4384_v43, 16 }
 0x1ec   : > { %v1968_v36 = vmax.f32 %v1922_v27, 0.0  ;;  %v2168_v53 = vsel %vm2052_vm2, %v2163_v28, %v2167_v5 }
 0x1ed   : > { %v1185_v35 = vpop.f32.mrb[116].mxu1  ;;  %v1789_v16 = vpop.f32.mrb[116].mxu0  ;;  %2741 = vst.msk [vmem:[%s4140_s28 + $0x40] sm:$0xf] %vm2556_vm4, %v2702_v30  ;;  %2742 = vst.msk [vmem:[%s4140_s28 + $0x44] sm:$0xf] %vm2556_vm4, %v2703_v22  ;;  %v2272_v21 = vmax.bf16 %v2168_v53, %v4345_v45  ;;  %v2663_v45 = vmax.bf16 %v4394_v25, %v4328_v60  ;;  %v2664_v53 = vmax.bf16 %v4396_v3, %v4363_v38 }
 0x1ee   : > { %v1997_v12 = vpack.c.bf16 %v1968_v36, %v1967_v37  ;;  %v1186_v1 = vadd.f32 %v1185_v35, %v3986_v33  ;;  %v1187_v17 = vpop.f32.mrb[117].mxu1  ;;  %v1791_v46 = vpop.f32.mrb[117].mxu0  ;;  %v1870_v4 = vadd.f32 %v1789_v16, %v1178_v11 }
 0x1ef   : > { %v1188_v10 = vpop.f32.mrb[118].mxu1  ;;  %v1792_v23 = vpop.f32.mrb[118].mxu0  ;;  %v4414_v47 = vld [vmem:[#allocation2 + $0x78] sm:$0xff]  ;;  %v2388_v15 = vmax.bf16 %v2335_v44, %v2272_v21 }
 0x1f0   : > { %2021 = vst.msk [vmem:[#allocation2 + $0x80] sm:$0xff] %vm2004_vm1, %v1997_v12  ;;  %v1189_v33 = vadd.f32 %v1188_v10, %v3991_v50  ;;  %v1871_v0 = vadd.f32 %v1792_v23, %v1181_v20  ;;  %v1794_v19 = vpop.f32.mrb[119].mxu0  ;;  %v1190_v56 = vpop.f32.mrb[119].mxu1  ;;  %v2173_v41 = vshll.u32 %v4414_v47, 16  ;;  %v1923_v58 = vadd.f32 %v4356_v49, %v1870_v4 }
 0x1f1   : > { %v3123_v57 = vcombine.low %v2388_v15, %v2388_v15  ;;  %v3124_v50 = vcombine.high %v2388_v15, %v2388_v15  ;;  %v2336_v8 = vrot.slane %v4414_v47, 1  ;;  %v2171_v20 = vor.u32 %v2169_v51, %v2167_v5 }
 0x1f2   : > { %v1924_v11 = vadd.f32 %v4356_v49, %v1871_v0  ;;  %v2175_v26 = vrot.slane %v2173_v41, 1  ;;  %v4427_v61 = vld [vmem:[#allocation3 + $0x60] sm:$0xf]  ;;  %v4429_v34 = vld [vmem:[#allocation3 + $0x64] sm:$0xf]  ;;  %v1969_v42 = vmax.f32 %v1923_v58, 0.0 }
 0x1f3   : > { %v2704_v24 = vmax.bf16 %v2662_v39, %v4427_v61  ;;  %v2705_v55 = vmax.bf16 %v2663_v45, %v4429_v34  ;;  %2583 = vst.msk [vmem:[#allocation3 + $0x68] sm:$0xf] %vm2556_vm4, %v3123_v57  ;;  %2584 = vst.msk [vmem:[#allocation3 + $0x6c] sm:$0xf] %vm2556_vm4, %v3124_v50  ;;  %v2177_v36 = vshrl.u32 %v4414_v47, 16  ;;  %v2337_v30 = vsel %vm2306_vm3, %v2334_v52, %v2336_v8 }
 0x1f4   : > { %v1970_v60 = vmax.f32 %v1924_v11, 0.0  ;;  %v2176_v2 = vsel %vm2052_vm2, %v2171_v20, %v2175_v26  ;;  %v2665_v17 = vmax.bf16 %v4427_v61, %v4365_v48 }
 0x1f5   : > { %v1193_v29 = vpop.f32.mrb[120].mxu1  ;;  %v1797_v13 = vpop.f32.mrb[120].mxu0  ;;  %2743 = vst.msk [vmem:[%s4140_s28 + $0x48] sm:$0xf] %vm2556_vm4, %v2704_v24  ;;  %2744 = vst.msk [vmem:[%s4140_s28 + $0x4c] sm:$0xf] %vm2556_vm4, %v2705_v55  ;;  %v2273_v31 = vmax.bf16 %v2176_v2, %v4384_v43  ;;  %v2179_v46 = vor.u32 %v2177_v36, %v2175_v26 }
 0x1f6   : > { %v1998_v63 = vpack.c.bf16 %v1970_v60, %v1969_v42  ;;  %v1194_v18 = vadd.f32 %v1193_v29, %v3997_v40  ;;  %v1195_v9 = vpop.f32.mrb[121].mxu1  ;;  %v1799_v27 = vpop.f32.mrb[121].mxu0  ;;  %v1872_v37 = vadd.f32 %v1797_v13, %v1186_v1 }
 0x1f7   : > { %v4442_v59 = vld [vmem:[#allocation2 + $0x80] sm:$0xff]  ;;  %v1196_v28 = vpop.f32.mrb[122].mxu1  ;;  %v1800_v5 = vpop.f32.mrb[122].mxu0  ;;  %v2389_v12 = vmax.bf16 %v2337_v30, %v2273_v31  ;;  %v2666_v9 = vmax.bf16 %v4429_v34, %v4394_v25 }
 0x1f8   : > { %v2181_v40 = vshll.u32 %v4442_v59, 16  ;;  %2022 = vst.msk [vmem:[#allocation2 + $0x88] sm:$0xff] %vm2004_vm1, %v1998_v63  ;;  %v1197_v22 = vadd.f32 %v1196_v28, %v4002_v62  ;;  %v1802_v35 = vpop.f32.mrb[123].mxu0  ;;  %v1198_v16 = vpop.f32.mrb[123].mxu1  ;;  %v1873_v1 = vadd.f32 %v1800_v5, %v1189_v33  ;;  %v2338_v52 = vrot.slane %v4442_v59, 1 }
 0x1f9   : > { %v3125_v21 = vcombine.low %v2389_v12, %v2389_v12  ;;  %v3126_v4 = vcombine.high %v2389_v12, %v2389_v12  ;;  %v1925_v10 = vadd.f32 %v4356_v49, %v1872_v37 }
 0x1fa   : > { %v2183_v43 = vrot.slane %v2181_v40, 1  ;;  %v1926_v62 = vadd.f32 %v4356_v49, %v1873_v1  ;;  %v4458_v23 = vld [vmem:[#allocation3 + $0x68] sm:$0xf]  ;;  %v4460_v38 = vld [vmem:[#allocation3 + $0x6c] sm:$0xf]  ;;  %v2339_v58 = vsel %vm2306_vm3, %v2336_v8, %v2338_v52 }
 0x1fb   : > { %v2706_v48 = vmax.bf16 %v2664_v53, %v4458_v23  ;;  %v2707_v33 = vmax.bf16 %v2665_v17, %v4460_v38  ;;  %2585 = vst.msk [vmem:[#allocation3 + $0x70] sm:$0xf] %vm2556_vm4, %v3125_v21  ;;  %2586 = vst.msk [vmem:[#allocation3 + $0x74] sm:$0xf] %vm2556_vm4, %v3126_v4  ;;  %v1971_v57 = vmax.f32 %v1925_v10, 0.0  ;;  %v2667_v27 = vmax.bf16 %v4458_v23, %v4396_v3 }
 0x1fc   : > { %v2184_v44 = vsel %vm2052_vm2, %v2179_v46, %v2183_v43  ;;  %v1972_v39 = vmax.f32 %v1926_v62, 0.0 }
 0x1fd   : > { %v1201_v0 = vpop.f32.mrb[124].mxu1  ;;  %v1805_v19 = vpop.f32.mrb[124].mxu0  ;;  %v2274_v56 = vmax.bf16 %v2184_v44, %v4414_v47  ;;  %2745 = vst.msk [vmem:[%s4140_s28 + $0x50] sm:$0xf] %vm2556_vm4, %v2706_v48  ;;  %2746 = vst.msk [vmem:[%s4140_s28 + $0x54] sm:$0xf] %vm2556_vm4, %v2707_v33  ;;  %v2668_v44 = vmax.bf16 %v4460_v38, %v4427_v61 }
 0x1fe   : > { %v1202_v15 = vadd.f32 %v1201_v0, %v4006_v54  ;;  %v1874_v41 = vadd.f32 %v1805_v19, %v1194_v18  ;;  %v1203_v45 = vpop.f32.mrb[125].mxu1  ;;  %v1807_v51 = vpop.f32.mrb[125].mxu0  ;;  %v2185_v47 = vshrl.u32 %v4442_v59, 16  ;;  %v1999_v24 = vpack.c.bf16 %v1972_v39, %v1971_v57 }
 0x1ff   : > { %v4476_v11 = vld [vmem:[#allocation2 + $0x88] sm:$0xff]  ;;  %v1204_v50 = vpop.f32.mrb[126].mxu1  ;;  %v1808_v26 = vpop.f32.mrb[126].mxu0  ;;  %v2390_v20 = vmax.bf16 %v2339_v58, %v2274_v56 }
 0x200   : > { %v2189_v54 = vshll.u32 %v4476_v11, 16  ;;  %v1810_v42 = vpop.f32.mrb[127].mxu0  ;;  %v1206_v60 = vpop.f32.mrb[127].mxu1  ;;  %v1927_v55 = vadd.f32 %v4356_v49, %v1874_v41  ;;  %v1205_v29 = vadd.f32 %v1204_v50, %v4010_v32  ;;  %v1875_v13 = vadd.f32 %v1808_v26, %v1197_v22  ;;  %2023 = vst.msk [vmem:[#allocation2 + $0x90] sm:$0xff] %vm2004_vm1, %v1999_v24 }
 0x201   : > { %v2187_v2 = vor.u32 %v2185_v47, %v2183_v43  ;;  %v3127_v8 = vcombine.low %v2390_v20, %v2390_v20  ;;  %v3128_v63 = vcombine.high %v2390_v20, %v2390_v20  ;;  %v2340_v31 = vrot.slane %v4476_v11, 1 }
 0x202   : > { %v2191_v18 = vrot.slane %v2189_v54, 1  ;;  %v1928_v37 = vadd.f32 %v4356_v49, %v1875_v13  ;;  %v4489_v28 = vld [vmem:[#allocation3 + $0x70] sm:$0xf]  ;;  %v4491_v32 = vld [vmem:[#allocation3 + $0x74] sm:$0xf]  ;;  %v1973_v36 = vmax.f32 %v1927_v55, 0.0 }
 0x203   : > { %2587 = vst.msk [vmem:[#allocation3 + $0x78] sm:$0xf] %vm2556_vm4, %v3127_v8  ;;  %2588 = vst.msk [vmem:[#allocation3 + $0x7c] sm:$0xf] %vm2556_vm4, %v3128_v63  ;;  %v2708_v3 = vmax.bf16 %v2666_v9, %v4489_v28  ;;  %v2709_v5 = vmax.bf16 %v2667_v27, %v4491_v32  ;;  %v2341_v17 = vsel %vm2306_vm3, %v2338_v52, %v2340_v31  ;;  %v4632_v8 = vld [vmem:[#allocation4_spill] sm:$0xff] }
 0x204   : > { %v2192_v25 = vsel %vm2052_vm2, %v2187_v2, %v2191_v18  ;;  %v1974_v35 = vmax.f32 %v1928_v37, 0.0  ;;  %v2669_v0 = vmax.bf16 %v4489_v28, %v4429_v34  ;;  %v2670_v37 = vmax.bf16 %v4491_v32, %v4458_v23 }
 0x205   : > { %v1209_v30 = vpop.f32.mrb[128].mxu1  ;;  %v1813_v40 = vpop.f32.mrb[128].mxu0  ;;  %v2275_v22 = vmax.bf16 %v2192_v25, %v4442_v59  ;;  %2747 = vst.msk [vmem:[%s4140_s28 + $0x58] sm:$0xf] %vm2556_vm4, %v2708_v3  ;;  %2748 = vst.msk [vmem:[%s4140_s28 + $0x5c] sm:$0xf] %vm2556_vm4, %v2709_v5 }
 0x206   : > { %v1210_v16 = vadd.f32 %v1209_v30, %v4014_v14  ;;  %v1876_v53 = vadd.f32 %v1813_v40, %v1202_v15  ;;  %v1211_v12 = vpop.f32.mrb[129].mxu1  ;;  %v1815_v1 = vpop.f32.mrb[129].mxu0  ;;  %v2000_v4 = vpack.c.bf16 %v1974_v35, %v1973_v36  ;;  %v2193_v59 = vshrl.u32 %v4476_v11, 16 }
 0x207   : > { %v1212_v46 = vpop.f32.mrb[130].mxu1  ;;  %v1816_v43 = vpop.f32.mrb[130].mxu0  ;;  %v2391_v21 = vmax.bf16 %v2341_v17, %v2275_v22  ;;  %v4516_v56 = vld [vmem:[#allocation2 + $0x90] sm:$0xff] }
 0x208   : > { %v1213_v10 = vadd.f32 %v1212_v46, %v4018_v6  ;;  %v1818_v14 = vpop.f32.mrb[131].mxu0  ;;  %v1214_v62 = vpop.f32.mrb[131].mxu1  ;;  %v1929_v48 = vadd.f32 %v4356_v49, %v1876_v53  ;;  %v1877_v33 = vadd.f32 %v1816_v43, %v1205_v29  ;;  %2024 = vst.msk [vmem:[#allocation2 + $0x98] sm:$0xff] %vm2004_vm1, %v2000_v4  ;;  %v2197_v61 = vshll.u32 %v4516_v56, 16 }
 0x209   : > { %v3129_v52 = vcombine.low %v2391_v21, %v2391_v21  ;;  %v3130_v19 = vcombine.high %v2391_v21, %v2391_v21  ;;  %v2195_v45 = vor.u32 %v2193_v59, %v2191_v18  ;;  %v2342_v58 = vrot.slane %v4516_v56, 1 }
 0x20a   : > { %v4519_v6 = vld [vmem:[#allocation3 + $0x78] sm:$0xf]  ;;  %v4521_v39 = vld [vmem:[#allocation3 + $0x7c] sm:$0xf]  ;;  %v1930_v15 = vadd.f32 %v4356_v49, %v1877_v33  ;;  %v2199_v51 = vrot.slane %v2197_v61, 1  ;;  %v1975_v57 = vmax.f32 %v1929_v48, 0.0 }
 0x20b   : > { %v2710_v34 = vmax.bf16 %v2668_v44, %v4519_v6  ;;  %v2711_v41 = vmax.bf16 %v2669_v0, %v4521_v39  ;;  %2589 = vst.msk [vmem:[#allocation3 + $0x80] sm:$0xf] %vm2556_vm4, %v3129_v52  ;;  %2590 = vst.msk [vmem:[#allocation3 + $0x84] sm:$0xf] %vm2556_vm4, %v3130_v19  ;;  %v2343_v25 = vsel %vm2306_vm3, %v2340_v31, %v2342_v58 }
 0x20c   : > { %v1976_v50 = vmax.f32 %v1930_v15, 0.0  ;;  %v2200_v24 = vsel %vm2052_vm2, %v2195_v45, %v2199_v51  ;;  %v2671_v5 = vmax.bf16 %v4519_v6, %v4460_v38 }
 0x20d   : > { %v1217_v26 = vpop.f32.mrb[132].mxu1  ;;  %v1821_v47 = vpop.f32.mrb[132].mxu0  ;;  %2749 = vst.msk [vmem:[%s4140_s28 + $0x60] sm:$0xf] %vm2556_vm4, %v2710_v34  ;;  %2750 = vst.msk [vmem:[%s4140_s28 + $0x64] sm:$0xf] %vm2556_vm4, %v2711_v41  ;;  %v2276_v2 = vmax.bf16 %v2200_v24, %v4476_v11 }
 0x20e   : > { %v1218_v20 = vadd.f32 %v1217_v26, %v4022_v7  ;;  %v1878_v54 = vadd.f32 %v1821_v47, %v1210_v16  ;;  %v1219_v42 = vpop.f32.mrb[133].mxu1  ;;  %v1823_v60 = vpop.f32.mrb[133].mxu0  ;;  %v2001_v55 = vpack.c.bf16 %v1976_v50, %v1975_v57  ;;  %v2201_v7 = vshrl.u32 %v4516_v56, 16 }
 0x20f   : > { %v1220_v29 = vpop.f32.mrb[134].mxu1  ;;  %v1824_v13 = vpop.f32.mrb[134].mxu0  ;;  %v2047_v3 = vld [vmem:[#allocation2 + $0x98] sm:$0xff]  ;;  %v2392_v36 = vmax.bf16 %v2343_v25, %v2276_v2  ;;  %v2672_v47 = vmax.bf16 %v4521_v39, %v4489_v28 }
 0x210   : > { %v1221_v63 = vadd.f32 %v1220_v29, %v4632_v8  ;;  %v1879_v18 = vadd.f32 %v1824_v13, %v1213_v10  ;;  %v1826_v9 = vpop.f32.mrb[135].mxu0  ;;  %v1222_v27 = vpop.f32.mrb[135].mxu1  ;;  %2025 = vst.msk [vmem:[#allocation2 + $0xa0] sm:$0xff] %vm2004_vm1, %v2001_v55  ;;  %v2205_v30 = vshll.u32 %v2047_v3, 16  ;;  %v1931_v40 = vadd.f32 %v4356_v49, %v1878_v54 }
 0x211   : > { %v2203_v16 = vor.u32 %v2201_v7, %v2199_v51  ;;  %v3131_v53 = vcombine.low %v2392_v36, %v2392_v36  ;;  %v3132_v12 = vcombine.high %v2392_v36, %v2392_v36  ;;  %v2344_v38 = vrot.slane %v2047_v3, 1 }
 0x212   : > { %v4548_v22 = vld [vmem:[#allocation3 + $0x80] sm:$0xf]  ;;  %v4550_v23 = vld [vmem:[#allocation3 + $0x84] sm:$0xf]  ;;  %v1932_v11 = vadd.f32 %v4356_v49, %v1879_v18  ;;  %v2207_v1 = vrot.slane %v2205_v30, 1  ;;  %v1977_v46 = vmax.f32 %v1931_v40, 0.0 }
 0x213   : > { %v2712_v31 = vmax.bf16 %v2670_v37, %v4548_v22  ;;  %v2713_v35 = vmax.bf16 %v2671_v5, %v4550_v23  ;;  %2591 = vst.msk [vmem:[#allocation3 + $0x88] sm:$0xf] %vm2556_vm4, %v3131_v53  ;;  %2592 = vst.msk [vmem:[#allocation3 + $0x8c] sm:$0xf] %vm2556_vm4, %v3132_v12  ;;  %v2209_v52 = vshrl.u32 %v2047_v3, 16  ;;  %v2345_v19 = vsel %vm2306_vm3, %v2342_v58, %v2344_v38 }
 0x214   : > { %v1978_v43 = vmax.f32 %v1932_v11, 0.0  ;;  %v2208_v10 = vsel %vm2052_vm2, %v2203_v16, %v2207_v1  ;;  %v2673_v58 = vmax.bf16 %v4548_v22, %v4491_v32  ;;  %v2674_v18 = vmax.bf16 %v4550_v23, %v4519_v6 }
 0x215   : > { %v1829_v17 = vpop.f32.mrb[136].mxu0  ;;  %2751 = vst.msk [vmem:[%s4140_s28 + $0x68] sm:$0xf] %vm2556_vm4, %v2712_v31  ;;  %2752 = vst.msk [vmem:[%s4140_s28 + $0x6c] sm:$0xf] %vm2556_vm4, %v2713_v35  ;;  %v2277_v62 = vmax.bf16 %v2208_v10, %v4516_v56  ;;  %v2211_v41 = vor.u32 %v2209_v52, %v2207_v1 }
 0x216   : > { %v1880_v21 = vadd.f32 %v1829_v17, %v1218_v20  ;;  %v1831_v4 = vpop.f32.mrb[137].mxu0  ;;  %v2002_v48 = vpack.c.bf16 %v1978_v43, %v1977_v46 }
 0x217   : > { %v1832_v14 = vpop.f32.mrb[138].mxu0  ;;  %v2048_v44 = vld [vmem:[#allocation2 + $0xa0] sm:$0xff]  ;;  %v2393_v15 = vmax.bf16 %v2345_v19, %v2277_v62 }
 0x218   : > { %v1933_v33 = vadd.f32 %v4356_v49, %v1880_v21  ;;  %v1881_v0 = vadd.f32 %v1832_v14, %v1221_v63  ;;  %v1834_v59 = vpop.f32.mrb[139].mxu0  ;;  %v2213_v61 = vshll.u32 %v2048_v44, 16  ;;  %2026 = vst.msk [vmem:[#allocation2 + $0xa8] sm:$0xff] %vm2004_vm1, %v2002_v48  ;;  %v2346_v51 = vrot.slane %v2048_v44, 1 }
 0x219   : > { %v3133_v57 = vcombine.low %v2393_v15, %v2393_v15  ;;  %v3134_v56 = vcombine.high %v2393_v15, %v2393_v15  ;;  %v2217_v63 = vshrl.u32 %v2048_v44, 16 }
 0x21a   : > { %v1934_v34 = vadd.f32 %v4356_v49, %v1881_v0  ;;  %v2215_v45 = vrot.slane %v2213_v61, 1  ;;  %v1979_v50 = vmax.f32 %v1933_v33, 0.0  ;;  %v4572_v54 = vld [vmem:[#allocation3 + $0x88] sm:$0xf]  ;;  %v4574_v49 = vld [vmem:[#allocation3 + $0x8c] sm:$0xf]  ;;  %v2347_v28 = vsel %vm2306_vm3, %v2344_v38, %v2346_v51 }
 0x21b   : > { %2593 = vst.msk [vmem:[#allocation3 + $0x90] sm:$0xf] %vm2556_vm4, %v3133_v57  ;;  %2594 = vst.msk [vmem:[#allocation3 + $0x94] sm:$0xf] %vm2556_vm4, %v3134_v56  ;;  %v2714_v24 = vmax.bf16 %v2672_v47, %v4572_v54  ;;  %v2715_v55 = vmax.bf16 %v2673_v58, %v4574_v49  ;;  %v2675_v9 = vmax.bf16 %v4572_v54, %v4521_v39 }
 0x21c   : > { %v1980_v26 = vmax.f32 %v1934_v34, 0.0  ;;  %v2216_v20 = vsel %vm2052_vm2, %v2211_v41, %v2215_v45  ;;  %v2219_v25 = vor.u32 %v2217_v63, %v2215_v45  ;;  %v2676_v43 = vmax.bf16 %v4574_v49, %v4548_v22 }
 0x21d   : > { %v2278_v42 = vmax.bf16 %v2216_v20, %v2047_v3  ;;  %2753 = vst.msk [vmem:[%s4140_s28 + $0x70] sm:$0xf] %vm2556_vm4, %v2714_v24  ;;  %2754 = vst.msk [vmem:[%s4140_s28 + $0x74] sm:$0xf] %vm2556_vm4, %v2715_v55 }
 0x21e   : > { %v2003_v60 = vpack.c.bf16 %v1980_v26, %v1979_v50 }
 0x21f   : > { %v2394_v29 = vmax.bf16 %v2347_v28, %v2278_v42  ;;  %v2049_v32 = vld [vmem:[#allocation2 + $0xa8] sm:$0xff] }
 0x220   : > { %2027 = vst.msk [vmem:[#allocation2 + $0xb0] sm:$0xff] %vm2004_vm1, %v2003_v60  ;;  %v2221_v8 = vshll.u32 %v2049_v32, 16  ;;  %v2348_v3 = vrot.slane %v2049_v32, 1  ;;  %v2225_v11 = vshrl.u32 %v2049_v32, 16 }
 0x221   : > { %v3135_v13 = vcombine.low %v2394_v29, %v2394_v29  ;;  %v3136_v2 = vcombine.high %v2394_v29, %v2394_v29 }
 0x222   : > { %v2223_v27 = vrot.slane %v2221_v8, 1  ;;  %v2638_v37 = vld [vmem:[#allocation3 + $0x90] sm:$0xf]  ;;  %v2639_v7 = vld [vmem:[#allocation3 + $0x94] sm:$0xf]  ;;  %v2349_v31 = vsel %vm2306_vm3, %v2346_v51, %v2348_v3 }
 0x223   : > { %2595 = vst.msk [vmem:[#allocation3 + $0x98] sm:$0xf] %vm2556_vm4, %v3135_v13  ;;  %2596 = vst.msk [vmem:[#allocation3 + $0x9c] sm:$0xf] %vm2556_vm4, %v3136_v2  ;;  %v2716_v5 = vmax.bf16 %v2674_v18, %v2638_v37  ;;  %v2717_v36 = vmax.bf16 %v2675_v9, %v2639_v7  ;;  %v2677_v35 = vmax.bf16 %v2638_v37, %v4550_v23 }
 0x224   : > { %v2224_v30 = vsel %vm2052_vm2, %v2219_v25, %v2223_v27  ;;  %v2227_v1 = vor.u32 %v2225_v11, %v2223_v27  ;;  %v2678_v15 = vmax.bf16 %v2639_v7, %v4572_v54 }
 0x225   : > { %2755 = vst.msk [vmem:[%s4140_s28 + $0x78] sm:$0xf] %vm2556_vm4, %v2716_v5  ;;  %2756 = vst.msk [vmem:[%s4140_s28 + $0x7c] sm:$0xf] %vm2556_vm4, %v2717_v36  ;;  %v2279_v6 = vmax.bf16 %v2224_v30, %v2048_v44 }
 0x227   : > { %v2051_v40 = vld [vmem:[#allocation2 + $0xb0] sm:$0x1f]  ;;  %v2395_v16 = vmax.bf16 %v2349_v31, %v2279_v6 }
 0x228   : > { %v2229_v39 = vshll.u32 %v2051_v40, 16  ;;  %v2233_v38 = vshrl.u32 %v2051_v40, 16  ;;  %v2350_v17 = vrot.slane %v2051_v40, 1  ;;  %v2050_v23 = vld [vmem:[#allocation2 + $0xb0] sm:$0xf] }
 0x229   : > { %v3137_v4 = vcombine.low %v2395_v16, %v2395_v16  ;;  %v3138_v10 = vcombine.high %v2395_v16, %v2395_v16 }
 0x22a   : > { %v2231_v53 = vrot.slane %v2229_v39, 1  ;;  %v2641_v12 = vld [vmem:[#allocation3 + $0x9c] sm:$0xf]  ;;  %v2640_v46 = vld [vmem:[#allocation3 + $0x98] sm:$0xf]  ;;  %v2351_v0 = vsel %vm2306_vm3, %v2348_v3, %v2350_v17 }
 0x22b   : > { %v2719_v21 = vmax.bf16 %v2677_v35, %v2641_v12  ;;  %v2718_v44 = vmax.bf16 %v2676_v43, %v2640_v46  ;;  %2597 = vst.msk [vmem:[#allocation3 + $0xa0] sm:$0xf] %vm2556_vm4, %v3137_v4  ;;  %2598 = vst.msk [vmem:[#allocation3 + $0xa4] sm:$0xf] %vm2556_vm4, %v3138_v10  ;;  %v2679_v34 = vmax.bf16 %v2640_v46, %v4574_v49 }
 0x22c   : > { %v2232_v14 = vsel %vm2052_vm2, %v2227_v1, %v2231_v53  ;;  %v2235_v62 = vor.u32 %v2233_v38, %v2231_v53  ;;  %v2680_v56 = vmax.bf16 %v2641_v12, %v2638_v37 }
 0x22d   : > { %2758 = vst.msk [vmem:[%s4140_s28 + $0x84] sm:$0xf] %vm2556_vm4, %v2719_v21  ;;  %v2280_v48 = vmax.bf16 %v2232_v14, %v2049_v32  ;;  %2757 = vst.msk [vmem:[%s4140_s28 + $0x80] sm:$0xf] %vm2556_vm4, %v2718_v44 }
 0x22e   : > { %v2281_v33 = vmax.bf16 %v2235_v62, %v2050_v23 }
 0x22f   : > { %v2396_v22 = vmax.bf16 %v2351_v0, %v2280_v48 }
 0x230   : > { %v2397_v59 = vmax.bf16 %v2350_v17, %v2281_v33 }
 0x231   : > { %v3139_v52 = vcombine.low %v2396_v22, %v2396_v22  ;;  %v3140_v19 = vcombine.high %v2396_v22, %v2396_v22 }
 0x232   : > { %v3141_v61 = vcombine.low %v2397_v59, %v2397_v59  ;;  %v2642_v41 = vld [vmem:[#allocation3 + $0xa0] sm:$0xf]  ;;  %v2643_v45 = vld [vmem:[#allocation3 + $0xa4] sm:$0xf] }
 0x233   : > { %2599 = vst.msk [vmem:[#allocation3 + $0xa8] sm:$0xf] %vm2556_vm4, %v3139_v52  ;;  %2600 = vst.msk [vmem:[#allocation3 + $0xac] sm:$0xf] %vm2556_vm4, %v3140_v19  ;;  %v2720_v51 = vmax.bf16 %v2678_v15, %v2642_v41  ;;  %v2721_v57 = vmax.bf16 %v2679_v34, %v2643_v45  ;;  %v2681_v50 = vmax.bf16 %v2642_v41, %v2639_v7 }
 0x234   : > { %2601 = vst.msk [vmem:[#allocation3 + $0xb0] sm:$0xf] %vm2556_vm4, %v3141_v61  ;;  %v2682_v26 = vmax.bf16 %v2643_v45, %v2640_v46 }
 0x235   : > { %2759 = vst.msk [vmem:[%s4140_s28 + $0x88] sm:$0xf] %vm2556_vm4, %v2720_v51  ;;  %2760 = vst.msk [vmem:[%s4140_s28 + $0x8c] sm:$0xf] %vm2556_vm4, %v2721_v57 }
 0x23a   : > { %v2683_v47 = vld [vmem:[#allocation3 + $0xa8] sm:$0xf]  ;;  %v2684_v58 = vld [vmem:[#allocation3 + $0xac] sm:$0xf] }
 0x23b   : > { %v2685_v20 = vld [vmem:[#allocation3 + $0xb0] sm:$0xf]  ;;  %v2722_v54 = vmax.bf16 %v2683_v47, %v2680_v56  ;;  %v2723_v49 = vmax.bf16 %v2684_v58, %v2681_v50 }
 0x23c   : > { %v2724_v42 = vmax.bf16 %v2685_v20, %v2682_v26 }
 0x23d   : > { %2761 = vst.msk [vmem:[%s4140_s28 + $0x90] sm:$0xf] %vm2556_vm4, %v2722_v54  ;;  %2762 = vst.msk [vmem:[%s4140_s28 + $0x94] sm:$0xf] %vm2556_vm4, %v2723_v49 }
 0x23e   : > { %2763 = vst.msk [vmem:[%s4140_s28 + $0x98] sm:$0xf] %vm2556_vm4, %v2724_v42 }
 0x23f PF: > { %s13_s12 = sadd.s32 1, %s3307_s12  }
 0x240   : > { %p10_p4 = scmp.ge.s32.totalorder %s13_s12, 4  }
 0x242   :  { %12 = sbr.rel (!%p10_p4) target bundleno = 1 (0x1), region = 64 }

// kernel: finetune_net_forward.7
= control target key start
LH: loop header
LB: loop body
LE: loop exit
PB: predicated region body
PF: predicated region fallthrough
CT: control target
= control target key end

     0   :  { %s5288_s12 = smov 0   ;;  %s6982_s0 = inlined_call_operand.vmem [shape: bf16[2,184,320], index: 0, kind: input, shape index: {}]   ;;  %s6983_s1 = inlined_call_operand.vmem [shape: bf16[5,320,192], index: 1, kind: input, shape index: {}]   ;;  %s6984_s2 = inlined_call_operand.vmem [shape: f32[1,192], index: 2, kind: input, shape index: {}]   ;;  %s6985_s3 = inlined_call_operand.vmem [shape: bf16[2,80,192], index: 3, kind: output, shape index: {}]  }
   0x1 LB: > { %s3978_s13 = sadd.s32 4294967295, %s5265_s12   ;;  %p3982_p0 = scmp.ge.s32.totalorder %s5265_s12, 1  ;;  %s5265_s12 = sphi %s5288_s12, %s13_s12  }
   0x2   : > { %p137_p1 = scmp.lt.s32.totalorder %s5265_s12, 3 }
   0x4   : > { %p138_p2 = pnand %p3982_p0, %p137_p1 }
   0x6   : > { %141 = sbr.rel (%p138_p2) target bundleno = 643 (0x283), region = 32 }
   0xd   : > { %v4839_v0 = vld [vmem:[%s6983_s1 + $0x144] ss:$8 sps:$4 sm:$0xff]   ;;  %p161_p3 = scmp.lt.s32.totalorder %s3978_s13, 1  ;;  %v5267_v2 = vmov 0   ;;  %v4843_v3 = vld [vmem:[%s6983_s1 + $0x140] ss:$8 sps:$4 sm:$0xff]  }
   0xe   : > { %v4841_v1 = vld [vmem:[%s6983_s1 + $0x104] ss:$8 sps:$4 sm:$0xff]   ;;  %1218 = vmatprep.mubr.bf16.mxu0 %v5267_v2  ;;  %627 = vmatprep.subr.bf16.mxu1 %v4839_v0  ;;  %v4844_v4 = vld [vmem:[%s6983_s1 + $0x100] ss:$8 sps:$4 sm:$0xff]   ;;  %v4845_v5 = vld [vmem:[%s6983_s1 + $0x154] ss:$8 sps:$4 sm:$0xff]  }
   0xf   : > { %s6995_s13 = smov (!%p161_p3, %s3978_s13), 1  ;;  %1186 = vmatprep.subr.bf16.mxu0 %v4841_v1  ;;  %628 = vmatpush1.bf16.msra.mxu1 %v4843_v3  ;;  %v4847_v6 = vld [vmem:[%s6983_s1 + $0x114] ss:$8 sps:$4 sm:$0xff]   ;;  %v4849_v7 = vld [vmem:[%s6983_s1 + $0x150] ss:$8 sps:$4 sm:$0xff]   ;;  %vm602_vm0 = vcmask 523264  }
  0x10   : > { %1187 = vmatpush1.bf16.msra.mxu0 %v4844_v4  ;;  %629 = vmatprep.subr.bf16.mxu1 %v4845_v5  ;;  %v4850_v8 = vld [vmem:[%s6983_s1 + $0x110] ss:$8 sps:$4 sm:$0xff]   ;;  %v4851_v9 = vld [vmem:[%s6983_s1 + $0x164] ss:$8 sps:$4 sm:$0xff]   ;;  %s4828_s5 = smul.u32 276, %s6995_s13  ;;  %vm3447_vm1 = vcmask 1043456  }
  0x11   : > { %1188 = vmatprep.subr.bf16.mxu0 %v4847_v6  ;;  %v4853_v10 = vld [vmem:[%s6983_s1 + $0x124] ss:$8 sps:$4 sm:$0xff]   ;;  %v4855_v11 = vld [vmem:[%s6983_s1 + $0x160] ss:$8 sps:$4 sm:$0xff]   ;;  %v4857_v13 = vld [vmem:[%s6983_s1 + $0x174] ss:$8 sps:$4 sm:$0xff]  }
  0x12   : > { %v4856_v12 = vld [vmem:[%s6983_s1 + $0x120] ss:$8 sps:$4 sm:$0xff]   ;;  %v4859_v14 = vld [vmem:[%s6983_s1 + $0x134] ss:$8 sps:$4 sm:$0xff]   ;;  %s5345_s20 = scalar_lea.vmem %s6982_s0, %s4828_s5  ;;  %v4861_v15 = vld [vmem:[%s6983_s1 + $0x170] ss:$8 sps:$4 sm:$0xff]  }
  0x13   : > { %630 = vmatpush1.bf16.msra.mxu1 %v4849_v7  ;;  %v4862_v16 = vld [vmem:[%s6983_s1 + $0x130] ss:$8 sps:$4 sm:$0xff]   ;;  %v4863_v17 = vld [vmem:[%s6983_s1 + $0x184] ss:$8 sps:$4 sm:$0xff]   ;;  %v4865_v19 = vld [vmem:[%s5345_s20 + $0x8] ss:$12 sps:$4 sm:$0xff]  }
  0x14   : > { %1189 = vmatpush1.bf16.msra.mxu0 %v4850_v8  ;;  %631 = vmatprep.subr.bf16.mxu1 %v4851_v9  ;;  %v4869_v18 = vld [vmem:[%s6983_s1 + $0x384] ss:$8 sps:$4 sm:$0xff]   ;;  %v4866_v20 = vld [vmem:[%s6983_s1 + $0x180] ss:$8 sps:$4 sm:$0xff]   ;;  %v4870_v22 = vld [vmem:[%s6983_s1 + $0x194] ss:$8 sps:$4 sm:$0xff]  }
  0x15   : > { %1190 = vmatprep.subr.bf16.mxu0 %v4853_v10  ;;  %v4867_v21 = vld [vmem:[%s6983_s1 + $0x380] ss:$8 sps:$4 sm:$0xff]   ;;  %v4872_v23 = vld [vmem:[%s6983_s1 + $0x190] ss:$8 sps:$4 sm:$0xff]   ;;  %v4873_v24 = vld [vmem:[%s6983_s1 + $0x1a4] ss:$8 sps:$4 sm:$0xff]  }
  0x16   : > { %v4884_v25 = vld [vmem:[%s6983_s1 + $0x390] ss:$8 sps:$4 sm:$0xff]   ;;  %v4886_v26 = vld [vmem:[%s6983_s1 + $0x394] ss:$8 sps:$4 sm:$0xff]   ;;  %v5384_v27 = vld [vmem:[%s5345_s20 + $0x20] ss:$12 sps:$4 sm:$0xff]  }
  0x17   : > { %632 = vmatpush1.bf16.msra.mxu1 %v4855_v11  ;;  %v4876_v28 = vld [vmem:[%s6983_s1 + $0x1a0] ss:$8 sps:$4 sm:$0xff]   ;;  %v4877_v29 = vld [vmem:[%s6983_s1 + $0x1b4] ss:$8 sps:$4 sm:$0xff]   ;;  %v4879_v30 = vld [vmem:[%s6983_s1 + $0x1b0] ss:$8 sps:$4 sm:$0xff]  }
  0x18   : > { %1191 = vmatpush1.bf16.msra.mxu0 %v4856_v12  ;;  %633 = vmatprep.subr.bf16.mxu1 %v4857_v13  ;;  %v4880_v31 = vld [vmem:[%s6983_s1 + $0x1c4] ss:$8 sps:$4 sm:$0xff]   ;;  %v4901_v33 = vld [vmem:[%s6983_s1 + $0x3a0] ss:$8 sps:$4 sm:$0xff]   ;;  %v4887_v36 = vld [vmem:[%s6983_s1 + $0x1d4] ss:$8 sps:$4 sm:$0xff]  }
  0x19   : > { %1192 = vmatprep.subr.bf16.mxu0 %v4859_v14  ;;  %v5402_v32 = vld [vmem:[%s5345_s20 + $0x38] ss:$12 sps:$4 sm:$0xff]   ;;  %v4883_v35 = vld [vmem:[%s6983_s1 + $0x1c0] ss:$8 sps:$4 sm:$0xff]   ;;  %v5427_v40 = vld [vmem:[%s5345_s20 + $0x50] ss:$12 sps:$4 sm:$0xff]  }
  0x1a   : > { %v4903_v34 = vld [vmem:[%s6983_s1 + $0x3a4] ss:$8 sps:$4 sm:$0xff]   ;;  %v4889_v37 = vld [vmem:[%s6983_s1 + $0x1d0] ss:$8 sps:$4 sm:$0xff]   ;;  %v4916_v39 = vld [vmem:[%s5345_s20 + $0x1c] ss:$12 sps:$4 sm:$0xff]  }
  0x1b   : > { %634 = vmatpush1.bf16.msra.mxu1 %v4861_v15  ;;  %v4890_v38 = vld [vmem:[%s6983_s1 + $0x1e4] ss:$8 sps:$4 sm:$0xff]   ;;  %v4893_v41 = vld [vmem:[%s6983_s1 + $0x1e0] ss:$8 sps:$4 sm:$0xff]   ;;  %659 = vmatprep.mubr.bf16.mxu1 %v4916_v39  ;;  %v4894_v42 = vld [vmem:[%s6983_s1 + $0x1f4] ss:$8 sps:$4 sm:$0xff]  }
  0x1c   : > { %1193 = vmatpush1.bf16.msra.mxu0 %v4862_v16  ;;  %635 = vmatprep.subr.bf16.mxu1 %v4863_v17  ;;  %v4921_v43 = vld [vmem:[%s6983_s1 + $0x3b0] ss:$8 sps:$4 sm:$0xff]   ;;  %v4923_v44 = vld [vmem:[%s6983_s1 + $0x3b4] ss:$8 sps:$4 sm:$0xff]   ;;  %v4897_v46 = vld [vmem:[%s6983_s1 + $0x204] ss:$8 sps:$4 sm:$0xff]  }
  0x1d   : > { %1818 = vmatprep.subr.bf16.mxu0 %v4869_v18  ;;  %v4896_v45 = vld [vmem:[%s6983_s1 + $0x1f0] ss:$8 sps:$4 sm:$0xff]   ;;  %v5451_v47 = vld [vmem:[%s5345_s20 + $0x68] ss:$12 sps:$4 sm:$0xff]   ;;  %v4937_v49 = vld [vmem:[%s6983_s1 + $0x3c4] ss:$8 sps:$4 sm:$0xff]  }
  0x1e   : > { %v4900_v48 = vld [vmem:[%s6983_s1 + $0x200] ss:$8 sps:$4 sm:$0xff]   ;;  %v4904_v50 = vld [vmem:[%s6983_s1 + $0x214] ss:$8 sps:$4 sm:$0xff]   ;;  %v4906_v51 = vld [vmem:[%s6983_s1 + $0x210] ss:$8 sps:$4 sm:$0xff]  }
  0x1f   : > { %4143 = vmatmul.mubr.msk.bf16.vlgmr.msra.gmra.mrb[0].mxu0 %vm602_vm0, %v4865_v19  ;;  %636 = vmatpush1.bf16.msra.mxu1 %v4866_v20  ;;  %v4907_v52 = vld [vmem:[%s6983_s1 + $0x224] ss:$8 sps:$4 sm:$0xff]   ;;  %v4910_v54 = vld [vmem:[%s6983_s1 + $0x220] ss:$8 sps:$4 sm:$0xff]   ;;  %v4911_v55 = vld [vmem:[%s6983_s1 + $0x234] ss:$8 sps:$4 sm:$0xff]  }
  0x20   : > { %1819 = vmatpush1.bf16.msra.mxu0 %v4867_v21  ;;  %637 = vmatprep.subr.bf16.mxu1 %v4870_v22  ;;  %v5472_v53 = vld [vmem:[%s5345_s20 + $0x80] ss:$12 sps:$4 sm:$0xff]   ;;  %v4913_v56 = vld [vmem:[%s6983_s1 + $0x230] ss:$8 sps:$4 sm:$0xff]   ;;  %v4933_v62 = vld [vmem:[%s6983_s1 + $0x254] ss:$8 sps:$4 sm:$0xff]  }
  0x21   : > { %1228 = vmatprep.mubr.bf16.mxu0 %v5267_v2  ;;  %1820 = vmatprep.subr.bf16.mxu0 %v4886_v26  ;;  %v4919_v57 = vld [vmem:[%s6983_s1 + $0x244] ss:$8 sps:$4 sm:$0xff]   ;;  %v4917_v60 = vld [vmem:[%s6983_s1 + $0x240] ss:$8 sps:$4 sm:$0xff]   ;;  %v5508_v63 = vld [vmem:[%s5345_s20 + $0xb0] sm:$0xf] }
  0x22   : > { %v5490_v58 = vld [vmem:[%s5345_s20 + $0x18] ss:$12 sps:$4 sm:$0xff]   ;;  %v5499_v61 = vld [vmem:[%s5345_s20 + $0x34] ss:$12 sps:$4 sm:$0xff]   ;;  %v5519_v3 = vld [vmem:[%s5345_s20 + $0x30] ss:$12 sps:$4 sm:$0xff]   ;;  %v4102_v4 = vcombine.low %v5508_v63, %v5508_v63 }
  0x23   : > { %638 = vmatpush1.bf16.msra.mxu1 %v4872_v23  ;;  %v5493_v59 = vld [vmem:[%s5345_s20 + $0x98] ss:$12 sps:$4 sm:$0xff]   ;;  %v4954_v6 = vld [vmem:[%s6983_s1 + $0x260] ss:$8 sps:$4 sm:$0xff]   ;;  %v4978_v7 = vld [vmem:[%s6983_s1 + $0x274] ss:$8 sps:$4 sm:$0xff]  }
  0x24   : > { %639 = vmatprep.subr.bf16.mxu1 %v4873_v24  ;;  %1821 = vmatpush1.bf16.msra.mxu0 %v4884_v25  ;;  %v4931_v0 = vld [vmem:[%s6983_s1 + $0x250] ss:$8 sps:$4 sm:$0xff]   ;;  %v4956_v1 = vld [vmem:[%s6983_s1 + $0x264] ss:$8 sps:$4 sm:$0xff]   ;;  %v5537_v8 = vld [vmem:[%s5345_s20 + $0x48] ss:$12 sps:$4 sm:$0xff]  }
  0x25   : > { %1822 = vmatprep.subr.bf16.mxu0 %v4903_v34  ;;  %v5524_v5 = vld [vmem:[%s5345_s20 + $0x4c] ss:$12 sps:$4 sm:$0xff]   ;;  %v4935_v12 = vld [vmem:[%s6983_s1 + $0x3c0] ss:$8 sps:$4 sm:$0xff]   ;;  %v5550_v13 = vld [vmem:[%s5345_s20 + $0x64] ss:$12 sps:$4 sm:$0xff]  }
  0x26   : > { %v4976_v9 = vld [vmem:[%s6983_s1 + $0x270] ss:$8 sps:$4 sm:$0xff]   ;;  %v4997_v10 = vld [vmem:[%s6983_s1 + $0x4] ss:$8 sps:$4 sm:$0xff]   ;;  %v4940_v14 = vld [vmem:[%s6983_s1 + $0x3d4] ss:$8 sps:$4 sm:$0xff]  }
  0x27   : > { %4144 = vmatmul.mubr.msk.bf16.gmra.mrb[4].mxu0 %vm602_vm0, %v5384_v27  ;;  %640 = vmatpush1.bf16.msra.mxu1 %v4876_v28  ;;  %v4934_v11 = vld [vmem:[%s5345_s20 + $0x38] ss:$12 sps:$4 sm:$0xff]   ;;  %v5566_v17 = vld [vmem:[%s5345_s20 + $0x60] ss:$12 sps:$4 sm:$0xff]   ;;  %v4944_v18 = vld [vmem:[%s5345_s20 + $0x50] ss:$12 sps:$4 sm:$0xff]  }
  0x28   : > { %1238 = vmatprep.mubr.bf16.mxu0 %v5267_v2  ;;  %641 = vmatprep.subr.bf16.mxu1 %v4877_v29  ;;  %v4938_v15 = vld [vmem:[%s6983_s1 + $0x3d0] ss:$8 sps:$4 sm:$0xff]   ;;  %v4947_v16 = vld [vmem:[%s6983_s1 + $0x3e4] ss:$8 sps:$4 sm:$0xff]   ;;  %v4945_v19 = vld [vmem:[%s6983_s1 + $0x3e0] ss:$8 sps:$4 sm:$0xff]  }
  0x29   : > { %1823 = vmatpush1.bf16.msra.mxu0 %v4901_v33  ;;  %v5573_v20 = vld [vmem:[%s5345_s20 + $0x7c] ss:$12 sps:$4 sm:$0xff]   ;;  %v4948_v22 = vld [vmem:[%s6983_s1 + $0x3f0] ss:$8 sps:$4 sm:$0xff]   ;;  %v4960_v23 = vld [vmem:[%s6983_s1 + $0x404] ss:$8 sps:$4 sm:$0xff]  }
  0x2a   : > { %1824 = vmatprep.subr.bf16.mxu0 %v4923_v44  ;;  %v4950_v21 = vld [vmem:[%s6983_s1 + $0x3f4] ss:$8 sps:$4 sm:$0xff]   ;;  %v5589_v24 = vld [vmem:[%s5345_s20 + $0x78] ss:$12 sps:$4 sm:$0xff]   ;;  %v4958_v26 = vld [vmem:[%s6983_s1 + $0x400] ss:$8 sps:$4 sm:$0xff]  }
  0x2b   : > { %642 = vmatpush1.bf16.msra.mxu1 %v4879_v30  ;;  %v4957_v25 = vld [vmem:[%s5345_s20 + $0x68] ss:$12 sps:$4 sm:$0xff]   ;;  %v4961_v30 = vld [vmem:[%s6983_s1 + $0x410] ss:$8 sps:$4 sm:$0xff]   ;;  %vm3448_vm2 = vcmask 523268   ;;  %vm3671_vm7 = vcmask 1042432  }
  0x2c   : > { %643 = vmatprep.subr.bf16.mxu1 %v4880_v31  ;;  %v5596_v28 = vld [vmem:[%s5345_s20 + $0x94] ss:$12 sps:$4 sm:$0xff]   ;;  %v4970_v31 = vld [vmem:[%s6983_s1 + $0x424] ss:$8 sps:$4 sm:$0xff]   ;;  %vm6611_vm3 = vmor %vm3448_vm2, %vm3447_vm1  ;;  %vm3480_vm4 = vsmask.f32 3328 }
  0x2d   : > { %1825 = vmatpush1.bf16.msra.mxu0 %v4921_v43  ;;  %v4963_v29 = vld [vmem:[%s6983_s1 + $0x414] ss:$8 sps:$4 sm:$0xff]   ;;  %v5611_v33 = vld [vmem:[%s5345_s20 + $0xa8] sm:$0xff]  ;;  %v244_v43 = vld [vmem:[%s5345_s20 + $0xc0] sm:$0xff]  ;;  %vm3481_vm5 = vsmask.f32 7440 }
  0x2e   : > { %2369 = vmatprep.subr.bf16.mxu0 %v4937_v49  ;;  %v242_v34 = vld [vmem:[%s5345_s20 + $0xb4] sm:$0xff]  ;;  %vm6666_vm6 = vmor %vm3480_vm4, %vm3481_vm5  ;;  %vm3672_vm8 = vcmask 1046532   ;;  %s4829_s15 = smul.u32 80, %s6995_s13 }
  0x2f   : > { %4145 = vmatmul.mubr.msk.bf16.gmra.mrb[8].mxu0 %vm602_vm0, %v5402_v32  ;;  %644 = vmatpush1.bf16.msra.mxu1 %v4883_v35  ;;  %v5616_v35 = vld [vmem:[%s5345_s20 + $0x90] ss:$12 sps:$4 sm:$0xff]   ;;  %v4043_v44 = vcombine.low %v5611_v33, %v242_v34  ;;  %vm6681_vm9 = vmor %vm3671_vm7, %vm3672_vm8 }
  0x30   : > { %1248 = vmatprep.mubr.bf16.mxu0 %v5267_v2  ;;  %645 = vmatprep.subr.bf16.mxu1 %v4887_v36  ;;  %v4967_v36 = vld [vmem:[%s5345_s20 + $0x80] ss:$12 sps:$4 sm:$0xff]   ;;  %v4973_v39 = vld [vmem:[%s6983_s1 + $0x434] ss:$8 sps:$4 sm:$0xff]   ;;  %s6858_s17 = scalar_lea.vmem %s6985_s3, %s4829_s15 }
  0x31   : > { %v4985_v49 = vld [vmem:[%s6983_s1 + $0x454] ss:$8 sps:$4 sm:$0xff]  }
  0x33   : > { %646 = vmatpush1.bf16.msra.mxu1 %v4889_v37  ;;  %v4968_v37 = vld [vmem:[%s6983_s1 + $0x420] ss:$8 sps:$4 sm:$0xff]  }
  0x34   : > { %647 = vmatprep.subr.bf16.mxu1 %v4890_v38  ;;  %v4044_v38 = vcombine.high %v5611_v33, %v242_v34  ;;  %v5030_v34 = vld [vmem:[%s6983_s1 + $0x60] ss:$8 sps:$4 sm:$0xff]  }
  0x37   : > { %4146 = vmatmul.mubr.msk.bf16.gmra.mrb[12].mxu0 %vm602_vm0, %v5427_v40  ;;  %648 = vmatpush1.bf16.msra.mxu1 %v4893_v41  ;;  %v4971_v41 = vld [vmem:[%s6983_s1 + $0x430] ss:$8 sps:$4 sm:$0xff]  }
  0x38   : > { %1258 = vmatprep.mubr.bf16.mxu0 %v5267_v2  ;;  %649 = vmatprep.subr.bf16.mxu1 %v4894_v42  ;;  %v4982_v42 = vld [vmem:[%s6983_s1 + $0x444] ss:$8 sps:$4 sm:$0xff]  }
  0x3b   : > { %650 = vmatpush1.bf16.msra.mxu1 %v4896_v45  ;;  %v4979_v45 = vld [vmem:[%s5345_s20 + $0x98] ss:$12 sps:$4 sm:$0xff]  }
  0x3c   : > { %651 = vmatprep.subr.bf16.mxu1 %v4897_v46  ;;  %v4980_v46 = vld [vmem:[%s6983_s1 + $0x440] ss:$8 sps:$4 sm:$0xff]  }
  0x3f   : > { %4147 = vmatmul.mubr.msk.bf16.gmra.mrb[16].mxu0 %vm602_vm0, %v5451_v47  ;;  %652 = vmatpush1.bf16.msra.mxu1 %v4900_v48  ;;  %v4047_v48 = vcombine.high %v244_v43, %v244_v43 }
  0x40   : > { %1268 = vmatprep.mubr.bf16.mxu0 %v5267_v2  ;;  %653 = vmatprep.subr.bf16.mxu1 %v4904_v50  ;;  %v4983_v50 = vld [vmem:[%s6983_s1 + $0x450] ss:$8 sps:$4 sm:$0xff]  }
  0x43   : > { %654 = vmatpush1.bf16.msra.mxu1 %v4906_v51  ;;  %v4991_v51 = vld [vmem:[%s6983_s1 + $0x464] ss:$8 sps:$4 sm:$0xff]  }
  0x44   : > { %655 = vmatprep.subr.bf16.mxu1 %v4907_v52  ;;  %v4046_v52 = vcombine.low %v244_v43, %v244_v43  ;;  %v5047_v43 = vld [vmem:[%s6983_s1 + $0x94] ss:$8 sps:$4 sm:$0xff]  }
  0x47   : > { %4148 = vmatmul.mubr.msk.bf16.gmra.mrb[20].mxu0 %vm602_vm0, %v5472_v53  ;;  %656 = vmatpush1.bf16.msra.mxu1 %v4910_v54  ;;  %v4988_v54 = vld [vmem:[%s5345_s20 + $0xb0] ss:$12 sps:$4 sm:$0xff]  }
  0x48   : > { %1278 = vmatprep.mubr.bf16.mxu0 %v5267_v2  ;;  %657 = vmatprep.subr.bf16.mxu1 %v4911_v55  ;;  %v4989_v55 = vld [vmem:[%s6983_s1 + $0x460] ss:$8 sps:$4 sm:$0xff]  }
  0x4b   : > { %658 = vmatpush1.bf16.msra.mxu1 %v4913_v56  ;;  %v4994_v56 = vld [vmem:[%s6983_s1 + $0x474] ss:$8 sps:$4 sm:$0xff]  }
  0x4c   : > { %738 = vmatprep.subr.bf16.mxu1 %v4919_v57  ;;  %v4992_v57 = vld [vmem:[%s6983_s1 + $0x470] ss:$8 sps:$4 sm:$0xff]  }
  0x4e   : > { %660 = vmatmul.mubr.bf16.vlgmr.msra.gmra.mrb[0].mxu1 %v5490_v58 }
  0x4f   : > { %4149 = vmatmul.mubr.msk.bf16.gmra.mrb[24].mxu0 %vm602_vm0, %v5493_v59  ;;  %739 = vmatpush1.bf16.msra.mxu1 %v4917_v60  ;;  %v5001_v60 = vld [vmem:[%s6983_s1 + $0x484] ss:$8 sps:$4 sm:$0xff]  }
  0x50   : > { %669 = vmatprep.mubr.bf16.mxu1 %v5499_v61  ;;  %1288 = vmatprep.mubr.bf16.mxu0 %v5267_v2 }
  0x51   : > { %740 = vmatprep.subr.bf16.mxu1 %v4933_v62  ;;  %v4995_v62 = vld [vmem:[%s6983_s1] ss:$8 sps:$4 sm:$0xff]  }
  0x53   : > { %741 = vmatpush1.bf16.msra.mxu1 %v4931_v0  ;;  %v4998_v0 = vld [vmem:[%s5345_s20 + $0xc8] ss:$12 sps:$4 sm:$0xff]  }
  0x54   : > { %742 = vmatprep.subr.bf16.mxu1 %v4956_v1  ;;  %v4999_v1 = vld [vmem:[%s6983_s1 + $0x480] ss:$8 sps:$4 sm:$0xff]  }
  0x56   : > { %670 = vmatmul.mubr.bf16.gmra.mrb[4].mxu1 %v5519_v3 }
  0x57   : > { %4150 = vmatmul.mubr.msk.bf16.gmra.mrb[28].mxu0 %vm602_vm0, %v4102_v4  ;;  %679 = vmatprep.mubr.bf16.mxu1 %v5524_v5  ;;  %v5004_v4 = vld [vmem:[%s6983_s1 + $0x14] ss:$8 sps:$4 sm:$0xff]  }
  0x58   : > { %1850 = vmatprep.mubr.bf16.mxu0 %v5267_v2  ;;  %743 = vmatpush1.bf16.msra.mxu1 %v4954_v6  ;;  %v5007_v6 = vld [vmem:[%s6983_s1 + $0x494] ss:$8 sps:$4 sm:$0xff]  }
  0x59   : > { %744 = vmatprep.subr.bf16.mxu1 %v4978_v7  ;;  %v5002_v7 = vld [vmem:[%s6983_s1 + $0x10] ss:$8 sps:$4 sm:$0xff]  }
  0x5c   : > { %745 = vmatpush1.bf16.msra.mxu1 %v4976_v9  ;;  %v5690_v9 = vld [vmem:[%s6983_s1 + $0x490] ss:$8 sps:$4 sm:$0xff]  }
  0x5d   : > { %1075 = vmatprep.subr.bf16.mxu1 %v4997_v10  ;;  %v5010_v10 = vld [vmem:[%s6983_s1 + $0x24] ss:$8 sps:$4 sm:$0xff]  }
  0x5e   : > { %680 = vmatmul.mubr.bf16.gmra.mrb[8].mxu1 %v5537_v8 }
  0x5f   : > { %4255 = vmatmul.mubr.msk.bf16.vlgmr.msra.gmra.mrb[32].mxu0 %vm602_vm0, %v4934_v11  ;;  %689 = vmatprep.mubr.bf16.mxu1 %v5550_v13  ;;  %v5008_v11 = vld [vmem:[%s6983_s1 + $0x20] ss:$8 sps:$4 sm:$0xff]  }
  0x60   : > { %2370 = vmatpush1.bf16.msra.mxu0 %v4935_v12  ;;  %1860 = vmatprep.mubr.bf16.mxu0 %v5267_v2  ;;  %v5011_v12 = vld [vmem:[%s5345_s20 + $0xe0] ss:$0 sps:$4 sm:$0xff]  }
  0x61   : > { %2371 = vmatprep.subr.bf16.mxu0 %v4940_v14  ;;  %v5710_v14 = vld [vmem:[%s6983_s1 + $0x4a0] ss:$8 sps:$4 sm:$0xff]  }
  0x64   : > { %2372 = vmatpush1.bf16.msra.mxu0 %v4938_v15  ;;  %v5017_v15 = vld [vmem:[%s6983_s1 + $0x34] ss:$8 sps:$4 sm:$0xff]  }
  0x65   : > { %2373 = vmatprep.subr.bf16.mxu0 %v4947_v16  ;;  %v5719_v16 = vld [vmem:[%s6983_s1 + $0x4b4] ss:$8 sps:$4 sm:$0xff]  }
  0x66   : > { %690 = vmatmul.mubr.bf16.gmra.mrb[12].mxu1 %v5566_v17 }
  0x67   : > { %4256 = vmatmul.mubr.msk.bf16.gmra.mrb[36].mxu0 %vm602_vm0, %v4944_v18  ;;  %699 = vmatprep.mubr.bf16.mxu1 %v5573_v20  ;;  %v5015_v18 = vld [vmem:[%s6983_s1 + $0x30] ss:$8 sps:$4 sm:$0xff]  }
  0x68   : > { %2374 = vmatpush1.bf16.msra.mxu0 %v4945_v19  ;;  %1870 = vmatprep.mubr.bf16.mxu0 %v5267_v2  ;;  %v5731_v19 = vld [vmem:[%s6983_s1 + $0x4b0] ss:$8 sps:$4 sm:$0xff]  }
  0x69   : > { %2375 = vmatprep.subr.bf16.mxu0 %v4950_v21  ;;  %v5026_v21 = vld [vmem:[%s6983_s1 + $0x4c4] ss:$8 sps:$4 sm:$0xff]  }
  0x6c   : > { %2376 = vmatpush1.bf16.msra.mxu0 %v4948_v22  ;;  %v5021_v22 = vld [vmem:[%s6983_s1 + $0x40] ss:$8 sps:$4 sm:$0xff]  }
  0x6d   : > { %2377 = vmatprep.subr.bf16.mxu0 %v4960_v23  ;;  %v5024_v23 = vld [vmem:[%s6983_s1 + $0x4c0] ss:$8 sps:$4 sm:$0xff]  }
  0x6e   : > { %700 = vmatmul.mubr.bf16.gmra.mrb[16].mxu1 %v5589_v24 }
  0x6f   : > { %4257 = vmatmul.mubr.msk.bf16.gmra.mrb[40].mxu0 %vm602_vm0, %v4957_v25  ;;  %709 = vmatprep.mubr.bf16.mxu1 %v5596_v28  ;;  %v5029_v25 = vld [vmem:[%s6983_s1 + $0x54] ss:$8 sps:$4 sm:$0xff]  }
  0x70   : > { %2378 = vmatpush1.bf16.msra.mxu0 %v4958_v26  ;;  %1880 = vmatprep.mubr.bf16.mxu0 %v5267_v2  ;;  %v5035_v26 = vld [vmem:[%s6983_s1 + $0x4d4] ss:$8 sps:$4 sm:$0xff]  }
  0x71   : > { %2379 = vmatprep.subr.bf16.mxu0 %v4963_v29  ;;  %v5027_v29 = vld [vmem:[%s6983_s1 + $0x50] ss:$8 sps:$4 sm:$0xff]  }
  0x74   : > { %2380 = vmatpush1.bf16.msra.mxu0 %v4961_v30  ;;  %v5033_v30 = vld [vmem:[%s6983_s1 + $0x4d0] ss:$8 sps:$4 sm:$0xff]  }
  0x75   : > { %2381 = vmatprep.subr.bf16.mxu0 %v4970_v31  ;;  %v5032_v31 = vld [vmem:[%s6983_s1 + $0x64] ss:$8 sps:$4 sm:$0xff]  }
  0x76   : > { %710 = vmatmul.mubr.bf16.gmra.mrb[20].mxu1 %v5616_v35 }
  0x77   : > { %4258 = vmatmul.mubr.msk.bf16.gmra.mrb[44].mxu0 %vm602_vm0, %v4967_v36  ;;  %719 = vmatprep.mubr.bf16.mxu1 %v4044_v38  ;;  %v5038_v36 = vld [vmem:[%s6983_s1 + $0x74] ss:$8 sps:$4 sm:$0xff]  }
  0x78   : > { %2382 = vmatpush1.bf16.msra.mxu0 %v4968_v37  ;;  %1890 = vmatprep.mubr.bf16.mxu0 %v5267_v2  ;;  %v5039_v37 = vld [vmem:[%s6983_s1 + $0x4e0] ss:$8 sps:$4 sm:$0xff]   ;;  %v5050_v38 = vld [vmem:[%s6983_s1 + $0x4f4] ss:$8 sps:$4 sm:$0xff]  }
  0x79   : > { %2383 = vmatprep.subr.bf16.mxu0 %v4973_v39  ;;  %v5036_v39 = vld [vmem:[%s6983_s1 + $0x70] ss:$8 sps:$4 sm:$0xff]  }
  0x7c   : > { %2384 = vmatpush1.bf16.msra.mxu0 %v4971_v41  ;;  %v5048_v41 = vld [vmem:[%s6983_s1 + $0x4f0] ss:$8 sps:$4 sm:$0xff]  }
  0x7d   : > { %2385 = vmatprep.subr.bf16.mxu0 %v4982_v42  ;;  %v5042_v42 = vld [vmem:[%s6983_s1 + $0x80] ss:$8 sps:$4 sm:$0xff]  }
  0x7e   : > { %720 = vmatmul.mubr.bf16.gmra.mrb[24].mxu1 %v4043_v44  ;;  %v5057_v44 = vld [vmem:[%s6983_s1 + $0x504] ss:$8 sps:$4 sm:$0xff]  }
  0x7f   : > { %4259 = vmatmul.mubr.msk.bf16.gmra.mrb[48].mxu0 %vm602_vm0, %v4979_v45  ;;  %729 = vmatprep.mubr.bf16.mxu1 %v4047_v48  ;;  %v5045_v45 = vld [vmem:[%s6983_s1 + $0x90] ss:$8 sps:$4 sm:$0xff]  }
  0x80   : > { %2386 = vmatpush1.bf16.msra.mxu0 %v4980_v46  ;;  %1900 = vmatprep.mubr.bf16.mxu0 %v5267_v2  ;;  %v5053_v46 = vld [vmem:[%s6983_s1 + $0xa4] ss:$8 sps:$4 sm:$0xff]   ;;  %v5054_v48 = vld [vmem:[%s5345_s20 + $0x50] ss:$12 sps:$4 sm:$0xff]  }
  0x81   : > { %2387 = vmatprep.subr.bf16.mxu0 %v4985_v49  ;;  %v5055_v49 = vld [vmem:[%s6983_s1 + $0x500] ss:$8 sps:$4 sm:$0xff]  }
  0x84   : > { %2388 = vmatpush1.bf16.msra.mxu0 %v4983_v50  ;;  %v5060_v50 = vld [vmem:[%s6983_s1 + $0xb4] ss:$8 sps:$4 sm:$0xff]  }
  0x85   : > { %2389 = vmatprep.subr.bf16.mxu0 %v4991_v51  ;;  %v5063_v51 = vld [vmem:[%s6983_s1 + $0x514] ss:$8 sps:$4 sm:$0xff]  }
  0x86   : > { %730 = vmatmul.mubr.bf16.gmra.mrb[28].mxu1 %v4046_v52  ;;  %v5058_v52 = vld [vmem:[%s6983_s1 + $0xb0] ss:$8 sps:$4 sm:$0xff]  }
  0x87   : > { %4260 = vmatmul.mubr.msk.bf16.gmra.mrb[52].mxu0 %vm602_vm0, %v4988_v54  ;;  %770 = vmatprep.mubr.bf16.mxu1 %v5267_v2  ;;  %v5061_v54 = vld [vmem:[%s6983_s1 + $0x510] ss:$8 sps:$4 sm:$0xff]  }
  0x88   : > { %2390 = vmatpush1.bf16.msra.mxu0 %v4989_v55  ;;  %1910 = vmatprep.mubr.bf16.mxu0 %v5267_v2  ;;  %v243_v55 = vld [vmem:[%s5345_s20 + $0xbc] sm:$0xf] }
  0x89   : > { %2391 = vmatprep.subr.bf16.mxu0 %v4994_v56  ;;  %v5067_v56 = vld [vmem:[%s6983_s1 + $0xc4] ss:$8 sps:$4 sm:$0xff]  }
  0x8c   : > { %2392 = vmatpush1.bf16.msra.mxu0 %v4992_v57  ;;  %v5071_v57 = vld [vmem:[%s6983_s1 + $0x524] ss:$8 sps:$4 sm:$0xff]  }
  0x8d   : > { %2393 = vmatprep.subr.bf16.mxu0 %v5001_v60  ;;  %v5068_v60 = vld [vmem:[%s5345_s20 + $0x68] ss:$12 sps:$4 sm:$0xff]  }
  0x8e   : > { %4089 = vmatmul.mubr.msk.bf16.vlgmr.msra.gmra.mrb[0].mxu1 %vm602_vm0, %v5384_v27  ;;  %v5698_v27 = vld [vmem:[%s6983_s1 + $0x4a4] ss:$8 sps:$4 sm:$0xff]  }
  0x8f   : > { %4261 = vmatmul.mubr.msk.bf16.gmra.mrb[56].mxu0 %vm602_vm0, %v4998_v0  ;;  %1076 = vmatpush1.bf16.msra.mxu1 %v4995_v62  ;;  %v5065_v62 = vld [vmem:[%s6983_s1 + $0xc0] ss:$8 sps:$4 sm:$0xff]  }
  0x90   : > { %2394 = vmatpush1.bf16.msra.mxu0 %v4999_v1  ;;  %1077 = vmatprep.subr.bf16.mxu1 %v5004_v4  ;;  %v5069_v0 = vld [vmem:[%s6983_s1 + $0x520] ss:$8 sps:$4 sm:$0xff]   ;;  %v5074_v1 = vld [vmem:[%s6983_s1 + $0xd4] ss:$8 sps:$4 sm:$0xff]   ;;  %v5072_v4 = vld [vmem:[%s6983_s1 + $0xd0] ss:$8 sps:$4 sm:$0xff]  }
  0x91   : > { %2395 = vmatprep.subr.bf16.mxu0 %v5007_v6  ;;  %780 = vmatprep.mubr.bf16.mxu1 %v5267_v2  ;;  %v5075_v6 = vld [vmem:[%s6983_s1 + $0x530] ss:$8 sps:$4 sm:$0xff]  }
  0x92   : > { %1920 = vmatprep.mubr.bf16.mxu0 %v5267_v2 }
  0x93   : > { %1078 = vmatpush1.bf16.msra.mxu1 %v5002_v7  ;;  %v5081_v7 = vld [vmem:[%s6983_s1 + $0xe4] ss:$8 sps:$4 sm:$0xff]  }
  0x94   : > { %2396 = vmatpush1.bf16.msra.mxu0 %v5690_v9  ;;  %1079 = vmatprep.subr.bf16.mxu1 %v5010_v10  ;;  %v5085_v10 = vld [vmem:[%s6983_s1 + $0x544] ss:$8 sps:$4 sm:$0xff]  }
  0x95   : > { %2397 = vmatprep.subr.bf16.mxu0 %v5698_v27 }
  0x96   : > { %4090 = vmatmul.mubr.msk.bf16.gmra.mrb[4].mxu1 %vm602_vm0, %v5402_v32  ;;  %v5023_v32 = vld [vmem:[%s6983_s1 + $0x44] ss:$8 sps:$4 sm:$0xff]  }
  0x97   : > { %4262 = vmatmul.mubr.msk.bf16.gmra.mrb[60].mxu0 %vm602_vm0, %v5011_v12  ;;  %1080 = vmatpush1.bf16.msra.mxu1 %v5008_v11  ;;  %v5078_v11 = vld [vmem:[%s5345_s20 + $0xc8] ss:$0 sps:$4 sm:$0xff]   ;;  %v5082_v12 = vld [vmem:[%s5345_s20 + $0x80] ss:$12 sps:$4 sm:$0xff]  }
  0x98   : > { %2398 = vmatpush1.bf16.msra.mxu0 %v5710_v14  ;;  %1081 = vmatprep.subr.bf16.mxu1 %v5017_v15  ;;  %v5079_v15 = vld [vmem:[%s6983_s1 + $0xe0] ss:$8 sps:$4 sm:$0xff]  }
  0x99   : > { %2399 = vmatprep.subr.bf16.mxu0 %v5719_v16  ;;  %790 = vmatprep.mubr.bf16.mxu1 %v5267_v2 }
  0x9a   : > { %2401 = vmatprep.mubr.bf16.mxu0 %v5524_v5 }
  0x9b   : > { %1082 = vmatpush1.bf16.msra.mxu1 %v5015_v18  ;;  %v5083_v18 = vld [vmem:[%s6983_s1 + $0x540] ss:$8 sps:$4 sm:$0xff]  }
  0x9c   : > { %2400 = vmatpush1.bf16.msra.mxu0 %v5731_v19  ;;  %1083 = vmatprep.subr.bf16.mxu1 %v5023_v32  ;;  %v5088_v32 = vld [vmem:[%s6983_s1 + $0xf4] ss:$8 sps:$4 sm:$0xff]  }
  0x9d   : > { %2480 = vmatprep.subr.bf16.mxu0 %v5026_v21  ;;  %v5091_v21 = vld [vmem:[%s6983_s1 + $0x554] ss:$8 sps:$4 sm:$0xff]  }
  0x9e   : > { %4091 = vmatmul.mubr.msk.bf16.gmra.mrb[8].mxu1 %vm602_vm0, %v5427_v40  ;;  %v5041_v40 = vld [vmem:[%s6983_s1 + $0x4e4] ss:$8 sps:$4 sm:$0xff]  }
  0x9f   : > { %2402 = vmatmul.mubr.bf16.vlgmr.msra.gmra.mrb[32].mxu0 %v5537_v8  ;;  %1084 = vmatpush1.bf16.msra.mxu1 %v5021_v22  ;;  %v5094_v22 = vld [vmem:[%s5345_s20 + $0x4] ss:$12 sps:$4 sm:$0xff]  }
  0xa0   : > { %2481 = vmatpush1.bf16.msra.mxu0 %v5024_v23  ;;  %1085 = vmatprep.subr.bf16.mxu1 %v5029_v25  ;;  %v5086_v23 = vld [vmem:[%s6983_s1 + $0xf0] ss:$8 sps:$4 sm:$0xff]  }
  0xa1   : > { %800 = vmatprep.mubr.bf16.mxu1 %v5267_v2  ;;  %2411 = vmatprep.mubr.bf16.mxu0 %v5550_v13  ;;  %v5089_v25 = vld [vmem:[%s6983_s1 + $0x550] ss:$8 sps:$4 sm:$0xff]  }
  0xa2   : > { %2482 = vmatprep.subr.bf16.mxu0 %v5035_v26  ;;  %v5097_v26 = vld [vmem:[%s6983_s1 + $0x284] ss:$8 sps:$4 sm:$0xff]  }
  0xa3   : > { %1086 = vmatpush1.bf16.msra.mxu1 %v5027_v29  ;;  %v5101_v29 = vld [vmem:[%s6983_s1 + $0x564] ss:$8 sps:$4 sm:$0xff]  }
  0xa4   : > { %2483 = vmatpush1.bf16.msra.mxu0 %v5033_v30  ;;  %1087 = vmatprep.subr.bf16.mxu1 %v5032_v31  ;;  %v5092_v30 = vld [vmem:[%s5345_s20] ss:$12 sps:$4 sm:$0xff]   ;;  %v5098_v31 = vld [vmem:[%s5345_s20 + $0x98] ss:$12 sps:$4 sm:$0xff]  }
  0xa5   : > { %2484 = vmatprep.subr.bf16.mxu0 %v5041_v40  ;;  %v5095_v40 = vld [vmem:[%s6983_s1 + $0x280] ss:$8 sps:$4 sm:$0xff]  }
  0xa6   : > { %4092 = vmatmul.mubr.msk.bf16.gmra.mrb[12].mxu1 %vm602_vm0, %v5451_v47  ;;  %v5044_v47 = vld [vmem:[%s6983_s1 + $0x84] ss:$8 sps:$4 sm:$0xff]  }
  0xa7   : > { %2412 = vmatmul.mubr.bf16.gmra.mrb[36].mxu0 %v5566_v17  ;;  %1088 = vmatpush1.bf16.msra.mxu1 %v5030_v34  ;;  %v5099_v34 = vld [vmem:[%s6983_s1 + $0x560] ss:$8 sps:$4 sm:$0xff]  }
  0xa8   : > { %810 = vmatprep.mubr.bf16.mxu1 %v5267_v2  ;;  %1089 = vmatprep.subr.bf16.mxu1 %v5038_v36  ;;  %v5104_v36 = vld [vmem:[%s6983_s1 + $0x294] ss:$8 sps:$4 sm:$0xff]  }
  0xa9   : > { %2421 = vmatprep.mubr.bf16.mxu0 %v5573_v20  ;;  %2485 = vmatpush1.bf16.msra.mxu0 %v5039_v37  ;;  %v5107_v37 = vld [vmem:[%s6983_s1 + $0x574] ss:$8 sps:$4 sm:$0xff]  }
  0xaa   : > { %2486 = vmatprep.subr.bf16.mxu0 %v5050_v38  ;;  %v5102_v38 = vld [vmem:[%s6983_s1 + $0x290] ss:$8 sps:$4 sm:$0xff]  }
  0xab   : > { %1090 = vmatpush1.bf16.msra.mxu1 %v5036_v39  ;;  %v5105_v39 = vld [vmem:[%s6983_s1 + $0x570] ss:$8 sps:$4 sm:$0xff]  }
  0xac   : > { %1091 = vmatprep.subr.bf16.mxu1 %v5044_v47  ;;  %v5110_v47 = vld [vmem:[%s6983_s1 + $0x2a4] ss:$8 sps:$4 sm:$0xff]  }
  0xad   : > { %2487 = vmatpush1.bf16.msra.mxu0 %v5048_v41  ;;  %v5114_v41 = vld [vmem:[%s6983_s1 + $0x584] ss:$8 sps:$4 sm:$0xff]  }
  0xae   : > { %4093 = vmatmul.mubr.msk.bf16.gmra.mrb[16].mxu1 %vm602_vm0, %v5472_v53  ;;  %3031 = vmatprep.subr.bf16.mxu0 %v5057_v44  ;;  %v5051_v53 = vld [vmem:[%s6983_s1 + $0xa0] ss:$8 sps:$4 sm:$0xff]  }
  0xaf   : > { %2422 = vmatmul.mubr.bf16.gmra.mrb[40].mxu0 %v5589_v24  ;;  %1092 = vmatpush1.bf16.msra.mxu1 %v5042_v42  ;;  %v5231_v42 = vld [vmem:[%s5345_s20 + $0x1c] ss:$12 sps:$4 sm:$0xff]  }
  0xb0   : > { %820 = vmatprep.mubr.bf16.mxu1 %v5267_v2  ;;  %1093 = vmatprep.subr.bf16.mxu1 %v5047_v43  ;;  %v5111_v43 = vld [vmem:[%s5345_s20 + $0xb0] ss:$12 sps:$4 sm:$0xff]   ;;  %v5108_v44 = vld [vmem:[%s6983_s1 + $0x2a0] ss:$8 sps:$4 sm:$0xff]  }
  0xb1   : > { %2512 = vmatprep.mubr.bf16.mxu0 %v5267_v2 }
  0xb3   : > { %1094 = vmatpush1.bf16.msra.mxu1 %v5045_v45  ;;  %v5112_v45 = vld [vmem:[%s6983_s1 + $0x580] ss:$8 sps:$4 sm:$0xff]  }
  0xb4   : > { %1095 = vmatprep.subr.bf16.mxu1 %v5053_v46  ;;  %v5117_v46 = vld [vmem:[%s6983_s1 + $0x2b4] ss:$8 sps:$4 sm:$0xff]  }
  0xb6   : > { %4094 = vmatmul.mubr.msk.bf16.gmra.mrb[20].mxu1 %vm602_vm0, %v5493_v59  ;;  %v4045_v59 = vcombine.low %v5508_v63, %v243_v55  ;;  %v5077_v63 = vld [vmem:[%s6983_s1 + $0x534] ss:$8 sps:$4 sm:$0xff]  }
  0xb7   : > { %4367 = vmatmul.mubr.msk.bf16.vlgmr.msra.gmra.mrb[32].mxu0 %vm602_vm0, %v5054_v48  ;;  %1096 = vmatpush1.bf16.msra.mxu1 %v5051_v53  ;;  %v5120_v48 = vld [vmem:[%s6983_s1 + $0x594] ss:$8 sps:$4 sm:$0xff]   ;;  %v5115_v53 = vld [vmem:[%s6983_s1 + $0x2b0] ss:$8 sps:$4 sm:$0xff]  }
  0xb8   : > { %3032 = vmatpush1.bf16.msra.mxu0 %v5055_v49  ;;  %1097 = vmatprep.subr.bf16.mxu1 %v5060_v50  ;;  %v5118_v49 = vld [vmem:[%s6983_s1 + $0x590] ss:$8 sps:$4 sm:$0xff]   ;;  %v5123_v50 = vld [vmem:[%s6983_s1 + $0x2c4] ss:$8 sps:$4 sm:$0xff]   ;;  %v5133_v55 = vld [vmem:[%s6983_s1 + $0x5b4] ss:$8 sps:$4 sm:$0xff]  }
  0xb9   : > { %3033 = vmatprep.subr.bf16.mxu0 %v5063_v51  ;;  %830 = vmatprep.mubr.bf16.mxu1 %v5267_v2  ;;  %v5124_v51 = vld [vmem:[%s5345_s20 + $0xc8] ss:$12 sps:$4 sm:$0xff]  }
  0xba   : > { %2522 = vmatprep.mubr.bf16.mxu0 %v5267_v2 }
  0xbb   : > { %1098 = vmatpush1.bf16.msra.mxu1 %v5058_v52  ;;  %v5121_v52 = vld [vmem:[%s6983_s1 + $0x2c0] ss:$8 sps:$4 sm:$0xff]  }
  0xbc   : > { %3034 = vmatpush1.bf16.msra.mxu0 %v5061_v54  ;;  %1099 = vmatprep.subr.bf16.mxu1 %v5067_v56  ;;  %v5125_v54 = vld [vmem:[%s6983_s1 + $0x5a0] ss:$8 sps:$4 sm:$0xff]   ;;  %v5128_v56 = vld [vmem:[%s6983_s1 + $0x2d0] ss:$8 sps:$4 sm:$0xff]  }
  0xbd   : > { %3035 = vmatprep.subr.bf16.mxu0 %v5071_v57  ;;  %v5131_v57 = vld [vmem:[%s6983_s1 + $0x5b0] ss:$8 sps:$4 sm:$0xff]  }
  0xbe   : > { %4095 = vmatmul.mubr.msk.bf16.gmra.mrb[24].mxu1 %vm602_vm0, %v4045_v59  ;;  %v5136_v59 = vld [vmem:[%s6983_s1 + $0x2e4] ss:$8 sps:$4 sm:$0xff]  }
  0xbf   : > { %4368 = vmatmul.mubr.msk.bf16.gmra.mrb[36].mxu0 %vm602_vm0, %v5068_v60  ;;  %1100 = vmatpush1.bf16.msra.mxu1 %v5065_v62  ;;  %v5137_v60 = vld [vmem:[%s5345_s20 + $0xe0] ss:$12 sps:$4 sm:$0xff]  }
  0xc0   : > { %3036 = vmatpush1.bf16.msra.mxu0 %v5069_v0  ;;  %1101 = vmatprep.subr.bf16.mxu1 %v5074_v1  ;;  %v5134_v62 = vld [vmem:[%s6983_s1 + $0x2e0] ss:$8 sps:$4 sm:$0xff]   ;;  %v5146_v1 = vld [vmem:[%s6983_s1 + $0x5d4] ss:$8 sps:$4 sm:$0xff]  }
  0xc1   : > { %3037 = vmatprep.subr.bf16.mxu0 %v5077_v63  ;;  %840 = vmatprep.mubr.bf16.mxu1 %v5267_v2  ;;  %v5138_v0 = vld [vmem:[%s6983_s1 + $0x5c0] ss:$8 sps:$4 sm:$0xff]   ;;  %v5141_v63 = vld [vmem:[%s6983_s1 + $0x2f0] ss:$8 sps:$4 sm:$0xff]  }
  0xc2   : > { %2532 = vmatprep.mubr.bf16.mxu0 %v5267_v2 }
  0xc3   : > { %1102 = vmatpush1.bf16.msra.mxu1 %v5072_v4  ;;  %v5144_v4 = vld [vmem:[%s6983_s1 + $0x5d0] ss:$8 sps:$4 sm:$0xff]  }
  0xc4   : > { %3038 = vmatpush1.bf16.msra.mxu0 %v5075_v6  ;;  %1103 = vmatprep.subr.bf16.mxu1 %v5081_v7  ;;  %v5149_v6 = vld [vmem:[%s6983_s1 + $0x304] ss:$8 sps:$4 sm:$0xff]   ;;  %v5150_v7 = vld [vmem:[%s5345_s20 + $0xf8] ss:$0 sps:$4 sm:$0xff]  }
  0xc5   : > { %3039 = vmatprep.subr.bf16.mxu0 %v5085_v10  ;;  %v5147_v10 = vld [vmem:[%s6983_s1 + $0x300] ss:$8 sps:$4 sm:$0xff]  }
  0xc6   : > { %4096 = vmatmul.mubr.msk.bf16.gmra.mrb[32].mxu1 %vm602_vm0, %v5078_v11  ;;  %v5151_v11 = vld [vmem:[%s6983_s1 + $0x5e0] ss:$8 sps:$4 sm:$0xff]  }
  0xc7   : > { %4369 = vmatmul.mubr.msk.bf16.gmra.mrb[40].mxu0 %vm602_vm0, %v5082_v12  ;;  %1104 = vmatpush1.bf16.msra.mxu1 %v5079_v15  ;;  %v5156_v12 = vld [vmem:[%s6983_s1 + $0x314] ss:$8 sps:$4 sm:$0xff]   ;;  %v6039_v15 = vld [vmem:[%s5345_s20 + $0x64] ss:$12 sps:$4 sm:$0xff]  }
  0xc8   : > { %3040 = vmatpush1.bf16.msra.mxu0 %v5083_v18  ;;  %1105 = vmatprep.subr.bf16.mxu1 %v5088_v32  ;;  %v5154_v18 = vld [vmem:[%s6983_s1 + $0x310] ss:$8 sps:$4 sm:$0xff]  }
  0xc9   : > { %3041 = vmatprep.subr.bf16.mxu0 %v5091_v21  ;;  %1107 = vmatprep.mubr.bf16.mxu1 %v5094_v22  ;;  %v5157_v32 = vld [vmem:[%s6983_s1 + $0x5f0] ss:$8 sps:$4 sm:$0xff]   ;;  %v5165_v21 = vld [vmem:[%s6983_s1 + $0x324] ss:$8 sps:$4 sm:$0xff]  }
  0xca   : > { %2542 = vmatprep.mubr.bf16.mxu0 %v5267_v2 }
  0xcb   : > { %1106 = vmatpush1.bf16.msra.mxu1 %v5086_v23 }
  0xcc   : > { %3042 = vmatpush1.bf16.msra.mxu0 %v5089_v25  ;;  %1707 = vmatprep.subr.bf16.mxu1 %v5097_v26  ;;  %v6062_v25 = vld [vmem:[%s5345_s20 + $0x60] ss:$12 sps:$4 sm:$0xff]  }
  0xcd   : > { %3043 = vmatprep.subr.bf16.mxu0 %v5101_v29  ;;  %v5163_v29 = vld [vmem:[%s6983_s1 + $0x320] ss:$8 sps:$4 sm:$0xff]  }
  0xce   : > { %1108 = vmatmul.mubr.bf16.vlgmr.msra.gmra.mrb[0].mxu1 %v5092_v30  ;;  %v5166_v30 = vld [vmem:[%s6983_s1 + $0x600] ss:$8 sps:$4 sm:$0xff]  }
  0xcf   : > { %4370 = vmatmul.mubr.msk.bf16.gmra.mrb[64].mxu0 %vm602_vm0, %v5098_v31  ;;  %1708 = vmatpush1.bf16.msra.mxu1 %v5095_v40  ;;  %v6078_v40 = vld [vmem:[%s5345_s20 + $0x7c] ss:$12 sps:$4 sm:$0xff]  }
  0xd0   : > { %3044 = vmatpush1.bf16.msra.mxu0 %v5099_v34  ;;  %1709 = vmatprep.subr.bf16.mxu1 %v5104_v36  ;;  %v5191_v34 = vld [vmem:[%s6983_s1 + $0x614] ss:$8 sps:$4 sm:$0xff]   ;;  %v5169_v36 = vld [vmem:[%s6983_s1 + $0x330] ss:$8 sps:$4 sm:$0xff]  }
  0xd1   : > { %3045 = vmatprep.subr.bf16.mxu0 %v5107_v37  ;;  %1117 = vmatprep.mubr.bf16.mxu1 %v5231_v42  ;;  %v5189_v37 = vld [vmem:[%s6983_s1 + $0x610] ss:$8 sps:$4 sm:$0xff]  }
  0xd2   : > { %2552 = vmatprep.mubr.bf16.mxu0 %v5267_v2 }
  0xd3   : > { %1710 = vmatpush1.bf16.msra.mxu1 %v5102_v38  ;;  %v5209_v38 = vld [vmem:[%s6983_s1 + $0x624] ss:$8 sps:$4 sm:$0xff]  }
  0xd4   : > { %3046 = vmatpush1.bf16.msra.mxu0 %v5105_v39  ;;  %1711 = vmatprep.subr.bf16.mxu1 %v5110_v47 }
  0xd5   : > { %3047 = vmatprep.subr.bf16.mxu0 %v5114_v41  ;;  %v6104_v41 = vld [vmem:[%s5345_s20 + $0x78] ss:$12 sps:$4 sm:$0xff]  }
  0xd6   : > { %1118 = vmatmul.mubr.bf16.gmra.mrb[4].mxu1 %v5490_v58  ;;  %v5127_v58 = vld [vmem:[%s6983_s1 + $0x5a4] ss:$8 sps:$4 sm:$0xff]  }
  0xd7   : > { %4371 = vmatmul.mubr.msk.bf16.gmra.mrb[68].mxu0 %vm602_vm0, %v5111_v43  ;;  %1712 = vmatpush1.bf16.msra.mxu1 %v5108_v44  ;;  %v4101_v43 = vcombine.high %v5611_v33, %v5611_v33 }
  0xd8   : > { %3048 = vmatpush1.bf16.msra.mxu0 %v5112_v45  ;;  %1713 = vmatprep.subr.bf16.mxu1 %v5117_v46  ;;  %v5180_v45 = vld [vmem:[%s6983_s1 + $0x354] ss:$8 sps:$4 sm:$0xff]  }
  0xd9   : > { %3049 = vmatprep.subr.bf16.mxu0 %v5120_v48  ;;  %1127 = vmatprep.mubr.bf16.mxu1 %v5499_v61  ;;  %v5130_v61 = vld [vmem:[%s6983_s1 + $0x2d4] ss:$8 sps:$4 sm:$0xff]   ;;  %v5207_v48 = vld [vmem:[%s6983_s1 + $0x620] ss:$8 sps:$4 sm:$0xff]  }
  0xda   : > { %2562 = vmatprep.mubr.bf16.mxu0 %v5267_v2  ;;  %v6119_v46 = vld [vmem:[%s5345_s20 + $0x94] ss:$12 sps:$4 sm:$0xff]  }
  0xdb   : > { %1714 = vmatpush1.bf16.msra.mxu1 %v5115_v53  ;;  %v5216_v53 = vld [vmem:[%s6983_s1 + $0x634] ss:$8 sps:$4 sm:$0xff]  }
  0xdc   : > { %3050 = vmatpush1.bf16.msra.mxu0 %v5118_v49  ;;  %1715 = vmatprep.subr.bf16.mxu1 %v5123_v50  ;;  %v5178_v49 = vld [vmem:[%s6983_s1 + $0x350] ss:$8 sps:$4 sm:$0xff]  }
  0xdd   : > { %3051 = vmatprep.subr.bf16.mxu0 %v5127_v58  ;;  %v5214_v58 = vld [vmem:[%s6983_s1 + $0x630] ss:$8 sps:$4 sm:$0xff]  }
  0xde   : > { %1128 = vmatmul.mubr.bf16.gmra.mrb[8].mxu1 %v5519_v3  ;;  %v5140_v3 = vld [vmem:[%s6983_s1 + $0x5c4] ss:$8 sps:$4 sm:$0xff]  }
  0xdf   : > { %4372 = vmatmul.mubr.msk.bf16.gmra.mrb[72].mxu0 %vm602_vm0, %v5124_v51  ;;  %1716 = vmatpush1.bf16.msra.mxu1 %v5121_v52  ;;  %v4100_v52 = vcombine.low %v5611_v33, %v5611_v33  ;;  %v5194_v33 = vld [vmem:[%s6983_s1 + $0x374] ss:$8 sps:$4 sm:$0xff]  }
  0xe0   : > { %3052 = vmatpush1.bf16.msra.mxu0 %v5125_v54  ;;  %1717 = vmatprep.subr.bf16.mxu1 %v5130_v61  ;;  %v6146_v54 = vld [vmem:[%s5345_s20 + $0x90] ss:$12 sps:$4 sm:$0xff]  }
  0xe1   : > { %3053 = vmatprep.subr.bf16.mxu0 %v5133_v55  ;;  %1137 = vmatprep.mubr.bf16.mxu1 %v5524_v5  ;;  %v5143_v5 = vld [vmem:[%s6983_s1 + $0x2f4] ss:$8 sps:$4 sm:$0xff]   ;;  %v5185_v55 = vld [vmem:[%s6983_s1 + $0x360] ss:$8 sps:$4 sm:$0xff]  }
  0xe2   : > { %2572 = vmatprep.mubr.bf16.mxu0 %v5267_v2 }
  0xe3   : > { %1718 = vmatpush1.bf16.msra.mxu1 %v5128_v56  ;;  %v5197_v56 = vld [vmem:[%s5345_s20 + $0x34] ss:$12 sps:$4 sm:$0xff]  }
  0xe4   : > { %3054 = vmatpush1.bf16.msra.mxu0 %v5131_v57  ;;  %1719 = vmatprep.subr.bf16.mxu1 %v5136_v59  ;;  %v6160_v59 = vld [vmem:[%s5345_s20 + $0xac] ss:$12 sps:$4 sm:$0xff]  }
  0xe5   : > { %3055 = vmatprep.subr.bf16.mxu0 %v5140_v3  ;;  %v5192_v3 = vld [vmem:[%s6983_s1 + $0x370] ss:$8 sps:$4 sm:$0xff]  }
  0xe6   : > { %1138 = vmatmul.mubr.bf16.gmra.mrb[12].mxu1 %v5537_v8  ;;  %v5153_v8 = vld [vmem:[%s6983_s1 + $0x5e4] ss:$8 sps:$4 sm:$0xff]  }
  0xe7   : > { %4373 = vmatmul.mubr.msk.bf16.gmra.mrb[76].mxu0 %vm602_vm0, %v5137_v60  ;;  %1720 = vmatpush1.bf16.msra.mxu1 %v5134_v62 }
  0xe8   : > { %3056 = vmatpush1.bf16.msra.mxu0 %v5138_v0  ;;  %1721 = vmatprep.subr.bf16.mxu1 %v5143_v5  ;;  %v5195_v0 = vld [vmem:[%s5345_s20 + $0x30] ss:$12 sps:$4 sm:$0xff]   ;;  %v6173_v5 = vld [vmem:[%s5345_s20 + $0xa8] ss:$12 sps:$4 sm:$0xff]  }
  0xe9   : > { %3057 = vmatprep.subr.bf16.mxu0 %v5146_v1  ;;  %1147 = vmatprep.mubr.bf16.mxu1 %v5550_v13  ;;  %v5159_v13 = vld [vmem:[%s6983_s1 + $0x5f4] ss:$8 sps:$4 sm:$0xff]  }
  0xea   : > { %2582 = vmatprep.mubr.bf16.mxu0 %v5267_v2 }
  0xeb   : > { %1722 = vmatpush1.bf16.msra.mxu1 %v5141_v63  ;;  %v5201_v63 = vld [vmem:[%s5345_s20 + $0x4c] ss:$12 sps:$4 sm:$0xff]  }
  0xec   : > { %3058 = vmatpush1.bf16.msra.mxu0 %v5144_v4  ;;  %1723 = vmatprep.subr.bf16.mxu1 %v5149_v6  ;;  %v5232_v6 = vld [vmem:[%s6983_s1 + $0x3c4] ss:$8 sps:$4 sm:$0xff]  }
  0xed   : > { %3059 = vmatprep.subr.bf16.mxu0 %v5153_v8  ;;  %v6184_v8 = vld [vmem:[%s5345_s20 + $0xc4] ss:$12 sps:$4 sm:$0xff]  }
  0xee   : > { %1148 = vmatmul.mubr.bf16.gmra.mrb[16].mxu1 %v5566_v17  ;;  %v5168_v17 = vld [vmem:[%s6983_s1 + $0x604] ss:$8 sps:$4 sm:$0xff]  }
  0xef   : > { %4374 = vmatmul.mubr.msk.bf16.gmra.mrb[80].mxu0 %vm602_vm0, %v5150_v7  ;;  %1724 = vmatpush1.bf16.msra.mxu1 %v5147_v10  ;;  %v5233_v7 = vld [vmem:[%s6983_s1 + $0x3c0] ss:$8 sps:$4 sm:$0xff]   ;;  %v5234_v10 = vld [vmem:[%s6983_s1 + $0x3d4] ss:$8 sps:$4 sm:$0xff]  }
  0xf0   : > { %3060 = vmatpush1.bf16.msra.mxu0 %v5151_v11  ;;  %1725 = vmatprep.subr.bf16.mxu1 %v5156_v12  ;;  %v6197_v12 = vld [vmem:[%s5345_s20 + $0xd8] sm:$0xff] }
  0xf1   : > { %3061 = vmatprep.subr.bf16.mxu0 %v5159_v13  ;;  %1157 = vmatprep.mubr.bf16.mxu1 %v5573_v20  ;;  %v5171_v20 = vld [vmem:[%s6983_s1 + $0x334] ss:$8 sps:$4 sm:$0xff]   ;;  %v2643_v13 = vld [vmem:[%s5345_s20 + $0xe4] sm:$0xff] }
  0xf2   : > { %v6055_v22 = vpop.f32.mrb[0].mxu0  ;;  %3063 = vmatprep.mubr.bf16.mxu0 %v6039_v15 }
  0xf3   : > { %v6059_v23 = vpop.f32.mrb[1].mxu0  ;;  %1726 = vmatpush1.bf16.msra.mxu1 %v5154_v18 }
  0xf4   : > { %v6064_v26 = vpop.f32.mrb[2].mxu0  ;;  %3062 = vmatpush1.bf16.msra.mxu0 %v5157_v32  ;;  %1727 = vmatprep.subr.bf16.mxu1 %v5165_v21  ;;  %v5205_v32 = vld [vmem:[%s5345_s20 + $0x48] ss:$12 sps:$4 sm:$0xff]   ;;  %v6204_v21 = vld [vmem:[%s5345_s20 + $0xc0] ss:$12 sps:$4 sm:$0xff]  }
  0xf5   : > { %v6072_v31 = vpop.f32.mrb[3].mxu0  ;;  %3142 = vmatprep.subr.bf16.mxu0 %v5168_v17 }
  0xf6   : > { %1158 = vmatmul.mubr.bf16.gmra.mrb[20].mxu1 %v5589_v24  ;;  %v5176_v24 = vld [vmem:[%s6983_s1 + $0x344] ss:$8 sps:$4 sm:$0xff]  }
  0xf7   : > { %3064 = vmatmul.mubr.bf16.vlgmr.msra.gmra.mrb[32].mxu0 %v6062_v25  ;;  %1728 = vmatpush1.bf16.msra.mxu1 %v5163_v29  ;;  %v5235_v29 = vld [vmem:[%s6983_s1 + $0x3d0] ss:$8 sps:$4 sm:$0xff]  }
  0xf8   : > { %3143 = vmatpush1.bf16.msra.mxu0 %v5166_v30  ;;  %1729 = vmatprep.subr.bf16.mxu1 %v5171_v20  ;;  %v5236_v20 = vld [vmem:[%s6983_s1 + $0x3e4] ss:$8 sps:$4 sm:$0xff]  }
  0xf9   : > { %1167 = vmatprep.mubr.bf16.mxu1 %v5596_v28  ;;  %3073 = vmatprep.mubr.bf16.mxu0 %v6078_v40  ;;  %v5174_v28 = vld [vmem:[%s6983_s1 + $0x340] ss:$8 sps:$4 sm:$0xff]  }
  0xfa   : > { %v6098_v39 = vpop.f32.mrb[4].mxu0  ;;  %3144 = vmatprep.subr.bf16.mxu0 %v5191_v34  ;;  %v6217_v34 = vcombine.high %v6197_v12, %v2643_v13 }
  0xfb   : > { %v6101_v47 = vpop.f32.mrb[5].mxu0  ;;  %1730 = vmatpush1.bf16.msra.mxu1 %v5169_v36  ;;  %v5237_v36 = vld [vmem:[%s6983_s1 + $0x3e0] ss:$8 sps:$4 sm:$0xff]  }
  0xfc   : > { %v6106_v42 = vpop.f32.mrb[6].mxu0  ;;  %3145 = vmatpush1.bf16.msra.mxu0 %v5189_v37  ;;  %1731 = vmatprep.subr.bf16.mxu1 %v5176_v24  ;;  %v5238_v37 = vld [vmem:[%s6983_s1 + $0x3f4] ss:$8 sps:$4 sm:$0xff]  }
  0xfd   : > { %v6113_v44 = vpop.f32.mrb[7].mxu0  ;;  %3146 = vmatprep.subr.bf16.mxu0 %v5209_v38  ;;  %v6231_v38 = vld [vmem:[%s5345_s20 + $0xf0] sm:$0xff] }
  0xfe   : > { %1168 = vmatmul.mubr.bf16.gmra.mrb[24].mxu1 %v5616_v35  ;;  %v5187_v35 = vld [vmem:[%s6983_s1 + $0x364] ss:$8 sps:$4 sm:$0xff]  }
  0xff   : > { %3074 = vmatmul.mubr.bf16.gmra.mrb[36].mxu0 %v6104_v41  ;;  %1732 = vmatpush1.bf16.msra.mxu1 %v5174_v28  ;;  %v2647_v28 = vld [vmem:[%s5345_s20 + $0xfc] sm:$0xff] }
 0x100   : > { %1177 = vmatprep.mubr.bf16.mxu1 %v4101_v43  ;;  %1733 = vmatprep.subr.bf16.mxu1 %v5180_v45  ;;  %v6237_v45 = vcombine.low %v6197_v12, %v2643_v13 }
 0x101   : > { %3083 = vmatprep.mubr.bf16.mxu0 %v6119_v46  ;;  %3147 = vmatpush1.bf16.msra.mxu0 %v5207_v48 }
 0x102   : > { %v6136_v50 = vpop.f32.mrb[8].mxu0  ;;  %3148 = vmatprep.subr.bf16.mxu0 %v5216_v53 }
 0x103   : > { %v6141_v51 = vpop.f32.mrb[9].mxu0  ;;  %1734 = vmatpush1.bf16.msra.mxu1 %v5178_v49  ;;  %v5240_v49 = vld [vmem:[%s6983_s1 + $0x404] ss:$8 sps:$4 sm:$0xff]  }
 0x104   : > { %v6148_v61 = vpop.f32.mrb[10].mxu0  ;;  %1735 = vmatprep.subr.bf16.mxu1 %v5187_v35  ;;  %v4434_v35 = vcombine.high %v6231_v38, %v2647_v28 }
 0x105   : > { %v6154_v57 = vpop.f32.mrb[11].mxu0  ;;  %3149 = vmatpush1.bf16.msra.mxu0 %v5214_v58  ;;  %v5241_v58 = vld [vmem:[%s6983_s1 + $0x400] ss:$8 sps:$4 sm:$0xff]  }
 0x106   : > { %1178 = vmatmul.mubr.bf16.gmra.mrb[36].mxu1 %v4100_v52  ;;  %v5242_v52 = vld [vmem:[%s6983_s1 + $0x414] ss:$8 sps:$4 sm:$0xff]  }
 0x107   : > { %3084 = vmatmul.mubr.bf16.gmra.mrb[40].mxu0 %v6146_v54  ;;  %1736 = vmatpush1.bf16.msra.mxu1 %v5185_v55 }
 0x108   : > { %1739 = vmatprep.mubr.bf16.mxu1 %v5197_v56  ;;  %1737 = vmatprep.subr.bf16.mxu1 %v5194_v33  ;;  %v2649_v56 = vld [vmem:[%s5345_s20 + $0x108] sm:$0xff] }
 0x109   : > { %3093 = vmatprep.mubr.bf16.mxu0 %v6160_v59 }
 0x10a   : > { %v6167_v60 = vpop.f32.mrb[12].mxu0 }
 0x10b   : > { %v6169_v62 = vpop.f32.mrb[13].mxu0  ;;  %1738 = vmatpush1.bf16.msra.mxu1 %v5192_v3 }
 0x10c   : > { %v6175_v1 = vpop.f32.mrb[14].mxu0  ;;  %4544 = vmatprep.subr.bf16.mxu1 %v5232_v6  ;;  %v4437_v6 = vcombine.high %v2649_v56, %v2649_v56 }
 0x10d   : > { %v6178_v4 = vpop.f32.mrb[15].mxu0 }
 0x10e   : > { %1740 = vmatmul.mubr.bf16.vlgmr.msra.gmra.mrb[40].mxu1 %v5195_v0  ;;  %v5243_v0 = vld [vmem:[%s6983_s1 + $0x410] ss:$8 sps:$4 sm:$0xff]  }
 0x10f   : > { %3094 = vmatmul.mubr.bf16.gmra.mrb[64].mxu0 %v6173_v5  ;;  %4560 = vmatpush1.bf16.msra.mxu1 %v5233_v7  ;;  %v5245_v7 = vld [vmem:[%s6983_s1 + $0x420] ss:$8 sps:$4 sm:$0xff]  }
 0x110   : > { %1749 = vmatprep.mubr.bf16.mxu1 %v5201_v63  ;;  %4545 = vmatprep.subr.bf16.mxu1 %v5234_v10  ;;  %v5244_v63 = vld [vmem:[%s6983_s1 + $0x424] ss:$8 sps:$4 sm:$0xff]   ;;  %v5246_v10 = vld [vmem:[%s6983_s1 + $0x434] ss:$8 sps:$4 sm:$0xff]  }
 0x111   : > { %3103 = vmatprep.mubr.bf16.mxu0 %v6184_v8 }
 0x112   : > { %v6194_v11 = vpop.f32.mrb[16].mxu0 }
 0x113   : > { %v6200_v18 = vpop.f32.mrb[17].mxu0  ;;  %4561 = vmatpush1.bf16.msra.mxu1 %v5235_v29 }
 0x114   : > { %v6206_v17 = vpop.f32.mrb[18].mxu0  ;;  %4546 = vmatprep.subr.bf16.mxu1 %v5236_v20  ;;  %v5247_v20 = vld [vmem:[%s6983_s1 + $0x430] ss:$8 sps:$4 sm:$0xff]  }
 0x115   : > { %v6211_v30 = vpop.f32.mrb[19].mxu0 }
 0x116   : > { %1750 = vmatmul.mubr.bf16.gmra.mrb[44].mxu1 %v5205_v32 }
 0x117   : > { %3104 = vmatmul.mubr.bf16.gmra.mrb[68].mxu0 %v6204_v21  ;;  %4562 = vmatpush1.bf16.msra.mxu1 %v5237_v36 }
 0x118   : > { %1759 = vmatprep.mubr.bf16.mxu1 %v6039_v15  ;;  %4547 = vmatprep.subr.bf16.mxu1 %v5238_v37  ;;  %v5239_v15 = vld [vmem:[%s6983_s1 + $0x3f0] ss:$8 sps:$4 sm:$0xff]   ;;  %v5248_v37 = vld [vmem:[%s6983_s1 + $0x444] ss:$8 sps:$4 sm:$0xff]  }
 0x119   : > { %3113 = vmatprep.mubr.bf16.mxu0 %v6217_v34 }
 0x11a   : > { %v6228_v24 = vpop.f32.mrb[20].mxu0 }
 0x11b   : > { %v6234_v43 = vpop.f32.mrb[21].mxu0  ;;  %4563 = vmatpush1.bf16.msra.mxu1 %v5239_v15  ;;  %v5250_v15 = vld [vmem:[%s6983_s1 + $0x454] ss:$8 sps:$4 sm:$0xff]  }
 0x11c   : > { %v6239_v48 = vpop.f32.mrb[22].mxu0  ;;  %4548 = vmatprep.subr.bf16.mxu1 %v5240_v49  ;;  %v5219_v49 = vld [vmem:[%s5345_s20 + $0x68] ss:$12 sps:$4 sm:$0xff]  }
 0x11d   : > { %v6244_v53 = vpop.f32.mrb[23].mxu0 }
 0x11e   : > { %1760 = vmatmul.mubr.bf16.gmra.mrb[48].mxu1 %v6062_v25  ;;  %v4433_v25 = vcombine.low %v6231_v38, %v2647_v28  ;;  %v5249_v28 = vld [vmem:[%s6983_s1 + $0x440] ss:$8 sps:$4 sm:$0xff]  }
 0x11f   : > { %3114 = vmatmul.mubr.bf16.gmra.mrb[72].mxu0 %v6237_v45  ;;  %4564 = vmatpush1.bf16.msra.mxu1 %v5241_v58  ;;  %v5252_v58 = vld [vmem:[%s6983_s1 + $0x464] ss:$8 sps:$4 sm:$0xff]  }
 0x120   : > { %1769 = vmatprep.mubr.bf16.mxu1 %v6078_v40  ;;  %4549 = vmatprep.subr.bf16.mxu1 %v5242_v52  ;;  %v5253_v52 = vld [vmem:[%s6983_s1 + $0x460] ss:$8 sps:$4 sm:$0xff]  }
 0x121   : > { %3123 = vmatprep.mubr.bf16.mxu0 %v4434_v35  ;;  %v5251_v35 = vld [vmem:[%s6983_s1 + $0x450] ss:$8 sps:$4 sm:$0xff]  }
 0x122   : > { %v6259_v55 = vpop.f32.mrb[24].mxu0 }
 0x123   : > { %v6262_v33 = vpop.f32.mrb[25].mxu0  ;;  %4565 = vmatpush1.bf16.msra.mxu1 %v5243_v0  ;;  %v5255_v0 = vld [vmem:[%s6983_s1 + $0x470] ss:$8 sps:$4 sm:$0xff]  }
 0x124   : > { %v6265_v3 = vpop.f32.mrb[26].mxu0  ;;  %4550 = vmatprep.subr.bf16.mxu1 %v5244_v63  ;;  %v4213_v63 = vcombine.high %v6197_v12, %v6197_v12 }
 0x125   : > { %v6270_v40 = vpop.f32.mrb[27].mxu0 }
 0x126   : > { %1770 = vmatmul.mubr.bf16.gmra.mrb[52].mxu1 %v6104_v41  ;;  %v4436_v41 = vcombine.low %v2649_v56, %v2649_v56  ;;  %v5254_v56 = vld [vmem:[%s6983_s1 + $0x474] ss:$8 sps:$4 sm:$0xff]  }
 0x127   : > { %3124 = vmatmul.mubr.bf16.gmra.mrb[76].mxu0 %v4433_v25  ;;  %4566 = vmatpush1.bf16.msra.mxu1 %v5245_v7  ;;  %v5220_v25 = vld [vmem:[%s5345_s20 + $0x80] ss:$12 sps:$4 sm:$0xff]  }
 0x128   : > { %1779 = vmatprep.mubr.bf16.mxu1 %v6119_v46  ;;  %4551 = vmatprep.subr.bf16.mxu1 %v5246_v10  ;;  %v5257_v7 = vld [vmem:[%s6983_s1 + $0x480] ss:$8 sps:$4 sm:$0xff]   ;;  %v5258_v10 = vld [vmem:[%s6983_s1 + $0x494] ss:$8 sps:$4 sm:$0xff]  }
 0x129   : > { %3133 = vmatprep.mubr.bf16.mxu0 %v4437_v6  ;;  %v5256_v6 = vld [vmem:[%s6983_s1 + $0x484] ss:$8 sps:$4 sm:$0xff]  }
 0x12a   : > { %v6283_v13 = vpop.f32.mrb[28].mxu0 }
 0x12b   : > { %v6285_v32 = vpop.f32.mrb[29].mxu0  ;;  %4567 = vmatpush1.bf16.msra.mxu1 %v5247_v20 }
 0x12c   : > { %v1294_v29 = vpop.f32.mrb[30].mxu0  ;;  %4552 = vmatprep.subr.bf16.mxu1 %v5248_v37 }
 0x12d   : > { %v1295_v36 = vpop.f32.mrb[31].mxu0  ;;  %v5223_v29 = vld [vmem:[%s5345_s20 + $0x98] ss:$12 sps:$4 sm:$0xff]  }
 0x12e   : > { %1780 = vmatmul.mubr.bf16.gmra.mrb[56].mxu1 %v6146_v54  ;;  %v5224_v36 = vld [vmem:[%s5345_s20 + $0xb0] ss:$12 sps:$4 sm:$0xff]  }
 0x12f   : > { %3134 = vmatmul.mubr.bf16.gmra.mrb[84].mxu0 %v4436_v41  ;;  %4568 = vmatpush1.bf16.msra.mxu1 %v5249_v28  ;;  %v4212_v41 = vcombine.low %v6197_v12, %v6197_v12 }
 0x130   : > { %1789 = vmatprep.mubr.bf16.mxu1 %v6160_v59  ;;  %4553 = vmatprep.subr.bf16.mxu1 %v5250_v15 }
 0x131   : > { %3174 = vmatprep.mubr.bf16.mxu0 %v5267_v2 }
 0x133   : > { %4569 = vmatpush1.bf16.msra.mxu1 %v5251_v35 }
 0x134   : > { %4554 = vmatprep.subr.bf16.mxu1 %v5252_v58 }
 0x136   : > { %1790 = vmatmul.mubr.bf16.gmra.mrb[60].mxu1 %v6173_v5 }
 0x137   : > { %4479 = vmatmul.mubr.msk.bf16.vlgmr.msra.gmra.mrb[32].mxu0 %vm602_vm0, %v5219_v49  ;;  %4570 = vmatpush1.bf16.msra.mxu1 %v5253_v52  ;;  %v5226_v49 = vld [vmem:[%s5345_s20 + $0xe0] ss:$12 sps:$4 sm:$0xff]  }
 0x138   : > { %1799 = vmatprep.mubr.bf16.mxu1 %v6184_v8  ;;  %4555 = vmatprep.subr.bf16.mxu1 %v5254_v56 }
 0x139   : > { %3184 = vmatprep.mubr.bf16.mxu0 %v5267_v2 }
 0x13b   : > { %4571 = vmatpush1.bf16.msra.mxu1 %v5255_v0 }
 0x13c   : > { %4556 = vmatprep.subr.bf16.mxu1 %v5256_v6 }
 0x13e   : > { %1800 = vmatmul.mubr.bf16.gmra.mrb[64].mxu1 %v6204_v21 }
 0x13f   : > { %4480 = vmatmul.mubr.msk.bf16.gmra.mrb[36].mxu0 %vm602_vm0, %v5220_v25  ;;  %4572 = vmatpush1.bf16.msra.mxu1 %v5257_v7  ;;  %v5227_v25 = vld [vmem:[%s5345_s20 + $0xf8] ss:$12 sps:$4 sm:$0xff]   ;;  %v4324_v7 = vcombine.low %v6231_v38, %v6231_v38 }
 0x140   : > { %1809 = vmatprep.mubr.bf16.mxu1 %v4213_v63  ;;  %4557 = vmatprep.subr.bf16.mxu1 %v5258_v10  ;;  %v4325_v63 = vcombine.high %v6231_v38, %v6231_v38  ;;  %v5230_v10 = vld [vmem:[%s5345_s20 + $0x110] ss:$0 sps:$4 sm:$0xff]  }
 0x141   : > { %3194 = vmatprep.mubr.bf16.mxu0 %v5267_v2 }
 0x143   : > { %4573 = vmatpush1.bf16.msra.mxu1 %v5690_v9 }
 0x144   : > { %4558 = vmatprep.subr.bf16.mxu1 %v5698_v27 }
 0x146   : > { %1810 = vmatmul.mubr.bf16.gmra.mrb[68].mxu1 %v4212_v41 }
 0x147   : > { %4481 = vmatmul.mubr.msk.bf16.gmra.mrb[40].mxu0 %vm602_vm0, %v5223_v29  ;;  %4574 = vmatpush1.bf16.msra.mxu1 %v5710_v14 }
 0x148   : > { %2431 = vmatprep.mubr.bf16.mxu1 %v6119_v46  ;;  %4559 = vmatprep.subr.bf16.mxu1 %v5719_v16  ;;  %v5225_v46 = vld [vmem:[%s5345_s20 + $0xc8] ss:$12 sps:$4 sm:$0xff]  }
 0x149   : > { %3204 = vmatprep.mubr.bf16.mxu0 %v5267_v2 }
 0x14a   : > { %v6347_v20 = vpop.f32.mrb[44].mxu0 }
 0x14b   : > { %v6349_v12 = vpop.f32.mrb[45].mxu0  ;;  %4575 = vmatpush1.bf16.msra.mxu1 %v5731_v19 }
 0x14c   : > { %v6352_v9 = vpop.f32.mrb[46].mxu0 }
 0x14d   : > { %v6355_v27 = vpop.f32.mrb[47].mxu0 }
 0x14e   : > { %2432 = vmatmul.mubr.bf16.vlgmr.msra.gmra.mrb[72].mxu1 %v6146_v54 }
 0x14f   : > { %4482 = vmatmul.mubr.msk.bf16.gmra.mrb[64].mxu0 %vm602_vm0, %v5224_v36  ;;  %2441 = vmatprep.mubr.bf16.mxu1 %v6160_v59 }
 0x150   : > { %3214 = vmatprep.mubr.bf16.mxu0 %v5267_v2 }
 0x152   : > { %v6361_v14 = vpop.f32.mrb[48].mxu0 }
 0x153   : > { %v6363_v16 = vpop.f32.mrb[49].mxu0 }
 0x154   : > { %v6366_v37 = vpop.f32.mrb[50].mxu0 }
 0x155   : > { %v6368_v28 = vpop.f32.mrb[51].mxu0 }
 0x156   : > { %2442 = vmatmul.mubr.bf16.gmra.mrb[76].mxu1 %v6173_v5 }
 0x157   : > { %4483 = vmatmul.mubr.msk.bf16.gmra.mrb[68].mxu0 %vm602_vm0, %v5225_v46  ;;  %2451 = vmatprep.mubr.bf16.mxu1 %v6184_v8 }
 0x158   : > { %3224 = vmatprep.mubr.bf16.mxu0 %v5267_v2 }
 0x159   : > { %v731_v19 = vpop.f32.mrb[28].mxu1 }
 0x15a   : > { %v6374_v54 = vpop.f32.mrb[52].mxu0  ;;  %v733_v59 = vpop.f32.mrb[29].mxu1 }
 0x15b   : > { %v6376_v15 = vpop.f32.mrb[53].mxu0  ;;  %v735_v35 = vpop.f32.mrb[30].mxu1 }
 0x15c   : > { %v6379_v58 = vpop.f32.mrb[54].mxu0  ;;  %v736_v52 = vpop.f32.mrb[31].mxu1 }
 0x15d   : > { %v6381_v56 = vpop.f32.mrb[55].mxu0 }
 0x15e   : > { %2452 = vmatmul.mubr.bf16.gmra.mrb[80].mxu1 %v6204_v21 }
 0x15f   : > { %4484 = vmatmul.mubr.msk.bf16.gmra.mrb[72].mxu0 %vm602_vm0, %v5226_v49  ;;  %2461 = vmatprep.mubr.bf16.mxu1 %v6217_v34 }
 0x160   : > { %3234 = vmatprep.mubr.bf16.mxu0 %v5267_v2 }
 0x162   : > { %v6387_v5 = vpop.f32.mrb[56].mxu0 }
 0x163   : > { %v6389_v8 = vpop.f32.mrb[57].mxu0 }
 0x164   : > { %v6392_v0 = vpop.f32.mrb[58].mxu0 }
 0x165   : > { %v6396_v6 = vpop.f32.mrb[59].mxu0 }
 0x166   : > { %2462 = vmatmul.mubr.bf16.gmra.mrb[84].mxu1 %v6237_v45 }
 0x167   : > { %4485 = vmatmul.mubr.msk.bf16.gmra.mrb[76].mxu0 %vm602_vm0, %v5227_v25  ;;  %2471 = vmatprep.mubr.bf16.mxu1 %v4325_v63 }
 0x168   : > { %3244 = vmatprep.mubr.bf16.mxu0 %v5267_v2 }
 0x16a   : > { %v6401_v21 = vpop.f32.mrb[60].mxu0 }
 0x16b   : > { %v6403_v34 = vpop.f32.mrb[61].mxu0 }
 0x16c   : > { %v1926_v41 = vpop.f32.mrb[62].mxu0 }
 0x16d   : > { %v1927_v29 = vpop.f32.mrb[63].mxu0 }
 0x16e   : > { %2472 = vmatmul.mubr.bf16.gmra.mrb[88].mxu1 %v4324_v7 }
 0x16f   : > { %4486 = vmatmul.mubr.msk.bf16.gmra.mrb[88].mxu0 %vm602_vm0, %v5230_v10 }
 0x199   : > { %v842_v36 = vpop.f32.mrb[32].mxu1 }
 0x19a   : > { %v6409_v45 = vadd.f32 %v842_v36, %v731_v19  ;;  %v844_v46 = vpop.f32.mrb[33].mxu1 }
 0x19b   : > { %v6411_v49 = vadd.f32 %v844_v46, %v733_v59  ;;  %v846_v2 = vpop.f32.mrb[34].mxu1 }
 0x19c   : > { %v847_v35 = vpop.f32.mrb[35].mxu1 }
 0x1a1   : > { %v1109_v52 = vpop.f32.mrb[0].mxu1 }
 0x1a2   : > { %v6414_v25 = vadd.f32 %v6055_v22, %v1109_v52  ;;  %v1111_v63 = vpop.f32.mrb[1].mxu1 }
 0x1a3   : > { %v6417_v38 = vadd.f32 %v6059_v23, %v1111_v63  ;;  %v1113_v41 = vpop.f32.mrb[2].mxu1 }
 0x1a4   : > { %v6420_v7 = vadd.f32 %v6064_v26, %v1113_v41  ;;  %v1115_v10 = vpop.f32.mrb[3].mxu1 }
 0x1a5   : > { %v6423_v19 = vadd.f32 %v6072_v31, %v1115_v10 }
 0x1a9   : > { %v1119_v59 = vpop.f32.mrb[4].mxu1 }
 0x1aa   : > { %v6426_v29 = vadd.f32 %v6098_v39, %v1119_v59  ;;  %v1121_v36 = vpop.f32.mrb[5].mxu1 }
 0x1ab   : > { %v6429_v22 = vadd.f32 %v6101_v47, %v1121_v36  ;;  %v1123_v46 = vpop.f32.mrb[6].mxu1 }
 0x1ac   : > { %v6432_v23 = vadd.f32 %v6106_v42, %v1123_v46  ;;  %v1125_v2 = vpop.f32.mrb[7].mxu1 }
 0x1ad   : > { %v6435_v26 = vadd.f32 %v6113_v44, %v1125_v2 }
 0x1b1   : > { %v1129_v35 = vpop.f32.mrb[8].mxu1 }
 0x1b2   : > { %v6438_v31 = vadd.f32 %v6136_v50, %v1129_v35  ;;  %v1131_v52 = vpop.f32.mrb[9].mxu1 }
 0x1b3   : > { %v6441_v39 = vadd.f32 %v6141_v51, %v1131_v52  ;;  %v1133_v63 = vpop.f32.mrb[10].mxu1 }
 0x1b4   : > { %v6444_v47 = vadd.f32 %v6148_v61, %v1133_v63  ;;  %v1135_v41 = vpop.f32.mrb[11].mxu1 }
 0x1b5   : > { %v6447_v42 = vadd.f32 %v6154_v57, %v1135_v41 }
 0x1b9   : > { %v1139_v10 = vpop.f32.mrb[12].mxu1 }
 0x1ba   : > { %v6450_v44 = vadd.f32 %v6167_v60, %v1139_v10  ;;  %v1141_v59 = vpop.f32.mrb[13].mxu1 }
 0x1bb   : > { %v6453_v50 = vadd.f32 %v6169_v62, %v1141_v59  ;;  %v1143_v36 = vpop.f32.mrb[14].mxu1 }
 0x1bc   : > { %v6456_v51 = vadd.f32 %v6175_v1, %v1143_v36  ;;  %v1145_v46 = vpop.f32.mrb[15].mxu1 }
 0x1bd   : > { %v6459_v61 = vadd.f32 %v6178_v4, %v1145_v46 }
 0x1c1   : > { %v1149_v2 = vpop.f32.mrb[16].mxu1 }
 0x1c2   : > { %v6461_v35 = vpop.f32.mrb[80].mxu0  ;;  %v6464_v57 = vadd.f32 %v6194_v11, %v1149_v2  ;;  %v1151_v60 = vpop.f32.mrb[17].mxu1 }
 0x1c3   : > { %v6466_v52 = vpop.f32.mrb[81].mxu0  ;;  %v6469_v62 = vadd.f32 %v6200_v18, %v1151_v60  ;;  %v1153_v63 = vpop.f32.mrb[18].mxu1 }
 0x1c4   : > { %6986 = vst [vmem:[#allocation4_spill] sm:$0xff] %v6466_v52  ;;  %v2588_v41 = vpop.f32.mrb[82].mxu0  ;;  %v6472_v1 = vadd.f32 %v6206_v17, %v1153_v63  ;;  %v1155_v10 = vpop.f32.mrb[19].mxu1 }
 0x1c5   : > { %v2589_v4 = vpop.f32.mrb[83].mxu0  ;;  %v6475_v59 = vadd.f32 %v6211_v30, %v1155_v10 }
 0x1c9   : > { %v1159_v36 = vpop.f32.mrb[20].mxu1 }
 0x1ca   : > { %v6478_v11 = vadd.f32 %v6228_v24, %v1159_v36  ;;  %v1161_v46 = vpop.f32.mrb[21].mxu1 }
 0x1cb   : > { %v6481_v2 = vadd.f32 %v6234_v43, %v1161_v46  ;;  %v1163_v18 = vpop.f32.mrb[22].mxu1 }
 0x1cc   : > { %v6484_v60 = vadd.f32 %v6239_v48, %v1163_v18  ;;  %v1165_v41 = vpop.f32.mrb[23].mxu1 }
 0x1cd   : > { %v6487_v17 = vadd.f32 %v6244_v53, %v1165_v41 }
 0x1d1   : > { %v1169_v63 = vpop.f32.mrb[24].mxu1 }
 0x1d2   : > { %v6490_v30 = vadd.f32 %v6259_v55, %v1169_v63  ;;  %v1171_v10 = vpop.f32.mrb[25].mxu1 }
 0x1d3   : > { %v6493_v24 = vadd.f32 %v6262_v33, %v1171_v10  ;;  %v1173_v4 = vpop.f32.mrb[26].mxu1 }
 0x1d4   : > { %v6496_v43 = vadd.f32 %v6265_v3, %v1173_v4  ;;  %v1175_v36 = vpop.f32.mrb[27].mxu1 }
 0x1d5   : > { %v6499_v48 = vadd.f32 %v6270_v40, %v1175_v36 }
 0x1d9   : > { %v1179_v46 = vpop.f32.mrb[36].mxu1 }
 0x1da   : > { %v1180_v53 = vadd.f32 %v1179_v46, %v6409_v45  ;;  %v1181_v18 = vpop.f32.mrb[37].mxu1 }
 0x1db   : > { %v1182_v41 = vadd.f32 %v1181_v18, %v6411_v49  ;;  %v1183_v55 = vpop.f32.mrb[38].mxu1 }
 0x1dc   : > { %v6504_v63 = vadd.f32 %v6283_v13, %v1180_v53  ;;  %v1184_v33 = vpop.f32.mrb[39].mxu1 }
 0x1dd   : > { %v6507_v10 = vadd.f32 %v6285_v32, %v1182_v41 }
 0x1e1   : > { %v1741_v3 = vpop.f32.mrb[40].mxu1 }
 0x1e2   : > { %v4577_v4 = vadd.f32 %v6414_v25, %v1741_v3  ;;  %v1743_v52 = vpop.f32.mrb[41].mxu1 }
 0x1e3   : > { %v6511_v40 = vadd.f32 %v6417_v38, %v1743_v52  ;;  %v1745_v36 = vpop.f32.mrb[42].mxu1 }
 0x1e4   : > { %v6514_v45 = vadd.f32 %v6420_v7, %v1745_v36  ;;  %v1747_v49 = vpop.f32.mrb[43].mxu1 }
 0x1e5   : > { %v6517_v46 = vadd.f32 %v6423_v19, %v1747_v49 }
 0x1e9   : > { %v1751_v13 = vpop.f32.mrb[44].mxu1 }
 0x1ea   : > { %v6520_v53 = vadd.f32 %v6426_v29, %v1751_v13  ;;  %v1753_v32 = vpop.f32.mrb[45].mxu1 }
 0x1eb   : > { %v6523_v18 = vadd.f32 %v6429_v22, %v1753_v32  ;;  %v1755_v25 = vpop.f32.mrb[46].mxu1 }
 0x1ec   : > { %v6526_v38 = vadd.f32 %v6432_v23, %v1755_v25  ;;  %v1757_v52 = vpop.f32.mrb[47].mxu1 }
 0x1ed   : > { %v6529_v7 = vadd.f32 %v6435_v26, %v1757_v52 }
 0x1f1   : > { %v1761_v41 = vpop.f32.mrb[48].mxu1 }
 0x1f2   : > { %v6532_v19 = vadd.f32 %v6438_v31, %v1761_v41  ;;  %v1763_v55 = vpop.f32.mrb[49].mxu1 }
 0x1f3   : > { %v6535_v29 = vadd.f32 %v6441_v39, %v1763_v55  ;;  %v1765_v33 = vpop.f32.mrb[50].mxu1  ;;  %v3285_v39 = vlaneseq }
 0x1f4   : > { %v6538_v22 = vadd.f32 %v6444_v47, %v1765_v33  ;;  %v1767_v3 = vpop.f32.mrb[51].mxu1 }
 0x1f5   : > { %v6541_v23 = vadd.f32 %v6447_v42, %v1767_v3 }
 0x1f9   : > { %v1771_v36 = vpop.f32.mrb[52].mxu1 }
 0x1fa   : > { %v4613_v26 = vadd.f32 %v6450_v44, %v1771_v36  ;;  %v1773_v49 = vpop.f32.mrb[53].mxu1 }
 0x1fb   : > { %v4618_v13 = vadd.f32 %v6453_v50, %v1773_v49  ;;  %v1775_v31 = vpop.f32.mrb[54].mxu1  ;;  %v3286_v50 = vshrl.u32 %v3285_v39, 7 }
 0x1fc   : > { %v4623_v32 = vadd.f32 %v6456_v51, %v1775_v31  ;;  %v1777_v25 = vpop.f32.mrb[55].mxu1  ;;  %v6547_v52 = vadd.f32 %v4613_v26, %v6347_v20 }
 0x1fd   : > { %v4628_v47 = vadd.f32 %v6459_v61, %v1777_v25  ;;  %v6551_v41 = vadd.f32 %v4618_v13, %v6349_v12  ;;  %v3287_v13 = vsub.s32 0, %v3286_v50 }
 0x1fe   : > { %v6554_v42 = vadd.f32 %v4623_v32, %v6352_v9  ;;  %v3291_v32 = vsub.s32 1, %v3286_v50 }
 0x1ff   : > { %v6557_v44 = vadd.f32 %v4628_v47, %v6355_v27 }
 0x201   : > { %v1781_v55 = vpop.f32.mrb[56].mxu1 }
 0x202   : > { %v6559_v33 = vpop.f32.mrb[84].mxu0  ;;  %v4633_v51 = vadd.f32 %v6464_v57, %v1781_v55  ;;  %v1783_v3 = vpop.f32.mrb[57].mxu1  ;;  %v3283_v57 = vld [vmem:[%s6984_s2] sm:$0x3] }
 0x203   : > { %v6562_v20 = vpop.f32.mrb[85].mxu0  ;;  %v4638_v61 = vadd.f32 %v6469_v62, %v1783_v3  ;;  %v1785_v36 = vpop.f32.mrb[58].mxu1  ;;  %v6582_v39 = vrot.slane %v3283_v57, %v3287_v13  ;;  %v6584_v55 = vrot.slane %v3283_v57, %v3291_v32 }
 0x204   : > { %v3139_v12 = vpop.f32.mrb[86].mxu0  ;;  %v4643_v26 = vadd.f32 %v6472_v1, %v1785_v36  ;;  %v1787_v9 = vpop.f32.mrb[59].mxu1  ;;  %v6567_v27 = vadd.f32 %v4633_v51, %v6361_v14 }
 0x205   : > { %v3140_v49 = vpop.f32.mrb[87].mxu0  ;;  %v4648_v31 = vadd.f32 %v6475_v59, %v1787_v9  ;;  %v6574_v25 = vadd.f32 %v4638_v61, %v6363_v16 }
 0x206   : > { %v6577_v62 = vadd.f32 %v4643_v26, %v6366_v37 }
 0x207   : > { %v6580_v1 = vadd.f32 %v4648_v31, %v6368_v28 }
 0x209   : > { %v1791_v14 = vpop.f32.mrb[60].mxu1 }
 0x20a   : > { %v3176_v47 = vpop.f32.mrb[32].mxu0  ;;  %v4653_v59 = vadd.f32 %v6478_v11, %v1791_v14  ;;  %v1793_v3 = vpop.f32.mrb[61].mxu1 }
 0x20b   : > { %v4578_v51 = vadd.f32 %v4577_v4, %v3176_v47  ;;  %v3178_v50 = vpop.f32.mrb[33].mxu0  ;;  %v4658_v16 = vadd.f32 %v6481_v2, %v1793_v3  ;;  %v1795_v37 = vpop.f32.mrb[62].mxu1 }
 0x20c   : > { %v4581_v61 = vadd.f32 %v6511_v40, %v3178_v50  ;;  %v3180_v28 = vpop.f32.mrb[34].mxu0  ;;  %v4663_v12 = vadd.f32 %v6484_v60, %v1795_v37  ;;  %v1797_v9 = vpop.f32.mrb[63].mxu1  ;;  %v6593_v11 = vadd.f32 %v4653_v59, %v6374_v54 }
 0x20d   : > { %v3295_v36 = vadd.f32 %v4578_v51, %v6582_v39  ;;  %v4584_v26 = vadd.f32 %v6514_v45, %v3180_v28  ;;  %v3182_v49 = vpop.f32.mrb[35].mxu0  ;;  %v4668_v2 = vadd.f32 %v6487_v17, %v1797_v9  ;;  %v6599_v13 = vadd.f32 %v4658_v16, %v6376_v15 }
 0x20e   : > { %v3296_v4 = vadd.f32 %v4581_v61, %v6584_v55  ;;  %v4587_v40 = vadd.f32 %v6517_v46, %v3182_v49  ;;  %v6603_v60 = vadd.f32 %v4663_v12, %v6379_v58 }
 0x20f   : > { %v3325_v31 = vmax.f32 %v3295_v36, 0.0  ;;  %v3297_v57 = vadd.f32 %v4584_v26, %v6582_v39  ;;  %v6607_v54 = vadd.f32 %v4668_v2, %v6381_v56 }
 0x210   : > { %v3326_v45 = vmax.f32 %v3296_v4, 0.0  ;;  %v3298_v32 = vadd.f32 %v4587_v40, %v6584_v55 }
 0x211   : > { %v3327_v15 = vmax.f32 %v3297_v57, 0.0  ;;  %v1801_v47 = vpop.f32.mrb[64].mxu1 }
 0x212   : > { %v4529_v46 = vpack.c.bf16 %v3326_v45, %v3325_v31  ;;  %v3328_v14 = vmax.f32 %v3298_v32, 0.0  ;;  %v3186_v59 = vpop.f32.mrb[36].mxu0  ;;  %v4673_v58 = vadd.f32 %v6490_v30, %v1801_v47  ;;  %v1803_v3 = vpop.f32.mrb[65].mxu1 }
 0x213   : > { %v4590_v51 = vadd.f32 %v6520_v53, %v3186_v59  ;;  %v3188_v50 = vpop.f32.mrb[37].mxu0  ;;  %v4678_v16 = vadd.f32 %v6493_v24, %v1803_v3  ;;  %v1805_v37 = vpop.f32.mrb[66].mxu1 }
 0x214   : > { %3450 = vst.msk [vmem:[#allocation2] sm:$0xff] %vm6611_vm3, %v4529_v46  ;;  %v4530_v56 = vpack.c.bf16 %v3328_v14, %v3327_v15  ;;  %v4593_v61 = vadd.f32 %v6523_v18, %v3188_v50  ;;  %v3190_v28 = vpop.f32.mrb[38].mxu0  ;;  %v4683_v12 = vadd.f32 %v6496_v43, %v1805_v37  ;;  %v1807_v26 = vpop.f32.mrb[67].mxu1  ;;  %v6625_v9 = vadd.f32 %v4673_v58, %v6387_v5 }
 0x215   : > { %v3299_v36 = vadd.f32 %v4590_v51, %v6582_v39  ;;  %v4596_v30 = vadd.f32 %v6526_v38, %v3190_v28  ;;  %v3192_v53 = vpop.f32.mrb[39].mxu0  ;;  %v4688_v18 = vadd.f32 %v6499_v48, %v1807_v26  ;;  %v6633_v4 = vadd.f32 %v4678_v16, %v6389_v8 }
 0x216   : > { %3451 = vst.msk [vmem:[#allocation2 + $0x8] sm:$0xff] %vm6611_vm3, %v4530_v56  ;;  %v3300_v24 = vadd.f32 %v4593_v61, %v6584_v55  ;;  %v4599_v49 = vadd.f32 %v6529_v7, %v3192_v53  ;;  %v6637_v2 = vadd.f32 %v4683_v12, %v6392_v0 }
 0x217   : > { %v3329_v43 = vmax.f32 %v3299_v36, 0.0  ;;  %v3301_v38 = vadd.f32 %v4596_v30, %v6582_v39  ;;  %v6641_v31 = vadd.f32 %v4688_v18, %v6396_v6 }
 0x218   : > { %v3330_v5 = vmax.f32 %v3300_v24, 0.0  ;;  %v3302_v40 = vadd.f32 %v4599_v49, %v6584_v55 }
 0x219   : > { %v3331_v57 = vmax.f32 %v3301_v38, 0.0  ;;  %v1811_v32 = vpop.f32.mrb[68].mxu1 }
 0x21a   : > { %v4531_v45 = vpack.c.bf16 %v3330_v5, %v3329_v43  ;;  %v3332_v48 = vmax.f32 %v3302_v40, 0.0  ;;  %v3196_v7 = vpop.f32.mrb[40].mxu0  ;;  %v1923_v8 = vadd.f32 %v6401_v21, %v1811_v32  ;;  %v1813_v14 = vpop.f32.mrb[69].mxu1 }
 0x21b   : > { %v3465_v15 = vld [vmem:[#allocation2] sm:$0xff]  ;;  %v4602_v46 = vadd.f32 %v6532_v19, %v3196_v7  ;;  %v3198_v0 = vpop.f32.mrb[41].mxu0  ;;  %v1815_v58 = vpop.f32.mrb[70].mxu1  ;;  %v1925_v19 = vadd.f32 %v6403_v34, %v1813_v14 }
 0x21c   : > { %v3484_v47 = vshrl.u32 %v3465_v15, 16  ;;  %v3487_v59 = vshll.u32 %v3465_v15, 16  ;;  %3452 = vst.msk [vmem:[#allocation2 + $0x10] sm:$0xff] %vm6611_vm3, %v4531_v45  ;;  %v4532_v6 = vpack.c.bf16 %v3332_v48, %v3331_v57  ;;  %v3200_v51 = vpop.f32.mrb[42].mxu0  ;;  %v6650_v50 = vadd.f32 %v1923_v8, %v6504_v63  ;;  %v1816_v16 = vpop.f32.mrb[71].mxu1 }
 0x21d   : > { %v6647_v3 = vld [vmem:[#allocation2 + $0x8] sm:$0xff]  ;;  %v3303_v21 = vadd.f32 %v4602_v46, %v6582_v39  ;;  %v4605_v56 = vadd.f32 %v6535_v29, %v3198_v0  ;;  %v3202_v61 = vpop.f32.mrb[43].mxu0  ;;  %v3655_v30 = vld [vmem:[#allocation2] sm:$0xee]  ;;  %v6660_v26 = vadd.f32 %v1925_v19, %v6507_v10  ;;  %v4608_v18 = vadd.f32 %v6538_v22, %v3200_v51 }
 0x21e   : > { %v3486_v37 = vrot.slane %v3484_v47, 4  ;;  %v3489_v28 = vrot.slane %v3487_v59, 5  ;;  %v3493_v36 = vshll.u32 %v6647_v3, 16  ;;  %v3497_v12 = vshrl.u32 %v6647_v3, 16  ;;  %3453 = vst.msk [vmem:[#allocation2 + $0x18] sm:$0xff] %vm6611_vm3, %v4532_v6 }
 0x21f   : > { %v3333_v63 = vmax.f32 %v3303_v21, 0.0  ;;  %v3304_v34 = vadd.f32 %v4605_v56, %v6584_v55  ;;  %v4611_v38 = vadd.f32 %v6541_v23, %v3202_v61  ;;  %v4502_v5 = vrot.slane %v3655_v30, 9 }
 0x220   : > { %v3490_v53 = vor.u32 %v3489_v28, %v3486_v37  ;;  %v3495_v29 = vrot.slane %v3493_v36, 5  ;;  %v3499_v24 = vrot.slane %v3497_v12, 4  ;;  %v3305_v57 = vadd.f32 %v4608_v18, %v6582_v39 }
 0x221   : > { %v3334_v43 = vmax.f32 %v3304_v34, 0.0  ;;  %v2433_v45 = vpop.f32.mrb[72].mxu1  ;;  %v3676_v22 = vrot.slane %v6647_v3, 5  ;;  %v3306_v8 = vadd.f32 %v4611_v38, %v6584_v55 }
 0x222   : > { %v3491_v10 = vrot.slane %v3490_v53, 4  ;;  %v3500_v40 = vor.u32 %v3499_v24, %v3495_v29  ;;  %v3206_v48 = vpop.f32.mrb[64].mxu0  ;;  %v4615_v46 = vadd.f32 %v6547_v52, %v2433_v45  ;;  %v2435_v14 = vpop.f32.mrb[73].mxu1  ;;  %v3335_v16 = vmax.f32 %v3305_v57, 0.0 }
 0x223   : > { %v6673_v32 = vld [vmem:[#allocation2 + $0x10] sm:$0xff]  ;;  %v4533_v7 = vpack.c.bf16 %v3334_v43, %v3333_v63  ;;  %v3208_v0 = vpop.f32.mrb[65].mxu0  ;;  %v2437_v51 = vpop.f32.mrb[74].mxu1  ;;  %v3336_v61 = vmax.f32 %v3306_v8, 0.0  ;;  %v3678_v34 = vrot.slane %v3676_v22, 4  ;;  %v4620_v8 = vadd.f32 %v6551_v41, %v2435_v14 }
 0x224   : > { %v3496_v23 = vsel %vm6666_vm6, %v3491_v10, %v3495_v29  ;;  %v3501_v47 = vrot.slane %v3500_v40, 4  ;;  %v3503_v6 = vshll.u32 %v6673_v32, 16  ;;  %v3507_v58 = vshrl.u32 %v6673_v32, 16  ;;  %v3210_v21 = vpop.f32.mrb[66].mxu0  ;;  %v2439_v37 = vpop.f32.mrb[75].mxu1 }
 0x225   : > { %v3641_v19 = vmax.bf16 %v3496_v23, %v3465_v15  ;;  %v3679_v52 = vrot.slane %v6673_v32, 5  ;;  %v6688_v56 = vld [vmem:[#allocation2 + $0x18] sm:$0xff]  ;;  %3454 = vst.msk [vmem:[#allocation2 + $0x20] sm:$0xff] %vm6611_vm3, %v4533_v7  ;;  %v3212_v28 = vpop.f32.mrb[67].mxu0  ;;  %v3677_v15 = vsel %vm6681_vm9, %v4502_v5, %v3676_v22  ;;  %v4534_v45 = vpack.c.bf16 %v3336_v61, %v3335_v16 }
 0x226   : > { %v3505_v36 = vrot.slane %v3503_v6, 5  ;;  %v3509_v12 = vrot.slane %v3507_v58, 4  ;;  %v3513_v30 = vshll.u32 %v6688_v56, 16  ;;  %v3517_v63 = vshrl.u32 %v6688_v56, 16 }
 0x227   : > { %v3681_v53 = vrot.slane %v3679_v52, 4  ;;  %v3682_v29 = vrot.slane %v6688_v56, 5  ;;  %v6699_v10 = vmax.bf16 %v3677_v15, %v3641_v19  ;;  %v3680_v57 = vsel %vm6681_vm9, %v3678_v34, %v3679_v52  ;;  %3455 = vst.msk [vmem:[#allocation2 + $0x28] sm:$0xff] %vm6611_vm3, %v4534_v45 }
 0x228   : > { %v3506_v24 = vsel %vm6666_vm6, %v3501_v47, %v3505_v36  ;;  %v3510_v18 = vor.u32 %v3509_v12, %v3505_v36  ;;  %v3515_v43 = vrot.slane %v3513_v30, 5  ;;  %v3519_v38 = vrot.slane %v3517_v63, 4 }
 0x229   : > { %v3642_v40 = vmax.bf16 %v3506_v24, %v6647_v3  ;;  %v4616_v22 = vadd.f32 %v4615_v46, %v3206_v48  ;;  %v2443_v23 = vpop.f32.mrb[76].mxu1  ;;  %v4625_v47 = vadd.f32 %v6554_v42, %v2437_v51  ;;  %v4630_v3 = vadd.f32 %v6557_v44, %v2439_v37 }
 0x22a   : > { %v3511_v7 = vrot.slane %v3510_v18, 4  ;;  %v3520_v5 = vor.u32 %v3519_v38, %v3515_v43  ;;  %v3216_v6 = vpop.f32.mrb[68].mxu0  ;;  %v4635_v19 = vadd.f32 %v6567_v27, %v2443_v23  ;;  %v2445_v52 = vpop.f32.mrb[77].mxu1  ;;  %v3683_v48 = vsel %vm6681_vm9, %v3681_v53, %v3682_v29 }
 0x22b   : > { %v6705_v58 = vmax.bf16 %v3680_v57, %v3642_v40  ;;  %v3218_v16 = vpop.f32.mrb[69].mxu0  ;;  %v3307_v41 = vadd.f32 %v4616_v22, %v6582_v39  ;;  %v4621_v14 = vadd.f32 %v4620_v8, %v3208_v0  ;;  %v2447_v61 = vpop.f32.mrb[78].mxu1  ;;  %v4626_v24 = vadd.f32 %v4625_v47, %v3210_v21 }
 0x22c   : > { %v6714_v46 = vld [vmem:[#allocation2 + $0x20] sm:$0xff]  ;;  %v6717_v36 = vpop.f32.mrb[70].mxu0  ;;  %v3516_v27 = vsel %vm6666_vm6, %v3511_v7, %v3515_v43  ;;  %v2449_v37 = vpop.f32.mrb[79].mxu1  ;;  %v3521_v30 = vrot.slane %v3520_v5, 4  ;;  %v4631_v18 = vadd.f32 %v4630_v3, %v3212_v28  ;;  %v3684_v43 = vrot.slane %v3682_v29, 4 }
 0x22d   : > { %v4503_v42 = vcombine.low %v6699_v10, %v6705_v58  ;;  %v4504_v44 = vcombine.high %v6699_v10, %v6705_v58  ;;  %v3523_v51 = vshll.u32 %v6714_v46, 16  ;;  %v3222_v12 = vpop.f32.mrb[71].mxu0  ;;  %v3527_v63 = vshrl.u32 %v6714_v46, 16 }
 0x22e   : > { %v3337_v0 = vmax.f32 %v3307_v41, 0.0  ;;  %v3308_v15 = vadd.f32 %v4621_v14, %v6584_v55  ;;  %v3685_v53 = vrot.slane %v6714_v46, 5  ;;  %v3643_v38 = vmax.bf16 %v3516_v27, %v6673_v32  ;;  %v6736_v41 = vld [vmem:[#allocation2 + $0x28] sm:$0xff] }
 0x22f   : > { %3816 = vst.msk [vmem:[#allocation3 + $0x8] sm:$0xff] %vm602_vm0, %v4504_v44  ;;  %v3525_v34 = vrot.slane %v3523_v51, 5  ;;  %v3529_v40 = vrot.slane %v3527_v63, 4  ;;  %v3309_v7 = vadd.f32 %v4626_v24, %v6582_v39  ;;  %v3310_v5 = vadd.f32 %v4631_v18, %v6584_v55 }
 0x230   : > { %v3338_v57 = vmax.f32 %v3308_v15, 0.0  ;;  %v4636_v22 = vadd.f32 %v4635_v19, %v3216_v6  ;;  %v4640_v28 = vadd.f32 %v6574_v25, %v2445_v52  ;;  %v3686_v47 = vsel %vm6681_vm9, %v3684_v43, %v3685_v53 }
 0x231   : > { %v3526_v45 = vsel %vm6666_vm6, %v3521_v30, %v3525_v34  ;;  %v3530_v8 = vor.u32 %v3529_v40, %v3525_v34  ;;  %v2453_v32 = vpop.f32.mrb[80].mxu1  ;;  %v3533_v3 = vshll.u32 %v6736_v41, 16  ;;  %v3537_v14 = vshrl.u32 %v6736_v41, 16 }
 0x232   : > { %v3644_v23 = vmax.bf16 %v3526_v45, %v6688_v56  ;;  %v4535_v21 = vpack.c.bf16 %v3338_v57, %v3337_v0  ;;  %v3226_v29 = vpop.f32.mrb[72].mxu0  ;;  %v3339_v44 = vmax.f32 %v3309_v7, 0.0  ;;  %v2455_v27 = vpop.f32.mrb[81].mxu1  ;;  %v3733_v19 = vmax.bf16 %v3683_v48, %v3643_v38 }
 0x233   : > { %v3228_v6 = vpop.f32.mrb[73].mxu0  ;;  %v3340_v56 = vmax.f32 %v3310_v5, 0.0  ;;  %v3311_v25 = vadd.f32 %v4636_v22, %v6582_v39  ;;  %v2457_v52 = vpop.f32.mrb[82].mxu1  ;;  %v3531_v63 = vrot.slane %v3530_v8, 4  ;;  %v3535_v0 = vrot.slane %v3533_v3, 5 }
 0x234   : > { %v3734_v51 = vmax.bf16 %v3686_v47, %v3644_v23  ;;  %3456 = vst.msk [vmem:[#allocation2 + $0x30] sm:$0xff] %vm6611_vm3, %v4535_v21  ;;  %v3230_v30 = vpop.f32.mrb[74].mxu0  ;;  %v2459_v15 = vpop.f32.mrb[83].mxu1  ;;  %v3539_v43 = vrot.slane %v3537_v14, 4  ;;  %v3687_v48 = vrot.slane %v3685_v53, 4  ;;  %v4641_v38 = vadd.f32 %v4640_v28, %v3218_v16 }
 0x235   : > { %v6746_v34 = vpop.f32.mrb[75].mxu0  ;;  %v4536_v40 = vpack.c.bf16 %v3340_v56, %v3339_v44  ;;  %v4645_v57 = vadd.f32 %v6577_v62, %v2447_v61  ;;  %v3688_v45 = vrot.slane %v6736_v41, 5  ;;  %v3341_v7 = vmax.f32 %v3311_v25, 0.0 }
 0x236   : > { %v6748_v24 = vcombine.low %v3733_v19, %v3734_v51  ;;  %v4506_v18 = vcombine.high %v3733_v19, %v3734_v51  ;;  %v4650_v5 = vadd.f32 %v6580_v1, %v2449_v37  ;;  %v4655_v22 = vadd.f32 %v6593_v11, %v2453_v32 }
 0x237   : > { %3457 = vst.msk [vmem:[#allocation2 + $0x38] sm:$0xff] %vm6611_vm3, %v4536_v40  ;;  %v3536_v8 = vsel %vm6666_vm6, %v3531_v63, %v3535_v0  ;;  %v3312_v53 = vadd.f32 %v4641_v38, %v6584_v55  ;;  %v4646_v16 = vadd.f32 %v4645_v57, %v6717_v36  ;;  %v4660_v62 = vadd.f32 %v6599_v13, %v2455_v27 }
 0x238   : > { %3818 = vst.msk [vmem:[#allocation3 + $0x18] sm:$0xff] %vm602_vm0, %v4506_v18  ;;  %v3540_v61 = vor.u32 %v3539_v43, %v3535_v0  ;;  %v4651_v23 = vadd.f32 %v4650_v5, %v3222_v12  ;;  %v4656_v21 = vadd.f32 %v4655_v22, %v3226_v29  ;;  %v4665_v28 = vadd.f32 %v6603_v60, %v2457_v52 }
 0x239   : > { %v2463_v47 = vpop.f32.mrb[84].mxu1  ;;  %v3342_v11 = vmax.f32 %v3312_v53, 0.0  ;;  %v3313_v37 = vadd.f32 %v4646_v16, %v6582_v39  ;;  %v4661_v32 = vadd.f32 %v4660_v62, %v3228_v6  ;;  %v4670_v14 = vadd.f32 %v6607_v54, %v2459_v15 }
 0x23a   : > { %v6763_v3 = vpop.f32.mrb[76].mxu0  ;;  %v6769_v44 = vpop.f32.mrb[85].mxu1  ;;  %v3645_v13 = vmax.bf16 %v3536_v8, %v6714_v46  ;;  %v3314_v29 = vadd.f32 %v4651_v23, %v6584_v55  ;;  %v3315_v6 = vadd.f32 %v4656_v21, %v6582_v39  ;;  %v3541_v46 = vrot.slane %v3540_v61, 4 }
 0x23b   : > { %v6765_v1 = vld [vmem:[#allocation2 + $0x30] sm:$0xff]  ;;  %v6771_v36 = vpop.f32.mrb[77].mxu0  ;;  %v2467_v27 = vpop.f32.mrb[86].mxu1  ;;  %v4537_v51 = vpack.c.bf16 %v3342_v11, %v3341_v7  ;;  %v3343_v56 = vmax.f32 %v3313_v37, 0.0  ;;  %v3316_v54 = vadd.f32 %v4661_v32, %v6584_v55  ;;  %v4666_v57 = vadd.f32 %v4665_v28, %v3230_v30 }
 0x23c   : > { %v3543_v12 = vshll.u32 %v6765_v1, 16  ;;  %v3547_v60 = vshrl.u32 %v6765_v1, 16  ;;  %v6777_v19 = vpop.f32.mrb[78].mxu0  ;;  %v6781_v25 = vpop.f32.mrb[87].mxu1  ;;  %v3691_v15 = vrot.slane %v6765_v1, 5  ;;  %v3344_v43 = vmax.f32 %v3314_v29, 0.0 }
 0x23d   : > { %v6783_v52 = vpop.f32.mrb[79].mxu0  ;;  %3458 = vst.msk [vmem:[#allocation2 + $0x40] sm:$0xff] %vm6611_vm3, %v4537_v51  ;;  %v3345_v40 = vmax.f32 %v3315_v6, 0.0  ;;  %v3346_v38 = vmax.f32 %v3316_v54, 0.0  ;;  %v3690_v7 = vrot.slane %v3688_v45, 4  ;;  %v3689_v53 = vsel %vm6681_vm9, %v3687_v48, %v3688_v45 }
 0x23e   : > { %v3545_v63 = vrot.slane %v3543_v12, 5  ;;  %v3549_v0 = vrot.slane %v3547_v60, 4  ;;  %v6786_v18 = vld [vmem:[#allocation2 + $0x38] sm:$0xff]  ;;  %v4538_v61 = vpack.c.bf16 %v3344_v43, %v3343_v56  ;;  %v3735_v32 = vmax.bf16 %v3689_v53, %v3645_v13 }
 0x23f   : > { %v3553_v8 = vshll.u32 %v6786_v18, 16  ;;  %v3557_v62 = vshrl.u32 %v6786_v18, 16  ;;  %v3692_v21 = vsel %vm6681_vm9, %v3690_v7, %v3691_v15  ;;  %v4539_v28 = vpack.c.bf16 %v3346_v38, %v3345_v40  ;;  %v6810_v29 = vld [vmem:[#allocation3 + $0x18] sm:$0xff] }
 0x240   : > { %v3546_v5 = vsel %vm6666_vm6, %v3541_v46, %v3545_v63  ;;  %v3550_v22 = vor.u32 %v3549_v0, %v3545_v63  ;;  %3459 = vst.msk [vmem:[#allocation2 + $0x48] sm:$0xff] %vm6611_vm3, %v4538_v61  ;;  %v3693_v51 = vrot.slane %v3691_v15, 4  ;;  %v3694_v56 = vrot.slane %v6786_v18, 5 }
 0x241   : > { %v3646_v16 = vmax.bf16 %v3546_v5, %v6736_v41  ;;  %v3555_v30 = vrot.slane %v3553_v8, 5  ;;  %v6799_v11 = vpop.f32.mrb[88].mxu1  ;;  %v3559_v60 = vrot.slane %v3557_v62, 4  ;;  %v3317_v41 = vadd.f32 %v4666_v57, %v6582_v39  ;;  %3460 = vst.msk [vmem:[#allocation2 + $0x50] sm:$0xff] %vm6611_vm3, %v4539_v28  ;;  %v3830_v57 = vld [vmem:[#allocation3 + $0x8] sm:$0xff] }
 0x242   : > { %v3551_v23 = vrot.slane %v3550_v22, 4  ;;  %v6801_v37 = vpop.f32.mrb[88].mxu0  ;;  %v6806_v48 = vpop.f32.mrb[89].mxu1  ;;  %v4671_v13 = vadd.f32 %v4670_v14, %v6746_v34  ;;  %v4675_v6 = vadd.f32 %v6625_v9, %v2463_v47  ;;  %v4680_v9 = vadd.f32 %v6633_v4, %v6769_v44 }
 0x243   : > { %v3736_v12 = vmax.bf16 %v3692_v21, %v3646_v16  ;;  %v6808_v45 = vpop.f32.mrb[89].mxu0  ;;  %v2477_v54 = vpop.f32.mrb[90].mxu1  ;;  %v3560_v40 = vor.u32 %v3559_v60, %v3555_v30  ;;  %v4685_v34 = vadd.f32 %v6637_v2, %v2467_v27  ;;  %v3841_v47 = vmax.bf16 %v6748_v24, %v4503_v42 }
 0x244   : > { %v3250_v46 = vpop.f32.mrb[90].mxu0  ;;  %v3556_v43 = vsel %vm6666_vm6, %v3551_v23, %v3555_v30  ;;  %v2478_v38 = vpop.f32.mrb[91].mxu1  ;;  %v3473_v7 = vld [vmem:[#allocation2 + $0x40] sm:$0xff]  ;;  %v3318_v5 = vadd.f32 %v4671_v13, %v6584_v55  ;;  %v4676_v22 = vadd.f32 %v4675_v6, %v6763_v3  ;;  %v3842_v14 = vmax.bf16 %v6810_v29, %v3830_v57 }
 0x245   : > { %v6817_v63 = vcombine.low %v3735_v32, %v3736_v12  ;;  %v4508_v0 = vcombine.high %v3735_v32, %v3736_v12  ;;  %v3251_v15 = vpop.f32.mrb[91].mxu0  ;;  %v3347_v8 = vmax.f32 %v3317_v41, 0.0  ;;  %v3695_v53 = vsel %vm6681_vm9, %v3693_v51, %v3694_v56 }
 0x246   : > { %v3563_v16 = vshll.u32 %v3473_v7, 16  ;;  %v3567_v3 = vshrl.u32 %v3473_v7, 16  ;;  %v3348_v62 = vmax.f32 %v3318_v5, 0.0  ;;  %v3647_v4 = vmax.bf16 %v3556_v43, %v6765_v1 }
 0x247   : > { %3820 = vst.msk [vmem:[#allocation3 + $0x28] sm:$0xff] %vm602_vm0, %v4508_v0  ;;  %v4681_v2 = vadd.f32 %v4680_v9, %v6771_v36  ;;  %v4686_v10 = vadd.f32 %v4685_v34, %v6777_v19  ;;  %v4690_v58 = vadd.f32 %v6641_v31, %v6781_v25  ;;  %v3561_v42 = vrot.slane %v3560_v40, 4  ;;  %v3474_v23 = vld [vmem:[#allocation2 + $0x48] sm:$0xff] }
 0x248   : > { %v3565_v44 = vrot.slane %v3563_v16, 5  ;;  %v3569_v27 = vrot.slane %v3567_v3, 4  ;;  %v3697_v61 = vrot.slane %v3473_v7, 5  ;;  %v3696_v21 = vrot.slane %v3694_v56, 4  ;;  %v6839_v32 = vld [vmem:[#allocation2 + $0x50] sm:$0xff] }
 0x249   : > { %v3573_v30 = vshll.u32 %v3474_v23, 16  ;;  %v3577_v28 = vshrl.u32 %v3474_v23, 16  ;;  %v4540_v12 = vpack.c.bf16 %v3348_v62, %v3347_v8  ;;  %v3853_v1 = vmax.bf16 %v6817_v63, %v3841_v47 }
 0x24a   : > { %v3566_v36 = vsel %vm6666_vm6, %v3561_v42, %v3565_v44  ;;  %v3570_v19 = vor.u32 %v3569_v27, %v3565_v44  ;;  %v3583_v31 = vshll.u32 %v6839_v32, 16  ;;  %v3737_v25 = vmax.bf16 %v3695_v53, %v3647_v4 }
 0x24b   : > { %v3648_v60 = vmax.bf16 %v3566_v36, %v6786_v18  ;;  %v3575_v41 = vrot.slane %v3573_v30, 5  ;;  %v3579_v51 = vrot.slane %v3577_v28, 4  ;;  %3461 = vst.msk [vmem:[#allocation2 + $0x58] sm:$0xff] %vm6611_vm3, %v4540_v12  ;;  %v3698_v6 = vsel %vm6681_vm9, %v3696_v21, %v3697_v61 }
 0x24c   : > { %v3571_v13 = vrot.slane %v3570_v19, 4  ;;  %v3699_v54 = vrot.slane %v3697_v61, 4  ;;  %v3319_v46 = vadd.f32 %v4676_v22, %v6582_v39  ;;  %v3700_v38 = vrot.slane %v3474_v23, 5 }
 0x24d   : > { %v3738_v43 = vmax.bf16 %v3698_v6, %v3648_v60  ;;  %v3580_v40 = vor.u32 %v3579_v51, %v3575_v41  ;;  %v3585_v15 = vrot.slane %v3583_v31, 5  ;;  %v3587_v57 = vshrl.u32 %v6839_v32, 16 }
 0x24e   : > { %v6849_v56 = vld [vmem:[#allocation3 + $0x28] sm:$0xff]  ;;  %v3576_v18 = vsel %vm6666_vm6, %v3571_v13, %v3575_v41  ;;  %v3703_v5 = vrot.slane %v6839_v32, 5  ;;  %v3702_v53 = vrot.slane %v3700_v38, 4  ;;  %v3320_v16 = vadd.f32 %v4681_v2, %v6584_v55  ;;  %v6993_v13 = vld [vmem:[#allocation4_spill] sm:$0xff] }
 0x24f   : > { %v3854_v0 = vmax.bf16 %v3842_v14, %v6849_v56  ;;  %v6864_v34 = vcombine.low %v3737_v25, %v3738_v43  ;;  %v4510_v47 = vcombine.high %v3737_v25, %v3738_v43  ;;  %v3581_v14 = vrot.slane %v3580_v40, 4 }
 0x250   : > { %v3649_v8 = vmax.bf16 %v3576_v18, %v3473_v7  ;;  %v3349_v4 = vmax.f32 %v3319_v46, 0.0  ;;  %v3321_v42 = vadd.f32 %v4686_v10, %v6582_v39  ;;  %v4691_v44 = vadd.f32 %v4690_v58, %v6783_v52 }
 0x251   : > { %v4517_v22 = vcombine.low %v3853_v1, %v3854_v0  ;;  %v4518_v9 = vcombine.high %v3853_v1, %v3854_v0  ;;  %3822 = vst.msk [vmem:[#allocation3 + $0x38] sm:$0xff] %vm602_vm0, %v4510_v47  ;;  %v3586_v3 = vsel %vm6666_vm6, %v3581_v14, %v3585_v15  ;;  %v3701_v27 = vsel %vm6681_vm9, %v3699_v54, %v3700_v38 }
 0x252   : > { %v6876_v62 = vld [vmem:[#allocation2 + $0x58] sm:$0xff]  ;;  %v3589_v61 = vrot.slane %v3587_v57, 4  ;;  %v3650_v21 = vmax.bf16 %v3586_v3, %v3474_v23  ;;  %v3704_v7 = vsel %vm6681_vm9, %v3702_v53, %v3703_v5  ;;  %v3350_v2 = vmax.f32 %v3320_v16, 0.0 }
 0x253   : > { %3913 = vst.msk [vmem:[%s6858_s17] sm:$0xff] %vm6611_vm3, %v4517_v22  ;;  %3914 = vst.msk [vmem:[%s6858_s17 + $0x8] sm:$0xff] %vm6611_vm3, %v4518_v9  ;;  %v3351_v30 = vmax.f32 %v3321_v42, 0.0  ;;  %v3322_v28 = vadd.f32 %v4691_v44, %v6584_v55  ;;  %v2585_v12 = vadd.f32 %v6461_v35, %v6799_v11  ;;  %v3739_v10 = vmax.bf16 %v3701_v27, %v3649_v8 }
 0x254   : > { %v3740_v1 = vmax.bf16 %v3704_v7, %v3650_v21  ;;  %v3593_v52 = vshll.u32 %v6876_v62, 16  ;;  %v3597_v58 = vshrl.u32 %v6876_v62, 16  ;;  %v4541_v36 = vpack.c.bf16 %v3350_v2, %v3349_v4 }
 0x255   : > { %v3352_v23 = vmax.f32 %v3322_v28, 0.0  ;;  %v2619_v19 = vadd.f32 %v2585_v12, %v6650_v50  ;;  %v3843_v31 = vmax.bf16 %v6817_v63, %v6748_v24  ;;  %v3844_v25 = vmax.bf16 %v6849_v56, %v6810_v29 }
 0x256   : > { %v6896_v60 = vcombine.low %v3739_v10, %v3740_v1  ;;  %v4512_v41 = vcombine.high %v3739_v10, %v3740_v1  ;;  %v3590_v11 = vor.u32 %v3589_v61, %v3585_v15  ;;  %3462 = vst.msk [vmem:[#allocation2 + $0x60] sm:$0xff] %vm6611_vm3, %v4541_v36  ;;  %v3247_v50 = vadd.f32 %v6801_v37, %v6559_v33 }
 0x257   : > { %v4542_v51 = vpack.c.bf16 %v3352_v23, %v3351_v30  ;;  %v2587_v24 = vadd.f32 %v6993_v13, %v6806_v48  ;;  %v3855_v29 = vmax.bf16 %v6864_v34, %v3843_v31  ;;  %v3595_v54 = vrot.slane %v3593_v52, 5 }
 0x258   : > { %v6898_v35 = vld [vmem:[#allocation3 + $0x38] sm:$0xff]  ;;  %3824 = vst.msk [vmem:[#allocation3 + $0x48] sm:$0xff] %vm602_vm0, %v4512_v41  ;;  %v3599_v46 = vrot.slane %v3597_v58, 4  ;;  %v3281_v0 = vadd.f32 %v3247_v50, %v2619_v19  ;;  %v3249_v37 = vadd.f32 %v6808_v45, %v6562_v20  ;;  %v3591_v48 = vrot.slane %v3590_v11, 4 }
 0x259   : > { %v3856_v6 = vmax.bf16 %v3844_v25, %v6898_v35  ;;  %3463 = vst.msk [vmem:[#allocation2 + $0x68] sm:$0xff] %vm6611_vm3, %v4542_v51  ;;  %v2620_v43 = vadd.f32 %v2587_v24, %v6660_v26  ;;  %v3845_v57 = vmax.bf16 %v6864_v34, %v6817_v63  ;;  %v3846_v26 = vmax.bf16 %v6898_v35, %v6849_v56 }
 0x25a   : > { %v3323_v38 = vadd.f32 %v6582_v39, %v3281_v0  ;;  %v3600_v15 = vor.u32 %v3599_v46, %v3595_v54  ;;  %v3706_v22 = vrot.slane %v6876_v62, 5  ;;  %v3596_v9 = vsel %vm6666_vm6, %v3591_v48, %v3595_v54 }
 0x25b   : > { %v4519_v40 = vcombine.low %v3855_v29, %v3856_v6  ;;  %v4520_v33 = vcombine.high %v3855_v29, %v3856_v6  ;;  %v3282_v18 = vadd.f32 %v3249_v37, %v2620_v43  ;;  %v3705_v53 = vrot.slane %v3703_v5, 4 }
 0x25c   : > { %v3353_v8 = vmax.f32 %v3323_v38, 0.0  ;;  %v3857_v63 = vmax.bf16 %v6896_v60, %v3845_v57  ;;  %v3651_v21 = vmax.bf16 %v3596_v9, %v6839_v32  ;;  %v3708_v7 = vrot.slane %v3706_v22, 4 }
 0x25d   : > { %3915 = vst.msk [vmem:[%s6858_s17 + $0x10] sm:$0xff] %vm6611_vm3, %v4519_v40  ;;  %3916 = vst.msk [vmem:[%s6858_s17 + $0x18] sm:$0xff] %vm6611_vm3, %v4520_v33  ;;  %v3477_v20 = vld [vmem:[#allocation2 + $0x60] sm:$0xff]  ;;  %v3324_v45 = vadd.f32 %v6584_v55, %v3282_v18  ;;  %v3601_v55 = vrot.slane %v3600_v15, 4  ;;  %v3707_v10 = vsel %vm6681_vm9, %v3705_v53, %v3706_v22  ;;  %v3847_v54 = vmax.bf16 %v6896_v60, %v6864_v34 }
 0x25e   : > { %v3603_v47 = vshll.u32 %v3477_v20, 16  ;;  %v3607_v14 = vshrl.u32 %v3477_v20, 16  ;;  %v3709_v44 = vrot.slane %v3477_v20, 5  ;;  %v3741_v52 = vmax.bf16 %v3707_v10, %v3651_v21 }
 0x25f   : > { %v6927_v39 = vld [vmem:[#allocation3 + $0x48] sm:$0xff]  ;;  %v3354_v3 = vmax.f32 %v3324_v45, 0.0 }
 0x260   : > { %v3858_v56 = vmax.bf16 %v3846_v26, %v6927_v39  ;;  %v3478_v16 = vld [vmem:[#allocation2 + $0x68] sm:$0xff]  ;;  %v3605_v4 = vrot.slane %v3603_v47, 5  ;;  %v3609_v42 = vrot.slane %v3607_v14, 4  ;;  %v3710_v32 = vsel %vm6681_vm9, %v3708_v7, %v3709_v44 }
 0x261   : > { %v3613_v2 = vshll.u32 %v3478_v16, 16  ;;  %v3617_v30 = vshrl.u32 %v3478_v16, 16  ;;  %v4543_v28 = vpack.c.bf16 %v3354_v3, %v3353_v8  ;;  %v3712_v51 = vrot.slane %v3478_v16, 5 }
 0x262   : > { %v4521_v27 = vcombine.low %v3857_v63, %v3858_v56  ;;  %v4522_v61 = vcombine.high %v3857_v63, %v3858_v56  ;;  %v3606_v5 = vsel %vm6666_vm6, %v3601_v55, %v3605_v4  ;;  %v3610_v1 = vor.u32 %v3609_v42, %v3605_v4 }
 0x263   : > { %v3652_v12 = vmax.bf16 %v3606_v5, %v6876_v62  ;;  %3464 = vst.msk [vmem:[#allocation2 + $0x70] sm:$0xff] %vm6611_vm3, %v4543_v28  ;;  %v3615_v36 = vrot.slane %v3613_v2, 5  ;;  %v3619_v23 = vrot.slane %v3617_v30, 4  ;;  %v3711_v13 = vrot.slane %v3709_v44, 4 }
 0x264   : > { %3917 = vst.msk [vmem:[%s6858_s17 + $0x20] sm:$0xff] %vm6611_vm3, %v4521_v27  ;;  %3918 = vst.msk [vmem:[%s6858_s17 + $0x28] sm:$0xff] %vm6611_vm3, %v4522_v61  ;;  %v3611_v25 = vrot.slane %v3610_v1, 4  ;;  %v3848_v46 = vmax.bf16 %v6927_v39, %v6898_v35  ;;  %v3714_v40 = vrot.slane %v3712_v51, 4 }
 0x265   : > { %v3742_v58 = vmax.bf16 %v3710_v32, %v3652_v12  ;;  %v3620_v62 = vor.u32 %v3619_v23, %v3615_v36  ;;  %v3713_v18 = vsel %vm6681_vm9, %v3711_v13, %v3712_v51 }
 0x266   : > { %v3616_v11 = vsel %vm6666_vm6, %v3611_v25, %v3615_v36 }
 0x267   : > { %v4513_v19 = vcombine.low %v3741_v52, %v3742_v58  ;;  %v4514_v31 = vcombine.high %v3741_v52, %v3742_v58  ;;  %v3621_v24 = vrot.slane %v3620_v62, 4  ;;  %v3653_v0 = vmax.bf16 %v3616_v11, %v3477_v20 }
 0x269   : > { %3826 = vst.msk [vmem:[#allocation3 + $0x58] sm:$0xff] %vm602_vm0, %v4514_v31  ;;  %v3859_v37 = vmax.bf16 %v4513_v19, %v3847_v54  ;;  %v3743_v35 = vmax.bf16 %v3713_v18, %v3653_v0  ;;  %v3849_v20 = vmax.bf16 %v4513_v19, %v6896_v60 }
 0x26a   : > { %v3479_v41 = vld [vmem:[#allocation2 + $0x70] sm:$0x11] }
 0x26b   : > { %v3623_v50 = vshll.u32 %v3479_v41, 16  ;;  %v3715_v6 = vrot.slane %v3479_v41, 5 }
 0x26d   : > { %v3625_v29 = vrot.slane %v3623_v50, 5  ;;  %v3716_v15 = vsel %vm6681_vm9, %v3714_v40, %v3715_v6 }
 0x26f   : > { %v3626_v33 = vsel %vm6666_vm6, %v3621_v24, %v3625_v29 }
 0x270   : > { %v3840_v43 = vld [vmem:[#allocation3 + $0x58] sm:$0xff]  ;;  %v3654_v38 = vmax.bf16 %v3626_v33, %v3478_v16 }
 0x271   : > { %v3860_v48 = vmax.bf16 %v3848_v46, %v3840_v43  ;;  %v3850_v59 = vmax.bf16 %v3840_v43, %v6927_v39 }
 0x272   : > { %v3744_v26 = vmax.bf16 %v3716_v15, %v3654_v38 }
 0x273   : > { %v4523_v34 = vcombine.low %v3859_v37, %v3860_v48  ;;  %v4524_v57 = vcombine.high %v3859_v37, %v3860_v48 }
 0x274   : > { %v4515_v49 = vcombine.low %v3743_v35, %v3744_v26  ;;  %v4516_v22 = vcombine.high %v3743_v35, %v3744_v26 }
 0x275   : > { %3919 = vst.msk [vmem:[%s6858_s17 + $0x30] sm:$0xff] %vm6611_vm3, %v4523_v34  ;;  %3920 = vst.msk [vmem:[%s6858_s17 + $0x38] sm:$0xff] %vm6611_vm3, %v4524_v57 }
 0x276   : > { %3828 = vst.msk [vmem:[#allocation3 + $0x68] sm:$0xff] %vm602_vm0, %v4516_v22  ;;  %v3861_v9 = vmax.bf16 %v4515_v49, %v3849_v20 }
 0x27d   : > { %v3852_v45 = vld [vmem:[#allocation3 + $0x68] sm:$0xff] }
 0x27e   : > { %v3862_v47 = vmax.bf16 %v3852_v45, %v3850_v59 }
 0x280   : > { %v4525_v14 = vcombine.low %v3861_v9, %v3862_v47  ;;  %v4526_v8 = vcombine.high %v3861_v9, %v3862_v47 }
 0x282   : > { %3921 = vst.msk [vmem:[%s6858_s17 + $0x40] sm:$0xff] %vm6611_vm3, %v4525_v14  ;;  %3922 = vst.msk [vmem:[%s6858_s17 + $0x48] sm:$0xff] %vm6611_vm3, %v4526_v8 }
 0x283 PF: > { %s13_s12 = sadd.s32 1, %s5265_s12  }
 0x284   : > { %p10_p4 = scmp.ge.s32.totalorder %s13_s12, 4  }
 0x286   :  { %12 = sbr.rel (!%p10_p4) target bundleno = 1 (0x1), region = 66 }

// kernel: finetune_net_forward.8
= control target key start
LH: loop header
LB: loop body
LE: loop exit
PB: predicated region body
PF: predicated region fallthrough
CT: control target
= control target key end

     0   :  { %s4948_s12 = smov 0   ;;  %s6168_s0 = inlined_call_operand.vmem [shape: bf16[2,40,576], index: 0, kind: input, shape index: {}]   ;;  %s6169_s1 = inlined_call_operand.vmem [shape: bf16[3,576,384], index: 1, kind: input, shape index: {}]   ;;  %s6170_s2 = inlined_call_operand.vmem [shape: f32[1,384], index: 2, kind: input, shape index: {}]   ;;  %s6171_s3 = inlined_call_operand.vmem [shape: bf16[2,24,384], index: 3, kind: output, shape index: {}]  }
   0x1 LB: > { %s3513_s13 = sadd.s32 4294967295, %s4925_s12   ;;  %p3517_p0 = scmp.ge.s32.totalorder %s4925_s12, 1  ;;  %s4925_s12 = sphi %s4948_s12, %s13_s12  }
   0x2   : > { %p137_p1 = scmp.lt.s32.totalorder %s4925_s12, 3 }
   0x4   : > { %p138_p2 = pnand %p3517_p0, %p137_p1 }
   0x5   : > { %v4453_v0 = vld [vmem:[%s6169_s1 + $0x364] ss:$12 sps:$4 sm:$0xff] (!%p138_p2)   ;;  %v4457_v2 = vld [vmem:[%s6169_s1 + $0x360] ss:$12 sps:$4 sm:$0xff] (!%p138_p2)   ;;  %v4459_v4 = vld [vmem:[%s6169_s1 + $0x37c] ss:$12 sps:$4 sm:$0xff] (!%p138_p2)  }
   0x6   : > { %141 = sbr.rel (%p138_p2) target bundleno = 575 (0x23f), region = 32  ;;  %v4455_v1 = vld [vmem:[%s6169_s1 + $0x4e4] ss:$12 sps:$4 sm:$0xff] (!%p138_p2)   ;;  %1098 = vmatprep.subr.bf16.mxu1 (!%p138_p2), %v4453_v0  ;;  %v4458_v3 = vld [vmem:[%s6169_s1 + $0x4e0] ss:$12 sps:$4 sm:$0xff] (!%p138_p2)   ;;  %p161_p3 = scmp.lt.s32.totalorder (!%p138_p2), %s3513_s13, 1 }
   0x7   : > { %1149 = vmatprep.subr.bf16.mxu0 (!%p138_p2), %v4455_v1  ;;  %1099 = vmatpush1.bf16.msra.mxu1 (!%p138_p2), %v4457_v2  ;;  %v4461_v5 = vld [vmem:[%s6169_s1 + $0x4fc] ss:$12 sps:$4 sm:$0xff] (!%p138_p2)   ;;  %v4463_v6 = vld [vmem:[%s6169_s1 + $0x378] ss:$12 sps:$4 sm:$0xff] (!%p138_p2)   ;;  %v4465_v8 = vld [vmem:[%s6169_s1 + $0x394] ss:$12 sps:$4 sm:$0xff] (!%p138_p2)  }
   0x8   : > { %1150 = vmatpush1.bf16.msra.mxu0 (!%p138_p2), %v4458_v3  ;;  %1100 = vmatprep.subr.bf16.mxu1 (!%p138_p2), %v4459_v4  ;;  %v4464_v7 = vld [vmem:[%s6169_s1 + $0x4f8] ss:$12 sps:$4 sm:$0xff] (!%p138_p2)   ;;  %v4467_v9 = vld [vmem:[%s6169_s1 + $0x514] ss:$12 sps:$4 sm:$0xff] (!%p138_p2)   ;;  %v4469_v10 = vld [vmem:[%s6169_s1 + $0x390] ss:$12 sps:$4 sm:$0xff] (!%p138_p2)  }
   0x9   : > { %1151 = vmatprep.subr.bf16.mxu0 (!%p138_p2), %v4461_v5  ;;  %v4470_v11 = vld [vmem:[%s6169_s1 + $0x510] ss:$12 sps:$4 sm:$0xff] (!%p138_p2)   ;;  %v4471_v12 = vld [vmem:[%s6169_s1 + $0x3ac] ss:$12 sps:$4 sm:$0xff] (!%p138_p2)   ;;  %v4475_v14 = vld [vmem:[%s6169_s1 + $0x3a8] ss:$12 sps:$4 sm:$0xff] (!%p138_p2)  }
   0xa   : > { %v4473_v13 = vld [vmem:[%s6169_s1 + $0x52c] ss:$12 sps:$4 sm:$0xff] (!%p138_p2)   ;;  %v4476_v15 = vld [vmem:[%s6169_s1 + $0x528] ss:$12 sps:$4 sm:$0xff] (!%p138_p2)   ;;  %v4477_v16 = vld [vmem:[%s6169_s1 + $0x3c4] ss:$12 sps:$4 sm:$0xff] (!%p138_p2)  }
   0xb   : > { %1101 = vmatpush1.bf16.msra.mxu1 (!%p138_p2), %v4463_v6  ;;  %v4479_v17 = vld [vmem:[%s6169_s1 + $0x544] ss:$12 sps:$4 sm:$0xff] (!%p138_p2)   ;;  %v4481_v18 = vld [vmem:[%s6169_s1 + $0x3c0] ss:$12 sps:$4 sm:$0xff] (!%p138_p2)   ;;  %v4483_v20 = vld [vmem:[%s6169_s1 + $0x3dc] ss:$12 sps:$4 sm:$0xff] (!%p138_p2)  }
   0xc   : > { %1152 = vmatpush1.bf16.msra.mxu0 (!%p138_p2), %v4464_v7  ;;  %1102 = vmatprep.subr.bf16.mxu1 (!%p138_p2), %v4465_v8  ;;  %v4482_v19 = vld [vmem:[%s6169_s1 + $0x540] ss:$12 sps:$4 sm:$0xff] (!%p138_p2)   ;;  %v4485_v21 = vld [vmem:[%s6169_s1 + $0x55c] ss:$12 sps:$4 sm:$0xff] (!%p138_p2)   ;;  %v4487_v22 = vld [vmem:[%s6169_s1 + $0x3d8] ss:$12 sps:$4 sm:$0xff] (!%p138_p2)  }
   0xd   : > { %1153 = vmatprep.subr.bf16.mxu0 %v4467_v9  ;;  %v4488_v23 = vld [vmem:[%s6169_s1 + $0x558] ss:$12 sps:$4 sm:$0xff]   ;;  %v4489_v24 = vld [vmem:[%s6169_s1 + $0x3f4] ss:$12 sps:$4 sm:$0xff]   ;;  %v4493_v26 = vld [vmem:[%s6169_s1 + $0x3f0] ss:$12 sps:$4 sm:$0xff]  }
   0xe   : > { %v4491_v25 = vld [vmem:[%s6169_s1 + $0x574] ss:$12 sps:$4 sm:$0xff]   ;;  %v4494_v27 = vld [vmem:[%s6169_s1 + $0x570] ss:$12 sps:$4 sm:$0xff]   ;;  %v4495_v28 = vld [vmem:[%s6169_s1 + $0x40c] ss:$12 sps:$4 sm:$0xff]  }
   0xf   : > { %1103 = vmatpush1.bf16.msra.mxu1 %v4469_v10  ;;  %v4497_v29 = vld [vmem:[%s6169_s1 + $0x58c] ss:$12 sps:$4 sm:$0xff]   ;;  %v4499_v30 = vld [vmem:[%s6169_s1 + $0x408] ss:$12 sps:$4 sm:$0xff]   ;;  %v4501_v32 = vld [vmem:[%s6169_s1 + $0x424] ss:$12 sps:$4 sm:$0xff]  }
  0x10   : > { %1154 = vmatpush1.bf16.msra.mxu0 %v4470_v11  ;;  %1104 = vmatprep.subr.bf16.mxu1 %v4471_v12  ;;  %v4500_v31 = vld [vmem:[%s6169_s1 + $0x588] ss:$12 sps:$4 sm:$0xff]   ;;  %v4503_v33 = vld [vmem:[%s6169_s1 + $0x5a4] ss:$12 sps:$4 sm:$0xff]   ;;  %v4505_v34 = vld [vmem:[%s6169_s1 + $0x420] ss:$12 sps:$4 sm:$0xff]  }
  0x11   : > { %1155 = vmatprep.subr.bf16.mxu0 %v4473_v13  ;;  %v4506_v35 = vld [vmem:[%s6169_s1 + $0x5a0] ss:$12 sps:$4 sm:$0xff]   ;;  %s6173_s13 = smov (!%p161_p3, %s3513_s13), 1  ;;  %v4507_v36 = vld [vmem:[%s6169_s1 + $0x43c] ss:$12 sps:$4 sm:$0xff]   ;;  %vm1091_vm0 = vcmask 523264  }
  0x12   : > { %v4509_v37 = vld [vmem:[%s6169_s1 + $0x5bc] ss:$12 sps:$4 sm:$0xff]   ;;  %v4511_v38 = vld [vmem:[%s6169_s1 + $0x438] ss:$12 sps:$4 sm:$0xff]   ;;  %s4442_s17 = smul.u32 100, %s6173_s13 }
  0x13   : > { %1105 = vmatpush1.bf16.msra.mxu1 %v4475_v14  ;;  %v4512_v39 = vld [vmem:[%s6169_s1 + $0x5b8] ss:$12 sps:$4 sm:$0xff]   ;;  %v4513_v40 = vld [vmem:[%s6169_s1 + $0x454] ss:$12 sps:$4 sm:$0xff]   ;;  %v4517_v42 = vld [vmem:[%s6169_s1 + $0x450] ss:$12 sps:$4 sm:$0xff]  }
  0x14   : > { %1156 = vmatpush1.bf16.msra.mxu0 %v4476_v15  ;;  %1106 = vmatprep.subr.bf16.mxu1 %v4477_v16  ;;  %v4515_v41 = vld [vmem:[%s6169_s1 + $0x5d4] ss:$12 sps:$4 sm:$0xff]   ;;  %v4518_v43 = vld [vmem:[%s6169_s1 + $0x5d0] ss:$12 sps:$4 sm:$0xff]   ;;  %s5098_s30 = scalar_lea.vmem %s6168_s0, %s4442_s17  ;;  %v4519_v44 = vld [vmem:[%s6169_s1 + $0x46c] ss:$12 sps:$4 sm:$0xff]  }
  0x15   : > { %1157 = vmatprep.subr.bf16.mxu0 %v4479_v17  ;;  %v4521_v45 = vld [vmem:[%s6169_s1 + $0x5ec] ss:$12 sps:$4 sm:$0xff]   ;;  %v4523_v46 = vld [vmem:[%s6169_s1 + $0x468] ss:$12 sps:$4 sm:$0xff]   ;;  %v5119_v50 = vld [vmem:[%s5098_s30 + $0x1c] sm:$0xff]  ;;  %s4443_s15 = smul.u32 36, %s6173_s13 }
  0x16   : > { %v4524_v47 = vld [vmem:[%s6169_s1 + $0x5e8] ss:$12 sps:$4 sm:$0xff]   ;;  %v4525_v52 = vld [vmem:[%s6169_s1 + $0x484] ss:$12 sps:$4 sm:$0xff]   ;;  %v4529_v56 = vld [vmem:[%s6169_s1 + $0x480] ss:$12 sps:$4 sm:$0xff]  }
  0x17   : > { %1107 = vmatpush1.bf16.msra.mxu1 %v4481_v18  ;;  %v5113_v48 = vld [vmem:[%s5098_s30 + $0x14] sm:$0xff]  ;;  %v5116_v49 = vld [vmem:[%s5098_s30 + $0x28] sm:$0xff]  ;;  %v4527_v55 = vld [vmem:[%s6169_s1 + $0x604] ss:$12 sps:$4 sm:$0xff]   ;;  %s170_s17 = scalar_lea.vmem %s6171_s3, %s4443_s15 }
  0x18   : > { %1158 = vmatpush1.bf16.msra.mxu0 %v4482_v19  ;;  %1108 = vmatprep.subr.bf16.mxu1 %v4483_v20  ;;  %v179_v51 = vld [vmem:[%s5098_s30 + $0x30] sm:$0xff]  ;;  %v5127_v53 = vcombine.high %v5113_v48, %v5116_v49  ;;  %v4530_v57 = vld [vmem:[%s6169_s1 + $0x600] ss:$12 sps:$4 sm:$0xff]   ;;  %v4531_v58 = vld [vmem:[%s6169_s1 + $0x49c] ss:$12 sps:$4 sm:$0xff]   ;;  %v5191_v10 = vcombine.low %v5113_v48, %v5116_v49 }
  0x19   : > { %1159 = vmatprep.subr.bf16.mxu0 %v4485_v21  ;;  %v5130_v54 = vcombine.high %v5119_v50, %v179_v51  ;;  %v4533_v59 = vld [vmem:[%s6169_s1 + $0x61c] ss:$12 sps:$4 sm:$0xff]   ;;  %v4535_v60 = vld [vmem:[%s6169_s1 + $0x498] ss:$12 sps:$4 sm:$0xff]   ;;  %v4537_v62 = vld [vmem:[%s6169_s1 + $0x4b4] ss:$12 sps:$4 sm:$0xff]   ;;  %v5194_v11 = vcombine.low %v5119_v50, %v179_v51 }
  0x1a   : > { %1130 = vmatprep.mubr.bf16.mxu1 %v5127_v53  ;;  %v4536_v61 = vld [vmem:[%s6169_s1 + $0x618] ss:$12 sps:$4 sm:$0xff]   ;;  %v4539_v63 = vld [vmem:[%s6169_s1 + $0x634] ss:$12 sps:$4 sm:$0xff]   ;;  %v4541_v0 = vld [vmem:[%s6169_s1 + $0x4b0] ss:$12 sps:$4 sm:$0xff]  }
  0x1b   : > { %1109 = vmatpush1.bf16.msra.mxu1 %v4487_v22  ;;  %1181 = vmatprep.mubr.bf16.mxu0 %v5130_v54  ;;  %v4542_v1 = vld [vmem:[%s6169_s1 + $0x630] ss:$12 sps:$4 sm:$0xff]   ;;  %v4543_v2 = vld [vmem:[%s6169_s1 + $0x4cc] ss:$12 sps:$4 sm:$0xff]   ;;  %v4547_v4 = vld [vmem:[%s6169_s1 + $0x4c8] ss:$12 sps:$4 sm:$0xff]  }
  0x1c   : > { %1160 = vmatpush1.bf16.msra.mxu0 %v4488_v23  ;;  %1110 = vmatprep.subr.bf16.mxu1 %v4489_v24  ;;  %v4545_v3 = vld [vmem:[%s6169_s1 + $0x64c] ss:$12 sps:$4 sm:$0xff]   ;;  %v4548_v5 = vld [vmem:[%s6169_s1 + $0x648] ss:$12 sps:$4 sm:$0xff]   ;;  %v4555_v6 = vld [vmem:[%s6169_s1 + $0x664] ss:$12 sps:$4 sm:$0xff]  }
  0x1d   : > { %1161 = vmatprep.subr.bf16.mxu0 %v4491_v25  ;;  %v4558_v7 = vld [vmem:[%s6169_s1 + $0x4] ss:$12 sps:$4 sm:$0xff]   ;;  %v4553_v8 = vld [vmem:[%s6169_s1 + $0x660] ss:$12 sps:$4 sm:$0xff]   ;;  %v4561_v14 = vld [vmem:[%s6169_s1 + $0x67c] ss:$12 sps:$4 sm:$0xff]  }
  0x1e   : > { %v325_v9 = vld [vmem:[%s5098_s30 + $0x3c] sm:$0xff]  ;;  %v326_v12 = vld [vmem:[%s5098_s30 + $0x44] sm:$0xff]  ;;  %v4601_v51 = vld [vmem:[%s6169_s1 + $0xac] ss:$12 sps:$4 sm:$0xff]  }
  0x1f   : > { %1111 = vmatpush1.bf16.msra.mxu1 %v4493_v26  ;;  %v4556_v13 = vld [vmem:[%s6169_s1] ss:$12 sps:$4 sm:$0xff]   ;;  %v4564_v15 = vld [vmem:[%s6169_s1 + $0x1c] ss:$12 sps:$4 sm:$0xff]   ;;  %v5206_v16 = vcombine.high %v325_v9, %v325_v9  ;;  %v5208_v17 = vcombine.high %v326_v12, %v326_v12  ;;  %v4559_v18 = vld [vmem:[%s6169_s1 + $0x678] ss:$12 sps:$4 sm:$0xff]   ;;  %v5229_v23 = vcombine.low %v325_v9, %v325_v9  ;;  %v5234_v25 = vcombine.low %v326_v12, %v326_v12 }
  0x20   : > { %1162 = vmatpush1.bf16.msra.mxu0 %v4494_v27  ;;  %1112 = vmatprep.subr.bf16.mxu1 %v4495_v28  ;;  %v4562_v19 = vld [vmem:[%s6169_s1 + $0x18] ss:$12 sps:$4 sm:$0xff]   ;;  %v4569_v20 = vld [vmem:[%s6169_s1 + $0x694] ss:$12 sps:$4 sm:$0xff]   ;;  %v4567_v22 = vld [vmem:[%s6169_s1 + $0x690] ss:$12 sps:$4 sm:$0xff]  }
  0x21   : > { %1163 = vmatprep.subr.bf16.mxu0 %v4497_v29  ;;  %v4572_v21 = vld [vmem:[%s6169_s1 + $0x34] ss:$12 sps:$4 sm:$0xff]   ;;  %v4570_v24 = vld [vmem:[%s6169_s1 + $0x30] ss:$12 sps:$4 sm:$0xff]   ;;  %v4575_v26 = vld [vmem:[%s6169_s1 + $0x6ac] ss:$12 sps:$4 sm:$0xff]  }
  0x22   : > { %v4578_v27 = vld [vmem:[%s6169_s1 + $0x4c] ss:$12 sps:$4 sm:$0xff]   ;;  %v4573_v28 = vld [vmem:[%s6169_s1 + $0x6a8] ss:$12 sps:$4 sm:$0xff]   ;;  %v4626_v12 = vld [vmem:[%s6169_s1 + $0x124] ss:$12 sps:$4 sm:$0xff]  }
  0x23   : > { %1113 = vmatpush1.bf16.msra.mxu1 %v4499_v30  ;;  %v4576_v29 = vld [vmem:[%s6169_s1 + $0x48] ss:$12 sps:$4 sm:$0xff]   ;;  %v5251_v30 = vld [vmem:[%s5098_s30 + $0x24] sm:$0xf] }
  0x24   : > { %1164 = vmatpush1.bf16.msra.mxu0 %v4500_v31  ;;  %1114 = vmatprep.subr.bf16.mxu1 %v4501_v32  ;;  %v5254_v31 = vld [vmem:[%s5098_s30 + $0x38] sm:$0xf]  ;;  %v4582_v32 = vld [vmem:[%s6169_s1 + $0x428] ss:$12 sps:$4 sm:$0xff]  }
  0x25   : > { %1165 = vmatprep.subr.bf16.mxu0 %v4503_v33  ;;  %v4585_v33 = vld [vmem:[%s6169_s1 + $0x64] ss:$12 sps:$4 sm:$0xff]   ;;  %v4623_v9 = vld [vmem:[%s6169_s1 + $0x5a8] ss:$12 sps:$4 sm:$0xff]  }
  0x27   : > { %1115 = vmatpush1.bf16.msra.mxu1 %v4505_v34  ;;  %v4927_v34 = vmov 0  }
  0x28   : > { %1166 = vmatpush1.bf16.msra.mxu0 %v4506_v35  ;;  %1116 = vmatprep.subr.bf16.mxu1 %v4507_v36  ;;  %v4583_v35 = vld [vmem:[%s6169_s1 + $0x60] ss:$12 sps:$4 sm:$0xff]   ;;  %v5268_v36 = vcombine.low %v5251_v30, %v5254_v31 }
  0x29   : > { %1167 = vmatprep.subr.bf16.mxu0 %v4509_v37  ;;  %v4586_v37 = vld [vmem:[%s6169_s1 + $0x368] ss:$12 sps:$4 sm:$0xff]  }
  0x2b   : > { %1117 = vmatpush1.bf16.msra.mxu1 %v4511_v38  ;;  %v4587_v38 = vld [vmem:[%s6169_s1 + $0x440] ss:$12 sps:$4 sm:$0xff]  }
  0x2c   : > { %1168 = vmatpush1.bf16.msra.mxu0 %v4512_v39  ;;  %1118 = vmatprep.subr.bf16.mxu1 %v4513_v40  ;;  %v4590_v39 = vld [vmem:[%s6169_s1 + $0x7c] ss:$12 sps:$4 sm:$0xff]   ;;  %v4588_v40 = vld [vmem:[%s6169_s1 + $0x78] ss:$12 sps:$4 sm:$0xff]  }
  0x2d   : > { %1169 = vmatprep.subr.bf16.mxu0 %v4515_v41  ;;  %v4591_v41 = vld [vmem:[%s6169_s1 + $0x380] ss:$12 sps:$4 sm:$0xff]  }
  0x2f   : > { %1119 = vmatpush1.bf16.msra.mxu1 %v4517_v42  ;;  %v4593_v42 = vld [vmem:[%s6169_s1 + $0x458] ss:$12 sps:$4 sm:$0xff]  }
  0x30   : > { %1170 = vmatpush1.bf16.msra.mxu0 %v4518_v43  ;;  %1120 = vmatprep.subr.bf16.mxu1 %v4519_v44  ;;  %v4596_v43 = vld [vmem:[%s6169_s1 + $0x94] ss:$12 sps:$4 sm:$0xff]   ;;  %v5295_v44 = vld [vmem:[%s5098_s30 + $0x4c] ss:$0 sps:$4 sm:$0xff]  }
  0x31   : > { %1171 = vmatprep.subr.bf16.mxu0 %v4521_v45  ;;  %v4594_v45 = vld [vmem:[%s6169_s1 + $0x90] ss:$12 sps:$4 sm:$0xff]  }
  0x33   : > { %1121 = vmatpush1.bf16.msra.mxu1 %v4523_v46  ;;  %v4597_v46 = vld [vmem:[%s6169_s1 + $0x398] ss:$12 sps:$4 sm:$0xff]  }
  0x34   : > { %1172 = vmatpush1.bf16.msra.mxu0 %v4524_v47  ;;  %1122 = vmatprep.subr.bf16.mxu1 %v4525_v52  ;;  %v4598_v47 = vld [vmem:[%s6169_s1 + $0x470] ss:$12 sps:$4 sm:$0xff]   ;;  %v4599_v52 = vld [vmem:[%s6169_s1 + $0xa8] ss:$12 sps:$4 sm:$0xff]  }
  0x35   : > { %1173 = vmatprep.subr.bf16.mxu0 %v4527_v55  ;;  %v4602_v55 = vld [vmem:[%s6169_s1 + $0x3b0] ss:$12 sps:$4 sm:$0xff]  }
  0x37   : > { %1123 = vmatpush1.bf16.msra.mxu1 %v4529_v56  ;;  %v4603_v56 = vld [vmem:[%s6169_s1 + $0x488] ss:$12 sps:$4 sm:$0xff]  }
  0x38   : > { %1174 = vmatpush1.bf16.msra.mxu0 %v4530_v57  ;;  %1124 = vmatprep.subr.bf16.mxu1 %v4531_v58  ;;  %v4606_v57 = vld [vmem:[%s6169_s1 + $0xc4] ss:$12 sps:$4 sm:$0xff]   ;;  %v4604_v58 = vld [vmem:[%s6169_s1 + $0xc0] ss:$12 sps:$4 sm:$0xff]  }
  0x39   : > { %1175 = vmatprep.subr.bf16.mxu0 %v4533_v59  ;;  %v4607_v59 = vld [vmem:[%s6169_s1 + $0x3c8] ss:$12 sps:$4 sm:$0xff]  }
  0x3b   : > { %1125 = vmatpush1.bf16.msra.mxu1 %v4535_v60  ;;  %v4608_v60 = vld [vmem:[%s6169_s1 + $0x4a0] ss:$12 sps:$4 sm:$0xff]  }
  0x3c   : > { %1176 = vmatpush1.bf16.msra.mxu0 %v4536_v61  ;;  %1126 = vmatprep.subr.bf16.mxu1 %v4537_v62  ;;  %v5334_v61 = vld [vmem:[%s5098_s30] sm:$0xff] }
  0x3d   : > { %1177 = vmatprep.subr.bf16.mxu0 %v4539_v63  ;;  %v5341_v62 = vcombine.high %v5334_v61, %v5113_v48  ;;  %v4609_v63 = vld [vmem:[%s6169_s1 + $0xd8] ss:$12 sps:$4 sm:$0xff]  }
  0x3f   : > { %1127 = vmatpush1.bf16.msra.mxu1 %v4541_v0  ;;  %v4612_v0 = vld [vmem:[%s6169_s1 + $0x3e0] ss:$12 sps:$4 sm:$0xff]  }
  0x40   : > { %1178 = vmatpush1.bf16.msra.mxu0 %v4542_v1  ;;  %1128 = vmatprep.subr.bf16.mxu1 %v4543_v2  ;;  %v4613_v1 = vld [vmem:[%s6169_s1 + $0x4b8] ss:$12 sps:$4 sm:$0xff]   ;;  %v4616_v2 = vld [vmem:[%s6169_s1 + $0xf4] ss:$12 sps:$4 sm:$0xff]  }
  0x41   : > { %1179 = vmatprep.subr.bf16.mxu0 %v4545_v3  ;;  %v4614_v3 = vld [vmem:[%s6169_s1 + $0xf0] ss:$12 sps:$4 sm:$0xff]  }
  0x43   : > { %1129 = vmatpush1.bf16.msra.mxu1 %v4547_v4  ;;  %v4617_v4 = vld [vmem:[%s6169_s1 + $0x3f8] ss:$12 sps:$4 sm:$0xff]  }
  0x44   : > { %1180 = vmatpush1.bf16.msra.mxu0 %v4548_v5  ;;  %1200 = vmatprep.subr.bf16.mxu1 %v4555_v6  ;;  %v4618_v5 = vld [vmem:[%s6169_s1 + $0x4d0] ss:$12 sps:$4 sm:$0xff]   ;;  %v4621_v6 = vld [vmem:[%s6169_s1 + $0x10c] ss:$12 sps:$4 sm:$0xff]  }
  0x45   : > { %2003 = vmatprep.subr.bf16.mxu0 %v4558_v7  ;;  %v4619_v7 = vld [vmem:[%s6169_s1 + $0x108] ss:$12 sps:$4 sm:$0xff]  }
  0x46   : > { %1131 = vmatmul.mubr.bf16.vlgmr.msra.gmra.mrb[0].mxu1 %v5191_v10 }
  0x47   : > { %1182 = vmatmul.mubr.bf16.vlgmr.msra.gmra.mrb[0].mxu0 %v5194_v11  ;;  %1201 = vmatpush1.bf16.msra.mxu1 %v4553_v8  ;;  %v4622_v8 = vld [vmem:[%s6169_s1 + $0x410] ss:$12 sps:$4 sm:$0xff]  }
  0x48   : > { %2004 = vmatpush1.bf16.msra.mxu0 %v4556_v13  ;;  %1202 = vmatprep.subr.bf16.mxu1 %v4561_v14  ;;  %v4624_v13 = vld [vmem:[%s6169_s1 + $0x120] ss:$12 sps:$4 sm:$0xff]   ;;  %v4627_v14 = vld [vmem:[%s6169_s1 + $0x4e8] ss:$12 sps:$4 sm:$0xff]  }
  0x49   : > { %2005 = vmatprep.subr.bf16.mxu0 %v4564_v15  ;;  %1140 = vmatprep.mubr.bf16.mxu1 %v5206_v16  ;;  %v4628_v15 = vld [vmem:[%s6169_s1 + $0x5c0] ss:$12 sps:$4 sm:$0xff]  }
  0x4a   : > { %1191 = vmatprep.mubr.bf16.mxu0 %v5208_v17 }
  0x4b   : > { %1203 = vmatpush1.bf16.msra.mxu1 %v4559_v18  ;;  %v4631_v18 = vld [vmem:[%s6169_s1 + $0x13c] ss:$12 sps:$4 sm:$0xff]  }
  0x4c   : > { %2006 = vmatpush1.bf16.msra.mxu0 %v4562_v19  ;;  %1204 = vmatprep.subr.bf16.mxu1 %v4569_v20  ;;  %v4629_v19 = vld [vmem:[%s6169_s1 + $0x138] ss:$12 sps:$4 sm:$0xff]   ;;  %v4632_v20 = vld [vmem:[%s6169_s1 + $0x500] ss:$12 sps:$4 sm:$0xff]  }
  0x4d   : > { %2007 = vmatprep.subr.bf16.mxu0 %v4572_v21  ;;  %v4633_v21 = vld [vmem:[%s6169_s1 + $0x5d8] ss:$12 sps:$4 sm:$0xff]  }
  0x4e   : > { %1141 = vmatmul.mubr.bf16.gmra.mrb[4].mxu1 %v5229_v23 }
  0x4f   : > { %1192 = vmatmul.mubr.bf16.gmra.mrb[4].mxu0 %v5234_v25  ;;  %1205 = vmatpush1.bf16.msra.mxu1 %v4567_v22  ;;  %v4636_v22 = vld [vmem:[%s6169_s1 + $0x154] ss:$12 sps:$4 sm:$0xff]  }
  0x50   : > { %2008 = vmatpush1.bf16.msra.mxu0 %v4570_v24  ;;  %1206 = vmatprep.subr.bf16.mxu1 %v4575_v26  ;;  %v4637_v24 = vld [vmem:[%s6169_s1 + $0x518] ss:$12 sps:$4 sm:$0xff]   ;;  %v4638_v26 = vld [vmem:[%s6169_s1 + $0x5f0] ss:$12 sps:$4 sm:$0xff]  }
  0x51   : > { %2009 = vmatprep.subr.bf16.mxu0 %v4578_v27  ;;  %1232 = vmatprep.mubr.bf16.mxu1 %v4927_v34  ;;  %v4639_v27 = vld [vmem:[%s6169_s1 + $0x168] ss:$12 sps:$4 sm:$0xff]  }
  0x52   : > { %2035 = vmatprep.mubr.bf16.mxu0 %v5341_v62 }
  0x53   : > { %1207 = vmatpush1.bf16.msra.mxu1 %v4573_v28  ;;  %v4642_v28 = vld [vmem:[%s6169_s1 + $0x530] ss:$12 sps:$4 sm:$0xff]  }
  0x54   : > { %2010 = vmatpush1.bf16.msra.mxu0 %v4576_v29  ;;  %4188 = vmatprep.subr.bf16.mxu1 %v4582_v32  ;;  %v4645_v29 = vld [vmem:[%s6169_s1 + $0x608] ss:$12 sps:$4 sm:$0xff]   ;;  %v4648_v32 = vld [vmem:[%s6169_s1 + $0x184] ss:$12 sps:$4 sm:$0xff]  }
  0x55   : > { %2011 = vmatprep.subr.bf16.mxu0 %v4585_v33  ;;  %v4646_v33 = vld [vmem:[%s6169_s1 + $0x180] ss:$12 sps:$4 sm:$0xff]  }
  0x56   : > { %3782 = vmatmul.mubr.msk.bf16.vlgmr.msra.gmra.mrb[8].mxu1 %vm1091_vm0, %v5268_v36 }
  0x57   : > { %4189 = vmatpush3.bf16.msra.mxu1 %v4586_v37  ;;  %1242 = vmatprep.mubr.bf16.mxu1 %v4927_v34  ;;  %v4650_v37 = vld [vmem:[%s6169_s1 + $0x620] ss:$12 sps:$4 sm:$0xff]  }
  0x58   : > { %2012 = vmatpush1.bf16.msra.mxu0 %v4583_v35  ;;  %4190 = vmatprep.subr.bf16.mxu1 %v4587_v38  ;;  %v4649_v35 = vld [vmem:[%s6169_s1 + $0x548] ss:$12 sps:$4 sm:$0xff]   ;;  %v4651_v38 = vld [vmem:[%s6169_s1 + $0x198] ss:$12 sps:$4 sm:$0xff]  }
  0x59   : > { %2013 = vmatprep.subr.bf16.mxu0 %v4590_v39  ;;  %v4654_v39 = vld [vmem:[%s6169_s1 + $0x560] ss:$12 sps:$4 sm:$0xff]  }
  0x5b   : > { %4191 = vmatpush3.bf16.msra.mxu1 %v4591_v41  ;;  %v4660_v41 = vld [vmem:[%s6169_s1 + $0x1b4] ss:$12 sps:$4 sm:$0xff]  }
  0x5c   : > { %2014 = vmatpush1.bf16.msra.mxu0 %v4588_v40  ;;  %4192 = vmatprep.subr.bf16.mxu1 %v4593_v42  ;;  %v4656_v40 = vld [vmem:[%s6169_s1 + $0x638] ss:$12 sps:$4 sm:$0xff]   ;;  %v4658_v42 = vld [vmem:[%s6169_s1 + $0x1b0] ss:$12 sps:$4 sm:$0xff]  }
  0x5d   : > { %2015 = vmatprep.subr.bf16.mxu0 %v4596_v43  ;;  %v5471_v43 = vcombine.low %v5116_v49, %v5116_v49 }
  0x5e   : > { %3783 = vmatmul.mubr.msk.bf16.gmra.mrb[12].mxu1 %vm1091_vm0, %v5295_v44 }
  0x5f   : > { %4193 = vmatpush3.bf16.msra.mxu1 %v4597_v46  ;;  %1283 = vmatprep.mubr.bf16.mxu1 %v5127_v53  ;;  %v4611_v53 = vld [vmem:[%s6169_s1 + $0xdc] ss:$12 sps:$4 sm:$0xff]  }
  0x60   : > { %2016 = vmatpush1.bf16.msra.mxu0 %v4594_v45  ;;  %4194 = vmatprep.subr.bf16.mxu1 %v4598_v47  ;;  %v4661_v45 = vld [vmem:[%s6169_s1 + $0x578] ss:$12 sps:$4 sm:$0xff]   ;;  %v4662_v46 = vld [vmem:[%s6169_s1 + $0x650] ss:$12 sps:$4 sm:$0xff]  }
  0x61   : > { %2017 = vmatprep.subr.bf16.mxu0 %v4601_v51  ;;  %v4665_v47 = vld [vmem:[%s6169_s1 + $0x1cc] ss:$12 sps:$4 sm:$0xff]   ;;  %v4666_v51 = vld [vmem:[%s6169_s1 + $0x590] ss:$12 sps:$4 sm:$0xff]  }
  0x63   : > { %4195 = vmatpush3.bf16.msra.mxu1 %v4602_v55  ;;  %v4670_v55 = vld [vmem:[%s6169_s1 + $0x1e4] ss:$12 sps:$4 sm:$0xff]  }
  0x64   : > { %2018 = vmatpush1.bf16.msra.mxu0 %v4599_v52  ;;  %4196 = vmatprep.subr.bf16.mxu1 %v4603_v56  ;;  %v4667_v52 = vld [vmem:[%s6169_s1 + $0x668] ss:$12 sps:$4 sm:$0xff]   ;;  %v4668_v56 = vld [vmem:[%s6169_s1 + $0x1e0] ss:$12 sps:$4 sm:$0xff]  }
  0x65   : > { %2019 = vmatprep.subr.bf16.mxu0 %v4606_v57  ;;  %v4671_v57 = vld [vmem:[%s6169_s1 + $0x680] ss:$12 sps:$4 sm:$0xff]  }
  0x67   : > { %4197 = vmatpush3.bf16.msra.mxu1 %v4607_v59  ;;  %v4674_v59 = vld [vmem:[%s6169_s1 + $0x1fc] ss:$12 sps:$4 sm:$0xff]  }
  0x68   : > { %2020 = vmatpush1.bf16.msra.mxu0 %v4604_v58  ;;  %4198 = vmatprep.subr.bf16.mxu1 %v4608_v60  ;;  %v5502_v58 = vld [vmem:[%s5098_s30 + $0x8] sm:$0xff] }
  0x69   : > { %2021 = vmatprep.subr.bf16.mxu0 %v4611_v53  ;;  %v5509_v60 = vcombine.high %v5502_v58, %v5119_v50  ;;  %v4675_v53 = vld [vmem:[%s6169_s1 + $0x698] ss:$12 sps:$4 sm:$0xff]   ;;  %v4678_v50 = vld [vmem:[%s6169_s1 + $0x214] ss:$12 sps:$4 sm:$0xff]  }
  0x6b   : > { %4199 = vmatpush3.bf16.msra.mxu1 %v4612_v0  ;;  %v4682_v0 = vld [vmem:[%s6169_s1 + $0x22c] ss:$12 sps:$4 sm:$0xff]  }
  0x6c   : > { %2022 = vmatpush1.bf16.msra.mxu0 %v4609_v63  ;;  %4200 = vmatprep.subr.bf16.mxu1 %v4613_v1  ;;  %v4679_v63 = vld [vmem:[%s6169_s1 + $0x6b0] ss:$12 sps:$4 sm:$0xff]  }
  0x6d   : > { %2023 = vmatprep.subr.bf16.mxu0 %v4616_v2  ;;  %v4685_v1 = vld [vmem:[%s6169_s1 + $0x244] ss:$12 sps:$4 sm:$0xff]  }
  0x6e   : > { %v4688_v2 = vld [vmem:[%s6169_s1 + $0x304] ss:$12 sps:$4 sm:$0xff]  }
  0x6f   : > { %4201 = vmatpush3.bf16.msra.mxu1 %v4617_v4  ;;  %v4691_v4 = vld [vmem:[%s6169_s1 + $0x25c] ss:$12 sps:$4 sm:$0xff]  }
  0x70   : > { %2024 = vmatpush1.bf16.msra.mxu0 %v4614_v3  ;;  %4202 = vmatprep.subr.bf16.mxu1 %v4618_v5  ;;  %v4686_v3 = vld [vmem:[%s6169_s1 + $0x300] ss:$12 sps:$4 sm:$0xff]   ;;  %v4689_v5 = vld [vmem:[%s6169_s1 + $0x258] ss:$12 sps:$4 sm:$0xff]  }
  0x71   : > { %2025 = vmatprep.subr.bf16.mxu0 %v4621_v6  ;;  %v4692_v6 = vld [vmem:[%s6169_s1 + $0x318] ss:$12 sps:$4 sm:$0xff]  }
  0x73   : > { %4203 = vmatpush3.bf16.msra.mxu1 %v4622_v8  ;;  %v4700_v8 = vld [vmem:[%s6169_s1 + $0x334] ss:$12 sps:$4 sm:$0xff]  }
  0x74   : > { %2026 = vmatpush1.bf16.msra.mxu0 %v4619_v7  ;;  %4216 = vmatprep.subr.bf16.mxu1 %v4623_v9  ;;  %v4697_v7 = vld [vmem:[%s6169_s1 + $0x274] ss:$12 sps:$4 sm:$0xff]   ;;  %v4698_v9 = vld [vmem:[%s6169_s1 + $0x330] ss:$12 sps:$4 sm:$0xff]  }
  0x75   : > { %2027 = vmatprep.subr.bf16.mxu0 %v4626_v12  ;;  %v4703_v12 = vld [vmem:[%s6169_s1 + $0x28c] ss:$12 sps:$4 sm:$0xff]  }
  0x76   : > { %1284 = vmatmul.mubr.bf16.vlgmr.msra.gmra.mrb[16].mxu1 %v5191_v10  ;;  %v4634_v10 = vld [vmem:[%s6169_s1 + $0x150] ss:$12 sps:$4 sm:$0xff]  }
  0x77   : > { %4217 = vmatpush3.bf16.msra.mxu1 %v4627_v14  ;;  %1291 = vmatprep.mubr.bf16.mxu1 %v5206_v16  ;;  %v4641_v16 = vld [vmem:[%s6169_s1 + $0x16c] ss:$12 sps:$4 sm:$0xff]   ;;  %v4701_v14 = vld [vmem:[%s6169_s1 + $0x288] ss:$12 sps:$4 sm:$0xff]  }
  0x78   : > { %2028 = vmatpush1.bf16.msra.mxu0 %v4624_v13  ;;  %4218 = vmatprep.subr.bf16.mxu1 %v4628_v15  ;;  %v4706_v13 = vld [vmem:[%s6169_s1 + $0x34c] ss:$12 sps:$4 sm:$0xff]   ;;  %v4704_v15 = vld [vmem:[%s6169_s1 + $0x348] ss:$12 sps:$4 sm:$0xff]  }
  0x79   : > { %2029 = vmatprep.subr.bf16.mxu0 %v4631_v18  ;;  %v4709_v18 = vld [vmem:[%s6169_s1 + $0x2a4] ss:$12 sps:$4 sm:$0xff]  }
  0x7b   : > { %4219 = vmatpush3.bf16.msra.mxu1 %v4632_v20  ;;  %v4710_v20 = vld [vmem:[%s6169_s1 + $0xc8] ss:$12 sps:$4 sm:$0xff]  }
  0x7c   : > { %2030 = vmatpush1.bf16.msra.mxu0 %v4629_v19  ;;  %4220 = vmatprep.subr.bf16.mxu1 %v4633_v21  ;;  %v174_v19 = vld [vmem:[%s5098_s30 + $0x10] sm:$0xf]  ;;  %v4707_v21 = vld [vmem:[%s6169_s1 + $0x2a0] ss:$12 sps:$4 sm:$0xff]  }
  0x7d   : > { %2031 = vmatprep.subr.bf16.mxu0 %v4636_v22  ;;  %v5600_v22 = vcombine.low %v174_v19, %v5251_v30  ;;  %v4713_v30 = vld [vmem:[%s6169_s1 + $0x2b8] ss:$12 sps:$4 sm:$0xff]   ;;  %v4782_v19 = vld [vmem:[%s6169_s1 + $0x200] ss:$12 sps:$4 sm:$0xff]  }
  0x7e   : > { %1292 = vmatmul.mubr.bf16.gmra.mrb[20].mxu1 %v5229_v23  ;;  %v5434_v23 = vcombine.low %v5334_v61, %v5113_v48  ;;  %v4653_v48 = vld [vmem:[%s6169_s1 + $0x19c] ss:$12 sps:$4 sm:$0xff]   ;;  %v4672_v61 = vld [vmem:[%s6169_s1 + $0x1f8] ss:$12 sps:$4 sm:$0xff]  }
  0x7f   : > { %4221 = vmatpush3.bf16.msra.mxu1 %v4637_v24  ;;  %1331 = vmatprep.mubr.bf16.mxu1 %v5130_v54  ;;  %v5450_v54 = vcombine.high %v5116_v49, %v5116_v49  ;;  %v4663_v49 = vld [vmem:[%s6169_s1 + $0x1c8] ss:$12 sps:$4 sm:$0xff]  }
  0x80   : > { %2032 = vmatpush1.bf16.msra.mxu0 %v4634_v10  ;;  %4222 = vmatprep.subr.bf16.mxu1 %v4638_v26  ;;  %v4712_v10 = vld [vmem:[%s6169_s1 + $0x8] ss:$12 sps:$4 sm:$0xff]   ;;  %v4716_v26 = vld [vmem:[%s6169_s1 + $0xe0] ss:$12 sps:$4 sm:$0xff]  }
  0x81   : > { %2033 = vmatprep.subr.bf16.mxu0 %v4641_v16  ;;  %v4715_v24 = vld [vmem:[%s6169_s1 + $0x2bc] ss:$12 sps:$4 sm:$0xff]   ;;  %v4717_v16 = vld [vmem:[%s6169_s1 + $0x20] ss:$12 sps:$4 sm:$0xff]  }
  0x83   : > { %4223 = vmatpush3.bf16.msra.mxu1 %v4642_v28  ;;  %v4721_v28 = vld [vmem:[%s6169_s1 + $0xf8] ss:$12 sps:$4 sm:$0xff]  }
  0x84   : > { %2034 = vmatpush1.bf16.msra.mxu0 %v4639_v27  ;;  %4224 = vmatprep.subr.bf16.mxu1 %v4645_v29  ;;  %v4720_v27 = vld [vmem:[%s6169_s1 + $0x2d4] ss:$12 sps:$4 sm:$0xff]   ;;  %v4718_v29 = vld [vmem:[%s6169_s1 + $0x2d0] ss:$12 sps:$4 sm:$0xff]  }
  0x85   : > { %2054 = vmatprep.subr.bf16.mxu0 %v4648_v32  ;;  %v4722_v32 = vld [vmem:[%s6169_s1 + $0x38] ss:$12 sps:$4 sm:$0xff]  }
  0x87   : > { %2036 = vmatmul.mubr.bf16.vlgmr.msra.gmra.mrb[8].mxu0 %v5434_v23  ;;  %4225 = vmatpush3.bf16.msra.mxu1 %v4649_v35  ;;  %v4725_v35 = vld [vmem:[%s6169_s1 + $0x2ec] ss:$12 sps:$4 sm:$0xff]  }
  0x88   : > { %2055 = vmatpush1.bf16.msra.mxu0 %v4646_v33  ;;  %4226 = vmatprep.subr.bf16.mxu1 %v4650_v37  ;;  %v5634_v33 = vcombine.low %v5254_v31, %v5254_v31  ;;  %v4726_v37 = vld [vmem:[%s6169_s1 + $0x110] ss:$12 sps:$4 sm:$0xff]  }
  0x89   : > { %2056 = vmatprep.subr.bf16.mxu0 %v4653_v48  ;;  %2045 = vmatprep.mubr.bf16.mxu0 %v5450_v54  ;;  %v4723_v48 = vld [vmem:[%s6169_s1 + $0x2e8] ss:$12 sps:$4 sm:$0xff]   ;;  %v4727_v31 = vld [vmem:[%s6169_s1 + $0x50] ss:$12 sps:$4 sm:$0xff]  }
  0x8b   : > { %4227 = vmatpush3.bf16.msra.mxu1 %v4654_v39  ;;  %v4733_v39 = vld [vmem:[%s6169_s1 + $0x6c4] ss:$12 sps:$4 sm:$0xff]  }
  0x8c   : > { %2057 = vmatpush1.bf16.msra.mxu0 %v4651_v38  ;;  %4228 = vmatprep.subr.bf16.mxu1 %v4656_v40  ;;  %v4730_v38 = vld [vmem:[%s6169_s1 + $0x128] ss:$12 sps:$4 sm:$0xff]   ;;  %v4917_v40 = vld [vmem:[%s5098_s30 + $0x1c] sm:$0xff] }
  0x8d   : > { %2058 = vmatprep.subr.bf16.mxu0 %v4660_v41  ;;  %v5659_v41 = vcombine.low %v5502_v58, %v4917_v40  ;;  %v4744_v58 = vld [vmem:[%s6169_s1 + $0x6f0] ss:$12 sps:$4 sm:$0xff]  }
  0x8e   : > { %v4805_v40 = vld [vmem:[%s6169_s1 + $0x350] ss:$12 sps:$4 sm:$0xff]  }
  0x8f   : > { %2046 = vmatmul.mubr.bf16.gmra.mrb[12].mxu0 %v5471_v43  ;;  %4229 = vmatpush3.bf16.msra.mxu1 %v4661_v45  ;;  %v4734_v45 = vld [vmem:[%s6169_s1 + $0x68] ss:$12 sps:$4 sm:$0xff]  }
  0x90   : > { %2059 = vmatpush1.bf16.msra.mxu0 %v4658_v42  ;;  %4230 = vmatprep.subr.bf16.mxu1 %v4662_v46  ;;  %v4731_v42 = vld [vmem:[%s6169_s1 + $0x6c0] ss:$12 sps:$4 sm:$0xff]   ;;  %v4738_v46 = vld [vmem:[%s6169_s1 + $0x6dc] ss:$12 sps:$4 sm:$0xff]  }
  0x91   : > { %2060 = vmatprep.subr.bf16.mxu0 %v4665_v47  ;;  %2086 = vmatprep.mubr.bf16.mxu0 %v5509_v60  ;;  %v4736_v47 = vld [vmem:[%s6169_s1 + $0x6d8] ss:$12 sps:$4 sm:$0xff]  }
  0x93   : > { %4231 = vmatpush3.bf16.msra.mxu1 %v4666_v51 }
  0x94   : > { %2061 = vmatpush1.bf16.msra.mxu0 %v4663_v49  ;;  %4374 = vmatprep.subr.bf16.mxu1 %v4667_v52  ;;  %v4918_v49 = vld [vmem:[%s5098_s30 + $0x30] sm:$0xff] }
  0x95   : > { %2062 = vmatprep.subr.bf16.mxu0 %v4670_v55  ;;  %v5677_v51 = vcombine.high %v4918_v49, %v4918_v49  ;;  %v4743_v55 = vld [vmem:[%s6169_s1 + $0x158] ss:$12 sps:$4 sm:$0xff]  }
  0x96   : > { %1332 = vmatmul.mubr.bf16.vlgmr.msra.gmra.mrb[24].mxu1 %v5194_v11  ;;  %v4676_v11 = vld [vmem:[%s6169_s1 + $0x210] ss:$12 sps:$4 sm:$0xff]  }
  0x97   : > { %4375 = vmatpush3.bf16.msra.mxu1 %v4667_v52  ;;  %1339 = vmatprep.mubr.bf16.mxu1 %v5208_v17  ;;  %v4680_v17 = vld [vmem:[%s6169_s1 + $0x228] ss:$12 sps:$4 sm:$0xff]   ;;  %v4739_v52 = vld [vmem:[%s6169_s1 + $0x80] ss:$12 sps:$4 sm:$0xff]  }
  0x98   : > { %2063 = vmatpush1.bf16.msra.mxu0 %v4668_v56  ;;  %4376 = vmatprep.subr.bf16.mxu1 %v4671_v57  ;;  %v4746_v56 = vld [vmem:[%s6169_s1 + $0x6f4] ss:$12 sps:$4 sm:$0xff]  }
  0x99   : > { %2064 = vmatprep.subr.bf16.mxu0 %v4674_v59  ;;  %v4747_v59 = vld [vmem:[%s6169_s1 + $0x98] ss:$12 sps:$4 sm:$0xff]  }
  0x9b   : > { %4377 = vmatpush3.bf16.msra.mxu1 %v4671_v57  ;;  %v5690_v57 = vcombine.low %v4918_v49, %v4918_v49  ;;  %v4816_v49 = vld [vmem:[%s6169_s1 + $0x6c8] ss:$12 sps:$4 sm:$0xff]  }
  0x9c   : > { %2065 = vmatpush1.bf16.msra.mxu0 %v4672_v61  ;;  %4378 = vmatprep.subr.bf16.mxu1 %v4675_v53  ;;  %v4748_v61 = vld [vmem:[%s6169_s1 + $0x170] ss:$12 sps:$4 sm:$0xff]  }
  0x9d   : > { %2066 = vmatprep.subr.bf16.mxu0 %v4678_v50  ;;  %v4749_v50 = vld [vmem:[%s6169_s1 + $0x708] ss:$12 sps:$4 sm:$0xff]  }
  0x9e   : > { %1340 = vmatmul.mubr.bf16.gmra.mrb[28].mxu1 %v5234_v25  ;;  %v4683_v25 = vld [vmem:[%s6169_s1 + $0x240] ss:$12 sps:$4 sm:$0xff]  }
  0x9f   : > { %4379 = vmatpush3.bf16.msra.mxu1 %v4675_v53  ;;  %4382 = vmatprep.mubr.msk.bf16.mxu1 %vm1091_vm0, %v5268_v36  ;;  %v4694_v36 = vld [vmem:[%s6169_s1 + $0x31c] ss:$12 sps:$4 sm:$0xff]   ;;  %v4751_v53 = vld [vmem:[%s6169_s1 + $0x70c] ss:$12 sps:$4 sm:$0xff]  }
  0xa0   : > { %2067 = vmatpush1.bf16.msra.mxu0 %v4676_v11  ;;  %4380 = vmatprep.subr.bf16.mxu1 %v4679_v63  ;;  %v5708_v11 = vld [vmem:[%s5098_s30 + $0x2c] ss:$20 sps:$4 sm:$0xff]  }
  0xa1   : > { %2068 = vmatprep.subr.bf16.mxu0 %v4682_v0  ;;  %v4753_v0 = vld [vmem:[%s6169_s1 + $0x248] ss:$12 sps:$4 sm:$0xff]  }
  0xa3   : > { %4381 = vmatpush3.bf16.msra.mxu1 %v4679_v63  ;;  %v4752_v63 = vld [vmem:[%s6169_s1 + $0xb0] ss:$12 sps:$4 sm:$0xff]  }
  0xa4   : > { %2069 = vmatpush1.bf16.msra.mxu0 %v4680_v17  ;;  %2105 = vmatprep.subr.bf16.mxu1 %v4688_v2  ;;  %v4756_v17 = vld [vmem:[%s6169_s1 + $0x724] ss:$12 sps:$4 sm:$0xff]   ;;  %v4757_v2 = vld [vmem:[%s6169_s1 + $0x188] ss:$12 sps:$4 sm:$0xff]  }
  0xa5   : > { %2070 = vmatprep.subr.bf16.mxu0 %v4685_v1  ;;  %v4754_v1 = vld [vmem:[%s6169_s1 + $0x720] ss:$12 sps:$4 sm:$0xff]  }
  0xa6   : > { %4383 = vmatmul.mubr.msk.bf16.vlgmr.msra.gmra.mrb[32].mxu1 %vm1091_vm0, %v5295_v44  ;;  %v4695_v44 = vld [vmem:[%s6169_s1 + $0x270] ss:$12 sps:$4 sm:$0xff]  }
  0xa7   : > { %2106 = vmatpush1.bf16.msra.mxu1 %v4686_v3  ;;  %2137 = vmatprep.mubr.bf16.mxu1 %v4927_v34  ;;  %v4761_v3 = vld [vmem:[%s6169_s1 + $0x73c] ss:$12 sps:$4 sm:$0xff]  }
  0xa8   : > { %2071 = vmatpush1.bf16.msra.mxu0 %v4683_v25  ;;  %2107 = vmatprep.subr.bf16.mxu1 %v4694_v36  ;;  %v4758_v25 = vld [vmem:[%s6169_s1 + $0x260] ss:$12 sps:$4 sm:$0xff]  }
  0xa9   : > { %2072 = vmatprep.subr.bf16.mxu0 %v4691_v4  ;;  %v4759_v4 = vld [vmem:[%s6169_s1 + $0x738] ss:$12 sps:$4 sm:$0xff]   ;;  %v4762_v36 = vld [vmem:[%s6169_s1 + $0x1a0] ss:$12 sps:$4 sm:$0xff]  }
  0xab   : > { %2108 = vmatpush1.bf16.msra.mxu1 %v4692_v6  ;;  %v4764_v6 = vld [vmem:[%s6169_s1 + $0x750] ss:$12 sps:$4 sm:$0xff]  }
  0xac   : > { %2073 = vmatpush1.bf16.msra.mxu0 %v4689_v5  ;;  %2109 = vmatprep.subr.bf16.mxu1 %v4700_v8  ;;  %v4763_v5 = vld [vmem:[%s6169_s1 + $0x278] ss:$12 sps:$4 sm:$0xff]   ;;  %v4768_v8 = vld [vmem:[%s6169_s1 + $0x290] ss:$12 sps:$4 sm:$0xff]  }
  0xad   : > { %2074 = vmatprep.subr.bf16.mxu0 %v4697_v7  ;;  %v4767_v7 = vld [vmem:[%s6169_s1 + $0x1b8] ss:$12 sps:$4 sm:$0xff]  }
  0xaf   : > { %2110 = vmatpush1.bf16.msra.mxu1 %v4698_v9  ;;  %v4772_v9 = vld [vmem:[%s6169_s1 + $0x1d0] ss:$12 sps:$4 sm:$0xff]  }
  0xb0   : > { %2075 = vmatpush1.bf16.msra.mxu0 %v4695_v44  ;;  %2111 = vmatprep.subr.bf16.mxu1 %v4706_v13  ;;  %v4769_v44 = vld [vmem:[%s6169_s1 + $0x768] ss:$12 sps:$4 sm:$0xff]   ;;  %v4774_v13 = vld [vmem:[%s6169_s1 + $0x780] ss:$12 sps:$4 sm:$0xff]  }
  0xb1   : > { %2076 = vmatprep.subr.bf16.mxu0 %v4703_v12  ;;  %v4773_v12 = vld [vmem:[%s6169_s1 + $0x2a8] ss:$12 sps:$4 sm:$0xff]  }
  0xb3   : > { %2112 = vmatpush1.bf16.msra.mxu1 %v4704_v15  ;;  %v4778_v15 = vld [vmem:[%s6169_s1 + $0x2c0] ss:$12 sps:$4 sm:$0xff]  }
  0xb4   : > { %2077 = vmatpush1.bf16.msra.mxu0 %v4701_v14  ;;  %4250 = vmatprep.subr.bf16.mxu1 %v4710_v20  ;;  %v4777_v14 = vld [vmem:[%s6169_s1 + $0x1e8] ss:$12 sps:$4 sm:$0xff]   ;;  %v4783_v20 = vld [vmem:[%s6169_s1 + $0x2d8] ss:$12 sps:$4 sm:$0xff]  }
  0xb5   : > { %2078 = vmatprep.subr.bf16.mxu0 %v4709_v18  ;;  %v4781_v18 = vld [vmem:[%s6169_s1 + $0x79c] ss:$12 sps:$4 sm:$0xff]  }
  0xb6   : > { %3904 = vmatmul.mubr.msk.bf16.vlgmr.msra.gmra.mrb[36].mxu1 %vm1091_vm0, %v5600_v22 }
  0xb7   : > { %4251 = vmatpush3.bf16.msra.mxu1 %v4712_v10  ;;  %2147 = vmatprep.mubr.bf16.mxu1 %v4927_v34  ;;  %v4784_v10 = vld [vmem:[%s6169_s1 + $0x7b0] ss:$12 sps:$4 sm:$0xff]  }
  0xb8   : > { %2079 = vmatpush1.bf16.msra.mxu0 %v4707_v21  ;;  %4252 = vmatprep.subr.bf16.mxu1 %v4716_v26  ;;  %v4786_v21 = vld [vmem:[%s6169_s1 + $0x7b4] ss:$12 sps:$4 sm:$0xff]   ;;  %v4788_v26 = vld [vmem:[%s6169_s1 + $0x2f0] ss:$12 sps:$4 sm:$0xff]  }
  0xb9   : > { %2080 = vmatprep.subr.bf16.mxu0 %v4715_v24  ;;  %v4787_v24 = vld [vmem:[%s6169_s1 + $0x218] ss:$12 sps:$4 sm:$0xff]  }
  0xbb   : > { %4253 = vmatpush3.bf16.msra.mxu1 %v4717_v16  ;;  %v4789_v16 = vld [vmem:[%s6169_s1 + $0x7c8] ss:$12 sps:$4 sm:$0xff]  }
  0xbc   : > { %2081 = vmatpush1.bf16.msra.mxu0 %v4713_v30  ;;  %4254 = vmatprep.subr.bf16.mxu1 %v4721_v28  ;;  %v4791_v30 = vld [vmem:[%s6169_s1 + $0x7cc] ss:$12 sps:$4 sm:$0xff]   ;;  %v4793_v28 = vld [vmem:[%s6169_s1 + $0x308] ss:$12 sps:$4 sm:$0xff]  }
  0xbd   : > { %2082 = vmatprep.subr.bf16.mxu0 %v4720_v27  ;;  %v4792_v27 = vld [vmem:[%s6169_s1 + $0x230] ss:$12 sps:$4 sm:$0xff]  }
  0xbe   : > { %3905 = vmatmul.mubr.msk.bf16.gmra.mrb[40].mxu1 %vm1091_vm0, %v5634_v33 }
  0xbf   : > { %4255 = vmatpush3.bf16.msra.mxu1 %v4722_v32  ;;  %2188 = vmatprep.mubr.bf16.mxu1 %v5341_v62  ;;  %v4735_v62 = vld [vmem:[%s6169_s1 + $0x140] ss:$12 sps:$4 sm:$0xff]  }
  0xc0   : > { %2083 = vmatpush1.bf16.msra.mxu0 %v4718_v29  ;;  %4256 = vmatprep.subr.bf16.mxu1 %v4726_v37  ;;  %v4796_v29 = vld [vmem:[%s6169_s1 + $0x7e4] ss:$12 sps:$4 sm:$0xff]   ;;  %v4794_v32 = vld [vmem:[%s6169_s1 + $0x7e0] ss:$12 sps:$4 sm:$0xff]   ;;  %v4800_v37 = vld [vmem:[%s6169_s1 + $0x7fc] ss:$12 sps:$4 sm:$0xff]  }
  0xc1   : > { %2084 = vmatprep.subr.bf16.mxu0 %v4725_v35  ;;  %v4797_v35 = vld [vmem:[%s6169_s1 + $0x320] ss:$12 sps:$4 sm:$0xff]  }
  0xc3   : > { %4257 = vmatpush3.bf16.msra.mxu1 %v4727_v31  ;;  %v4801_v31 = vld [vmem:[%s6169_s1 + $0x338] ss:$12 sps:$4 sm:$0xff]  }
  0xc4   : > { %2085 = vmatpush1.bf16.msra.mxu0 %v4723_v48  ;;  %4258 = vmatprep.subr.bf16.mxu1 %v4730_v38  ;;  %v4798_v48 = vld [vmem:[%s6169_s1 + $0x7f8] ss:$12 sps:$4 sm:$0xff]   ;;  %v4804_v38 = vld [vmem:[%s6169_s1 + $0x814] ss:$12 sps:$4 sm:$0xff]  }
  0xc5   : > { %3078 = vmatprep.subr.bf16.mxu0 %v4733_v39  ;;  %v4802_v39 = vld [vmem:[%s6169_s1 + $0x810] ss:$12 sps:$4 sm:$0xff]  }
  0xc7   : > { %2087 = vmatmul.mubr.bf16.vlgmr.msra.gmra.mrb[8].mxu0 %v5659_v41  ;;  %4259 = vmatpush3.bf16.msra.mxu1 %v4734_v45  ;;  %v5855_v45 = vld [vmem:[%s5098_s30 + $0x28] ss:$20 sps:$4 sm:$0xff]  }
  0xc8   : > { %3079 = vmatpush1.bf16.msra.mxu0 %v4731_v42  ;;  %4260 = vmatprep.subr.bf16.mxu1 %v4735_v62  ;;  %v4806_v42 = vld [vmem:[%s6169_s1 + $0x828] ss:$12 sps:$4 sm:$0xff]   ;;  %v4814_v62 = vld [vmem:[%s6169_s1 + $0x844] ss:$12 sps:$4 sm:$0xff]  }
  0xc9   : > { %3080 = vmatprep.subr.bf16.mxu0 %v4738_v46  ;;  %2096 = vmatprep.mubr.bf16.mxu0 %v5677_v51  ;;  %v4815_v46 = vld [vmem:[%s6169_s1 + $0x788] ss:$12 sps:$4 sm:$0xff]  }
  0xcb   : > { %4261 = vmatpush3.bf16.msra.mxu1 %v4739_v52  ;;  %v4819_v52 = vld [vmem:[%s6169_s1 + $0x85c] ss:$12 sps:$4 sm:$0xff]  }
  0xcc   : > { %3081 = vmatpush1.bf16.msra.mxu0 %v4736_v47  ;;  %4262 = vmatprep.subr.bf16.mxu1 %v4743_v55  ;;  %v4812_v47 = vld [vmem:[%s6169_s1 + $0x840] ss:$12 sps:$4 sm:$0xff]  }
  0xcd   : > { %3082 = vmatprep.subr.bf16.mxu0 %v4746_v56  ;;  %v4817_v56 = vld [vmem:[%s6169_s1 + $0x858] ss:$12 sps:$4 sm:$0xff]  }
  0xcf   : > { %2097 = vmatmul.mubr.bf16.gmra.mrb[16].mxu0 %v5690_v57  ;;  %4263 = vmatpush3.bf16.msra.mxu1 %v4747_v59 }
  0xd0   : > { %3083 = vmatpush1.bf16.msra.mxu0 %v4744_v58  ;;  %4264 = vmatprep.subr.bf16.mxu1 %v4748_v61  ;;  %v4824_v58 = vld [vmem:[%s6169_s1 + $0x874] ss:$12 sps:$4 sm:$0xff]   ;;  %v4822_v61 = vld [vmem:[%s6169_s1 + $0x870] ss:$12 sps:$4 sm:$0xff]  }
  0xd1   : > { %3084 = vmatprep.subr.bf16.mxu0 %v4751_v53  ;;  %3110 = vmatprep.mubr.bf16.mxu0 %v5708_v11  ;;  %v4826_v53 = vld [vmem:[%s6169_s1 + $0x6f8] ss:$12 sps:$4 sm:$0xff]  }
  0xd3   : > { %4265 = vmatpush3.bf16.msra.mxu1 %v4752_v63  ;;  %v5912_v63 = vld [vmem:[%s5098_s30 + $0x34] ss:$20 sps:$4 sm:$0xff]  }
  0xd4   : > { %3085 = vmatpush1.bf16.msra.mxu0 %v4749_v50  ;;  %4278 = vmatprep.subr.bf16.mxu1 %v4753_v0  ;;  %v4829_v50 = vld [vmem:[%s6169_s1 + $0x88c] ss:$12 sps:$4 sm:$0xff]   ;;  %v4827_v0 = vld [vmem:[%s6169_s1 + $0x888] ss:$12 sps:$4 sm:$0xff]  }
  0xd5   : > { %3086 = vmatprep.subr.bf16.mxu0 %v4756_v17  ;;  %v4831_v17 = vld [vmem:[%s6169_s1 + $0x710] ss:$12 sps:$4 sm:$0xff]  }
  0xd6   : > { %2189 = vmatmul.mubr.bf16.vlgmr.msra.gmra.mrb[44].mxu1 %v5434_v23  ;;  %v4766_v23 = vld [vmem:[%s6169_s1 + $0x754] ss:$12 sps:$4 sm:$0xff]  }
  0xd7   : > { %4279 = vmatpush3.bf16.msra.mxu1 %v4757_v2  ;;  %2196 = vmatprep.mubr.bf16.mxu1 %v5450_v54  ;;  %v4771_v54 = vld [vmem:[%s6169_s1 + $0x76c] ss:$12 sps:$4 sm:$0xff]   ;;  %v4835_v2 = vld [vmem:[%s6169_s1 + $0x7e8] ss:$12 sps:$4 sm:$0xff]  }
  0xd8   : > { %3087 = vmatpush1.bf16.msra.mxu0 %v4754_v1  ;;  %4280 = vmatprep.subr.bf16.mxu1 %v4758_v25  ;;  %v4834_v1 = vld [vmem:[%s6169_s1 + $0x8a4] ss:$12 sps:$4 sm:$0xff]   ;;  %v4832_v25 = vld [vmem:[%s6169_s1 + $0x8a0] ss:$12 sps:$4 sm:$0xff]  }
  0xd9   : > { %3088 = vmatprep.subr.bf16.mxu0 %v4761_v3  ;;  %v4836_v3 = vld [vmem:[%s6169_s1 + $0x728] ss:$12 sps:$4 sm:$0xff]  }
  0xdb   : > { %4281 = vmatpush3.bf16.msra.mxu1 %v4762_v36  ;;  %v4840_v36 = vld [vmem:[%s6169_s1 + $0x800] ss:$12 sps:$4 sm:$0xff]  }
  0xdc   : > { %3089 = vmatpush1.bf16.msra.mxu0 %v4759_v4  ;;  %4282 = vmatprep.subr.bf16.mxu1 %v4763_v5  ;;  %v4839_v4 = vld [vmem:[%s6169_s1 + $0x8bc] ss:$12 sps:$4 sm:$0xff]   ;;  %v4837_v5 = vld [vmem:[%s6169_s1 + $0x8b8] ss:$12 sps:$4 sm:$0xff]  }
  0xdd   : > { %3090 = vmatprep.subr.bf16.mxu0 %v4766_v23  ;;  %v4841_v23 = vld [vmem:[%s6169_s1 + $0x740] ss:$12 sps:$4 sm:$0xff]  }
  0xde   : > { %2197 = vmatmul.mubr.bf16.gmra.mrb[48].mxu1 %v5471_v43  ;;  %v4776_v43 = vld [vmem:[%s6169_s1 + $0x784] ss:$12 sps:$4 sm:$0xff]  }
  0xdf   : > { %4283 = vmatpush3.bf16.msra.mxu1 %v4767_v7  ;;  %2236 = vmatprep.mubr.bf16.mxu1 %v5509_v60  ;;  %v4779_v60 = vld [vmem:[%s6169_s1 + $0x798] ss:$12 sps:$4 sm:$0xff]  }
  0xe0   : > { %3091 = vmatpush1.bf16.msra.mxu0 %v4764_v6  ;;  %4284 = vmatprep.subr.bf16.mxu1 %v4768_v8  ;;  %v4844_v6 = vld [vmem:[%s6169_s1 + $0x8d4] ss:$12 sps:$4 sm:$0xff]   ;;  %v4845_v7 = vld [vmem:[%s6169_s1 + $0x818] ss:$12 sps:$4 sm:$0xff]  }
  0xe1   : > { %3092 = vmatprep.subr.bf16.mxu0 %v4771_v54 }
  0xe3   : > { %4285 = vmatpush3.bf16.msra.mxu1 %v4772_v9 }
  0xe4   : > { %3093 = vmatpush1.bf16.msra.mxu0 %v4769_v44  ;;  %4286 = vmatprep.subr.bf16.mxu1 %v4773_v12 }
  0xe5   : > { %3094 = vmatprep.subr.bf16.mxu0 %v4776_v43 }
  0xe7   : > { %4287 = vmatpush3.bf16.msra.mxu1 %v4777_v14 }
  0xe8   : > { %3095 = vmatpush1.bf16.msra.mxu0 %v4774_v13  ;;  %4288 = vmatprep.subr.bf16.mxu1 %v4778_v15  ;;  %v4842_v15 = vld [vmem:[%s6169_s1 + $0x8d0] ss:$12 sps:$4 sm:$0xff]  }
  0xe9   : > { %3096 = vmatprep.subr.bf16.mxu0 %v4781_v18  ;;  %v4846_v18 = vld [vmem:[%s6169_s1 + $0x758] ss:$12 sps:$4 sm:$0xff]  }
  0xeb   : > { %4289 = vmatpush3.bf16.msra.mxu1 %v4782_v19 }
  0xec   : > { %3097 = vmatpush1.bf16.msra.mxu0 %v4779_v60  ;;  %4290 = vmatprep.subr.bf16.mxu1 %v4783_v20 }
  0xed   : > { %3098 = vmatprep.subr.bf16.mxu0 %v4786_v21  ;;  %v4849_v21 = vld [vmem:[%s6169_s1 + $0x8ec] ss:$12 sps:$4 sm:$0xff]  }
  0xef   : > { %4291 = vmatpush3.bf16.msra.mxu1 %v4787_v24 }
  0xf0   : > { %3099 = vmatpush1.bf16.msra.mxu0 %v4784_v10  ;;  %4292 = vmatprep.subr.bf16.mxu1 %v4788_v26  ;;  %v4850_v10 = vld [vmem:[%s6169_s1 + $0x830] ss:$12 sps:$4 sm:$0xff]   ;;  %v4847_v26 = vld [vmem:[%s6169_s1 + $0x8e8] ss:$12 sps:$4 sm:$0xff]  }
  0xf1   : > { %3100 = vmatprep.subr.bf16.mxu0 %v4791_v30  ;;  %v4851_v30 = vld [vmem:[%s6169_s1 + $0x770] ss:$12 sps:$4 sm:$0xff]  }
  0xf3   : > { %4293 = vmatpush3.bf16.msra.mxu1 %v4792_v27  ;;  %v4855_v27 = vld [vmem:[%s6169_s1 + $0x908] ss:$12 sps:$4 sm:$0xff]  }
  0xf4   : > { %3101 = vmatpush1.bf16.msra.mxu0 %v4789_v16  ;;  %4386 = vmatprep.subr.bf16.mxu1 %v4793_v28  ;;  %v4854_v16 = vld [vmem:[%s6169_s1 + $0x904] ss:$12 sps:$4 sm:$0xff]  }
  0xf5   : > { %3102 = vmatprep.subr.bf16.mxu0 %v4796_v29 }
  0xf6   : > { %2237 = vmatmul.mubr.bf16.vlgmr.msra.gmra.mrb[52].mxu1 %v5659_v41  ;;  %v4808_v41 = vld [vmem:[%s6169_s1 + $0x82c] ss:$12 sps:$4 sm:$0xff]  }
  0xf7   : > { %4387 = vmatpush3.bf16.msra.mxu1 %v4793_v28  ;;  %2244 = vmatprep.mubr.bf16.mxu1 %v5677_v51  ;;  %v2306_v51 = vld [vmem:[%s5098_s30 + $0x50] sm:$0xff] }
  0xf8   : > { %3103 = vmatpush1.bf16.msra.mxu0 %v4794_v32  ;;  %4388 = vmatprep.subr.bf16.mxu1 %v4797_v35  ;;  %v5878_v55 = vcombine.high %v2306_v51, %v2306_v51  ;;  %v5897_v59 = vcombine.low %v2306_v51, %v2306_v51  ;;  %v4864_v51 = vld [vmem:[%s6169_s1 + $0x934] ss:$12 sps:$4 sm:$0xff]  }
  0xf9   : > { %3104 = vmatprep.subr.bf16.mxu0 %v4800_v37 }
  0xfb   : > { %4389 = vmatpush3.bf16.msra.mxu1 %v4797_v35 }
  0xfc   : > { %3105 = vmatpush1.bf16.msra.mxu0 %v4798_v48  ;;  %4390 = vmatprep.subr.bf16.mxu1 %v4801_v31  ;;  %v4852_v48 = vld [vmem:[%s6169_s1 + $0x900] ss:$12 sps:$4 sm:$0xff]  }
  0xfd   : > { %3106 = vmatprep.subr.bf16.mxu0 %v4804_v38  ;;  %v4856_v38 = vld [vmem:[%s6169_s1 + $0x848] ss:$12 sps:$4 sm:$0xff]  }
  0xfe   : > { %2245 = vmatmul.mubr.bf16.gmra.mrb[56].mxu1 %v5690_v57  ;;  %v4821_v57 = vld [vmem:[%s6169_s1 + $0x6e0] ss:$12 sps:$4 sm:$0xff]  }
  0xff   : > { %4391 = vmatpush3.bf16.msra.mxu1 %v4801_v31  ;;  %4394 = vmatprep.mubr.msk.bf16.mxu1 %vm1091_vm0, %v5600_v22  ;;  %v4820_v22 = vld [vmem:[%s6169_s1 + $0x7a0] ss:$12 sps:$4 sm:$0xff]  }
 0x100   : > { %3107 = vmatpush1.bf16.msra.mxu0 %v4802_v39  ;;  %4392 = vmatprep.subr.bf16.mxu1 %v4805_v40 }
 0x101   : > { %3108 = vmatprep.subr.bf16.mxu0 %v4808_v41 }
 0x103   : > { %4393 = vmatpush3.bf16.msra.mxu1 %v4805_v40 }
 0x104   : > { %3109 = vmatpush1.bf16.msra.mxu0 %v4806_v42  ;;  %4312 = vmatprep.subr.bf16.mxu1 %v4815_v46  ;;  %v4859_v42 = vld [vmem:[%s6169_s1 + $0x91c] ss:$12 sps:$4 sm:$0xff]  }
 0x105   : > { %3129 = vmatprep.subr.bf16.mxu0 %v4814_v62  ;;  %v4860_v62 = vld [vmem:[%s6169_s1 + $0x920] ss:$12 sps:$4 sm:$0xff]  }
 0x106   : > { %4395 = vmatmul.mubr.msk.bf16.vlgmr.msra.gmra.mrb[60].mxu1 %vm1091_vm0, %v5634_v33  ;;  %v4825_v33 = vld [vmem:[%s6169_s1 + $0x7b8] ss:$12 sps:$4 sm:$0xff]  }
 0x107   : > { %3111 = vmatmul.mubr.bf16.vlgmr.msra.gmra.mrb[20].mxu0 %v5855_v45  ;;  %4313 = vmatpush3.bf16.msra.mxu1 %v4816_v49  ;;  %v4861_v49 = vld [vmem:[%s6169_s1 + $0x860] ss:$12 sps:$4 sm:$0xff]  }
 0x108   : > { %3130 = vmatpush1.bf16.msra.mxu0 %v4812_v47  ;;  %4314 = vmatprep.subr.bf16.mxu1 %v4820_v22  ;;  %v4857_v47 = vld [vmem:[%s6169_s1 + $0x918] ss:$12 sps:$4 sm:$0xff]  }
 0x109   : > { %3131 = vmatprep.subr.bf16.mxu0 %v4819_v52  ;;  %3263 = vmatprep.mubr.bf16.mxu1 %v5708_v11  ;;  %v4830_v11 = vld [vmem:[%s6169_s1 + $0x7d0] ss:$12 sps:$4 sm:$0xff]  }
 0x10a   : > { %3120 = vmatprep.mubr.bf16.mxu0 %v5878_v55 }
 0x10b   : > { %4315 = vmatpush3.bf16.msra.mxu1 %v4821_v57 }
 0x10c   : > { %3132 = vmatpush1.bf16.msra.mxu0 %v4817_v56  ;;  %4316 = vmatprep.subr.bf16.mxu1 %v4825_v33  ;;  %v4862_v33 = vld [vmem:[%s6169_s1 + $0x930] ss:$12 sps:$4 sm:$0xff]  }
 0x10d   : > { %3133 = vmatprep.subr.bf16.mxu0 %v4824_v58 }
 0x10f   : > { %3121 = vmatmul.mubr.bf16.gmra.mrb[24].mxu0 %v5897_v59  ;;  %4317 = vmatpush3.bf16.msra.mxu1 %v4826_v53 }
 0x110   : > { %3134 = vmatpush1.bf16.msra.mxu0 %v4822_v61  ;;  %4318 = vmatprep.subr.bf16.mxu1 %v4830_v11  ;;  %v4866_v61 = vld [vmem:[%s6169_s1 + $0x878] ss:$12 sps:$4 sm:$0xff]   ;;  %v4870_v11 = vld [vmem:[%s6169_s1 + $0x950] ss:$12 sps:$4 sm:$0xff]  }
 0x111   : > { %3135 = vmatprep.subr.bf16.mxu0 %v4829_v50  ;;  %3161 = vmatprep.mubr.bf16.mxu0 %v5912_v63 }
 0x113   : > { %4319 = vmatpush3.bf16.msra.mxu1 %v4831_v17  ;;  %v4867_v17 = vld [vmem:[%s6169_s1 + $0x948] ss:$12 sps:$4 sm:$0xff]  }
 0x114   : > { %3136 = vmatpush1.bf16.msra.mxu0 %v4827_v0  ;;  %4320 = vmatprep.subr.bf16.mxu1 %v4835_v2  ;;  %v4874_v2 = vld [vmem:[%s6169_s1 + $0x964] ss:$12 sps:$4 sm:$0xff]  }
 0x115   : > { %3137 = vmatprep.subr.bf16.mxu0 %v4834_v1  ;;  %v4871_v1 = vld [vmem:[%s6169_s1 + $0x890] ss:$12 sps:$4 sm:$0xff]  }
 0x117   : > { %4321 = vmatpush3.bf16.msra.mxu1 %v4836_v3 }
 0x118   : > { %3138 = vmatpush1.bf16.msra.mxu0 %v4832_v25  ;;  %4322 = vmatprep.subr.bf16.mxu1 %v4840_v36 }
 0x119   : > { %3139 = vmatprep.subr.bf16.mxu0 %v4839_v4  ;;  %v1132_v8 = vpop.f32.mrb[0].mxu1 }
 0x11a   : > { %v1183_v54 = vpop.f32.mrb[0].mxu0  ;;  %v1134_v9 = vpop.f32.mrb[1].mxu1 }
 0x11b   : > { %v1184_v44 = vadd.f32 %v1183_v54, %v1132_v8  ;;  %v1185_v12 = vpop.f32.mrb[1].mxu0  ;;  %v1136_v13 = vpop.f32.mrb[2].mxu1  ;;  %4323 = vmatpush3.bf16.msra.mxu1 %v4841_v23  ;;  %v4876_v23 = vld [vmem:[%s6169_s1 + $0x8a8] ss:$12 sps:$4 sm:$0xff]   ;;  %v4877_v54 = vld [vmem:[%s6169_s1 + $0x978] ss:$12 sps:$4 sm:$0xff]  }
 0x11c   : > { %v1186_v43 = vadd.f32 %v1185_v12, %v1134_v9  ;;  %v1187_v14 = vpop.f32.mrb[2].mxu0  ;;  %3140 = vmatpush1.bf16.msra.mxu0 %v4837_v5  ;;  %v1138_v19 = vpop.f32.mrb[3].mxu1  ;;  %4324 = vmatprep.subr.bf16.mxu1 %v4845_v7  ;;  %v4872_v5 = vld [vmem:[%s6169_s1 + $0x960] ss:$12 sps:$4 sm:$0xff]   ;;  %v4887_v12 = vld [vmem:[%s6169_s1 + $0x998] ss:$12 sps:$4 sm:$0xff]  }
 0x11d   : > { %v1188_v60 = vadd.f32 %v1187_v14, %v1136_v13  ;;  %v1189_v20 = vpop.f32.mrb[3].mxu0  ;;  %3141 = vmatprep.subr.bf16.mxu0 %v4844_v6  ;;  %v4880_v7 = vld [vmem:[%s6169_s1 + $0x980] ss:$12 sps:$4 sm:$0xff]   ;;  %v4888_v13 = vld [vmem:[%s6169_s1 + $0x8d8] ss:$12 sps:$4 sm:$0xff]  }
 0x11e   : > { %v1190_v24 = vadd.f32 %v1189_v20, %v1138_v19  ;;  %v4886_v9 = vld [vmem:[%s6169_s1 + $0x994] ss:$12 sps:$4 sm:$0xff]   ;;  %v4891_v14 = vld [vmem:[%s6169_s1 + $0x9ac] ss:$12 sps:$4 sm:$0xff]   ;;  %v4899_v19 = vld [vmem:[%s6169_s1 + $0x9c4] ss:$12 sps:$4 sm:$0xff]  }
 0x11f   : > { %4325 = vmatpush3.bf16.msra.mxu1 %v4846_v18  ;;  %v4889_v18 = vld [vmem:[%s6169_s1 + $0x9a8] ss:$12 sps:$4 sm:$0xff]  }
 0x120   : > { %3142 = vmatpush1.bf16.msra.mxu0 %v4842_v15  ;;  %4326 = vmatprep.subr.bf16.mxu1 %v4850_v10  ;;  %v4892_v15 = vld [vmem:[%s6169_s1 + $0x9b0] ss:$12 sps:$4 sm:$0xff]   ;;  %v4900_v20 = vld [vmem:[%s6169_s1 + $0x9c8] ss:$12 sps:$4 sm:$0xff]  }
 0x121   : > { %3143 = vmatprep.subr.bf16.mxu0 %v4849_v21  ;;  %v1142_v28 = vpop.f32.mrb[4].mxu1  ;;  %v4894_v21 = vld [vmem:[%s5098_s30 + $0x30] ss:$20 sps:$4 sm:$0xff]   ;;  %v2307_v10 = vld [vmem:[%s5098_s30 + $0x58] sm:$0xff] }
 0x122   : > { %v1193_v29 = vpop.f32.mrb[4].mxu0  ;;  %v1144_v32 = vpop.f32.mrb[5].mxu1 }
 0x123   : > { %v1194_v35 = vadd.f32 %v1193_v29, %v1142_v28  ;;  %v1195_v37 = vpop.f32.mrb[5].mxu0  ;;  %4327 = vmatpush3.bf16.msra.mxu1 %v4851_v30  ;;  %v1146_v31 = vpop.f32.mrb[6].mxu1  ;;  %v4904_v30 = vld [vmem:[%s6169_s1 + $0x9e0] ss:$12 sps:$4 sm:$0xff]   ;;  %v4910_v29 = vld [vmem:[%s6169_s1 + $0x9f8] ss:$12 sps:$4 sm:$0xff]  }
 0x124   : > { %3144 = vmatpush1.bf16.msra.mxu0 %v4847_v26  ;;  %v1196_v39 = vadd.f32 %v1195_v37, %v1144_v32  ;;  %v1197_v40 = vpop.f32.mrb[6].mxu0  ;;  %4340 = vmatprep.subr.bf16.mxu1 %v4855_v27  ;;  %v1147_v41 = vpop.f32.mrb[7].mxu1  ;;  %v4903_v26 = vld [vmem:[%s6169_s1 + $0x9dc] ss:$12 sps:$4 sm:$0xff]   ;;  %v4901_v27 = vld [vmem:[%s6169_s1 + $0x9d8] ss:$12 sps:$4 sm:$0xff]   ;;  %v4059_v37 = vcombine.low %v2307_v10, %v2307_v10 }
 0x125   : > { %3145 = vmatprep.subr.bf16.mxu0 %v4854_v16  ;;  %v1198_v46 = vpop.f32.mrb[7].mxu0  ;;  %v4060_v16 = vcombine.high %v2307_v10, %v2307_v10  ;;  %v4909_v28 = vld [vmem:[%s6169_s1 + $0x9f4] ss:$12 sps:$4 sm:$0xff]   ;;  %v4907_v31 = vld [vmem:[%s6169_s1 + $0x9f0] ss:$12 sps:$4 sm:$0xff]  }
 0x126   : > { %3264 = vmatmul.mubr.bf16.vlgmr.msra.gmra.mrb[64].mxu1 %v5855_v45  ;;  %v4865_v45 = vld [vmem:[%s6169_s1 + $0x938] ss:$12 sps:$4 sm:$0xff]   ;;  %v4914_v41 = vld [vmem:[%s6169_s1 + $0xa10] ss:$12 sps:$4 sm:$0xff]   ;;  %v4911_v46 = vld [vmem:[%s6169_s1 + $0xa08] ss:$12 sps:$4 sm:$0xff]  }
 0x127   : > { %4341 = vmatpush3.bf16.msra.mxu1 %v4856_v38  ;;  %3271 = vmatprep.mubr.bf16.mxu1 %v5878_v55  ;;  %v4869_v55 = vld [vmem:[%s6169_s1 + $0x94c] ss:$12 sps:$4 sm:$0xff]  }
 0x128   : > { %3146 = vmatpush1.bf16.msra.mxu0 %v4852_v48  ;;  %4342 = vmatprep.subr.bf16.mxu1 %v4860_v62  ;;  %v4913_v40 = vld [vmem:[%s6169_s1 + $0xa0c] ss:$12 sps:$4 sm:$0xff]  }
 0x129   : > { %3147 = vmatprep.subr.bf16.mxu0 %v4859_v42  ;;  %v1234_v52 = vpop.f32.mrb[8].mxu1  ;;  %v4915_v62 = vld [vmem:[%s5098_s30 + $0x38] ss:$20 sps:$4 sm:$0xff]  }
 0x12a   : > { %v6002_v22 = vadd.f32 %v1234_v52, %v1184_v44  ;;  %v1236_v56 = vpop.f32.mrb[9].mxu1  ;;  %v4882_v44 = vld [vmem:[%s6169_s1 + $0x8c0] ss:$12 sps:$4 sm:$0xff]  }
 0x12b   : > { %v6004_v57 = vadd.f32 %v1236_v56, %v1186_v43  ;;  %v1238_v58 = vpop.f32.mrb[10].mxu1  ;;  %4343 = vmatpush3.bf16.msra.mxu1 %v4861_v49  ;;  %v4884_v43 = vld [vmem:[%s6169_s1 + $0x990] ss:$12 sps:$4 sm:$0xff]   ;;  %v4916_v49 = vld [vmem:[%s5098_s30 + $0x60] ss:$0 sps:$4 sm:$0xff]  }
 0x12c   : > { %3148 = vmatpush1.bf16.msra.mxu0 %v4857_v47  ;;  %v6012_v53 = vadd.f32 %v1238_v58, %v1188_v60  ;;  %v1240_v50 = vpop.f32.mrb[11].mxu1  ;;  %4344 = vmatprep.subr.bf16.mxu1 %v4865_v45  ;;  %v4893_v60 = vld [vmem:[%s6169_s1 + $0x8f0] ss:$12 sps:$4 sm:$0xff]  }
 0x12d   : > { %3149 = vmatprep.subr.bf16.mxu0 %v4864_v51  ;;  %v6020_v0 = vadd.f32 %v1240_v50, %v1190_v24  ;;  %v4897_v24 = vld [vmem:[%s6169_s1 + $0x9c0] ss:$12 sps:$4 sm:$0xff]  }
 0x12e   : > { %3272 = vmatmul.mubr.bf16.gmra.mrb[68].mxu1 %v5897_v59  ;;  %v4875_v59 = vld [vmem:[%s6169_s1 + $0x968] ss:$12 sps:$4 sm:$0xff]  }
 0x12f   : > { %4345 = vmatpush3.bf16.msra.mxu1 %v4866_v61  ;;  %3311 = vmatprep.mubr.bf16.mxu1 %v5912_v63  ;;  %v4879_v63 = vld [vmem:[%s6169_s1 + $0x97c] ss:$12 sps:$4 sm:$0xff]  }
 0x130   : > { %3150 = vmatpush1.bf16.msra.mxu0 %v4862_v33  ;;  %4346 = vmatprep.subr.bf16.mxu1 %v4870_v11 }
 0x131   : > { %3151 = vmatprep.subr.bf16.mxu0 %v4869_v55  ;;  %v1244_v25 = vpop.f32.mrb[12].mxu1 }
 0x132   : > { %v6036_v3 = vadd.f32 %v1244_v25, %v1194_v35  ;;  %v1246_v4 = vpop.f32.mrb[13].mxu1 }
 0x133   : > { %v6038_v36 = vadd.f32 %v1246_v4, %v1196_v39  ;;  %4347 = vmatpush3.bf16.msra.mxu1 %v4871_v1  ;;  %v1248_v6 = vpop.f32.mrb[14].mxu1 }
 0x134   : > { %3152 = vmatpush1.bf16.msra.mxu0 %v4867_v17  ;;  %4348 = vmatprep.subr.bf16.mxu1 %v4875_v59  ;;  %v1249_v8 = vpop.f32.mrb[15].mxu1 }
 0x135   : > { %3153 = vmatprep.subr.bf16.mxu0 %v4874_v2 }
 0x137   : > { %4349 = vmatpush3.bf16.msra.mxu1 %v4876_v23 }
 0x138   : > { %3154 = vmatpush1.bf16.msra.mxu0 %v4872_v5  ;;  %4350 = vmatprep.subr.bf16.mxu1 %v4880_v7 }
 0x139   : > { %3155 = vmatprep.subr.bf16.mxu0 %v4879_v63 }
 0x13b   : > { %4351 = vmatpush3.bf16.msra.mxu1 %v4882_v44 }
 0x13c   : > { %3156 = vmatpush1.bf16.msra.mxu0 %v4877_v54  ;;  %4352 = vmatprep.subr.bf16.mxu1 %v4887_v12 }
 0x13d   : > { %3157 = vmatprep.subr.bf16.mxu0 %v4886_v9 }
 0x13f   : > { %4353 = vmatpush3.bf16.msra.mxu1 %v4888_v13 }
 0x140   : > { %3158 = vmatpush1.bf16.msra.mxu0 %v4884_v43  ;;  %4354 = vmatprep.subr.bf16.mxu1 %v4892_v15 }
 0x141   : > { %3159 = vmatprep.subr.bf16.mxu0 %v4891_v14 }
 0x143   : > { %4355 = vmatpush3.bf16.msra.mxu1 %v4893_v60 }
 0x144   : > { %3160 = vmatpush1.bf16.msra.mxu0 %v4889_v18  ;;  %4398 = vmatprep.subr.bf16.mxu1 %v4900_v20 }
 0x145   : > { %3180 = vmatprep.subr.bf16.mxu0 %v4899_v19 }
 0x146   : > { %3312 = vmatmul.mubr.bf16.vlgmr.msra.gmra.mrb[72].mxu1 %v4894_v21 }
 0x147   : > { %3162 = vmatmul.mubr.bf16.vlgmr.msra.gmra.mrb[20].mxu0 %v4894_v21  ;;  %4399 = vmatpush3.bf16.msra.mxu1 %v4900_v20 }
 0x148   : > { %3181 = vmatpush1.bf16.msra.mxu0 %v4897_v24  ;;  %4400 = vmatprep.subr.bf16.mxu1 %v4904_v30 }
 0x149   : > { %3182 = vmatprep.subr.bf16.mxu0 %v4903_v26  ;;  %v4204_v32 = vpop.f32.mrb[16].mxu1  ;;  %3171 = vmatprep.mubr.bf16.mxu0 %v4060_v16 }
 0x14a   : > { %3319 = vmatprep.mubr.bf16.mxu1 %v4060_v16  ;;  %v4205_v35 = vpop.f32.mrb[17].mxu1 }
 0x14b   : > { %4401 = vmatpush3.bf16.msra.mxu1 %v4904_v30  ;;  %v4206_v48 = vadd.f32 %v4205_v35, %v4204_v32  ;;  %v4207_v38 = vpop.f32.mrb[18].mxu1 }
 0x14c   : > { %3183 = vmatpush1.bf16.msra.mxu0 %v4901_v27  ;;  %4402 = vmatprep.subr.bf16.mxu1 %v4910_v29  ;;  %v4208_v39 = vpop.f32.mrb[19].mxu1 }
 0x14d   : > { %3184 = vmatprep.subr.bf16.mxu0 %v4909_v28  ;;  %v4209_v42 = vadd.f32 %v4208_v39, %v4207_v38 }
 0x14e   : > { %3320 = vmatmul.mubr.bf16.gmra.mrb[76].mxu1 %v4059_v37 }
 0x14f   : > { %3172 = vmatmul.mubr.bf16.gmra.mrb[28].mxu0 %v4059_v37  ;;  %4403 = vmatpush3.bf16.msra.mxu1 %v4910_v29 }
 0x150   : > { %3185 = vmatpush1.bf16.msra.mxu0 %v4907_v31  ;;  %4404 = vmatprep.subr.bf16.mxu1 %v4914_v41 }
 0x151   : > { %3186 = vmatprep.subr.bf16.mxu0 %v4913_v40  ;;  %3212 = vmatprep.mubr.bf16.mxu0 %v4927_v34  ;;  %v4210_v47 = vpop.f32.mrb[20].mxu1 }
 0x152   : > { %4406 = vmatprep.mubr.msk.bf16.mxu1 %vm1091_vm0, %v4915_v62  ;;  %v4211_v51 = vpop.f32.mrb[21].mxu1 }
 0x153   : > { %4405 = vmatpush3.bf16.msra.mxu1 %v4914_v41  ;;  %v4212_v45 = vadd.f32 %v4211_v51, %v4210_v47  ;;  %v4213_v52 = vpop.f32.mrb[22].mxu1 }
 0x154   : > { %3187 = vmatpush1.bf16.msra.mxu0 %v4911_v46  ;;  %v4214_v56 = vpop.f32.mrb[23].mxu1 }
 0x156   : > { %4407 = vmatmul.mubr.msk.bf16.vlgmr.msra.gmra.mrb[80].mxu1 %vm1091_vm0, %v4916_v49 }
 0x157   : > { %4170 = vmatmul.mubr.msk.bf16.vlgmr.msra.gmra.mrb[20].mxu0 %vm1091_vm0, %v4915_v62 }
 0x158   : > { %3222 = vmatprep.mubr.bf16.mxu0 %v4927_v34 }
 0x15f   : > { %4171 = vmatmul.mubr.msk.bf16.gmra.mrb[32].mxu0 %vm1091_vm0, %v4916_v49 }
 0x162   : > { %v2047_v58 = vpop.f32.mrb[12].mxu0 }
 0x163   : > { %v2048_v33 = vadd.f32 %v2047_v58, %v6036_v3  ;;  %v2049_v61 = vpop.f32.mrb[13].mxu0 }
 0x164   : > { %v2050_v50 = vadd.f32 %v2049_v61, %v6038_v36  ;;  %v2051_v55 = vpop.f32.mrb[14].mxu0 }
 0x165   : > { %v2052_v11 = vpop.f32.mrb[15].mxu0 }
 0x169   : > { %v4232_v17 = vpop.f32.mrb[24].mxu1 }
 0x16a   : > { %v4233_v1 = vpop.f32.mrb[25].mxu1 }
 0x16b   : > { %v4234_v2 = vadd.f32 %v4233_v1, %v4232_v17  ;;  %v4235_v59 = vpop.f32.mrb[26].mxu1 }
 0x16c   : > { %v4236_v25 = vpop.f32.mrb[27].mxu1 }
 0x16d   : > { %v4237_v4 = vadd.f32 %v4236_v25, %v4235_v59  ;;  %v1334_v5 = vadd.f32 %v4234_v2, %v4206_v48 }
 0x16f   : > { %v1337_v23 = vadd.f32 %v4237_v4, %v4209_v42 }
 0x171   : > { %v4238_v6 = vpop.f32.mrb[28].mxu1 }
 0x172   : > { %v4239_v34 = vpop.f32.mrb[29].mxu1 }
 0x173   : > { %v4240_v63 = vadd.f32 %v4239_v34, %v4238_v6  ;;  %v4241_v7 = vpop.f32.mrb[30].mxu1 }
 0x174   : > { %v4242_v8 = vpop.f32.mrb[31].mxu1 }
 0x175   : > { %v1342_v54 = vadd.f32 %v4240_v63, %v4212_v45 }
 0x179   : > { %v4384_v3 = vpop.f32.mrb[32].mxu1 }
 0x17a   : > { %v1390_v44 = vadd.f32 %v4384_v3, %v1342_v54  ;;  %v1381_v9 = vpop.f32.mrb[33].mxu1 }
 0x17b   : > { %v1382_v36 = vadd.f32 %v1381_v9, %v1334_v5  ;;  %v4385_v12 = vpop.f32.mrb[34].mxu1 }
 0x17c   : > { %v1384_v43 = vpop.f32.mrb[35].mxu1 }
 0x17d   : > { %v1385_v13 = vadd.f32 %v1384_v43, %v1337_v23 }
 0x189   : > { %v2139_v14 = vpop.f32.mrb[36].mxu1 }
 0x18a   : > { %v2141_v15 = vpop.f32.mrb[37].mxu1 }
 0x18b   : > { %v2143_v18 = vpop.f32.mrb[38].mxu1 }
 0x18c   : > { %v2145_v60 = vpop.f32.mrb[39].mxu1 }
 0x191   : > { %v2149_v19 = vpop.f32.mrb[40].mxu1 }
 0x192   : > { %v2151_v20 = vpop.f32.mrb[41].mxu1 }
 0x193   : > { %v2153_v21 = vpop.f32.mrb[42].mxu1 }
 0x194   : > { %v2154_v10 = vpop.f32.mrb[43].mxu1 }
 0x19a   : > { %v2088_v24 = vpop.f32.mrb[8].mxu0 }
 0x19b   : > { %v4412_v26 = vadd.f32 %v2088_v24, %v6002_v22  ;;  %v2090_v30 = vpop.f32.mrb[9].mxu0 }
 0x19c   : > { %v4417_v16 = vadd.f32 %v2090_v30, %v6004_v57  ;;  %v2092_v27 = vpop.f32.mrb[10].mxu0 }
 0x19d   : > { %v4422_v28 = vadd.f32 %v2092_v27, %v6012_v53  ;;  %v2094_v29 = vpop.f32.mrb[11].mxu0  ;;  %v6133_v32 = vadd.f32 %v4412_v26, %v2139_v14 }
 0x19e   : > { %v4427_v35 = vadd.f32 %v2094_v29, %v6020_v0  ;;  %v6136_v37 = vadd.f32 %v4417_v16, %v2141_v15 }
 0x19f   : > { %v6138_v48 = vadd.f32 %v4422_v28, %v2143_v18 }
 0x1a0   : > { %v6140_v31 = vadd.f32 %v4427_v35, %v2145_v60 }
 0x1a2   : > { %v2098_v38 = vpop.f32.mrb[16].mxu0 }
 0x1a3   : > { %v2099_v39 = vadd.f32 %v2098_v38, %v2048_v33  ;;  %v2100_v22 = vpop.f32.mrb[17].mxu0 }
 0x1a4   : > { %v2101_v40 = vadd.f32 %v2100_v22, %v2050_v50  ;;  %v2102_v41 = vpop.f32.mrb[18].mxu0 }
 0x1a5   : > { %v6142_v57 = vadd.f32 %v2149_v19, %v2099_v39  ;;  %v2103_v42 = vpop.f32.mrb[19].mxu0 }
 0x1a6   : > { %v6144_v53 = vadd.f32 %v2151_v20, %v2101_v40  ;;  %v3386_v40 = vlaneseq }
 0x1a9   : > { %v4266_v62 = vpop.f32.mrb[44].mxu1 }
 0x1aa   : > { %v4267_v46 = vpop.f32.mrb[45].mxu1 }
 0x1ab   : > { %v4268_v47 = vadd.f32 %v4267_v46, %v4266_v62  ;;  %v4269_v0 = vpop.f32.mrb[46].mxu1  ;;  %v3387_v46 = vshrl.u32 %v3386_v40, 7 }
 0x1ac   : > { %v4270_v49 = vpop.f32.mrb[47].mxu1 }
 0x1ad   : > { %v2191_v51 = vadd.f32 %v4268_v47, %v1382_v36  ;;  %v4271_v45 = vadd.f32 %v4270_v49, %v4269_v0 }
 0x1af   : > { %v2194_v52 = vadd.f32 %v4271_v45, %v1385_v13 }
 0x1b1   : > { %v4272_v56 = vpop.f32.mrb[48].mxu1 }
 0x1b2   : > { %v4273_v58 = vpop.f32.mrb[49].mxu1 }
 0x1b3   : > { %v4274_v61 = vadd.f32 %v4273_v58, %v4272_v56  ;;  %v4275_v33 = vpop.f32.mrb[50].mxu1 }
 0x1b4   : > { %v4276_v55 = vpop.f32.mrb[51].mxu1 }
 0x1b5   : > { %v2199_v50 = vadd.f32 %v4274_v61, %v1390_v44 }
 0x1c9   : > { %v4294_v11 = vpop.f32.mrb[52].mxu1 }
 0x1ca   : > { %v4295_v17 = vpop.f32.mrb[53].mxu1 }
 0x1cb   : > { %v4296_v1 = vadd.f32 %v4295_v17, %v4294_v11  ;;  %v4297_v2 = vpop.f32.mrb[54].mxu1  ;;  %v3384_v11 = vld [vmem:[%s6170_s2] sm:$0x7] }
 0x1cc   : > { %v4298_v59 = vpop.f32.mrb[55].mxu1 }
 0x1cd   : > { %v4299_v25 = vadd.f32 %v4298_v59, %v4297_v2  ;;  %v2239_v4 = vadd.f32 %v4296_v1, %v2191_v51  ;;  %v3392_v1 = vsub.s32 1, %v3387_v46  ;;  %v3396_v2 = vsub.s32 2, %v3387_v46 }
 0x1cf   : > { %v2242_v5 = vadd.f32 %v4299_v25, %v2194_v52 }
 0x1d1   : > { %v4300_v23 = vpop.f32.mrb[56].mxu1 }
 0x1d2   : > { %v4301_v6 = vpop.f32.mrb[57].mxu1 }
 0x1d3   : > { %v4302_v34 = vadd.f32 %v4301_v6, %v4300_v23  ;;  %v4303_v63 = vpop.f32.mrb[58].mxu1 }
 0x1d4   : > { %v4304_v7 = vpop.f32.mrb[59].mxu1 }
 0x1d5   : > { %v2247_v8 = vadd.f32 %v4302_v34, %v2199_v50  ;;  %v3388_v50 = vsub.s32 0, %v3387_v46  ;;  %v3397_v34 = vrot.slane %v3384_v11, %v3396_v2 }
 0x1d7   : > { %v3389_v59 = vrot.slane %v3384_v11, %v3388_v50 }
 0x1d9   : > { %v4396_v54 = vpop.f32.mrb[60].mxu1 }
 0x1da   : > { %v2295_v3 = vadd.f32 %v4396_v54, %v2247_v8  ;;  %v2286_v9 = vpop.f32.mrb[61].mxu1 }
 0x1db   : > { %v6146_v36 = vadd.f32 %v2286_v9, %v2239_v4  ;;  %v4397_v44 = vpop.f32.mrb[62].mxu1 }
 0x1dc   : > { %v2289_v12 = vpop.f32.mrb[63].mxu1 }
 0x1dd   : > { %v6148_v43 = vadd.f32 %v2289_v12, %v2242_v5  ;;  %v3393_v5 = vrot.slane %v3384_v11, %v3392_v1 }
 0x1e2   : > { %v3122_v13 = vpop.f32.mrb[24].mxu0 }
 0x1e3   : > { %v3124_v14 = vpop.f32.mrb[25].mxu0 }
 0x1e4   : > { %v3126_v15 = vpop.f32.mrb[26].mxu0 }
 0x1e5   : > { %v3127_v18 = vpop.f32.mrb[27].mxu0 }
 0x1f9   : > { %v4328_v60 = vpop.f32.mrb[64].mxu1 }
 0x1fa   : > { %v4329_v19 = vpop.f32.mrb[65].mxu1 }
 0x1fb   : > { %v4330_v20 = vadd.f32 %v4329_v19, %v4328_v60  ;;  %v4331_v21 = vpop.f32.mrb[66].mxu1 }
 0x1fc   : > { %v4332_v10 = vpop.f32.mrb[67].mxu1 }
 0x1fd   : > { %v4333_v24 = vadd.f32 %v4332_v10, %v4331_v21 }
 0x201   : > { %v4334_v26 = vpop.f32.mrb[68].mxu1 }
 0x202   : > { %v4335_v30 = vpop.f32.mrb[69].mxu1 }
 0x203   : > { %v4336_v16 = vadd.f32 %v4335_v30, %v4334_v26  ;;  %v4337_v27 = vpop.f32.mrb[70].mxu1 }
 0x204   : > { %v4338_v28 = vpop.f32.mrb[71].mxu1 }
 0x219   : > { %v4356_v29 = vpop.f32.mrb[72].mxu1 }
 0x21a   : > { %v4357_v35 = vpop.f32.mrb[73].mxu1 }
 0x21b   : > { %v4358_v38 = vadd.f32 %v4357_v35, %v4356_v29  ;;  %v4359_v39 = vpop.f32.mrb[74].mxu1 }
 0x21c   : > { %v4360_v22 = vpop.f32.mrb[75].mxu1 }
 0x21d   : > { %v4361_v41 = vadd.f32 %v4360_v22, %v4359_v39  ;;  %v3314_v42 = vadd.f32 %v4358_v38, %v4330_v20 }
 0x21f   : > { %v3317_v62 = vadd.f32 %v4361_v41, %v4333_v24 }
 0x221   : > { %v4362_v0 = vpop.f32.mrb[76].mxu1 }
 0x222   : > { %v3173_v47 = vpop.f32.mrb[28].mxu0  ;;  %v4363_v45 = vpop.f32.mrb[77].mxu1 }
 0x223   : > { %v3174_v49 = vadd.f32 %v3173_v47, %v3122_v13  ;;  %v3175_v51 = vpop.f32.mrb[29].mxu0  ;;  %v4364_v56 = vadd.f32 %v4363_v45, %v4362_v0  ;;  %v4365_v61 = vpop.f32.mrb[78].mxu1 }
 0x224   : > { %v3176_v52 = vadd.f32 %v3175_v51, %v3124_v14  ;;  %v3177_v58 = vpop.f32.mrb[30].mxu0  ;;  %v4366_v55 = vpop.f32.mrb[79].mxu1 }
 0x225   : > { %v3178_v33 = vpop.f32.mrb[31].mxu0  ;;  %v3322_v17 = vadd.f32 %v4364_v56, %v4336_v16 }
 0x229   : > { %v4408_v4 = vpop.f32.mrb[80].mxu1 }
 0x22a   : > { %v3214_v25 = vpop.f32.mrb[20].mxu0  ;;  %v3370_v6 = vadd.f32 %v4408_v4, %v3322_v17  ;;  %v3361_v7 = vpop.f32.mrb[81].mxu1 }
 0x22b   : > { %v4414_v23 = vadd.f32 %v6133_v32, %v3214_v25  ;;  %v3216_v63 = vpop.f32.mrb[21].mxu0  ;;  %v3362_v54 = vadd.f32 %v3361_v7, %v3314_v42  ;;  %v4409_v44 = vpop.f32.mrb[82].mxu1 }
 0x22c   : > { %v4419_v8 = vadd.f32 %v6136_v37, %v3216_v63  ;;  %v3218_v9 = vpop.f32.mrb[22].mxu0  ;;  %v3383_v13 = vadd.f32 %v3370_v6, %v2295_v3  ;;  %v3364_v18 = vpop.f32.mrb[83].mxu1 }
 0x22d   : > { %v3401_v12 = vadd.f32 %v4414_v23, %v3389_v59  ;;  %v4424_v14 = vadd.f32 %v6138_v48, %v3218_v9  ;;  %v3220_v15 = vpop.f32.mrb[23].mxu0  ;;  %v3377_v19 = vadd.f32 %v3362_v54, %v6146_v36  ;;  %v3365_v20 = vadd.f32 %v3364_v18, %v3317_v62 }
 0x22e   : > { %v3402_v60 = vadd.f32 %v4419_v8, %v3393_v5  ;;  %v4429_v32 = vadd.f32 %v6140_v31, %v3220_v15  ;;  %v3409_v10 = vadd.f32 %v3397_v34, %v3383_v13 }
 0x22f   : > { %v3410_v21 = vmax.f32 %v3401_v12, 0.0  ;;  %v3404_v24 = vadd.f32 %v4424_v14, %v3389_v59  ;;  %v3403_v26 = vadd.f32 %v3397_v34, %v3377_v19  ;;  %v3380_v16 = vadd.f32 %v3365_v20, %v6148_v43 }
 0x230   : > { %v3411_v37 = vmax.f32 %v3402_v60, 0.0  ;;  %v3405_v30 = vadd.f32 %v4429_v32, %v3393_v5  ;;  %v3418_v48 = vmax.f32 %v3409_v10, 0.0 }
 0x231   : > { %v3413_v3 = vmax.f32 %v3404_v24, 0.0  ;;  %v3412_v28 = vmax.f32 %v3403_v26, 0.0  ;;  %v3406_v29 = vadd.f32 %v3397_v34, %v3380_v16 }
 0x232   : > { %v4182_v27 = vpack.c.bf16 %v3411_v37, %v3410_v21  ;;  %v3414_v36 = vmax.f32 %v3405_v30, 0.0  ;;  %v3224_v31 = vpop.f32.mrb[32].mxu0  ;;  %v4187_v35 = vpack.c.bf16 %v3418_v48, %v3418_v48 }
 0x233   : > { %v3225_v38 = vadd.f32 %v3224_v31, %v3174_v49  ;;  %v3226_v39 = vpop.f32.mrb[33].mxu0  ;;  %v4183_v22 = vpack.c.bf16 %v3412_v28, %v3412_v28  ;;  %v3415_v41 = vmax.f32 %v3406_v29, 0.0 }
 0x234   : > { %3452 = vst [vmem:[%s170_s17] sm:$0xff] %v4182_v27  ;;  %v4184_v40 = vpack.c.bf16 %v3414_v36, %v3413_v3  ;;  %v3227_v42 = vadd.f32 %v3226_v39, %v3176_v52  ;;  %v3228_v43 = vpop.f32.mrb[34].mxu0  ;;  %3457 = vst [vmem:[%s170_s17 + $0x20] sm:$0xf] %v4187_v35 }
 0x235   : > { %v3381_v62 = vadd.f32 %v3225_v38, %v6142_v57  ;;  %v3229_v46 = vpop.f32.mrb[35].mxu0  ;;  %3453 = vst [vmem:[%s170_s17 + $0x8] sm:$0xf] %v4183_v22  ;;  %v4185_v47 = vpack.c.bf16 %v3415_v41, %v3415_v41 }
 0x236   : > { %3454 = vst [vmem:[%s170_s17 + $0xc] sm:$0xff] %v4184_v40  ;;  %v3382_v0 = vadd.f32 %v3227_v42, %v6144_v53 }
 0x237   : > { %v3407_v51 = vadd.f32 %v3389_v59, %v3381_v62  ;;  %3455 = vst [vmem:[%s170_s17 + $0x14] sm:$0xf] %v4185_v47 }
 0x238   : > { %v3408_v45 = vadd.f32 %v3393_v5, %v3382_v0 }
 0x239   : > { %v3416_v49 = vmax.f32 %v3407_v51, 0.0 }
 0x23a   : > { %v3417_v56 = vmax.f32 %v3408_v45, 0.0 }
 0x23c   : > { %v4186_v58 = vpack.c.bf16 %v3417_v56, %v3416_v49 }
 0x23e   : > { %3456 = vst [vmem:[%s170_s17 + $0x18] sm:$0xff] %v4186_v58 }
 0x23f PF: > { %s13_s12 = sadd.s32 1, %s4925_s12  }
 0x240   : > { %p10_p4 = scmp.ge.s32.totalorder %s13_s12, 4  }
 0x242   :  { %12 = sbr.rel (!%p10_p4) target bundleno = 1 (0x1), region = 64 }

// kernel: finetune_net_forward.9
= control target key start
LH: loop header
LB: loop body
LE: loop exit
PB: predicated region body
PF: predicated region fallthrough
CT: control target
= control target key end

     0   :  { %s5491_s12 = smov 0   ;;  %s6999_s0 = inlined_call_operand.vmem [shape: bf16[2,40,1152], index: 0, kind: input, shape index: {}]   ;;  %s7000_s1 = inlined_call_operand.vmem [shape: bf16[3,1152,256], index: 1, kind: input, shape index: {}]   ;;  %s7001_s2 = inlined_call_operand.vmem [shape: f32[1,256], index: 2, kind: input, shape index: {}]   ;;  %s7002_s3 = inlined_call_operand.vmem [shape: bf16[2,24,256], index: 3, kind: output, shape index: {}]  }
   0x1 LB: > { %s3880_s13 = sadd.s32 4294967295, %s5468_s12   ;;  %p3884_p0 = scmp.ge.s32.totalorder %s5468_s12, 1  ;;  %s5468_s12 = sphi %s5491_s12, %s13_s12  }
   0x2   : > { %p137_p1 = scmp.lt.s32.totalorder %s5468_s12, 3 }
   0x4   : > { %p138_p2 = pnand %p3884_p0, %p137_p1 }
   0x5   : > { %v4752_v0 = vld [vmem:[%s7000_s1 + $0x484] ss:$8 sps:$4 sm:$0xff] (!%p138_p2)   ;;  %v4756_v2 = vld [vmem:[%s7000_s1 + $0x480] ss:$8 sps:$4 sm:$0xff] (!%p138_p2)   ;;  %v4758_v4 = vld [vmem:[%s7000_s1 + $0x494] ss:$8 sps:$4 sm:$0xff] (!%p138_p2)  }
   0x6   : > { %141 = sbr.rel (%p138_p2) target bundleno = 679 (0x2a7), region = 32  ;;  %v4754_v1 = vld [vmem:[%s7000_s1 + $0x204] ss:$8 sps:$4 sm:$0xff] (!%p138_p2)   ;;  %1279 = vmatprep.subr.bf16.mxu1 (!%p138_p2), %v4752_v0  ;;  %v4757_v3 = vld [vmem:[%s7000_s1 + $0x200] ss:$8 sps:$4 sm:$0xff] (!%p138_p2)   ;;  %p161_p3 = scmp.lt.s32.totalorder (!%p138_p2), %s3880_s13, 1 }
   0x7   : > { %2406 = vmatprep.subr.bf16.mxu0 (!%p138_p2), %v4754_v1  ;;  %1280 = vmatpush1.bf16.msra.mxu1 (!%p138_p2), %v4756_v2  ;;  %v4760_v5 = vld [vmem:[%s7000_s1 + $0x214] ss:$8 sps:$4 sm:$0xff] (!%p138_p2)   ;;  %v4762_v6 = vld [vmem:[%s7000_s1 + $0x490] ss:$8 sps:$4 sm:$0xff] (!%p138_p2)   ;;  %v4764_v8 = vld [vmem:[%s7000_s1 + $0x4a4] ss:$8 sps:$4 sm:$0xff] (!%p138_p2)  }
   0x8   : > { %2407 = vmatpush1.bf16.msra.mxu0 (!%p138_p2), %v4757_v3  ;;  %1281 = vmatprep.subr.bf16.mxu1 (!%p138_p2), %v4758_v4  ;;  %v4763_v7 = vld [vmem:[%s7000_s1 + $0x210] ss:$8 sps:$4 sm:$0xff] (!%p138_p2)   ;;  %v4766_v9 = vld [vmem:[%s7000_s1 + $0x224] ss:$8 sps:$4 sm:$0xff] (!%p138_p2)   ;;  %v4768_v10 = vld [vmem:[%s7000_s1 + $0x4a0] ss:$8 sps:$4 sm:$0xff] (!%p138_p2)  }
   0x9   : > { %2408 = vmatprep.subr.bf16.mxu0 (!%p138_p2), %v4760_v5  ;;  %v4769_v11 = vld [vmem:[%s7000_s1 + $0x220] ss:$8 sps:$4 sm:$0xff] (!%p138_p2)   ;;  %v4770_v12 = vld [vmem:[%s7000_s1 + $0x4b4] ss:$8 sps:$4 sm:$0xff] (!%p138_p2)   ;;  %v4774_v14 = vld [vmem:[%s7000_s1 + $0x4b0] ss:$8 sps:$4 sm:$0xff] (!%p138_p2)  }
   0xa   : > { %v4772_v13 = vld [vmem:[%s7000_s1 + $0x234] ss:$8 sps:$4 sm:$0xff] (!%p138_p2)   ;;  %v4775_v15 = vld [vmem:[%s7000_s1 + $0x230] ss:$8 sps:$4 sm:$0xff] (!%p138_p2)   ;;  %v4776_v16 = vld [vmem:[%s7000_s1 + $0x4c4] ss:$8 sps:$4 sm:$0xff] (!%p138_p2)  }
   0xb   : > { %1282 = vmatpush1.bf16.msra.mxu1 (!%p138_p2), %v4762_v6  ;;  %v4778_v17 = vld [vmem:[%s7000_s1 + $0x244] ss:$8 sps:$4 sm:$0xff] (!%p138_p2)   ;;  %v4780_v18 = vld [vmem:[%s7000_s1 + $0x4c0] ss:$8 sps:$4 sm:$0xff] (!%p138_p2)   ;;  %v4782_v20 = vld [vmem:[%s7000_s1 + $0x4d4] ss:$8 sps:$4 sm:$0xff] (!%p138_p2)  }
   0xc   : > { %2409 = vmatpush1.bf16.msra.mxu0 (!%p138_p2), %v4763_v7  ;;  %1283 = vmatprep.subr.bf16.mxu1 (!%p138_p2), %v4764_v8  ;;  %v4781_v19 = vld [vmem:[%s7000_s1 + $0x240] ss:$8 sps:$4 sm:$0xff] (!%p138_p2)   ;;  %v4784_v21 = vld [vmem:[%s7000_s1 + $0x254] ss:$8 sps:$4 sm:$0xff] (!%p138_p2)   ;;  %v4786_v22 = vld [vmem:[%s7000_s1 + $0x4d0] ss:$8 sps:$4 sm:$0xff] (!%p138_p2)  }
   0xd   : > { %2410 = vmatprep.subr.bf16.mxu0 %v4766_v9  ;;  %v4787_v23 = vld [vmem:[%s7000_s1 + $0x250] ss:$8 sps:$4 sm:$0xff]   ;;  %v4788_v24 = vld [vmem:[%s7000_s1 + $0x4e4] ss:$8 sps:$4 sm:$0xff]   ;;  %v4792_v26 = vld [vmem:[%s7000_s1 + $0x4e0] ss:$8 sps:$4 sm:$0xff]  }
   0xe   : > { %v4790_v25 = vld [vmem:[%s7000_s1 + $0x264] ss:$8 sps:$4 sm:$0xff]   ;;  %v4793_v27 = vld [vmem:[%s7000_s1 + $0x260] ss:$8 sps:$4 sm:$0xff]   ;;  %v4794_v28 = vld [vmem:[%s7000_s1 + $0x4f4] ss:$8 sps:$4 sm:$0xff]  }
   0xf   : > { %1284 = vmatpush1.bf16.msra.mxu1 %v4768_v10  ;;  %v4796_v29 = vld [vmem:[%s7000_s1 + $0x274] ss:$8 sps:$4 sm:$0xff]   ;;  %v4798_v30 = vld [vmem:[%s7000_s1 + $0x4f0] ss:$8 sps:$4 sm:$0xff]   ;;  %v4800_v32 = vld [vmem:[%s7000_s1 + $0x504] ss:$8 sps:$4 sm:$0xff]  }
  0x10   : > { %2411 = vmatpush1.bf16.msra.mxu0 %v4769_v11  ;;  %1285 = vmatprep.subr.bf16.mxu1 %v4770_v12  ;;  %v4799_v31 = vld [vmem:[%s7000_s1 + $0x270] ss:$8 sps:$4 sm:$0xff]   ;;  %v4802_v33 = vld [vmem:[%s7000_s1 + $0x284] ss:$8 sps:$4 sm:$0xff]   ;;  %v4804_v34 = vld [vmem:[%s7000_s1 + $0x500] ss:$8 sps:$4 sm:$0xff]  }
  0x11   : > { %2412 = vmatprep.subr.bf16.mxu0 %v4772_v13  ;;  %v4805_v35 = vld [vmem:[%s7000_s1 + $0x280] ss:$8 sps:$4 sm:$0xff]   ;;  %s7004_s13 = smov (!%p161_p3, %s3880_s13), 1  ;;  %v4806_v36 = vld [vmem:[%s7000_s1 + $0x514] ss:$8 sps:$4 sm:$0xff]  }
  0x12   : > { %v4808_v37 = vld [vmem:[%s7000_s1 + $0x294] ss:$8 sps:$4 sm:$0xff]   ;;  %v4810_v38 = vld [vmem:[%s7000_s1 + $0x510] ss:$8 sps:$4 sm:$0xff]   ;;  %s4741_s17 = smul.u32 180, %s7004_s13 }
  0x13   : > { %1286 = vmatpush1.bf16.msra.mxu1 %v4774_v14  ;;  %v4811_v39 = vld [vmem:[%s7000_s1 + $0x290] ss:$8 sps:$4 sm:$0xff]   ;;  %v4812_v40 = vld [vmem:[%s7000_s1 + $0x524] ss:$8 sps:$4 sm:$0xff]   ;;  %v4816_v42 = vld [vmem:[%s7000_s1 + $0x520] ss:$8 sps:$4 sm:$0xff]  }
  0x14   : > { %2413 = vmatpush1.bf16.msra.mxu0 %v4775_v15  ;;  %1287 = vmatprep.subr.bf16.mxu1 %v4776_v16  ;;  %v4814_v41 = vld [vmem:[%s7000_s1 + $0x2a4] ss:$8 sps:$4 sm:$0xff]   ;;  %v4817_v43 = vld [vmem:[%s7000_s1 + $0x2a0] ss:$8 sps:$4 sm:$0xff]   ;;  %s5641_s30 = scalar_lea.vmem %s6999_s0, %s4741_s17  ;;  %v4818_v44 = vld [vmem:[%s7000_s1 + $0x534] ss:$8 sps:$4 sm:$0xff]  }
  0x15   : > { %2414 = vmatprep.subr.bf16.mxu0 %v4778_v17  ;;  %v4820_v45 = vld [vmem:[%s7000_s1 + $0x2b4] ss:$8 sps:$4 sm:$0xff]   ;;  %v4822_v46 = vld [vmem:[%s7000_s1 + $0x530] ss:$8 sps:$4 sm:$0xff]   ;;  %v177_v48 = vld [vmem:[%s5641_s30 + $0x24] sm:$0xff]  ;;  %s4742_s15 = smul.u32 24, %s7004_s13 }
  0x16   : > { %v4823_v47 = vld [vmem:[%s7000_s1 + $0x2b0] ss:$8 sps:$4 sm:$0xff]   ;;  %v182_v49 = vld [vmem:[%s5641_s30 + $0x48] sm:$0xff]  ;;  %v4830_v60 = vld [vmem:[%s7000_s1 + $0x554] ss:$8 sps:$4 sm:$0xff]  }
  0x17   : > { %1288 = vmatpush1.bf16.msra.mxu1 %v4780_v18  ;;  %v4824_v50 = vld [vmem:[%s7000_s1 + $0x544] ss:$8 sps:$4 sm:$0xff]   ;;  %v4032_v52 = vcombine.high %v177_v48, %v182_v49  ;;  %v174_v53 = vld [vmem:[%s5641_s30 + $0x10] sm:$0xff]  ;;  %v5668_v55 = vld [vmem:[%s5641_s30 + $0x58] sm:$0xff]  ;;  %v4031_v12 = vcombine.low %v177_v48, %v182_v49  ;;  %s170_s18 = scalar_lea.vmem %s7002_s3, %s4742_s15 }
  0x18   : > { %2415 = vmatpush1.bf16.msra.mxu0 %v4781_v19  ;;  %1289 = vmatprep.subr.bf16.mxu1 %v4782_v20  ;;  %v4826_v51 = vld [vmem:[%s7000_s1 + $0x2c4] ss:$8 sps:$4 sm:$0xff]   ;;  %v5665_v54 = vld [vmem:[%s5641_s30 + $0x34] sm:$0xff]  ;;  %v4828_v58 = vld [vmem:[%s7000_s1 + $0x540] ss:$8 sps:$4 sm:$0xff]   ;;  %v4207_v17 = vcombine.high %v5668_v55, %v5668_v55 }
  0x19   : > { %2416 = vmatprep.subr.bf16.mxu0 %v4784_v21  ;;  %1311 = vmatprep.mubr.bf16.mxu1 %v4032_v52  ;;  %v4035_v56 = vcombine.low %v5665_v54, %v5668_v55  ;;  %v4198_v57 = vcombine.high %v174_v53, %v5665_v54  ;;  %v4829_v59 = vld [vmem:[%s7000_s1 + $0x2c0] ss:$8 sps:$4 sm:$0xff]   ;;  %v4832_v61 = vld [vmem:[%s7000_s1 + $0x2d4] ss:$8 sps:$4 sm:$0xff]   ;;  %v4834_v62 = vld [vmem:[%s7000_s1 + $0x550] ss:$8 sps:$4 sm:$0xff]   ;;  %v4197_v11 = vcombine.low %v174_v53, %v5665_v54 }
  0x1a   : > { %v4835_v63 = vld [vmem:[%s7000_s1 + $0x2d0] ss:$8 sps:$4 sm:$0xff]   ;;  %v4836_v0 = vld [vmem:[%s7000_s1 + $0x564] ss:$8 sps:$4 sm:$0xff]   ;;  %v4840_v2 = vld [vmem:[%s7000_s1 + $0x560] ss:$8 sps:$4 sm:$0xff]   ;;  %v4036_v14 = vcombine.high %v5665_v54, %v5668_v55 }
  0x1b   : > { %1290 = vmatpush1.bf16.msra.mxu1 %v4786_v22  ;;  %2438 = vmatprep.mubr.bf16.mxu0 %v4198_v57  ;;  %v4838_v1 = vld [vmem:[%s7000_s1 + $0x2e4] ss:$8 sps:$4 sm:$0xff]   ;;  %v4841_v3 = vld [vmem:[%s7000_s1 + $0x2e0] ss:$8 sps:$4 sm:$0xff]   ;;  %v4842_v4 = vld [vmem:[%s7000_s1 + $0x574] ss:$8 sps:$4 sm:$0xff]  }
  0x1c   : > { %2417 = vmatpush1.bf16.msra.mxu0 %v4787_v23  ;;  %1291 = vmatprep.subr.bf16.mxu1 %v4788_v24  ;;  %v4844_v5 = vld [vmem:[%s7000_s1 + $0x2f4] ss:$8 sps:$4 sm:$0xff]   ;;  %v4846_v6 = vld [vmem:[%s7000_s1 + $0x570] ss:$8 sps:$4 sm:$0xff]   ;;  %v4851_v8 = vld [vmem:[%s7000_s1 + $0x584] ss:$8 sps:$4 sm:$0xff]   ;;  %v4206_v23 = vcombine.low %v5668_v55, %v5668_v55 }
  0x1d   : > { %2418 = vmatprep.subr.bf16.mxu0 %v4790_v25  ;;  %v4847_v7 = vld [vmem:[%s7000_s1 + $0x2f0] ss:$8 sps:$4 sm:$0xff]   ;;  %v4857_v9 = vld [vmem:[%s7000_s1 + $0x304] ss:$8 sps:$4 sm:$0xff]   ;;  %v4849_v10 = vld [vmem:[%s7000_s1 + $0x580] ss:$8 sps:$4 sm:$0xff]  }
  0x1e   : > { %v4855_v13 = vld [vmem:[%s7000_s1 + $0x300] ss:$8 sps:$4 sm:$0xff]   ;;  %v4861_v15 = vld [vmem:[%s7000_s1 + $0x594] ss:$8 sps:$4 sm:$0xff]   ;;  %v4859_v18 = vld [vmem:[%s7000_s1 + $0x590] ss:$8 sps:$4 sm:$0xff]  }
  0x1f   : > { %1292 = vmatpush1.bf16.msra.mxu1 %v4792_v26  ;;  %v4864_v16 = vld [vmem:[%s7000_s1 + $0x314] ss:$8 sps:$4 sm:$0xff]   ;;  %v4862_v19 = vld [vmem:[%s7000_s1 + $0x310] ss:$8 sps:$4 sm:$0xff]   ;;  %v4867_v20 = vld [vmem:[%s7000_s1 + $0x5a4] ss:$8 sps:$4 sm:$0xff]  }
  0x20   : > { %2419 = vmatpush1.bf16.msra.mxu0 %v4793_v27  ;;  %1293 = vmatprep.subr.bf16.mxu1 %v4794_v28  ;;  %v4870_v21 = vld [vmem:[%s7000_s1 + $0x324] ss:$8 sps:$4 sm:$0xff]   ;;  %v4865_v22 = vld [vmem:[%s7000_s1 + $0x5a0] ss:$8 sps:$4 sm:$0xff]   ;;  %v4873_v25 = vld [vmem:[%s7000_s1 + $0x5b4] ss:$8 sps:$4 sm:$0xff]  }
  0x21   : > { %2420 = vmatprep.subr.bf16.mxu0 %v4796_v29  ;;  %v4868_v24 = vld [vmem:[%s7000_s1 + $0x320] ss:$8 sps:$4 sm:$0xff]   ;;  %v4876_v26 = vld [vmem:[%s7000_s1 + $0x334] ss:$8 sps:$4 sm:$0xff]   ;;  %v4871_v27 = vld [vmem:[%s7000_s1 + $0x5b0] ss:$8 sps:$4 sm:$0xff]  }
  0x22   : > { %v4874_v28 = vld [vmem:[%s7000_s1 + $0x330] ss:$8 sps:$4 sm:$0xff]   ;;  %v4879_v29 = vld [vmem:[%s7000_s1 + $0x5c4] ss:$8 sps:$4 sm:$0xff]   ;;  %v4900_v48 = vld [vmem:[%s7000_s1 + $0x374] ss:$8 sps:$4 sm:$0xff]  }
  0x23   : > { %1294 = vmatpush1.bf16.msra.mxu1 %v4798_v30  ;;  %v4882_v30 = vld [vmem:[%s7000_s1 + $0x344] ss:$8 sps:$4 sm:$0xff]   ;;  %v5828_v49 = vld [vmem:[%s5641_s30 + $0x18] sm:$0xff] }
  0x24   : > { %2421 = vmatpush1.bf16.msra.mxu0 %v4799_v31  ;;  %1295 = vmatprep.subr.bf16.mxu1 %v4800_v32  ;;  %v4877_v31 = vld [vmem:[%s7000_s1 + $0x5c0] ss:$8 sps:$4 sm:$0xff]   ;;  %v4895_v52 = vld [vmem:[%s7000_s1 + $0x5f0] ss:$8 sps:$4 sm:$0xff]   ;;  %v4903_v57 = vld [vmem:[%s7000_s1 + $0x604] ss:$8 sps:$4 sm:$0xff]  }
  0x25   : > { %2422 = vmatprep.subr.bf16.mxu0 %v4802_v33  ;;  %v4880_v32 = vld [vmem:[%s7000_s1 + $0x340] ss:$8 sps:$4 sm:$0xff]   ;;  %v4885_v33 = vld [vmem:[%s7000_s1 + $0x5d4] ss:$8 sps:$4 sm:$0xff]   ;;  %v4898_v53 = vld [vmem:[%s7000_s1 + $0x370] ss:$8 sps:$4 sm:$0xff]  }
  0x26   : > { %v5078_v54 = vld [vmem:[%s7000_s1 + $0x9a4] ss:$8 sps:$4 sm:$0xff]  }
  0x27   : > { %1296 = vmatpush1.bf16.msra.mxu1 %v4804_v34  ;;  %v4888_v34 = vld [vmem:[%s7000_s1 + $0x354] ss:$8 sps:$4 sm:$0xff]  }
  0x28   : > { %2423 = vmatpush1.bf16.msra.mxu0 %v4805_v35  ;;  %1297 = vmatprep.subr.bf16.mxu1 %v4806_v36  ;;  %v5789_v35 = vld [vmem:[%s5641_s30 + $0x6c] sm:$0xff] }
  0x29   : > { %2424 = vmatprep.subr.bf16.mxu0 %v4808_v37  ;;  %v4041_v36 = vcombine.high %v5789_v35, %v5789_v35  ;;  %v4040_v37 = vcombine.low %v5789_v35, %v5789_v35 }
  0x2b   : > { %1298 = vmatpush1.bf16.msra.mxu1 %v4810_v38  ;;  %v4883_v38 = vld [vmem:[%s7000_s1 + $0x5d0] ss:$8 sps:$4 sm:$0xff]  }
  0x2c   : > { %2425 = vmatpush1.bf16.msra.mxu0 %v4811_v39  ;;  %1299 = vmatprep.subr.bf16.mxu1 %v4812_v40  ;;  %v4886_v39 = vld [vmem:[%s7000_s1 + $0x350] ss:$8 sps:$4 sm:$0xff]   ;;  %v4891_v40 = vld [vmem:[%s7000_s1 + $0x5e4] ss:$8 sps:$4 sm:$0xff]  }
  0x2d   : > { %2426 = vmatprep.subr.bf16.mxu0 %v4814_v41  ;;  %v4894_v41 = vld [vmem:[%s7000_s1 + $0x364] ss:$8 sps:$4 sm:$0xff]  }
  0x2f   : > { %1300 = vmatpush1.bf16.msra.mxu1 %v4816_v42  ;;  %v4889_v42 = vld [vmem:[%s7000_s1 + $0x5e0] ss:$8 sps:$4 sm:$0xff]  }
  0x30   : > { %2427 = vmatpush1.bf16.msra.mxu0 %v4817_v43  ;;  %1301 = vmatprep.subr.bf16.mxu1 %v4818_v44  ;;  %v4892_v43 = vld [vmem:[%s7000_s1 + $0x360] ss:$8 sps:$4 sm:$0xff]   ;;  %v5814_v44 = vld [vmem:[%s5641_s30 + $0x2c] sm:$0xff] }
  0x31   : > { %2428 = vmatprep.subr.bf16.mxu0 %v4820_v45  ;;  %v5817_v45 = vld [vmem:[%s5641_s30 + $0x50] sm:$0xff] }
  0x33   : > { %1302 = vmatpush1.bf16.msra.mxu1 %v4822_v46  ;;  %v4897_v46 = vld [vmem:[%s7000_s1 + $0x5f4] ss:$8 sps:$4 sm:$0xff]  }
  0x34   : > { %2429 = vmatpush1.bf16.msra.mxu0 %v4823_v47  ;;  %1303 = vmatprep.subr.bf16.mxu1 %v4824_v50  ;;  %v4034_v47 = vcombine.high %v5814_v44, %v5817_v45  ;;  %v5831_v50 = vld [vmem:[%s5641_s30 + $0x3c] sm:$0xff] }
  0x35   : > { %2430 = vmatprep.subr.bf16.mxu0 %v4826_v51  ;;  %v4200_v51 = vcombine.high %v5828_v49, %v5831_v50 }
  0x37   : > { %1304 = vmatpush1.bf16.msra.mxu1 %v4828_v58  ;;  %v4906_v58 = vld [vmem:[%s7000_s1 + $0x384] ss:$8 sps:$4 sm:$0xff]  }
  0x38   : > { %2431 = vmatpush1.bf16.msra.mxu0 %v4829_v59  ;;  %1305 = vmatprep.subr.bf16.mxu1 %v4830_v60  ;;  %v4901_v59 = vld [vmem:[%s7000_s1 + $0x600] ss:$8 sps:$4 sm:$0xff]  }
  0x39   : > { %2432 = vmatprep.subr.bf16.mxu0 %v4832_v61  ;;  %v4904_v60 = vld [vmem:[%s7000_s1 + $0x380] ss:$8 sps:$4 sm:$0xff]   ;;  %v4909_v61 = vld [vmem:[%s7000_s1 + $0x614] ss:$8 sps:$4 sm:$0xff]  }
  0x3b   : > { %1306 = vmatpush1.bf16.msra.mxu1 %v4834_v62  ;;  %v4912_v62 = vld [vmem:[%s7000_s1 + $0x394] ss:$8 sps:$4 sm:$0xff]  }
  0x3c   : > { %2433 = vmatpush1.bf16.msra.mxu0 %v4835_v63  ;;  %1307 = vmatprep.subr.bf16.mxu1 %v4836_v0  ;;  %v4907_v63 = vld [vmem:[%s7000_s1 + $0x610] ss:$8 sps:$4 sm:$0xff]  }
  0x3d   : > { %2434 = vmatprep.subr.bf16.mxu0 %v4838_v1  ;;  %v4910_v0 = vld [vmem:[%s7000_s1 + $0x390] ss:$8 sps:$4 sm:$0xff]   ;;  %v4915_v1 = vld [vmem:[%s7000_s1 + $0x624] ss:$8 sps:$4 sm:$0xff]  }
  0x3f   : > { %1308 = vmatpush1.bf16.msra.mxu1 %v4840_v2  ;;  %v4918_v2 = vld [vmem:[%s7000_s1 + $0x3a4] ss:$8 sps:$4 sm:$0xff]  }
  0x40   : > { %2435 = vmatpush1.bf16.msra.mxu0 %v4841_v3  ;;  %1309 = vmatprep.subr.bf16.mxu1 %v4842_v4  ;;  %v4913_v3 = vld [vmem:[%s7000_s1 + $0x620] ss:$8 sps:$4 sm:$0xff]  }
  0x41   : > { %2436 = vmatprep.subr.bf16.mxu0 %v4844_v5  ;;  %v4916_v4 = vld [vmem:[%s7000_s1 + $0x3a0] ss:$8 sps:$4 sm:$0xff]   ;;  %v4921_v5 = vld [vmem:[%s7000_s1 + $0x634] ss:$8 sps:$4 sm:$0xff]  }
  0x43   : > { %1310 = vmatpush1.bf16.msra.mxu1 %v4846_v6  ;;  %v4924_v6 = vld [vmem:[%s7000_s1 + $0x3b4] ss:$8 sps:$4 sm:$0xff]  }
  0x44   : > { %2437 = vmatpush1.bf16.msra.mxu0 %v4847_v7  ;;  %1330 = vmatprep.subr.bf16.mxu1 %v4851_v8  ;;  %v4919_v7 = vld [vmem:[%s7000_s1 + $0x630] ss:$8 sps:$4 sm:$0xff]  }
  0x45   : > { %2457 = vmatprep.subr.bf16.mxu0 %v4857_v9  ;;  %v4922_v8 = vld [vmem:[%s7000_s1 + $0x3b0] ss:$8 sps:$4 sm:$0xff]   ;;  %v4927_v9 = vld [vmem:[%s7000_s1 + $0x644] ss:$8 sps:$4 sm:$0xff]  }
  0x46   : > { %1312 = vmatmul.mubr.bf16.vlgmr.msra.gmra.mrb[0].mxu1 %v4031_v12  ;;  %v4928_v12 = vld [vmem:[%s7000_s1 + $0x3c0] ss:$8 sps:$4 sm:$0xff]  }
  0x47   : > { %2439 = vmatmul.mubr.bf16.vlgmr.msra.gmra.mrb[0].mxu0 %v4197_v11  ;;  %1331 = vmatpush1.bf16.msra.mxu1 %v4849_v10  ;;  %v4930_v10 = vld [vmem:[%s7000_s1 + $0x3c4] ss:$8 sps:$4 sm:$0xff]   ;;  %v4925_v11 = vld [vmem:[%s7000_s1 + $0x640] ss:$8 sps:$4 sm:$0xff]  }
  0x48   : > { %2458 = vmatpush1.bf16.msra.mxu0 %v4855_v13  ;;  %1332 = vmatprep.subr.bf16.mxu1 %v4861_v15  ;;  %v4933_v13 = vld [vmem:[%s7000_s1 + $0x654] ss:$8 sps:$4 sm:$0xff]  }
  0x49   : > { %2459 = vmatprep.subr.bf16.mxu0 %v4864_v16  ;;  %2448 = vmatprep.mubr.bf16.mxu0 %v4207_v17  ;;  %v4936_v15 = vld [vmem:[%s7000_s1 + $0x3d4] ss:$8 sps:$4 sm:$0xff]   ;;  %v4931_v16 = vld [vmem:[%s7000_s1 + $0x650] ss:$8 sps:$4 sm:$0xff]  }
  0x4a   : > { %1321 = vmatprep.mubr.bf16.mxu1 %v4041_v36  ;;  %v4934_v17 = vld [vmem:[%s7000_s1 + $0x3d0] ss:$8 sps:$4 sm:$0xff]  }
  0x4b   : > { %1333 = vmatpush1.bf16.msra.mxu1 %v4859_v18  ;;  %v4943_v18 = vld [vmem:[%s7000_s1 + $0x664] ss:$8 sps:$4 sm:$0xff]  }
  0x4c   : > { %2460 = vmatpush1.bf16.msra.mxu0 %v4862_v19  ;;  %1334 = vmatprep.subr.bf16.mxu1 %v4867_v20  ;;  %v4946_v19 = vld [vmem:[%s7000_s1 + $0x3e4] ss:$8 sps:$4 sm:$0xff]   ;;  %v4941_v20 = vld [vmem:[%s7000_s1 + $0x660] ss:$8 sps:$4 sm:$0xff]  }
  0x4d   : > { %2461 = vmatprep.subr.bf16.mxu0 %v4870_v21  ;;  %v4944_v21 = vld [vmem:[%s7000_s1 + $0x3e0] ss:$8 sps:$4 sm:$0xff]  }
  0x4e   : > { %1322 = vmatmul.mubr.bf16.gmra.mrb[4].mxu1 %v4040_v37  ;;  %v4965_v37 = vld [vmem:[%s7000_s1 + $0x694] ss:$8 sps:$4 sm:$0xff]  }
  0x4f   : > { %2449 = vmatmul.mubr.bf16.gmra.mrb[4].mxu0 %v4206_v23  ;;  %1335 = vmatpush1.bf16.msra.mxu1 %v4865_v22  ;;  %v4949_v22 = vld [vmem:[%s7000_s1 + $0x674] ss:$8 sps:$4 sm:$0xff]  }
  0x50   : > { %2462 = vmatpush1.bf16.msra.mxu0 %v4868_v24  ;;  %1336 = vmatprep.subr.bf16.mxu1 %v4873_v25  ;;  %v4952_v23 = vld [vmem:[%s7000_s1 + $0x3f4] ss:$8 sps:$4 sm:$0xff]   ;;  %v4947_v24 = vld [vmem:[%s7000_s1 + $0x670] ss:$8 sps:$4 sm:$0xff]  }
  0x51   : > { %2463 = vmatprep.subr.bf16.mxu0 %v4876_v26  ;;  %1362 = vmatprep.mubr.bf16.mxu1 %v4034_v47  ;;  %v4950_v25 = vld [vmem:[%s7000_s1 + $0x3f0] ss:$8 sps:$4 sm:$0xff]   ;;  %v4957_v26 = vld [vmem:[%s7000_s1 + $0x684] ss:$8 sps:$4 sm:$0xff]   ;;  %v4971_v47 = vld [vmem:[%s7000_s1 + $0x6a0] ss:$8 sps:$4 sm:$0xff]  }
  0x52   : > { %2489 = vmatprep.mubr.bf16.mxu0 %v4200_v51  ;;  %v4982_v51 = vld [vmem:[%s7000_s1 + $0x434] ss:$8 sps:$4 sm:$0xff]  }
  0x53   : > { %1337 = vmatpush1.bf16.msra.mxu1 %v4871_v27  ;;  %v4962_v27 = vld [vmem:[%s7000_s1 + $0x404] ss:$8 sps:$4 sm:$0xff]  }
  0x54   : > { %2464 = vmatpush1.bf16.msra.mxu0 %v4874_v28  ;;  %1338 = vmatprep.subr.bf16.mxu1 %v4879_v29  ;;  %v5944_v28 = vld [vmem:[%s5641_s30 + $0x74] sm:$0xff]  ;;  %v4033_v29 = vcombine.low %v5814_v44, %v5817_v45  ;;  %v4976_v44 = vld [vmem:[%s7000_s1 + $0x424] ss:$8 sps:$4 sm:$0xff]  }
  0x55   : > { %2465 = vmatprep.subr.bf16.mxu0 %v4882_v30  ;;  %v4199_v30 = vcombine.low %v5828_v49, %v5831_v50  ;;  %v4042_v45 = vcombine.low %v5944_v28, %v5944_v28  ;;  %v4979_v49 = vld [vmem:[%s7000_s1 + $0x6b4] ss:$8 sps:$4 sm:$0xff]  }
  0x57   : > { %1339 = vmatpush1.bf16.msra.mxu1 %v4877_v31  ;;  %v5951_v31 = vld [vmem:[%s5641_s30 + $0x60] sm:$0xff] }
  0x58   : > { %2466 = vmatpush1.bf16.msra.mxu0 %v4880_v32  ;;  %1340 = vmatprep.subr.bf16.mxu1 %v4885_v33  ;;  %v4955_v32 = vld [vmem:[%s7000_s1 + $0x680] ss:$8 sps:$4 sm:$0xff]   ;;  %v4037_v36 = vcombine.low %v5831_v50, %v5951_v31 }
  0x59   : > { %2467 = vmatprep.subr.bf16.mxu0 %v4888_v34  ;;  %v4960_v33 = vld [vmem:[%s7000_s1 + $0x400] ss:$8 sps:$4 sm:$0xff]   ;;  %v4038_v34 = vcombine.high %v5831_v50, %v5951_v31  ;;  %v5182_v50 = vld [vmem:[%s7000_s1 + $0xaa4] ss:$8 sps:$4 sm:$0xff]  }
  0x5b   : > { %1341 = vmatpush1.bf16.msra.mxu1 %v4883_v38  ;;  %v4968_v38 = vld [vmem:[%s7000_s1 + $0x414] ss:$8 sps:$4 sm:$0xff]  }
  0x5c   : > { %2468 = vmatpush1.bf16.msra.mxu0 %v4886_v39  ;;  %1342 = vmatprep.subr.bf16.mxu1 %v4891_v40  ;;  %v4043_v39 = vcombine.high %v5944_v28, %v5944_v28  ;;  %v4209_v40 = vcombine.high %v5951_v31, %v5951_v31 }
  0x5d   : > { %2469 = vmatprep.subr.bf16.mxu0 %v4894_v41  ;;  %v4963_v41 = vld [vmem:[%s7000_s1 + $0x690] ss:$8 sps:$4 sm:$0xff]  }
  0x5f   : > { %1343 = vmatpush1.bf16.msra.mxu1 %v4889_v42  ;;  %v4966_v42 = vld [vmem:[%s7000_s1 + $0x410] ss:$8 sps:$4 sm:$0xff]  }
  0x60   : > { %2470 = vmatpush1.bf16.msra.mxu0 %v4892_v43  ;;  %1344 = vmatprep.subr.bf16.mxu1 %v4897_v46  ;;  %v4973_v43 = vld [vmem:[%s7000_s1 + $0x6a4] ss:$8 sps:$4 sm:$0xff]   ;;  %v4208_v46 = vcombine.low %v5951_v31, %v5951_v31 }
  0x61   : > { %2471 = vmatprep.subr.bf16.mxu0 %v4900_v48  ;;  %v4974_v48 = vld [vmem:[%s7000_s1 + $0x420] ss:$8 sps:$4 sm:$0xff]  }
  0x63   : > { %1345 = vmatpush1.bf16.msra.mxu1 %v4895_v52  ;;  %v4977_v52 = vld [vmem:[%s7000_s1 + $0x6b0] ss:$8 sps:$4 sm:$0xff]  }
  0x64   : > { %2472 = vmatpush1.bf16.msra.mxu0 %v4898_v53  ;;  %1346 = vmatprep.subr.bf16.mxu1 %v4903_v57  ;;  %v4980_v53 = vld [vmem:[%s7000_s1 + $0x430] ss:$8 sps:$4 sm:$0xff]   ;;  %v4985_v57 = vld [vmem:[%s7000_s1 + $0x6c4] ss:$8 sps:$4 sm:$0xff]  }
  0x65   : > { %2473 = vmatprep.subr.bf16.mxu0 %v4906_v58  ;;  %v4988_v58 = vld [vmem:[%s7000_s1 + $0x444] ss:$8 sps:$4 sm:$0xff]  }
  0x67   : > { %1347 = vmatpush1.bf16.msra.mxu1 %v4901_v59  ;;  %v5470_v59 = vmov 0  }
  0x68   : > { %2474 = vmatpush1.bf16.msra.mxu0 %v4904_v60  ;;  %1348 = vmatprep.subr.bf16.mxu1 %v4909_v61  ;;  %v4983_v60 = vld [vmem:[%s7000_s1 + $0x6c0] ss:$8 sps:$4 sm:$0xff]  }
  0x69   : > { %2475 = vmatprep.subr.bf16.mxu0 %v4912_v62  ;;  %v4986_v61 = vld [vmem:[%s7000_s1 + $0x440] ss:$8 sps:$4 sm:$0xff]   ;;  %v4991_v62 = vld [vmem:[%s7000_s1 + $0x6d4] ss:$8 sps:$4 sm:$0xff]  }
  0x6b   : > { %1349 = vmatpush1.bf16.msra.mxu1 %v4907_v63  ;;  %v4989_v63 = vld [vmem:[%s7000_s1 + $0x6d0] ss:$8 sps:$4 sm:$0xff]  }
  0x6c   : > { %2476 = vmatpush1.bf16.msra.mxu0 %v4910_v0  ;;  %1350 = vmatprep.subr.bf16.mxu1 %v4915_v1  ;;  %v4992_v0 = vld [vmem:[%s7000_s1 + $0x450] ss:$8 sps:$4 sm:$0xff]   ;;  %v4999_v1 = vld [vmem:[%s7000_s1 + $0x6e4] ss:$8 sps:$4 sm:$0xff]  }
  0x6d   : > { %2477 = vmatprep.subr.bf16.mxu0 %v4918_v2  ;;  %v5002_v2 = vld [vmem:[%s7000_s1 + $0x464] ss:$8 sps:$4 sm:$0xff]  }
  0x6f   : > { %1351 = vmatpush1.bf16.msra.mxu1 %v4913_v3  ;;  %v6042_v3 = vld [vmem:[%s5641_s30 + $0x44] sm:$0xf] }
  0x70   : > { %2478 = vmatpush1.bf16.msra.mxu0 %v4916_v4  ;;  %1352 = vmatprep.subr.bf16.mxu1 %v4921_v5  ;;  %v6045_v4 = vld [vmem:[%s5641_s30 + $0x68] sm:$0xf] }
  0x71   : > { %2479 = vmatprep.subr.bf16.mxu0 %v4924_v6  ;;  %v4039_v5 = vcombine.low %v6042_v3, %v6045_v4  ;;  %v4997_v6 = vld [vmem:[%s7000_s1 + $0x6e0] ss:$8 sps:$4 sm:$0xff]  }
  0x73   : > { %1353 = vmatpush1.bf16.msra.mxu1 %v4919_v7  ;;  %v5000_v7 = vld [vmem:[%s7000_s1 + $0x460] ss:$8 sps:$4 sm:$0xff]  }
  0x74   : > { %2480 = vmatpush1.bf16.msra.mxu0 %v4922_v8  ;;  %1354 = vmatprep.subr.bf16.mxu1 %v4927_v9  ;;  %v5005_v8 = vld [vmem:[%s7000_s1 + $0x6f4] ss:$8 sps:$4 sm:$0xff]  }
  0x75   : > { %2481 = vmatprep.subr.bf16.mxu0 %v4930_v10  ;;  %v5008_v9 = vld [vmem:[%s7000_s1 + $0x474] ss:$8 sps:$4 sm:$0xff]   ;;  %v5003_v10 = vld [vmem:[%s7000_s1 + $0x6f0] ss:$8 sps:$4 sm:$0xff]  }
  0x77   : > { %1355 = vmatpush1.bf16.msra.mxu1 %v4925_v11  ;;  %v5006_v11 = vld [vmem:[%s7000_s1 + $0x470] ss:$8 sps:$4 sm:$0xff]  }
  0x78   : > { %2482 = vmatpush1.bf16.msra.mxu0 %v4928_v12  ;;  %1356 = vmatprep.subr.bf16.mxu1 %v4933_v13  ;;  %v176_v12 = vld [vmem:[%s5641_s30 + $0x20] sm:$0xf]  ;;  %v5011_v13 = vld [vmem:[%s7000_s1 + $0x704] ss:$8 sps:$4 sm:$0xff]  }
  0x79   : > { %2483 = vmatprep.subr.bf16.mxu0 %v4936_v15  ;;  %v5014_v15 = vld [vmem:[%s7000_s1 + $0x904] ss:$8 sps:$4 sm:$0xff]  }
  0x7b   : > { %1357 = vmatpush1.bf16.msra.mxu1 %v4931_v16  ;;  %v5009_v16 = vld [vmem:[%s7000_s1 + $0x700] ss:$8 sps:$4 sm:$0xff]  }
  0x7c   : > { %2484 = vmatpush1.bf16.msra.mxu0 %v4934_v17  ;;  %1358 = vmatprep.subr.bf16.mxu1 %v4943_v18  ;;  %v4201_v17 = vcombine.low %v176_v12, %v6042_v3  ;;  %v5012_v18 = vld [vmem:[%s7000_s1 + $0x900] ss:$8 sps:$4 sm:$0xff]   ;;  %v5082_v12 = vld [vmem:[%s7000_s1 + $0x9b0] ss:$8 sps:$4 sm:$0xff]  }
  0x7d   : > { %2485 = vmatprep.subr.bf16.mxu0 %v4946_v19  ;;  %v5018_v19 = vld [vmem:[%s7000_s1 + $0x714] ss:$8 sps:$4 sm:$0xff]   ;;  %v5231_v3 = vld [vmem:[%s7000_s1 + $0x20] ss:$8 sps:$4 sm:$0xff]  }
  0x7f   : > { %1359 = vmatpush1.bf16.msra.mxu1 %v4941_v20  ;;  %v5021_v20 = vld [vmem:[%s7000_s1 + $0x914] ss:$8 sps:$4 sm:$0xff]  }
  0x80   : > { %2486 = vmatpush1.bf16.msra.mxu0 %v4944_v21  ;;  %1360 = vmatprep.subr.bf16.mxu1 %v4949_v22  ;;  %v5016_v21 = vld [vmem:[%s7000_s1 + $0x710] ss:$8 sps:$4 sm:$0xff]  }
  0x81   : > { %2487 = vmatprep.subr.bf16.mxu0 %v4952_v23  ;;  %v5019_v22 = vld [vmem:[%s7000_s1 + $0x910] ss:$8 sps:$4 sm:$0xff]   ;;  %v5024_v23 = vld [vmem:[%s7000_s1 + $0x724] ss:$8 sps:$4 sm:$0xff]  }
  0x83   : > { %1361 = vmatpush1.bf16.msra.mxu1 %v4947_v24  ;;  %v5027_v24 = vld [vmem:[%s7000_s1 + $0x924] ss:$8 sps:$4 sm:$0xff]  }
  0x84   : > { %2488 = vmatpush1.bf16.msra.mxu0 %v4950_v25  ;;  %1381 = vmatprep.subr.bf16.mxu1 %v4957_v26  ;;  %v5022_v25 = vld [vmem:[%s7000_s1 + $0x720] ss:$8 sps:$4 sm:$0xff]   ;;  %v4210_v26 = vcombine.low %v6045_v4, %v6045_v4 }
  0x85   : > { %2508 = vmatprep.subr.bf16.mxu0 %v4962_v27  ;;  %v6106_v27 = vld [vmem:[%s5641_s30 + $0x48] sm:$0xff] }
  0x86   : > { %1363 = vmatmul.mubr.bf16.vlgmr.msra.gmra.mrb[0].mxu1 %v4033_v29  ;;  %v5025_v29 = vld [vmem:[%s7000_s1 + $0x920] ss:$8 sps:$4 sm:$0xff]  }
  0x87   : > { %2490 = vmatmul.mubr.bf16.vlgmr.msra.gmra.mrb[0].mxu0 %v4199_v30  ;;  %1382 = vmatpush1.bf16.msra.mxu1 %v4955_v32  ;;  %v5030_v30 = vld [vmem:[%s7000_s1 + $0x734] ss:$8 sps:$4 sm:$0xff]  }
  0x88   : > { %2509 = vmatpush1.bf16.msra.mxu0 %v4960_v33  ;;  %1383 = vmatprep.subr.bf16.mxu1 %v4965_v37  ;;  %v5033_v32 = vld [vmem:[%s7000_s1 + $0x934] ss:$8 sps:$4 sm:$0xff]   ;;  %v4500_v33 = vcombine.high %v6106_v27, %v5789_v35  ;;  %v5028_v37 = vld [vmem:[%s7000_s1 + $0x730] ss:$8 sps:$4 sm:$0xff]   ;;  %v5039_v35 = vld [vmem:[%s7000_s1 + $0x944] ss:$8 sps:$4 sm:$0xff]  }
  0x89   : > { %2510 = vmatprep.subr.bf16.mxu0 %v4968_v38  ;;  %1372 = vmatprep.mubr.bf16.mxu1 %v4043_v39  ;;  %v5031_v38 = vld [vmem:[%s7000_s1 + $0x930] ss:$8 sps:$4 sm:$0xff]   ;;  %v5036_v39 = vld [vmem:[%s7000_s1 + $0x744] ss:$8 sps:$4 sm:$0xff]  }
  0x8a   : > { %2499 = vmatprep.mubr.bf16.mxu0 %v4209_v40  ;;  %v5034_v40 = vld [vmem:[%s7000_s1 + $0x740] ss:$8 sps:$4 sm:$0xff]  }
  0x8b   : > { %1384 = vmatpush1.bf16.msra.mxu1 %v4963_v41  ;;  %v5037_v41 = vld [vmem:[%s7000_s1 + $0x940] ss:$8 sps:$4 sm:$0xff]  }
  0x8c   : > { %2511 = vmatpush1.bf16.msra.mxu0 %v4966_v42  ;;  %1385 = vmatprep.subr.bf16.mxu1 %v4973_v43  ;;  %v5042_v42 = vld [vmem:[%s7000_s1 + $0x754] ss:$8 sps:$4 sm:$0xff]  }
  0x8d   : > { %2512 = vmatprep.subr.bf16.mxu0 %v4976_v44  ;;  %v5045_v43 = vld [vmem:[%s7000_s1 + $0x954] ss:$8 sps:$4 sm:$0xff]   ;;  %v5040_v44 = vld [vmem:[%s7000_s1 + $0x750] ss:$8 sps:$4 sm:$0xff]  }
  0x8e   : > { %1373 = vmatmul.mubr.bf16.gmra.mrb[8].mxu1 %v4042_v45  ;;  %v5043_v45 = vld [vmem:[%s7000_s1 + $0x950] ss:$8 sps:$4 sm:$0xff]  }
  0x8f   : > { %2500 = vmatmul.mubr.bf16.gmra.mrb[8].mxu0 %v4208_v46  ;;  %1386 = vmatpush1.bf16.msra.mxu1 %v4971_v47  ;;  %v5048_v46 = vld [vmem:[%s7000_s1 + $0x764] ss:$8 sps:$4 sm:$0xff]  }
  0x90   : > { %2513 = vmatpush1.bf16.msra.mxu0 %v4974_v48  ;;  %1387 = vmatprep.subr.bf16.mxu1 %v4979_v49  ;;  %v5051_v47 = vld [vmem:[%s7000_s1 + $0x964] ss:$8 sps:$4 sm:$0xff]   ;;  %v5046_v48 = vld [vmem:[%s7000_s1 + $0x760] ss:$8 sps:$4 sm:$0xff]  }
  0x91   : > { %2514 = vmatprep.subr.bf16.mxu0 %v4982_v51  ;;  %2540 = vmatprep.mubr.bf16.mxu0 %v5470_v59  ;;  %v5049_v49 = vld [vmem:[%s7000_s1 + $0x960] ss:$8 sps:$4 sm:$0xff]   ;;  %v5054_v51 = vld [vmem:[%s7000_s1 + $0x774] ss:$8 sps:$4 sm:$0xff]  }
  0x92   : > { %1413 = vmatprep.mubr.bf16.mxu1 %v4036_v14  ;;  %v4994_v14 = vld [vmem:[%s7000_s1 + $0x454] ss:$8 sps:$4 sm:$0xff]  }
  0x93   : > { %1388 = vmatpush1.bf16.msra.mxu1 %v4977_v52  ;;  %v5057_v52 = vld [vmem:[%s7000_s1 + $0x974] ss:$8 sps:$4 sm:$0xff]  }
  0x94   : > { %2515 = vmatpush1.bf16.msra.mxu0 %v4980_v53  ;;  %1389 = vmatprep.subr.bf16.mxu1 %v4985_v57  ;;  %v5052_v53 = vld [vmem:[%s7000_s1 + $0x770] ss:$8 sps:$4 sm:$0xff]  }
  0x95   : > { %2516 = vmatprep.subr.bf16.mxu0 %v4988_v58  ;;  %v5055_v57 = vld [vmem:[%s7000_s1 + $0x970] ss:$8 sps:$4 sm:$0xff]   ;;  %v5061_v58 = vld [vmem:[%s7000_s1 + $0x784] ss:$8 sps:$4 sm:$0xff]  }
  0x97   : > { %1390 = vmatpush1.bf16.msra.mxu1 %v4983_v60  ;;  %v5064_v60 = vld [vmem:[%s7000_s1 + $0x984] ss:$8 sps:$4 sm:$0xff]  }
  0x98   : > { %2517 = vmatpush1.bf16.msra.mxu0 %v4986_v61  ;;  %1391 = vmatprep.subr.bf16.mxu1 %v4991_v62  ;;  %v333_v61 = vld [vmem:[%s5641_s30 + $0x7c] sm:$0xff] }
  0x99   : > { %2518 = vmatprep.subr.bf16.mxu0 %v4994_v14  ;;  %v5059_v62 = vld [vmem:[%s7000_s1 + $0x780] ss:$8 sps:$4 sm:$0xff]   ;;  %v4044_v55 = vcombine.low %v333_v61, %v333_v61 }
  0x9a   : > { %v5062_v14 = vld [vmem:[%s7000_s1 + $0x980] ss:$8 sps:$4 sm:$0xff]  }
  0x9b   : > { %1392 = vmatpush1.bf16.msra.mxu1 %v4989_v63  ;;  %v5067_v63 = vld [vmem:[%s7000_s1 + $0x794] ss:$8 sps:$4 sm:$0xff]  }
  0x9c   : > { %2519 = vmatpush1.bf16.msra.mxu0 %v4992_v0  ;;  %1393 = vmatprep.subr.bf16.mxu1 %v4999_v1  ;;  %v5070_v0 = vld [vmem:[%s7000_s1 + $0x994] ss:$8 sps:$4 sm:$0xff]   ;;  %v4045_v1 = vcombine.high %v333_v61, %v333_v61  ;;  %v5139_v61 = vld [vmem:[%s7000_s1 + $0x844] ss:$8 sps:$4 sm:$0xff]  }
  0x9d   : > { %2520 = vmatprep.subr.bf16.mxu0 %v5002_v2  ;;  %v5065_v2 = vld [vmem:[%s7000_s1 + $0x790] ss:$8 sps:$4 sm:$0xff]  }
  0x9f   : > { %1394 = vmatpush1.bf16.msra.mxu1 %v4997_v6  ;;  %v5068_v6 = vld [vmem:[%s7000_s1 + $0x990] ss:$8 sps:$4 sm:$0xff]  }
  0xa0   : > { %2521 = vmatpush1.bf16.msra.mxu0 %v5000_v7  ;;  %1395 = vmatprep.subr.bf16.mxu1 %v5005_v8  ;;  %v5075_v7 = vld [vmem:[%s7000_s1 + $0x7a4] ss:$8 sps:$4 sm:$0xff]   ;;  %v5076_v8 = vld [vmem:[%s7000_s1 + $0x9a0] ss:$8 sps:$4 sm:$0xff]  }
  0xa1   : > { %2522 = vmatprep.subr.bf16.mxu0 %v5008_v9  ;;  %v5081_v9 = vld [vmem:[%s7000_s1 + $0x7b4] ss:$8 sps:$4 sm:$0xff]  }
  0xa3   : > { %1396 = vmatpush1.bf16.msra.mxu1 %v5003_v10  ;;  %v5084_v10 = vld [vmem:[%s7000_s1 + $0x9b4] ss:$8 sps:$4 sm:$0xff]  }
  0xa4   : > { %2523 = vmatpush1.bf16.msra.mxu0 %v5006_v11  ;;  %1397 = vmatprep.subr.bf16.mxu1 %v5011_v13  ;;  %v5079_v11 = vld [vmem:[%s7000_s1 + $0x7b0] ss:$8 sps:$4 sm:$0xff]   ;;  %v5087_v13 = vld [vmem:[%s7000_s1 + $0x7c4] ss:$8 sps:$4 sm:$0xff]  }
  0xa5   : > { %3517 = vmatprep.subr.bf16.mxu0 %v5014_v15  ;;  %v5090_v15 = vld [vmem:[%s7000_s1 + $0x9c4] ss:$8 sps:$4 sm:$0xff]  }
  0xa7   : > { %2541 = vmatmul.mubr.bf16.vlgmr.msra.gmra.mrb[0].mxu0 %v4201_v17  ;;  %1398 = vmatpush1.bf16.msra.mxu1 %v5009_v16  ;;  %v5085_v16 = vld [vmem:[%s7000_s1 + $0x7c0] ss:$8 sps:$4 sm:$0xff]  }
  0xa8   : > { %3518 = vmatpush1.bf16.msra.mxu0 %v5012_v18  ;;  %1399 = vmatprep.subr.bf16.mxu1 %v5018_v19  ;;  %v5088_v17 = vld [vmem:[%s7000_s1 + $0x9c0] ss:$8 sps:$4 sm:$0xff]   ;;  %v5093_v18 = vld [vmem:[%s7000_s1 + $0x7d4] ss:$8 sps:$4 sm:$0xff]   ;;  %v5091_v19 = vld [vmem:[%s7000_s1 + $0x7d0] ss:$8 sps:$4 sm:$0xff]  }
  0xa9   : > { %3519 = vmatprep.subr.bf16.mxu0 %v5021_v20  ;;  %2550 = vmatprep.mubr.bf16.mxu0 %v5470_v59  ;;  %v5094_v20 = vld [vmem:[%s7000_s1 + $0x9d0] ss:$8 sps:$4 sm:$0xff]  }
  0xab   : > { %1400 = vmatpush1.bf16.msra.mxu1 %v5016_v21  ;;  %v5101_v21 = vld [vmem:[%s7000_s1 + $0x7e4] ss:$8 sps:$4 sm:$0xff]  }
  0xac   : > { %3520 = vmatpush1.bf16.msra.mxu0 %v5019_v22  ;;  %1401 = vmatprep.subr.bf16.mxu1 %v5024_v23  ;;  %v5104_v22 = vld [vmem:[%s7000_s1 + $0x9e4] ss:$8 sps:$4 sm:$0xff]   ;;  %v5099_v23 = vld [vmem:[%s7000_s1 + $0x7e0] ss:$8 sps:$4 sm:$0xff]  }
  0xad   : > { %3521 = vmatprep.subr.bf16.mxu0 %v5027_v24  ;;  %v5102_v24 = vld [vmem:[%s7000_s1 + $0x9e0] ss:$8 sps:$4 sm:$0xff]  }
  0xaf   : > { %2551 = vmatmul.mubr.bf16.gmra.mrb[12].mxu0 %v4210_v26  ;;  %1402 = vmatpush1.bf16.msra.mxu1 %v5022_v25  ;;  %v5107_v25 = vld [vmem:[%s7000_s1 + $0x7f4] ss:$8 sps:$4 sm:$0xff]  }
  0xb0   : > { %3522 = vmatpush1.bf16.msra.mxu0 %v5025_v29  ;;  %1403 = vmatprep.subr.bf16.mxu1 %v5030_v30  ;;  %v5110_v26 = vld [vmem:[%s7000_s1 + $0x9f4] ss:$8 sps:$4 sm:$0xff]   ;;  %v5105_v29 = vld [vmem:[%s7000_s1 + $0x7f0] ss:$8 sps:$4 sm:$0xff]  }
  0xb1   : > { %3523 = vmatprep.subr.bf16.mxu0 %v5033_v32  ;;  %3549 = vmatprep.mubr.bf16.mxu0 %v4500_v33  ;;  %v5108_v30 = vld [vmem:[%s7000_s1 + $0x9f0] ss:$8 sps:$4 sm:$0xff]   ;;  %v5113_v32 = vld [vmem:[%s7000_s1 + $0x804] ss:$8 sps:$4 sm:$0xff]  }
  0xb2   : > { %v5118_v33 = vld [vmem:[%s7000_s1 + $0xa04] ss:$8 sps:$4 sm:$0xff]  }
  0xb3   : > { %1404 = vmatpush1.bf16.msra.mxu1 %v5028_v37  ;;  %v5111_v37 = vld [vmem:[%s7000_s1 + $0x800] ss:$8 sps:$4 sm:$0xff]  }
  0xb4   : > { %3524 = vmatpush1.bf16.msra.mxu0 %v5031_v38  ;;  %1405 = vmatprep.subr.bf16.mxu1 %v5036_v39  ;;  %v5456_v38 = vld [vmem:[%s5641_s30 + $0x6c] sm:$0xff] }
  0xb5   : > { %3525 = vmatprep.subr.bf16.mxu0 %v5039_v35  ;;  %v4499_v39 = vcombine.low %v6106_v27, %v5456_v38  ;;  %v2569_v35 = vld [vmem:[%s5641_s30 + $0x90] sm:$0xff] }
  0xb6   : > { %v5119_v27 = vld [vmem:[%s7000_s1 + $0x810] ss:$8 sps:$4 sm:$0xff]   ;;  %v5200_v38 = vld [vmem:[%s7000_s1 + $0xad4] ss:$8 sps:$4 sm:$0xff]  }
  0xb7   : > { %1406 = vmatpush1.bf16.msra.mxu1 %v5034_v40  ;;  %v5116_v40 = vld [vmem:[%s7000_s1 + $0xa00] ss:$8 sps:$4 sm:$0xff]  }
  0xb8   : > { %3526 = vmatpush1.bf16.msra.mxu0 %v5037_v41  ;;  %1407 = vmatprep.subr.bf16.mxu1 %v5042_v42  ;;  %v5121_v41 = vld [vmem:[%s7000_s1 + $0x814] ss:$8 sps:$4 sm:$0xff]  }
  0xb9   : > { %3527 = vmatprep.subr.bf16.mxu0 %v5045_v43  ;;  %v5124_v42 = vld [vmem:[%s7000_s1 + $0xa14] ss:$8 sps:$4 sm:$0xff]   ;;  %v4509_v43 = vcombine.high %v2569_v35, %v2569_v35 }
  0xbb   : > { %1408 = vmatpush1.bf16.msra.mxu1 %v5040_v44  ;;  %v5122_v44 = vld [vmem:[%s7000_s1 + $0xa10] ss:$8 sps:$4 sm:$0xff]  }
  0xbc   : > { %3528 = vmatpush1.bf16.msra.mxu0 %v5043_v45  ;;  %1409 = vmatprep.subr.bf16.mxu1 %v5048_v46  ;;  %v5127_v45 = vld [vmem:[%s7000_s1 + $0x824] ss:$8 sps:$4 sm:$0xff]  }
  0xbd   : > { %3529 = vmatprep.subr.bf16.mxu0 %v5051_v47  ;;  %v5130_v46 = vld [vmem:[%s7000_s1 + $0xa24] ss:$8 sps:$4 sm:$0xff]   ;;  %v5125_v47 = vld [vmem:[%s7000_s1 + $0x820] ss:$8 sps:$4 sm:$0xff]  }
  0xbf   : > { %1410 = vmatpush1.bf16.msra.mxu1 %v5046_v48  ;;  %v4508_v48 = vcombine.low %v2569_v35, %v2569_v35  ;;  %v5198_v35 = vld [vmem:[%s7000_s1 + $0xad0] ss:$8 sps:$4 sm:$0xff]  }
  0xc0   : > { %3530 = vmatpush1.bf16.msra.mxu0 %v5049_v49  ;;  %1411 = vmatprep.subr.bf16.mxu1 %v5054_v51  ;;  %v6313_v49 = vld [vmem:[%s5641_s30 + $0x50] sm:$0xff]  ;;  %v5128_v51 = vld [vmem:[%s7000_s1 + $0xa20] ss:$8 sps:$4 sm:$0xff]  }
  0xc1   : > { %3531 = vmatprep.subr.bf16.mxu0 %v5057_v52  ;;  %v5133_v52 = vld [vmem:[%s7000_s1 + $0x834] ss:$8 sps:$4 sm:$0xff]  }
  0xc3   : > { %1412 = vmatpush1.bf16.msra.mxu1 %v5052_v53  ;;  %v5136_v53 = vld [vmem:[%s7000_s1 + $0xa34] ss:$8 sps:$4 sm:$0xff]  }
  0xc4   : > { %3532 = vmatpush1.bf16.msra.mxu0 %v5055_v57  ;;  %1432 = vmatprep.subr.bf16.mxu1 %v5061_v58  ;;  %v4502_v57 = vcombine.high %v6313_v49, %v5944_v28  ;;  %v5131_v58 = vld [vmem:[%s7000_s1 + $0x830] ss:$8 sps:$4 sm:$0xff]   ;;  %v5142_v28 = vld [vmem:[%s7000_s1 + $0xa44] ss:$8 sps:$4 sm:$0xff]  }
  0xc5   : > { %3533 = vmatprep.subr.bf16.mxu0 %v5064_v60  ;;  %v5134_v60 = vld [vmem:[%s7000_s1 + $0xa30] ss:$8 sps:$4 sm:$0xff]  }
  0xc6   : > { %1414 = vmatmul.mubr.bf16.vlgmr.msra.gmra.mrb[0].mxu1 %v4035_v56  ;;  %v5073_v56 = vld [vmem:[%s7000_s1 + $0x7a0] ss:$8 sps:$4 sm:$0xff]  }
  0xc7   : > { %1433 = vmatpush1.bf16.msra.mxu1 %v5059_v62  ;;  %1423 = vmatprep.mubr.bf16.mxu1 %v4045_v1  ;;  %v5137_v62 = vld [vmem:[%s7000_s1 + $0x840] ss:$8 sps:$4 sm:$0xff]   ;;  %v5143_v1 = vld [vmem:[%s7000_s1 + $0x850] ss:$8 sps:$4 sm:$0xff]  }
  0xc8   : > { %3534 = vmatpush1.bf16.msra.mxu0 %v5062_v14  ;;  %1434 = vmatprep.subr.bf16.mxu1 %v5067_v63  ;;  %v5140_v14 = vld [vmem:[%s7000_s1 + $0xa40] ss:$8 sps:$4 sm:$0xff]   ;;  %v5145_v63 = vld [vmem:[%s7000_s1 + $0x854] ss:$8 sps:$4 sm:$0xff]  }
  0xc9   : > { %3535 = vmatprep.subr.bf16.mxu0 %v5070_v0  ;;  %v5148_v0 = vld [vmem:[%s7000_s1 + $0xa54] ss:$8 sps:$4 sm:$0xff]  }
  0xcb   : > { %1435 = vmatpush1.bf16.msra.mxu1 %v5065_v2  ;;  %v5146_v2 = vld [vmem:[%s7000_s1 + $0xa50] ss:$8 sps:$4 sm:$0xff]  }
  0xcc   : > { %3536 = vmatpush1.bf16.msra.mxu0 %v5068_v6  ;;  %1436 = vmatprep.subr.bf16.mxu1 %v5075_v7  ;;  %v5151_v6 = vld [vmem:[%s7000_s1 + $0x864] ss:$8 sps:$4 sm:$0xff]  }
  0xcd   : > { %3537 = vmatprep.subr.bf16.mxu0 %v5078_v54  ;;  %v5154_v7 = vld [vmem:[%s7000_s1 + $0xa64] ss:$8 sps:$4 sm:$0xff]   ;;  %v5149_v54 = vld [vmem:[%s7000_s1 + $0x860] ss:$8 sps:$4 sm:$0xff]  }
  0xce   : > { %1424 = vmatmul.mubr.bf16.gmra.mrb[12].mxu1 %v4044_v55  ;;  %v5152_v55 = vld [vmem:[%s7000_s1 + $0xa60] ss:$8 sps:$4 sm:$0xff]  }
  0xcf   : > { %1437 = vmatpush1.bf16.msra.mxu1 %v5073_v56  ;;  %1464 = vmatprep.mubr.bf16.mxu1 %v4038_v34  ;;  %v5096_v34 = vld [vmem:[%s7000_s1 + $0x9d4] ss:$8 sps:$4 sm:$0xff]  }
  0xd0   : > { %3538 = vmatpush1.bf16.msra.mxu0 %v5076_v8  ;;  %1438 = vmatprep.subr.bf16.mxu1 %v5081_v9  ;;  %v5157_v56 = vld [vmem:[%s7000_s1 + $0x874] ss:$8 sps:$4 sm:$0xff]   ;;  %v5155_v9 = vld [vmem:[%s7000_s1 + $0x870] ss:$8 sps:$4 sm:$0xff]  }
  0xd1   : > { %3539 = vmatprep.subr.bf16.mxu0 %v5084_v10  ;;  %v5160_v8 = vld [vmem:[%s7000_s1 + $0xa74] ss:$8 sps:$4 sm:$0xff]   ;;  %v5158_v10 = vld [vmem:[%s7000_s1 + $0xa70] ss:$8 sps:$4 sm:$0xff]  }
  0xd3   : > { %1439 = vmatpush1.bf16.msra.mxu1 %v5079_v11  ;;  %v5165_v11 = vld [vmem:[%s7000_s1 + $0x884] ss:$8 sps:$4 sm:$0xff]  }
  0xd4   : > { %3540 = vmatpush1.bf16.msra.mxu0 %v5082_v12  ;;  %1440 = vmatprep.subr.bf16.mxu1 %v5087_v13  ;;  %v5168_v12 = vld [vmem:[%s7000_s1 + $0xa84] ss:$8 sps:$4 sm:$0xff]   ;;  %v5163_v13 = vld [vmem:[%s7000_s1 + $0x880] ss:$8 sps:$4 sm:$0xff]  }
  0xd5   : > { %3541 = vmatprep.subr.bf16.mxu0 %v5090_v15  ;;  %v334_v15 = vld [vmem:[%s5641_s30 + $0x84] sm:$0xff] }
  0xd6   : > { %v4046_v31 = vcombine.low %v334_v15, %v334_v15 }
  0xd7   : > { %1441 = vmatpush1.bf16.msra.mxu1 %v5085_v16  ;;  %v5166_v16 = vld [vmem:[%s7000_s1 + $0xa80] ss:$8 sps:$4 sm:$0xff]  }
  0xd8   : > { %3542 = vmatpush1.bf16.msra.mxu0 %v5088_v17  ;;  %1442 = vmatprep.subr.bf16.mxu1 %v5093_v18  ;;  %v5171_v17 = vld [vmem:[%s7000_s1 + $0x894] ss:$8 sps:$4 sm:$0xff]  }
  0xd9   : > { %3543 = vmatprep.subr.bf16.mxu0 %v5096_v34  ;;  %v5174_v18 = vld [vmem:[%s7000_s1 + $0xa94] ss:$8 sps:$4 sm:$0xff]   ;;  %v4047_v34 = vcombine.high %v334_v15, %v334_v15  ;;  %v5241_v15 = vld [vmem:[%s7000_s1 + $0xb30] ss:$8 sps:$4 sm:$0xff]  }
  0xdb   : > { %1443 = vmatpush1.bf16.msra.mxu1 %v5091_v19  ;;  %v5169_v19 = vld [vmem:[%s7000_s1 + $0x890] ss:$8 sps:$4 sm:$0xff]  }
  0xdc   : > { %3544 = vmatpush1.bf16.msra.mxu0 %v5094_v20  ;;  %1444 = vmatprep.subr.bf16.mxu1 %v5101_v21  ;;  %v5172_v20 = vld [vmem:[%s7000_s1 + $0xa90] ss:$8 sps:$4 sm:$0xff]   ;;  %v5179_v21 = vld [vmem:[%s7000_s1 + $0x8a4] ss:$8 sps:$4 sm:$0xff]  }
  0xdd   : > { %3545 = vmatprep.subr.bf16.mxu0 %v5104_v22  ;;  %v5180_v22 = vld [vmem:[%s7000_s1 + $0xaa0] ss:$8 sps:$4 sm:$0xff]  }
  0xdf   : > { %1445 = vmatpush1.bf16.msra.mxu1 %v5099_v23  ;;  %v5185_v23 = vld [vmem:[%s7000_s1 + $0x8b4] ss:$8 sps:$4 sm:$0xff]  }
  0xe0   : > { %3546 = vmatpush1.bf16.msra.mxu0 %v5102_v24  ;;  %1446 = vmatprep.subr.bf16.mxu1 %v5107_v25  ;;  %v5188_v24 = vld [vmem:[%s7000_s1 + $0xab4] ss:$8 sps:$4 sm:$0xff]   ;;  %v5183_v25 = vld [vmem:[%s7000_s1 + $0x8b0] ss:$8 sps:$4 sm:$0xff]  }
  0xe1   : > { %3547 = vmatprep.subr.bf16.mxu0 %v5110_v26  ;;  %v5186_v26 = vld [vmem:[%s7000_s1 + $0xab0] ss:$8 sps:$4 sm:$0xff]  }
  0xe3   : > { %1447 = vmatpush1.bf16.msra.mxu1 %v5105_v29  ;;  %v5191_v29 = vld [vmem:[%s7000_s1 + $0x8c4] ss:$8 sps:$4 sm:$0xff]  }
  0xe4   : > { %3548 = vmatpush1.bf16.msra.mxu0 %v5108_v30  ;;  %1448 = vmatprep.subr.bf16.mxu1 %v5113_v32  ;;  %v5194_v30 = vld [vmem:[%s7000_s1 + $0xac4] ss:$8 sps:$4 sm:$0xff]   ;;  %v5189_v32 = vld [vmem:[%s7000_s1 + $0x8c0] ss:$8 sps:$4 sm:$0xff]  }
  0xe5   : > { %3568 = vmatprep.subr.bf16.mxu0 %v5118_v33  ;;  %v5192_v33 = vld [vmem:[%s7000_s1 + $0xac0] ss:$8 sps:$4 sm:$0xff]  }
  0xe7   : > { %3550 = vmatmul.mubr.bf16.vlgmr.msra.gmra.mrb[0].mxu0 %v4499_v39  ;;  %1449 = vmatpush1.bf16.msra.mxu1 %v5111_v37  ;;  %v5197_v37 = vld [vmem:[%s7000_s1 + $0x8d4] ss:$8 sps:$4 sm:$0xff]   ;;  %v5195_v39 = vld [vmem:[%s7000_s1 + $0x8d0] ss:$8 sps:$4 sm:$0xff]  }
  0xe8   : > { %3569 = vmatpush1.bf16.msra.mxu0 %v5116_v40  ;;  %1450 = vmatprep.subr.bf16.mxu1 %v5121_v41  ;;  %v5205_v40 = vld [vmem:[%s7000_s1 + $0x8e4] ss:$8 sps:$4 sm:$0xff]  }
  0xe9   : > { %3570 = vmatprep.subr.bf16.mxu0 %v5124_v42  ;;  %3559 = vmatprep.mubr.bf16.mxu0 %v4509_v43  ;;  %v5208_v41 = vld [vmem:[%s7000_s1 + $0xae4] ss:$8 sps:$4 sm:$0xff]   ;;  %v5203_v42 = vld [vmem:[%s7000_s1 + $0x8e0] ss:$8 sps:$4 sm:$0xff]  }
  0xea   : > { %v5206_v43 = vld [vmem:[%s7000_s1 + $0xae0] ss:$8 sps:$4 sm:$0xff]  }
  0xeb   : > { %1451 = vmatpush1.bf16.msra.mxu1 %v5119_v27  ;;  %v5211_v27 = vld [vmem:[%s7000_s1 + $0x8f4] ss:$8 sps:$4 sm:$0xff]  }
  0xec   : > { %3571 = vmatpush1.bf16.msra.mxu0 %v5122_v44  ;;  %1452 = vmatprep.subr.bf16.mxu1 %v5127_v45  ;;  %v5214_v44 = vld [vmem:[%s7000_s1 + $0xaf4] ss:$8 sps:$4 sm:$0xff]   ;;  %v5209_v45 = vld [vmem:[%s7000_s1 + $0x8f0] ss:$8 sps:$4 sm:$0xff]  }
  0xed   : > { %3572 = vmatprep.subr.bf16.mxu0 %v5130_v46  ;;  %v5212_v46 = vld [vmem:[%s7000_s1 + $0xaf0] ss:$8 sps:$4 sm:$0xff]  }
  0xef   : > { %3560 = vmatmul.mubr.bf16.gmra.mrb[16].mxu0 %v4508_v48  ;;  %1453 = vmatpush1.bf16.msra.mxu1 %v5125_v47  ;;  %v5219_v47 = vld [vmem:[%s7000_s1 + $0x4] ss:$8 sps:$4 sm:$0xff]  }
  0xf0   : > { %3573 = vmatpush1.bf16.msra.mxu0 %v5128_v51  ;;  %1454 = vmatprep.subr.bf16.mxu1 %v5133_v52  ;;  %v5222_v48 = vld [vmem:[%s7000_s1 + $0xb04] ss:$8 sps:$4 sm:$0xff]   ;;  %v5457_v52 = vld [vmem:[%s5641_s30 + $0x74] sm:$0xff] }
  0xf1   : > { %3574 = vmatprep.subr.bf16.mxu0 %v5136_v53  ;;  %3600 = vmatprep.mubr.bf16.mxu0 %v4502_v57  ;;  %v4501_v53 = vcombine.low %v6313_v49, %v5457_v52  ;;  %v5217_v57 = vld [vmem:[%s7000_s1] ss:$8 sps:$4 sm:$0xff]   ;;  %v5228_v49 = vld [vmem:[%s7000_s1 + $0xb14] ss:$8 sps:$4 sm:$0xff]   ;;  %v5289_v52 = vld [vmem:[%s7000_s1 + $0xbb0] ss:$8 sps:$4 sm:$0xff]  }
  0xf3   : > { %1455 = vmatpush1.bf16.msra.mxu1 %v5131_v58  ;;  %v2570_v58 = vld [vmem:[%s5641_s30 + $0x98] sm:$0xff] }
  0xf4   : > { %3575 = vmatpush1.bf16.msra.mxu0 %v5134_v60  ;;  %1456 = vmatprep.subr.bf16.mxu1 %v5139_v61  ;;  %v5220_v61 = vld [vmem:[%s7000_s1 + $0xb00] ss:$8 sps:$4 sm:$0xff]   ;;  %v4510_v4 = vcombine.low %v2570_v58, %v2570_v58 }
  0xf5   : > { %3576 = vmatprep.subr.bf16.mxu0 %v5142_v28  ;;  %v5225_v28 = vld [vmem:[%s7000_s1 + $0x14] ss:$8 sps:$4 sm:$0xff]  }
  0xf7   : > { %1457 = vmatpush1.bf16.msra.mxu1 %v5137_v62 }
  0xf8   : > { %3577 = vmatpush1.bf16.msra.mxu0 %v5140_v14  ;;  %1458 = vmatprep.subr.bf16.mxu1 %v5145_v63  ;;  %v5223_v63 = vld [vmem:[%s7000_s1 + $0x10] ss:$8 sps:$4 sm:$0xff]  }
  0xf9   : > { %3578 = vmatprep.subr.bf16.mxu0 %v5148_v0  ;;  %v5226_v0 = vld [vmem:[%s7000_s1 + $0xb10] ss:$8 sps:$4 sm:$0xff]  }
  0xfb   : > { %1459 = vmatpush1.bf16.msra.mxu1 %v5143_v1  ;;  %v4511_v1 = vcombine.high %v2570_v58, %v2570_v58  ;;  %v5292_v58 = vld [vmem:[%s7000_s1 + $0xc0] ss:$8 sps:$4 sm:$0xff]  }
  0xfc   : > { %3579 = vmatpush1.bf16.msra.mxu0 %v5146_v2  ;;  %1460 = vmatprep.subr.bf16.mxu1 %v5151_v6  ;;  %v5233_v2 = vld [vmem:[%s7000_s1 + $0x24] ss:$8 sps:$4 sm:$0xff]  }
  0xfd   : > { %3580 = vmatprep.subr.bf16.mxu0 %v5154_v7  ;;  %v5237_v6 = vld [vmem:[%s7000_s1 + $0xb24] ss:$8 sps:$4 sm:$0xff]  }
  0xfe   : > { %v5230_v7 = vld [vmem:[%s5641_s30 + $0x8c] ss:$0 sps:$4 sm:$0xff]  }
  0xff   : > { %1461 = vmatpush1.bf16.msra.mxu1 %v5149_v54  ;;  %v5235_v54 = vld [vmem:[%s7000_s1 + $0xb20] ss:$8 sps:$4 sm:$0xff]  }
 0x100   : > { %3581 = vmatpush1.bf16.msra.mxu0 %v5152_v55  ;;  %1462 = vmatprep.subr.bf16.mxu1 %v5157_v56  ;;  %v5240_v55 = vld [vmem:[%s7000_s1 + $0x34] ss:$8 sps:$4 sm:$0xff]  }
 0x101   : > { %3582 = vmatprep.subr.bf16.mxu0 %v5160_v8  ;;  %v5243_v56 = vld [vmem:[%s7000_s1 + $0xb34] ss:$8 sps:$4 sm:$0xff]  }
 0x103   : > { %1463 = vmatpush1.bf16.msra.mxu1 %v5155_v9  ;;  %v6541_v9 = vld [vmem:[%s5641_s30 + $0x24] sm:$0xff] }
 0x104   : > { %3583 = vmatpush1.bf16.msra.mxu0 %v5158_v10  ;;  %1483 = vmatprep.subr.bf16.mxu1 %v5165_v11  ;;  %v5320_v11 = vld [vmem:[%s5641_s30 + $0x5c] ss:$36 sps:$4 sm:$0xff]  }
 0x105   : > { %3584 = vmatprep.subr.bf16.mxu0 %v5168_v12 }
 0x106   : > { %1465 = vmatmul.mubr.bf16.vlgmr.msra.gmra.mrb[0].mxu1 %v4037_v36  ;;  %v5177_v36 = vld [vmem:[%s7000_s1 + $0x8a0] ss:$8 sps:$4 sm:$0xff]  }
 0x107   : > { %1484 = vmatpush1.bf16.msra.mxu1 %v5163_v13  ;;  %1474 = vmatprep.mubr.bf16.mxu1 %v4047_v34  ;;  %v5238_v13 = vld [vmem:[%s7000_s1 + $0x30] ss:$8 sps:$4 sm:$0xff]  }
 0x108   : > { %3585 = vmatpush1.bf16.msra.mxu0 %v5166_v16  ;;  %1485 = vmatprep.subr.bf16.mxu1 %v5171_v17  ;;  %v5246_v17 = vld [vmem:[%s7000_s1 + $0x44] ss:$8 sps:$4 sm:$0xff]  }
 0x109   : > { %3586 = vmatprep.subr.bf16.mxu0 %v5174_v18  ;;  %v5249_v18 = vld [vmem:[%s7000_s1 + $0xb44] ss:$8 sps:$4 sm:$0xff]  }
 0x10b   : > { %1486 = vmatpush1.bf16.msra.mxu1 %v5169_v19  ;;  %v5244_v19 = vld [vmem:[%s7000_s1 + $0x40] ss:$8 sps:$4 sm:$0xff]  }
 0x10c   : > { %3587 = vmatpush1.bf16.msra.mxu0 %v5172_v20  ;;  %1487 = vmatprep.subr.bf16.mxu1 %v5179_v21  ;;  %v5247_v20 = vld [vmem:[%s7000_s1 + $0xb40] ss:$8 sps:$4 sm:$0xff]   ;;  %v5252_v21 = vld [vmem:[%s7000_s1 + $0x54] ss:$8 sps:$4 sm:$0xff]  }
 0x10d   : > { %3588 = vmatprep.subr.bf16.mxu0 %v5182_v50  ;;  %v5255_v50 = vld [vmem:[%s7000_s1 + $0xb54] ss:$8 sps:$4 sm:$0xff]  }
 0x10e   : > { %1475 = vmatmul.mubr.bf16.gmra.mrb[16].mxu1 %v4046_v31  ;;  %v5250_v31 = vld [vmem:[%s7000_s1 + $0x50] ss:$8 sps:$4 sm:$0xff]  }
 0x10f   : > { %1488 = vmatpush1.bf16.msra.mxu1 %v5177_v36  ;;  %1515 = vmatprep.mubr.bf16.mxu1 %v5470_v59  ;;  %v5253_v36 = vld [vmem:[%s7000_s1 + $0xb50] ss:$8 sps:$4 sm:$0xff]  }
 0x110   : > { %3589 = vmatpush1.bf16.msra.mxu0 %v5180_v22  ;;  %1489 = vmatprep.subr.bf16.mxu1 %v5185_v23  ;;  %v5258_v22 = vld [vmem:[%s7000_s1 + $0x64] ss:$8 sps:$4 sm:$0xff]  }
 0x111   : > { %3590 = vmatprep.subr.bf16.mxu0 %v5188_v24  ;;  %v5261_v23 = vld [vmem:[%s7000_s1 + $0xb64] ss:$8 sps:$4 sm:$0xff]   ;;  %v5256_v24 = vld [vmem:[%s7000_s1 + $0x60] ss:$8 sps:$4 sm:$0xff]  }
 0x113   : > { %1490 = vmatpush1.bf16.msra.mxu1 %v5183_v25  ;;  %v5259_v25 = vld [vmem:[%s7000_s1 + $0xb60] ss:$8 sps:$4 sm:$0xff]  }
 0x114   : > { %3591 = vmatpush1.bf16.msra.mxu0 %v5186_v26  ;;  %1491 = vmatprep.subr.bf16.mxu1 %v5191_v29  ;;  %v5264_v26 = vld [vmem:[%s7000_s1 + $0x74] ss:$8 sps:$4 sm:$0xff]  }
 0x115   : > { %3592 = vmatprep.subr.bf16.mxu0 %v5194_v30  ;;  %v5267_v29 = vld [vmem:[%s7000_s1 + $0xb74] ss:$8 sps:$4 sm:$0xff]   ;;  %v5262_v30 = vld [vmem:[%s7000_s1 + $0x70] ss:$8 sps:$4 sm:$0xff]  }
 0x117   : > { %1492 = vmatpush1.bf16.msra.mxu1 %v5189_v32  ;;  %v5265_v32 = vld [vmem:[%s7000_s1 + $0xb70] ss:$8 sps:$4 sm:$0xff]  }
 0x118   : > { %3593 = vmatpush1.bf16.msra.mxu0 %v5192_v33  ;;  %1493 = vmatprep.subr.bf16.mxu1 %v5197_v37  ;;  %v5270_v33 = vld [vmem:[%s7000_s1 + $0x84] ss:$8 sps:$4 sm:$0xff]  }
 0x119   : > { %3594 = vmatprep.subr.bf16.mxu0 %v5200_v38  ;;  %v5273_v37 = vld [vmem:[%s7000_s1 + $0xb84] ss:$8 sps:$4 sm:$0xff]   ;;  %v5268_v38 = vld [vmem:[%s7000_s1 + $0x80] ss:$8 sps:$4 sm:$0xff]  }
 0x11b   : > { %1494 = vmatpush1.bf16.msra.mxu1 %v5195_v39  ;;  %v5271_v39 = vld [vmem:[%s7000_s1 + $0xb80] ss:$8 sps:$4 sm:$0xff]  }
 0x11c   : > { %3595 = vmatpush1.bf16.msra.mxu0 %v5198_v35  ;;  %1495 = vmatprep.subr.bf16.mxu1 %v5205_v40  ;;  %v5276_v35 = vld [vmem:[%s7000_s1 + $0x94] ss:$8 sps:$4 sm:$0xff]  }
 0x11d   : > { %3596 = vmatprep.subr.bf16.mxu0 %v5208_v41  ;;  %v5279_v40 = vld [vmem:[%s7000_s1 + $0xb94] ss:$8 sps:$4 sm:$0xff]   ;;  %v5274_v41 = vld [vmem:[%s7000_s1 + $0x90] ss:$8 sps:$4 sm:$0xff]  }
 0x11f   : > { %1496 = vmatpush1.bf16.msra.mxu1 %v5203_v42  ;;  %v5277_v42 = vld [vmem:[%s7000_s1 + $0xb90] ss:$8 sps:$4 sm:$0xff]  }
 0x120   : > { %3597 = vmatpush1.bf16.msra.mxu0 %v5206_v43  ;;  %1497 = vmatprep.subr.bf16.mxu1 %v5211_v27  ;;  %v5282_v43 = vld [vmem:[%s7000_s1 + $0xa4] ss:$8 sps:$4 sm:$0xff]  }
 0x121   : > { %3598 = vmatprep.subr.bf16.mxu0 %v5214_v44  ;;  %v6538_v8 = vpop.f32.mrb[4].mxu1  ;;  %v5285_v27 = vld [vmem:[%s7000_s1 + $0xba4] ss:$8 sps:$4 sm:$0xff]   ;;  %v5280_v44 = vld [vmem:[%s7000_s1 + $0xa0] ss:$8 sps:$4 sm:$0xff]  }
 0x122   : > { %v6487_v51 = vpop.f32.mrb[4].mxu0  ;;  %v6546_v12 = vpop.f32.mrb[5].mxu1 }
 0x123   : > { %v6495_v60 = vpop.f32.mrb[5].mxu0  ;;  %1498 = vmatpush1.bf16.msra.mxu1 %v5209_v45  ;;  %v1327_v16 = vpop.f32.mrb[6].mxu1  ;;  %v5283_v45 = vld [vmem:[%s7000_s1 + $0xba0] ss:$8 sps:$4 sm:$0xff]  }
 0x124   : > { %3599 = vmatpush1.bf16.msra.mxu0 %v5212_v46  ;;  %v2454_v62 = vpop.f32.mrb[6].mxu0  ;;  %2304 = vmatprep.subr.bf16.mxu1 %v5219_v47  ;;  %v1328_v34 = vpop.f32.mrb[7].mxu1  ;;  %v5288_v46 = vld [vmem:[%s7000_s1 + $0xb4] ss:$8 sps:$4 sm:$0xff]  }
 0x125   : > { %3619 = vmatprep.subr.bf16.mxu0 %v5222_v48  ;;  %v2455_v14 = vpop.f32.mrb[7].mxu0  ;;  %v5291_v47 = vld [vmem:[%s7000_s1 + $0xbb4] ss:$8 sps:$4 sm:$0xff]   ;;  %v5286_v48 = vld [vmem:[%s7000_s1 + $0xb0] ss:$8 sps:$4 sm:$0xff]  }
 0x126   : > { %1516 = vmatmul.mubr.bf16.vlgmr.msra.gmra.mrb[0].mxu1 %v4039_v5  ;;  %v6527_v5 = vld [vmem:[%s5641_s30] sm:$0xff]  ;;  %v5303_v62 = vld [vmem:[%s7000_s1 + $0xbd4] ss:$8 sps:$4 sm:$0xff]   ;;  %v5301_v14 = vld [vmem:[%s7000_s1 + $0xbd0] ss:$8 sps:$4 sm:$0xff]  }
 0x127   : > { %3601 = vmatmul.mubr.bf16.vlgmr.msra.gmra.mrb[0].mxu0 %v4501_v53  ;;  %2305 = vmatpush1.bf16.msra.mxu1 %v5217_v57  ;;  %v4194_v10 = vcombine.high %v6527_v5, %v6541_v9  ;;  %v5294_v53 = vld [vmem:[%s7000_s1 + $0xc4] ss:$8 sps:$4 sm:$0xff]   ;;  %v5318_v16 = vld [vmem:[%s5641_s30 + $0x58] ss:$36 sps:$4 sm:$0xff]  }
 0x128   : > { %3620 = vmatpush1.bf16.msra.mxu0 %v5220_v61  ;;  %2306 = vmatprep.subr.bf16.mxu1 %v5225_v28  ;;  %v5297_v57 = vld [vmem:[%s7000_s1 + $0xbc4] ss:$8 sps:$4 sm:$0xff]   ;;  %v5295_v61 = vld [vmem:[%s7000_s1 + $0xbc0] ss:$8 sps:$4 sm:$0xff]   ;;  %v5300_v28 = vld [vmem:[%s7000_s1 + $0xd4] ss:$8 sps:$4 sm:$0xff]  }
 0x129   : > { %3621 = vmatprep.subr.bf16.mxu0 %v5228_v49  ;;  %1525 = vmatprep.mubr.bf16.mxu1 %v5470_v59  ;;  %v5298_v49 = vld [vmem:[%s7000_s1 + $0xd0] ss:$8 sps:$4 sm:$0xff]  }
 0x12a   : > { %3610 = vmatprep.mubr.bf16.mxu0 %v4511_v1  ;;  %v5304_v1 = vld [vmem:[%s7000_s1 + $0xe0] ss:$8 sps:$4 sm:$0xff]  }
 0x12b   : > { %2307 = vmatpush1.bf16.msra.mxu1 %v5223_v63  ;;  %v5306_v63 = vld [vmem:[%s7000_s1 + $0xe4] ss:$8 sps:$4 sm:$0xff]  }
 0x12c   : > { %3622 = vmatpush1.bf16.msra.mxu0 %v5226_v0  ;;  %2308 = vmatprep.subr.bf16.mxu1 %v5233_v2  ;;  %v5309_v0 = vld [vmem:[%s7000_s1 + $0xbe4] ss:$8 sps:$4 sm:$0xff]   ;;  %v5307_v2 = vld [vmem:[%s7000_s1 + $0xbe0] ss:$8 sps:$4 sm:$0xff]  }
 0x12d   : > { %3623 = vmatprep.subr.bf16.mxu0 %v5237_v6  ;;  %v5312_v6 = vld [vmem:[%s7000_s1 + $0xf4] ss:$8 sps:$4 sm:$0xff]  }
 0x12e   : > { %1526 = vmatmul.mubr.bf16.gmra.mrb[20].mxu1 %v5230_v7  ;;  %v5315_v7 = vld [vmem:[%s7000_s1 + $0xbf4] ss:$8 sps:$4 sm:$0xff]  }
 0x12f   : > { %3611 = vmatmul.mubr.bf16.gmra.mrb[20].mxu0 %v4510_v4  ;;  %2309 = vmatpush1.bf16.msra.mxu1 %v5231_v3  ;;  %v5310_v3 = vld [vmem:[%s7000_s1 + $0xf0] ss:$8 sps:$4 sm:$0xff]  }
 0x130   : > { %3624 = vmatpush1.bf16.msra.mxu0 %v5235_v54  ;;  %2310 = vmatprep.subr.bf16.mxu1 %v5240_v55  ;;  %v5313_v4 = vld [vmem:[%s7000_s1 + $0xbf0] ss:$8 sps:$4 sm:$0xff]   ;;  %v5323_v54 = vld [vmem:[%s7000_s1 + $0x104] ss:$8 sps:$4 sm:$0xff]  }
 0x131   : > { %3625 = vmatprep.subr.bf16.mxu0 %v5243_v56  ;;  %2336 = vmatprep.mubr.bf16.mxu1 %v4194_v10  ;;  %v5326_v55 = vld [vmem:[%s7000_s1 + $0xc04] ss:$8 sps:$4 sm:$0xff]  }
 0x132   : > { %3651 = vmatprep.mubr.bf16.mxu0 %v5320_v11 }
 0x133   : > { %2311 = vmatpush1.bf16.msra.mxu1 %v5238_v13 }
 0x134   : > { %3626 = vmatpush1.bf16.msra.mxu0 %v5241_v15  ;;  %2312 = vmatprep.subr.bf16.mxu1 %v5246_v17  ;;  %v4193_v15 = vcombine.low %v6527_v5, %v6541_v9  ;;  %v2571_v17 = vld [vmem:[%s5641_s30 + $0xa0] sm:$0xff]  ;;  %v5329_v9 = vld [vmem:[%s7000_s1 + $0x114] ss:$8 sps:$4 sm:$0xff]  }
 0x135   : > { %3627 = vmatprep.subr.bf16.mxu0 %v5249_v18 }
 0x137   : > { %2313 = vmatpush1.bf16.msra.mxu1 %v5244_v19  ;;  %v5321_v19 = vld [vmem:[%s7000_s1 + $0x100] ss:$8 sps:$4 sm:$0xff]  }
 0x138   : > { %3628 = vmatpush1.bf16.msra.mxu0 %v5247_v20  ;;  %2314 = vmatprep.subr.bf16.mxu1 %v5252_v21 }
 0x139   : > { %3629 = vmatprep.subr.bf16.mxu0 %v5255_v50 }
 0x13b   : > { %2315 = vmatpush1.bf16.msra.mxu1 %v5250_v31  ;;  %v5459_v31 = vld [vmem:[%s5641_s30 + $0x48] sm:$0xff] }
 0x13c   : > { %3630 = vmatpush1.bf16.msra.mxu0 %v5253_v36  ;;  %2316 = vmatprep.subr.bf16.mxu1 %v5258_v22  ;;  %v4203_v36 = vcombine.high %v5459_v31, %v5459_v31  ;;  %v4513_v22 = vcombine.high %v2571_v17, %v2571_v17 }
 0x13d   : > { %3631 = vmatprep.subr.bf16.mxu0 %v5261_v23  ;;  %v5327_v23 = vld [vmem:[%s7000_s1 + $0x110] ss:$8 sps:$4 sm:$0xff]  }
 0x13f   : > { %2317 = vmatpush1.bf16.msra.mxu1 %v5256_v24  ;;  %v5330_v24 = vld [vmem:[%s7000_s1 + $0xc10] ss:$8 sps:$4 sm:$0xff]  }
 0x140   : > { %3632 = vmatpush1.bf16.msra.mxu0 %v5259_v25  ;;  %2318 = vmatprep.subr.bf16.mxu1 %v5264_v26  ;;  %v5338_v25 = vld [vmem:[%s7000_s1 + $0x124] ss:$8 sps:$4 sm:$0xff]  }
 0x141   : > { %3633 = vmatprep.subr.bf16.mxu0 %v5267_v29  ;;  %v5342_v26 = vld [vmem:[%s7000_s1 + $0xc24] ss:$8 sps:$4 sm:$0xff]   ;;  %v4202_v29 = vcombine.low %v5459_v31, %v5459_v31  ;;  %v5397_v31 = vld [vmem:[%s7000_s1 + $0x1c0] ss:$8 sps:$4 sm:$0xff]  }
 0x143   : > { %2319 = vmatpush1.bf16.msra.mxu1 %v5262_v30  ;;  %v4512_v30 = vcombine.low %v2571_v17, %v2571_v17  ;;  %v5390_v17 = vld [vmem:[%s7000_s1 + $0xca4] ss:$8 sps:$4 sm:$0xff]  }
 0x144   : > { %3634 = vmatpush1.bf16.msra.mxu0 %v5265_v32  ;;  %2320 = vmatprep.subr.bf16.mxu1 %v5270_v33  ;;  %v6744_v32 = vld [vmem:[%s5641_s30 + $0x8] sm:$0xff] }
 0x145   : > { %3635 = vmatprep.subr.bf16.mxu0 %v5273_v37  ;;  %v5336_v33 = vld [vmem:[%s7000_s1 + $0x120] ss:$8 sps:$4 sm:$0xff]  }
 0x146   : > { %v5340_v37 = vld [vmem:[%s7000_s1 + $0xc20] ss:$8 sps:$4 sm:$0xff]  }
 0x147   : > { %2321 = vmatpush1.bf16.msra.mxu1 %v5268_v38  ;;  %v5345_v38 = vld [vmem:[%s7000_s1 + $0x134] ss:$8 sps:$4 sm:$0xff]  }
 0x148   : > { %3636 = vmatpush1.bf16.msra.mxu0 %v5271_v39  ;;  %2322 = vmatprep.subr.bf16.mxu1 %v5276_v35  ;;  %v5348_v39 = vld [vmem:[%s7000_s1 + $0xc34] ss:$8 sps:$4 sm:$0xff]   ;;  %v6759_v35 = vld [vmem:[%s5641_s30 + $0x2c] sm:$0xff] }
 0x149   : > { %3637 = vmatprep.subr.bf16.mxu0 %v5279_v40  ;;  %v4196_v40 = vcombine.high %v6744_v32, %v6759_v35 }
 0x14b   : > { %2323 = vmatpush1.bf16.msra.mxu1 %v5274_v41  ;;  %v5425_v41 = vld [vmem:[%s5641_s30 + $0x64] ss:$36 sps:$4 sm:$0xff]  }
 0x14c   : > { %3638 = vmatpush1.bf16.msra.mxu0 %v5277_v42  ;;  %2324 = vmatprep.subr.bf16.mxu1 %v5282_v43  ;;  %v5343_v42 = vld [vmem:[%s7000_s1 + $0x130] ss:$8 sps:$4 sm:$0xff]  }
 0x14d   : > { %3639 = vmatprep.subr.bf16.mxu0 %v5285_v27  ;;  %v5346_v43 = vld [vmem:[%s7000_s1 + $0xc30] ss:$8 sps:$4 sm:$0xff]   ;;  %v5351_v27 = vld [vmem:[%s7000_s1 + $0x144] ss:$8 sps:$4 sm:$0xff]  }
 0x14f   : > { %2325 = vmatpush1.bf16.msra.mxu1 %v5280_v44  ;;  %v5354_v44 = vld [vmem:[%s7000_s1 + $0xc44] ss:$8 sps:$4 sm:$0xff]  }
 0x150   : > { %3640 = vmatpush1.bf16.msra.mxu0 %v5283_v45  ;;  %2326 = vmatprep.subr.bf16.mxu1 %v5288_v46  ;;  %v5349_v45 = vld [vmem:[%s7000_s1 + $0x140] ss:$8 sps:$4 sm:$0xff]  }
 0x151   : > { %3641 = vmatprep.subr.bf16.mxu0 %v5291_v47  ;;  %v5352_v46 = vld [vmem:[%s7000_s1 + $0xc40] ss:$8 sps:$4 sm:$0xff]   ;;  %v5357_v47 = vld [vmem:[%s7000_s1 + $0x154] ss:$8 sps:$4 sm:$0xff]  }
 0x153   : > { %2327 = vmatpush1.bf16.msra.mxu1 %v5286_v48  ;;  %v5360_v48 = vld [vmem:[%s7000_s1 + $0xc54] ss:$8 sps:$4 sm:$0xff]  }
 0x154   : > { %3642 = vmatpush1.bf16.msra.mxu0 %v5289_v52  ;;  %2328 = vmatprep.subr.bf16.mxu1 %v5294_v53  ;;  %v5355_v52 = vld [vmem:[%s7000_s1 + $0x150] ss:$8 sps:$4 sm:$0xff]  }
 0x155   : > { %3643 = vmatprep.subr.bf16.mxu0 %v5297_v57  ;;  %v5358_v53 = vld [vmem:[%s7000_s1 + $0xc50] ss:$8 sps:$4 sm:$0xff]   ;;  %v5363_v57 = vld [vmem:[%s7000_s1 + $0x164] ss:$8 sps:$4 sm:$0xff]  }
 0x157   : > { %2329 = vmatpush1.bf16.msra.mxu1 %v5292_v58  ;;  %v5366_v58 = vld [vmem:[%s7000_s1 + $0xc64] ss:$8 sps:$4 sm:$0xff]  }
 0x158   : > { %3644 = vmatpush1.bf16.msra.mxu0 %v5295_v61  ;;  %2330 = vmatprep.subr.bf16.mxu1 %v5300_v28  ;;  %v5361_v61 = vld [vmem:[%s7000_s1 + $0x160] ss:$8 sps:$4 sm:$0xff]  }
 0x159   : > { %3645 = vmatprep.subr.bf16.mxu0 %v5303_v62  ;;  %v5364_v28 = vld [vmem:[%s7000_s1 + $0xc60] ss:$8 sps:$4 sm:$0xff]   ;;  %v5369_v62 = vld [vmem:[%s7000_s1 + $0x174] ss:$8 sps:$4 sm:$0xff]  }
 0x15b   : > { %2331 = vmatpush1.bf16.msra.mxu1 %v5298_v49  ;;  %v5372_v49 = vld [vmem:[%s7000_s1 + $0xc74] ss:$8 sps:$4 sm:$0xff]  }
 0x15c   : > { %3646 = vmatpush1.bf16.msra.mxu0 %v5301_v14  ;;  %2332 = vmatprep.subr.bf16.mxu1 %v5306_v63  ;;  %v5367_v14 = vld [vmem:[%s7000_s1 + $0x170] ss:$8 sps:$4 sm:$0xff]  }
 0x15d   : > { %3647 = vmatprep.subr.bf16.mxu0 %v5309_v0  ;;  %v5370_v63 = vld [vmem:[%s7000_s1 + $0xc70] ss:$8 sps:$4 sm:$0xff]   ;;  %v5375_v0 = vld [vmem:[%s7000_s1 + $0x184] ss:$8 sps:$4 sm:$0xff]  }
 0x15f   : > { %2333 = vmatpush1.bf16.msra.mxu1 %v5304_v1  ;;  %v5378_v1 = vld [vmem:[%s7000_s1 + $0xc84] ss:$8 sps:$4 sm:$0xff]  }
 0x160   : > { %3648 = vmatpush1.bf16.msra.mxu0 %v5307_v2  ;;  %2334 = vmatprep.subr.bf16.mxu1 %v5312_v6 }
 0x161   : > { %3649 = vmatprep.subr.bf16.mxu0 %v5315_v7  ;;  %v1374_v56 = vpop.f32.mrb[8].mxu1  ;;  %v5373_v7 = vld [vmem:[%s7000_s1 + $0x180] ss:$8 sps:$4 sm:$0xff]  }
 0x162   : > { %v6704_v10 = vpop.f32.mrb[8].mxu0  ;;  %v6707_v11 = vadd.f32 %v1374_v56, %v6538_v8  ;;  %v1376_v13 = vpop.f32.mrb[9].mxu1  ;;  %v5324_v8 = vld [vmem:[%s7000_s1 + $0xc00] ss:$8 sps:$4 sm:$0xff]  }
 0x163   : > { %v6713_v18 = vpop.f32.mrb[9].mxu0  ;;  %v6716_v34 = vadd.f32 %v1376_v13, %v6546_v12  ;;  %2335 = vmatpush1.bf16.msra.mxu1 %v5310_v3  ;;  %v1378_v5 = vpop.f32.mrb[10].mxu1  ;;  %v5332_v12 = vld [vmem:[%s7000_s1 + $0xc14] ss:$8 sps:$4 sm:$0xff]   ;;  %v5376_v3 = vld [vmem:[%s7000_s1 + $0xc80] ss:$8 sps:$4 sm:$0xff]  }
 0x164   : > { %3650 = vmatpush1.bf16.msra.mxu0 %v5313_v4  ;;  %v2505_v20 = vpop.f32.mrb[10].mxu0  ;;  %2355 = vmatprep.subr.bf16.mxu1 %v5323_v54  ;;  %v1379_v50 = vpop.f32.mrb[11].mxu1  ;;  %v5381_v54 = vld [vmem:[%s7000_s1 + $0x194] ss:$8 sps:$4 sm:$0xff]   ;;  %v5379_v13 = vld [vmem:[%s7000_s1 + $0x190] ss:$8 sps:$4 sm:$0xff]  }
 0x165   : > { %3670 = vmatprep.subr.bf16.mxu0 %v5326_v55  ;;  %v2506_v21 = vpop.f32.mrb[11].mxu0  ;;  %v5384_v55 = vld [vmem:[%s7000_s1 + $0xc94] ss:$8 sps:$4 sm:$0xff]   ;;  %v5402_v50 = vld [vmem:[%s7000_s1 + $0xcc4] ss:$8 sps:$4 sm:$0xff]  }
 0x166   : > { %2337 = vmatmul.mubr.bf16.vlgmr.msra.gmra.mrb[0].mxu1 %v4193_v15  ;;  %v5382_v15 = vld [vmem:[%s7000_s1 + $0xc90] ss:$8 sps:$4 sm:$0xff]   ;;  %v5393_v20 = vld [vmem:[%s7000_s1 + $0x1b4] ss:$8 sps:$4 sm:$0xff]   ;;  %v5399_v21 = vld [vmem:[%s7000_s1 + $0x1c4] ss:$8 sps:$4 sm:$0xff]  }
 0x167   : > { %3652 = vmatmul.mubr.bf16.vlgmr.msra.gmra.mrb[0].mxu0 %v5318_v16  ;;  %2356 = vmatpush1.bf16.msra.mxu1 %v5321_v19  ;;  %v5387_v16 = vld [vmem:[%s7000_s1 + $0x1a4] ss:$8 sps:$4 sm:$0xff]   ;;  %v5385_v19 = vld [vmem:[%s7000_s1 + $0x1a0] ss:$8 sps:$4 sm:$0xff]   ;;  %v5396_v5 = vld [vmem:[%s7000_s1 + $0xcb4] ss:$8 sps:$4 sm:$0xff]  }
 0x168   : > { %3671 = vmatpush1.bf16.msra.mxu0 %v5324_v8  ;;  %2357 = vmatprep.subr.bf16.mxu1 %v5329_v9  ;;  %v5388_v8 = vld [vmem:[%s7000_s1 + $0xca0] ss:$8 sps:$4 sm:$0xff]   ;;  %v5391_v9 = vld [vmem:[%s7000_s1 + $0x1b0] ss:$8 sps:$4 sm:$0xff]  }
 0x169   : > { %3672 = vmatprep.subr.bf16.mxu0 %v5332_v12  ;;  %2346 = vmatprep.mubr.bf16.mxu1 %v4203_v36  ;;  %v5394_v12 = vld [vmem:[%s7000_s1 + $0xcb0] ss:$8 sps:$4 sm:$0xff]   ;;  %v5400_v36 = vld [vmem:[%s7000_s1 + $0xcc0] ss:$8 sps:$4 sm:$0xff]  }
 0x16a   : > { %3661 = vmatprep.mubr.bf16.mxu0 %v4513_v22  ;;  %v5405_v22 = vld [vmem:[%s7000_s1 + $0x1d4] ss:$8 sps:$4 sm:$0xff]  }
 0x16b   : > { %2358 = vmatpush1.bf16.msra.mxu1 %v5327_v23  ;;  %v5408_v23 = vld [vmem:[%s7000_s1 + $0xcd4] ss:$8 sps:$4 sm:$0xff]  }
 0x16c   : > { %3673 = vmatpush1.bf16.msra.mxu0 %v5330_v24  ;;  %2359 = vmatprep.subr.bf16.mxu1 %v5338_v25  ;;  %v5403_v24 = vld [vmem:[%s7000_s1 + $0x1d0] ss:$8 sps:$4 sm:$0xff]  }
 0x16d   : > { %3674 = vmatprep.subr.bf16.mxu0 %v5342_v26  ;;  %v5406_v25 = vld [vmem:[%s7000_s1 + $0xcd0] ss:$8 sps:$4 sm:$0xff]   ;;  %v5411_v26 = vld [vmem:[%s7000_s1 + $0x1e4] ss:$8 sps:$4 sm:$0xff]  }
 0x16e   : > { %2347 = vmatmul.mubr.bf16.gmra.mrb[24].mxu1 %v4202_v29  ;;  %v5414_v29 = vld [vmem:[%s7000_s1 + $0xce4] ss:$8 sps:$4 sm:$0xff]  }
 0x16f   : > { %3662 = vmatmul.mubr.bf16.gmra.mrb[24].mxu0 %v4512_v30  ;;  %2360 = vmatpush1.bf16.msra.mxu1 %v5336_v33  ;;  %v5409_v30 = vld [vmem:[%s7000_s1 + $0x1e0] ss:$8 sps:$4 sm:$0xff]  }
 0x170   : > { %3675 = vmatpush1.bf16.msra.mxu0 %v5340_v37  ;;  %2361 = vmatprep.subr.bf16.mxu1 %v5345_v38  ;;  %v5412_v33 = vld [vmem:[%s7000_s1 + $0xce0] ss:$8 sps:$4 sm:$0xff]   ;;  %v5417_v37 = vld [vmem:[%s7000_s1 + $0x1f4] ss:$8 sps:$4 sm:$0xff]  }
 0x171   : > { %3676 = vmatprep.subr.bf16.mxu0 %v5348_v39  ;;  %2387 = vmatprep.mubr.bf16.mxu1 %v4196_v40  ;;  %v5420_v38 = vld [vmem:[%s7000_s1 + $0xcf4] ss:$8 sps:$4 sm:$0xff]   ;;  %v5415_v39 = vld [vmem:[%s7000_s1 + $0x1f0] ss:$8 sps:$4 sm:$0xff]  }
 0x172   : > { %3702 = vmatprep.mubr.bf16.mxu0 %v5425_v41  ;;  %v5418_v40 = vld [vmem:[%s7000_s1 + $0xcf0] ss:$8 sps:$4 sm:$0xff]   ;;  %v5428_v41 = vld [vmem:[%s7000_s1 + $0xd04] ss:$8 sps:$4 sm:$0xff]  }
 0x173   : > { %2362 = vmatpush1.bf16.msra.mxu1 %v5343_v42 }
 0x174   : > { %3677 = vmatpush1.bf16.msra.mxu0 %v5346_v43  ;;  %2363 = vmatprep.subr.bf16.mxu1 %v5351_v27 }
 0x175   : > { %3678 = vmatprep.subr.bf16.mxu0 %v5354_v44  ;;  %v4195_v44 = vcombine.low %v6744_v32, %v6759_v35  ;;  %v5461_v32 = vld [vmem:[%s5641_s30 + $0x50] sm:$0xff] }
 0x176   : > { %v4205_v35 = vcombine.high %v5461_v32, %v5461_v32 }
 0x177   : > { %2364 = vmatpush1.bf16.msra.mxu1 %v5349_v45  ;;  %v5423_v45 = vld [vmem:[%s5641_s30 + $0x60] ss:$36 sps:$4 sm:$0xff]  }
 0x178   : > { %3679 = vmatpush1.bf16.msra.mxu0 %v5352_v46  ;;  %2365 = vmatprep.subr.bf16.mxu1 %v5357_v47  ;;  %v2572_v46 = vld [vmem:[%s5641_s30 + $0xa8] sm:$0xff] }
 0x179   : > { %3680 = vmatprep.subr.bf16.mxu0 %v5360_v48  ;;  %v5426_v48 = vld [vmem:[%s7000_s1 + $0xd00] ss:$8 sps:$4 sm:$0xff]  }
 0x17b   : > { %2366 = vmatpush1.bf16.msra.mxu1 %v5355_v52 }
 0x17c   : > { %3681 = vmatpush1.bf16.msra.mxu0 %v5358_v53  ;;  %2367 = vmatprep.subr.bf16.mxu1 %v5363_v57  ;;  %v4515_v57 = vcombine.high %v2572_v46, %v2572_v46 }
 0x17d   : > { %3682 = vmatprep.subr.bf16.mxu0 %v5366_v58  ;;  %v5438_v58 = vld [vmem:[%s7000_s1 + $0xd24] ss:$8 sps:$4 sm:$0xff]  }
 0x17f   : > { %2368 = vmatpush1.bf16.msra.mxu1 %v5361_v61  ;;  %v4204_v61 = vcombine.low %v5461_v32, %v5461_v32 }
 0x180   : > { %3683 = vmatpush1.bf16.msra.mxu0 %v5364_v28  ;;  %2369 = vmatprep.subr.bf16.mxu1 %v5369_v62  ;;  %v4514_v28 = vcombine.low %v2572_v46, %v2572_v46  ;;  %v5436_v62 = vld [vmem:[%s7000_s1 + $0xd20] ss:$8 sps:$4 sm:$0xff]  }
 0x181   : > { %3684 = vmatprep.subr.bf16.mxu0 %v5372_v49  ;;  %v5441_v49 = vld [vmem:[%s7000_s1 + $0xd34] ss:$8 sps:$4 sm:$0xff]  }
 0x182   : > { %v6824_v2 = vpop.f32.mrb[12].mxu0 }
 0x183   : > { %v6826_v6 = vpop.f32.mrb[13].mxu0  ;;  %2370 = vmatpush1.bf16.msra.mxu1 %v5367_v14  ;;  %v5439_v14 = vld [vmem:[%s7000_s1 + $0xd30] ss:$8 sps:$4 sm:$0xff]  }
 0x184   : > { %3685 = vmatpush1.bf16.msra.mxu0 %v5370_v63  ;;  %v2556_v4 = vpop.f32.mrb[14].mxu0  ;;  %2371 = vmatprep.subr.bf16.mxu1 %v5375_v0  ;;  %v5444_v63 = vld [vmem:[%s7000_s1 + $0xd44] ss:$8 sps:$4 sm:$0xff]   ;;  %v5442_v0 = vld [vmem:[%s7000_s1 + $0xd40] ss:$8 sps:$4 sm:$0xff]  }
 0x185   : > { %3686 = vmatprep.subr.bf16.mxu0 %v5378_v1  ;;  %v2557_v56 = vpop.f32.mrb[15].mxu0  ;;  %v5447_v1 = vld [vmem:[%s7000_s1 + $0xd54] ss:$8 sps:$4 sm:$0xff]  }
 0x186   : > { %v5453_v4 = vld [vmem:[%s7000_s1 + $0xd74] ss:$8 sps:$4 sm:$0xff]   ;;  %v5454_v56 = vld [vmem:[%s5641_s30 + $0x68] ss:$36 sps:$4 sm:$0xff]  }
 0x187   : > { %2372 = vmatpush1.bf16.msra.mxu1 %v5373_v7  ;;  %v5445_v7 = vld [vmem:[%s7000_s1 + $0xd50] ss:$8 sps:$4 sm:$0xff]  }
 0x188   : > { %3687 = vmatpush1.bf16.msra.mxu0 %v5376_v3  ;;  %2373 = vmatprep.subr.bf16.mxu1 %v5381_v54  ;;  %v5448_v3 = vld [vmem:[%s7000_s1 + $0xd60] ss:$8 sps:$4 sm:$0xff]   ;;  %v5451_v54 = vld [vmem:[%s7000_s1 + $0xd70] ss:$8 sps:$4 sm:$0xff]  }
 0x189   : > { %3688 = vmatprep.subr.bf16.mxu0 %v5384_v55 }
 0x18b   : > { %2374 = vmatpush1.bf16.msra.mxu1 %v5379_v13  ;;  %v5455_v13 = vld [vmem:[%s5641_s30 + $0xb0] ss:$0 sps:$4 sm:$0xff]  }
 0x18c   : > { %3689 = vmatpush1.bf16.msra.mxu0 %v5382_v15  ;;  %2375 = vmatprep.subr.bf16.mxu1 %v5387_v16 }
 0x18d   : > { %3690 = vmatprep.subr.bf16.mxu0 %v5390_v17 }
 0x18f   : > { %2376 = vmatpush1.bf16.msra.mxu1 %v5385_v19 }
 0x190   : > { %3691 = vmatpush1.bf16.msra.mxu0 %v5388_v8  ;;  %2377 = vmatprep.subr.bf16.mxu1 %v5393_v20 }
 0x191   : > { %3692 = vmatprep.subr.bf16.mxu0 %v5396_v5 }
 0x193   : > { %2378 = vmatpush1.bf16.msra.mxu1 %v5391_v9 }
 0x194   : > { %3693 = vmatpush1.bf16.msra.mxu0 %v5394_v12  ;;  %2379 = vmatprep.subr.bf16.mxu1 %v5399_v21 }
 0x195   : > { %3694 = vmatprep.subr.bf16.mxu0 %v5402_v50 }
 0x197   : > { %2380 = vmatpush1.bf16.msra.mxu1 %v5397_v31 }
 0x198   : > { %3695 = vmatpush1.bf16.msra.mxu0 %v5400_v36  ;;  %2381 = vmatprep.subr.bf16.mxu1 %v5405_v22 }
 0x199   : > { %3696 = vmatprep.subr.bf16.mxu0 %v5408_v23 }
 0x19b   : > { %2382 = vmatpush1.bf16.msra.mxu1 %v5403_v24 }
 0x19c   : > { %3697 = vmatpush1.bf16.msra.mxu0 %v5406_v25  ;;  %2383 = vmatprep.subr.bf16.mxu1 %v5411_v26 }
 0x19d   : > { %3698 = vmatprep.subr.bf16.mxu0 %v5414_v29 }
 0x19f   : > { %2384 = vmatpush1.bf16.msra.mxu1 %v5409_v30 }
 0x1a0   : > { %3699 = vmatpush1.bf16.msra.mxu0 %v5412_v33  ;;  %2385 = vmatprep.subr.bf16.mxu1 %v5417_v37 }
 0x1a1   : > { %3700 = vmatprep.subr.bf16.mxu0 %v5420_v38  ;;  %v1425_v42 = vpop.f32.mrb[12].mxu1 }
 0x1a2   : > { %v6922_v43 = vadd.f32 %v1425_v42, %v6707_v11  ;;  %v1427_v27 = vpop.f32.mrb[13].mxu1  ;;  %v5431_v11 = vld [vmem:[%s7000_s1 + $0xd14] ss:$8 sps:$4 sm:$0xff]  }
 0x1a3   : > { %v6929_v47 = vadd.f32 %v1427_v27, %v6716_v34  ;;  %2386 = vmatpush1.bf16.msra.mxu1 %v5415_v39  ;;  %v1429_v52 = vpop.f32.mrb[14].mxu1  ;;  %v5429_v34 = vld [vmem:[%s7000_s1 + $0xd10] ss:$8 sps:$4 sm:$0xff]  }
 0x1a4   : > { %3701 = vmatpush1.bf16.msra.mxu0 %v5418_v40  ;;  %4669 = vmatprep.subr.bf16.mxu1 %v5428_v41  ;;  %v1430_v53 = vpop.f32.mrb[15].mxu1 }
 0x1a5   : > { %3721 = vmatprep.subr.bf16.mxu0 %v5428_v41 }
 0x1a6   : > { %2388 = vmatmul.mubr.bf16.vlgmr.msra.gmra.mrb[0].mxu1 %v4195_v44 }
 0x1a7   : > { %3703 = vmatmul.mubr.bf16.vlgmr.msra.gmra.mrb[0].mxu0 %v5423_v45  ;;  %4677 = vmatpush1.bf16.msra.mxu1 %v5426_v48 }
 0x1a8   : > { %3722 = vmatpush1.bf16.msra.mxu0 %v5426_v48  ;;  %4670 = vmatprep.subr.bf16.mxu1 %v5431_v11 }
 0x1a9   : > { %3723 = vmatprep.subr.bf16.mxu0 %v5431_v11  ;;  %2397 = vmatprep.mubr.bf16.mxu1 %v4205_v35 }
 0x1aa   : > { %3712 = vmatprep.mubr.bf16.mxu0 %v4515_v57 }
 0x1ab   : > { %4678 = vmatpush1.bf16.msra.mxu1 %v5429_v34 }
 0x1ac   : > { %3724 = vmatpush1.bf16.msra.mxu0 %v5429_v34  ;;  %4671 = vmatprep.subr.bf16.mxu1 %v5438_v58 }
 0x1ad   : > { %3725 = vmatprep.subr.bf16.mxu0 %v5438_v58 }
 0x1ae   : > { %2398 = vmatmul.mubr.bf16.gmra.mrb[28].mxu1 %v4204_v61 }
 0x1af   : > { %3713 = vmatmul.mubr.bf16.gmra.mrb[28].mxu0 %v4514_v28  ;;  %4679 = vmatpush1.bf16.msra.mxu1 %v5436_v62 }
 0x1b0   : > { %3726 = vmatpush1.bf16.msra.mxu0 %v5436_v62  ;;  %4672 = vmatprep.subr.bf16.mxu1 %v5441_v49 }
 0x1b1   : > { %3727 = vmatprep.subr.bf16.mxu0 %v5441_v49  ;;  %3753 = vmatprep.mubr.bf16.mxu0 %v5470_v59 }
 0x1b2   : > { %3763 = vmatprep.mubr.bf16.mxu1 %v5470_v59  ;;  %v5450_v59 = vld [vmem:[%s7000_s1 + $0xd64] ss:$8 sps:$4 sm:$0xff]  }
 0x1b3   : > { %4680 = vmatpush1.bf16.msra.mxu1 %v5439_v14 }
 0x1b4   : > { %3728 = vmatpush1.bf16.msra.mxu0 %v5439_v14  ;;  %4673 = vmatprep.subr.bf16.mxu1 %v5444_v63 }
 0x1b5   : > { %3729 = vmatprep.subr.bf16.mxu0 %v5444_v63 }
 0x1b7   : > { %4681 = vmatpush1.bf16.msra.mxu1 %v5442_v0 }
 0x1b8   : > { %3730 = vmatpush1.bf16.msra.mxu0 %v5442_v0  ;;  %4674 = vmatprep.subr.bf16.mxu1 %v5447_v1 }
 0x1b9   : > { %3731 = vmatprep.subr.bf16.mxu0 %v5447_v1 }
 0x1bb   : > { %4682 = vmatpush1.bf16.msra.mxu1 %v5445_v7 }
 0x1bc   : > { %3732 = vmatpush1.bf16.msra.mxu0 %v5445_v7  ;;  %4675 = vmatprep.subr.bf16.mxu1 %v5450_v59 }
 0x1bd   : > { %3733 = vmatprep.subr.bf16.mxu0 %v5450_v59 }
 0x1bf   : > { %4683 = vmatpush1.bf16.msra.mxu1 %v5448_v3 }
 0x1c0   : > { %3734 = vmatpush1.bf16.msra.mxu0 %v5448_v3  ;;  %4676 = vmatprep.subr.bf16.mxu1 %v5453_v4 }
 0x1c1   : > { %3735 = vmatprep.subr.bf16.mxu0 %v5453_v4 }
 0x1c2   : > { %v3561_v55 = vpop.f32.mrb[16].mxu0 }
 0x1c3   : > { %v3563_v15 = vpop.f32.mrb[17].mxu0  ;;  %4684 = vmatpush1.bf16.msra.mxu1 %v5451_v54 }
 0x1c4   : > { %3736 = vmatpush1.bf16.msra.mxu0 %v5451_v54  ;;  %v3565_v16 = vpop.f32.mrb[18].mxu0 }
 0x1c5   : > { %v3566_v17 = vpop.f32.mrb[19].mxu0 }
 0x1c6   : > { %3764 = vmatmul.mubr.bf16.vlgmr.msra.gmra.mrb[32].mxu1 %v5455_v13 }
 0x1c7   : > { %3754 = vmatmul.mubr.bf16.vlgmr.msra.gmra.mrb[0].mxu0 %v5454_v56 }
 0x1e1   : > { %v1476_v19 = vpop.f32.mrb[16].mxu1 }
 0x1e2   : > { %v1477_v8 = vadd.f32 %v1476_v19, %v6922_v43  ;;  %v1478_v20 = vpop.f32.mrb[17].mxu1 }
 0x1e3   : > { %v1479_v5 = vadd.f32 %v1478_v20, %v6929_v47  ;;  %v1480_v9 = vpop.f32.mrb[18].mxu1 }
 0x1e4   : > { %v1481_v12 = vpop.f32.mrb[19].mxu1 }
 0x201   : > { %v1527_v21 = vpop.f32.mrb[20].mxu1 }
 0x202   : > { %v3612_v50 = vpop.f32.mrb[20].mxu0  ;;  %v1528_v31 = vadd.f32 %v1527_v21, %v1477_v8  ;;  %v1529_v22 = vpop.f32.mrb[21].mxu1 }
 0x203   : > { %v3613_v36 = vadd.f32 %v3612_v50, %v3561_v55  ;;  %v3614_v23 = vpop.f32.mrb[21].mxu0  ;;  %v1530_v24 = vadd.f32 %v1529_v22, %v1479_v5  ;;  %v1531_v26 = vpop.f32.mrb[22].mxu1  ;;  %v3780_v55 = vlaneseq }
 0x204   : > { %v3615_v25 = vadd.f32 %v3614_v23, %v3563_v15  ;;  %v3616_v29 = vpop.f32.mrb[22].mxu0  ;;  %v1532_v30 = vpop.f32.mrb[23].mxu1  ;;  %v3778_v15 = vld [vmem:[%s7001_s2] sm:$0x3] }
 0x205   : > { %v3617_v33 = vpop.f32.mrb[23].mxu0  ;;  %v3781_v56 = vshrl.u32 %v3780_v55, 7 }
 0x207   : > { %v3782_v13 = vsub.s32 0, %v3781_v56 }
 0x209   : > { %v3783_v16 = vrot.slane %v3778_v15, %v3782_v13 }
 0x241   : > { %v2348_v37 = vpop.f32.mrb[24].mxu1 }
 0x242   : > { %v3663_v38 = vpop.f32.mrb[24].mxu0  ;;  %v2349_v39 = vadd.f32 %v2348_v37, %v1528_v31  ;;  %v2350_v41 = vpop.f32.mrb[25].mxu1 }
 0x243   : > { %v3664_v40 = vadd.f32 %v3663_v38, %v3613_v36  ;;  %v3665_v42 = vpop.f32.mrb[25].mxu0  ;;  %v2351_v43 = vadd.f32 %v2350_v41, %v1530_v24  ;;  %v2352_v44 = vpop.f32.mrb[26].mxu1 }
 0x244   : > { %v3666_v27 = vadd.f32 %v3665_v42, %v3615_v25  ;;  %v3667_v45 = vpop.f32.mrb[26].mxu0  ;;  %v2353_v46 = vpop.f32.mrb[27].mxu1 }
 0x245   : > { %v3668_v47 = vpop.f32.mrb[27].mxu0 }
 0x279   : > { %v2389_v48 = vpop.f32.mrb[0].mxu1 }
 0x27a   : > { %v2391_v52 = vpop.f32.mrb[1].mxu1 }
 0x27b   : > { %v2393_v11 = vpop.f32.mrb[2].mxu1 }
 0x27c   : > { %v2395_v53 = vpop.f32.mrb[3].mxu1 }
 0x281   : > { %v2399_v32 = vpop.f32.mrb[28].mxu1 }
 0x282   : > { %v3714_v35 = vpop.f32.mrb[28].mxu0  ;;  %v2400_v57 = vadd.f32 %v2399_v32, %v2349_v39  ;;  %v2401_v58 = vpop.f32.mrb[29].mxu1 }
 0x283   : > { %v3715_v34 = vadd.f32 %v3714_v35, %v3664_v40  ;;  %v3716_v61 = vpop.f32.mrb[29].mxu0  ;;  %v2402_v28 = vadd.f32 %v2401_v58, %v2351_v43  ;;  %v2403_v49 = vpop.f32.mrb[30].mxu1 }
 0x284   : > { %v3717_v62 = vadd.f32 %v3716_v61, %v3666_v27  ;;  %v3718_v14 = vpop.f32.mrb[30].mxu0  ;;  %v2451_v63 = vadd.f32 %v6487_v51, %v2400_v57  ;;  %v2404_v0 = vpop.f32.mrb[31].mxu1  ;;  %v3786_v51 = vsub.s32 1, %v3781_v56 }
 0x285   : > { %v3719_v1 = vpop.f32.mrb[31].mxu0  ;;  %v2453_v7 = vadd.f32 %v6495_v60, %v2402_v28 }
 0x286   : > { %v2502_v59 = vadd.f32 %v6704_v10, %v2451_v63  ;;  %v3787_v19 = vrot.slane %v3778_v15, %v3786_v51 }
 0x287   : > { %v2504_v3 = vadd.f32 %v6713_v18, %v2453_v7 }
 0x288   : > { %v2553_v4 = vadd.f32 %v6824_v2, %v2502_v59 }
 0x289   : > { %v2555_v54 = vadd.f32 %v6826_v6, %v2504_v3 }
 0x299   : > { %v3765_v60 = vpop.f32.mrb[32].mxu1 }
 0x29a   : > { %v3755_v17 = vpop.f32.mrb[0].mxu0  ;;  %v3766_v8 = vadd.f32 %v3765_v60, %v3715_v34  ;;  %v3767_v20 = vpop.f32.mrb[33].mxu1 }
 0x29b   : > { %v4685_v10 = vadd.f32 %v3755_v17, %v2389_v48  ;;  %v3757_v18 = vpop.f32.mrb[1].mxu0  ;;  %v3768_v5 = vadd.f32 %v3767_v20, %v3717_v62  ;;  %v3769_v9 = vpop.f32.mrb[34].mxu1 }
 0x29c   : > { %v4686_v2 = vadd.f32 %v3757_v18, %v2391_v52  ;;  %v3759_v6 = vpop.f32.mrb[2].mxu0  ;;  %v3776_v21 = vadd.f32 %v3766_v8, %v2553_v4  ;;  %v3770_v36 = vpop.f32.mrb[35].mxu1 }
 0x29d   : > { %v3790_v12 = vadd.f32 %v4685_v10, %v3783_v16  ;;  %v4687_v50 = vadd.f32 %v3759_v6, %v2393_v11  ;;  %v3761_v31 = vpop.f32.mrb[3].mxu0  ;;  %v3777_v23 = vadd.f32 %v3768_v5, %v2555_v54 }
 0x29e   : > { %v3791_v22 = vadd.f32 %v4686_v2, %v3787_v19  ;;  %v4688_v24 = vadd.f32 %v3761_v31, %v2395_v53  ;;  %v3794_v26 = vadd.f32 %v3783_v16, %v3776_v21 }
 0x29f   : > { %v3796_v25 = vmax.f32 %v3790_v12, 0.0  ;;  %v3792_v29 = vadd.f32 %v4687_v50, %v3783_v16  ;;  %v3795_v33 = vadd.f32 %v3787_v19, %v3777_v23 }
 0x2a0   : > { %v3797_v30 = vmax.f32 %v3791_v22, 0.0  ;;  %v3793_v37 = vadd.f32 %v4688_v24, %v3787_v19  ;;  %v3800_v38 = vmax.f32 %v3794_v26, 0.0 }
 0x2a1   : > { %v3798_v39 = vmax.f32 %v3792_v29, 0.0  ;;  %v3801_v41 = vmax.f32 %v3795_v33, 0.0 }
 0x2a2   : > { %v4666_v40 = vpack.c.bf16 %v3797_v30, %v3796_v25  ;;  %v3799_v42 = vmax.f32 %v3793_v37, 0.0 }
 0x2a3   : > { %v4668_v43 = vpack.c.bf16 %v3801_v41, %v3800_v38 }
 0x2a4   : > { %3822 = vst [vmem:[%s170_s18] sm:$0xff] %v4666_v40  ;;  %v4667_v27 = vpack.c.bf16 %v3799_v42, %v3798_v39 }
 0x2a5   : > { %3824 = vst [vmem:[%s170_s18 + $0x10] sm:$0xff] %v4668_v43 }
 0x2a6   : > { %3823 = vst [vmem:[%s170_s18 + $0x8] sm:$0xff] %v4667_v27 }
 0x2a7 PF: > { %s13_s12 = sadd.s32 1, %s5468_s12  }
 0x2a8   : > { %p10_p4 = scmp.ge.s32.totalorder %s13_s12, 4  }
 0x2aa   :  { %12 = sbr.rel (!%p10_p4) target bundleno = 1 (0x1), region = 64 }

// kernel: finetune_net_forward.10
= control target key start
LH: loop header
LB: loop body
LE: loop exit
PB: predicated region body
PF: predicated region fallthrough
CT: control target
= control target key end

     0   :  { %s3877_s12 = smov 0   ;;  %s4899_s0 = inlined_call_operand.vmem [shape: bf16[2,48,768], index: 0, kind: input, shape index: {}]   ;;  %s4900_s1 = inlined_call_operand.vmem [shape: bf16[3,768,256], index: 1, kind: input, shape index: {}]   ;;  %s4901_s2 = inlined_call_operand.vmem [shape: f32[1,256], index: 2, kind: input, shape index: {}]   ;;  %s4902_s3 = inlined_call_operand.vmem [shape: bf16[2,8,256], index: 3, kind: output, shape index: {}]  }
   0x1 LB: > { %s2748_s13 = sadd.s32 4294967295, %s3855_s12   ;;  %p2752_p0 = scmp.ge.s32.totalorder %s3855_s12, 1  ;;  %s3855_s12 = sphi %s3877_s12, %s13_s12  }
   0x2   : > { %p137_p1 = scmp.lt.s32.totalorder %s3855_s12, 3 }
   0x4   : > { %p138_p2 = pnand %p2752_p0, %p137_p1 }
   0x5   : > { %v3383_v0 = vld [vmem:[%s4900_s1 + $0x304] ss:$8 sps:$4 sm:$0xff] (!%p138_p2)   ;;  %v3387_v2 = vld [vmem:[%s4900_s1 + $0x300] ss:$8 sps:$4 sm:$0xff] (!%p138_p2)   ;;  %v3389_v4 = vld [vmem:[%s4900_s1 + $0x314] ss:$8 sps:$4 sm:$0xff] (!%p138_p2)  }
   0x6   : > { %141 = sbr.rel (%p138_p2) target bundleno = 573 (0x23d), region = 32  ;;  %v3385_v1 = vld [vmem:[%s4900_s1 + $0x104] ss:$8 sps:$4 sm:$0xff] (!%p138_p2)   ;;  %919 = vmatprep.subr.bf16.mxu1 (!%p138_p2), %v3383_v0  ;;  %v3388_v3 = vld [vmem:[%s4900_s1 + $0x100] ss:$8 sps:$4 sm:$0xff] (!%p138_p2)   ;;  %p161_p3 = scmp.lt.s32.totalorder (!%p138_p2), %s2748_s13, 1 }
   0x7   : > { %1644 = vmatprep.subr.bf16.mxu0 (!%p138_p2), %v3385_v1  ;;  %920 = vmatpush1.bf16.msra.mxu1 (!%p138_p2), %v3387_v2  ;;  %v3391_v5 = vld [vmem:[%s4900_s1 + $0x114] ss:$8 sps:$4 sm:$0xff] (!%p138_p2)   ;;  %v3393_v6 = vld [vmem:[%s4900_s1 + $0x310] ss:$8 sps:$4 sm:$0xff] (!%p138_p2)   ;;  %v3395_v8 = vld [vmem:[%s4900_s1 + $0x324] ss:$8 sps:$4 sm:$0xff] (!%p138_p2)  }
   0x8   : > { %1645 = vmatpush1.bf16.msra.mxu0 (!%p138_p2), %v3388_v3  ;;  %921 = vmatprep.subr.bf16.mxu1 (!%p138_p2), %v3389_v4  ;;  %v3394_v7 = vld [vmem:[%s4900_s1 + $0x110] ss:$8 sps:$4 sm:$0xff] (!%p138_p2)   ;;  %v3397_v9 = vld [vmem:[%s4900_s1 + $0x124] ss:$8 sps:$4 sm:$0xff] (!%p138_p2)   ;;  %v3399_v10 = vld [vmem:[%s4900_s1 + $0x320] ss:$8 sps:$4 sm:$0xff] (!%p138_p2)  }
   0x9   : > { %1646 = vmatprep.subr.bf16.mxu0 (!%p138_p2), %v3391_v5  ;;  %v3400_v11 = vld [vmem:[%s4900_s1 + $0x120] ss:$8 sps:$4 sm:$0xff] (!%p138_p2)   ;;  %v3401_v12 = vld [vmem:[%s4900_s1 + $0x334] ss:$8 sps:$4 sm:$0xff] (!%p138_p2)   ;;  %v3405_v14 = vld [vmem:[%s4900_s1 + $0x330] ss:$8 sps:$4 sm:$0xff] (!%p138_p2)  }
   0xa   : > { %v3403_v13 = vld [vmem:[%s4900_s1 + $0x134] ss:$8 sps:$4 sm:$0xff] (!%p138_p2)   ;;  %v3406_v15 = vld [vmem:[%s4900_s1 + $0x130] ss:$8 sps:$4 sm:$0xff] (!%p138_p2)   ;;  %v3407_v16 = vld [vmem:[%s4900_s1 + $0x344] ss:$8 sps:$4 sm:$0xff] (!%p138_p2)  }
   0xb   : > { %922 = vmatpush1.bf16.msra.mxu1 (!%p138_p2), %v3393_v6  ;;  %v3409_v17 = vld [vmem:[%s4900_s1 + $0x144] ss:$8 sps:$4 sm:$0xff] (!%p138_p2)   ;;  %v3411_v18 = vld [vmem:[%s4900_s1 + $0x340] ss:$8 sps:$4 sm:$0xff] (!%p138_p2)   ;;  %v3413_v20 = vld [vmem:[%s4900_s1 + $0x354] ss:$8 sps:$4 sm:$0xff] (!%p138_p2)  }
   0xc   : > { %1647 = vmatpush1.bf16.msra.mxu0 (!%p138_p2), %v3394_v7  ;;  %923 = vmatprep.subr.bf16.mxu1 (!%p138_p2), %v3395_v8  ;;  %v3412_v19 = vld [vmem:[%s4900_s1 + $0x140] ss:$8 sps:$4 sm:$0xff] (!%p138_p2)   ;;  %v3415_v21 = vld [vmem:[%s4900_s1 + $0x154] ss:$8 sps:$4 sm:$0xff] (!%p138_p2)   ;;  %v3417_v22 = vld [vmem:[%s4900_s1 + $0x350] ss:$8 sps:$4 sm:$0xff] (!%p138_p2)  }
   0xd   : > { %1648 = vmatprep.subr.bf16.mxu0 %v3397_v9  ;;  %v3418_v23 = vld [vmem:[%s4900_s1 + $0x150] ss:$8 sps:$4 sm:$0xff]   ;;  %v3419_v24 = vld [vmem:[%s4900_s1 + $0x364] ss:$8 sps:$4 sm:$0xff]   ;;  %v3423_v26 = vld [vmem:[%s4900_s1 + $0x360] ss:$8 sps:$4 sm:$0xff]  }
   0xe   : > { %v3421_v25 = vld [vmem:[%s4900_s1 + $0x164] ss:$8 sps:$4 sm:$0xff]   ;;  %v3424_v27 = vld [vmem:[%s4900_s1 + $0x160] ss:$8 sps:$4 sm:$0xff]   ;;  %v3425_v28 = vld [vmem:[%s4900_s1 + $0x374] ss:$8 sps:$4 sm:$0xff]  }
   0xf   : > { %924 = vmatpush1.bf16.msra.mxu1 %v3399_v10  ;;  %v3427_v29 = vld [vmem:[%s4900_s1 + $0x174] ss:$8 sps:$4 sm:$0xff]   ;;  %v3429_v30 = vld [vmem:[%s4900_s1 + $0x370] ss:$8 sps:$4 sm:$0xff]   ;;  %v3431_v32 = vld [vmem:[%s4900_s1 + $0x384] ss:$8 sps:$4 sm:$0xff]  }
  0x10   : > { %1649 = vmatpush1.bf16.msra.mxu0 %v3400_v11  ;;  %925 = vmatprep.subr.bf16.mxu1 %v3401_v12  ;;  %v3430_v31 = vld [vmem:[%s4900_s1 + $0x170] ss:$8 sps:$4 sm:$0xff]   ;;  %v3433_v33 = vld [vmem:[%s4900_s1 + $0x184] ss:$8 sps:$4 sm:$0xff]   ;;  %v3435_v34 = vld [vmem:[%s4900_s1 + $0x380] ss:$8 sps:$4 sm:$0xff]  }
  0x11   : > { %1650 = vmatprep.subr.bf16.mxu0 %v3403_v13  ;;  %v3436_v35 = vld [vmem:[%s4900_s1 + $0x180] ss:$8 sps:$4 sm:$0xff]   ;;  %s4904_s13 = smov (!%p161_p3, %s2748_s13), 1  ;;  %v3437_v36 = vld [vmem:[%s4900_s1 + $0x394] ss:$8 sps:$4 sm:$0xff]   ;;  %vm2653_vm1 = vcmask 1046528  }
  0x12   : > { %v3439_v37 = vld [vmem:[%s4900_s1 + $0x194] ss:$8 sps:$4 sm:$0xff]   ;;  %v3441_v38 = vld [vmem:[%s4900_s1 + $0x390] ss:$8 sps:$4 sm:$0xff]   ;;  %s3374_s17 = smul.u32 144, %s4904_s13  ;;  %s3277_s11 = sshll.u32 %s4904_s13, 3 }
  0x13   : > { %926 = vmatpush1.bf16.msra.mxu1 %v3405_v14  ;;  %v3442_v39 = vld [vmem:[%s4900_s1 + $0x190] ss:$8 sps:$4 sm:$0xff]   ;;  %v3443_v40 = vld [vmem:[%s4900_s1 + $0x3a4] ss:$8 sps:$4 sm:$0xff]   ;;  %v3447_v42 = vld [vmem:[%s4900_s1 + $0x3a0] ss:$8 sps:$4 sm:$0xff]   ;;  %s170_s16 = scalar_lea.vmem %s4902_s3, %s3277_s11 }
  0x14   : > { %1651 = vmatpush1.bf16.msra.mxu0 %v3406_v15  ;;  %927 = vmatprep.subr.bf16.mxu1 %v3407_v16  ;;  %v3445_v41 = vld [vmem:[%s4900_s1 + $0x1a4] ss:$8 sps:$4 sm:$0xff]   ;;  %v3448_v43 = vld [vmem:[%s4900_s1 + $0x1a0] ss:$8 sps:$4 sm:$0xff]   ;;  %s4027_s30 = scalar_lea.vmem %s4899_s0, %s3374_s17  ;;  %v3449_v44 = vld [vmem:[%s4900_s1 + $0x3b4] ss:$8 sps:$4 sm:$0xff]  }
  0x15   : > { %1652 = vmatprep.subr.bf16.mxu0 %v3409_v17  ;;  %v3451_v45 = vld [vmem:[%s4900_s1 + $0x1b4] ss:$8 sps:$4 sm:$0xff]   ;;  %v3453_v46 = vld [vmem:[%s4900_s1 + $0x3b0] ss:$8 sps:$4 sm:$0xff]   ;;  %v3455_v50 = vld [vmem:[%s4900_s1 + $0x3c4] ss:$8 sps:$4 sm:$0xff]  }
  0x16   : > { %v174_v47 = vld [vmem:[%s4027_s30 + $0x18] sm:$0xff]  ;;  %v4040_v48 = vld [vmem:[%s4027_s30 + $0x30] sm:$0xff]  ;;  %v172_v52 = vld [vmem:[%s4027_s30 + $0x8] sm:$0xff]  ;;  %vm2608_vm0 = vsmask.f32 7424 }
  0x17   : > { %928 = vmatpush1.bf16.msra.mxu1 %v3411_v18  ;;  %v3454_v49 = vld [vmem:[%s4900_s1 + $0x1b0] ss:$8 sps:$4 sm:$0xff]   ;;  %v2853_v51 = vcombine.high %v174_v47, %v4040_v48  ;;  %v3457_v53 = vld [vmem:[%s4900_s1 + $0x1c4] ss:$8 sps:$4 sm:$0xff]   ;;  %v3459_v56 = vld [vmem:[%s4900_s1 + $0x3c0] ss:$8 sps:$4 sm:$0xff]   ;;  %v2852_v10 = vcombine.low %v174_v47, %v4040_v48 }
  0x18   : > { %1653 = vmatpush1.bf16.msra.mxu0 %v3412_v19  ;;  %929 = vmatprep.subr.bf16.mxu1 %v3413_v20  ;;  %v4054_v54 = vld [vmem:[%s4027_s30 + $0x20] sm:$0xff]  ;;  %v3461_v58 = vld [vmem:[%s4900_s1 + $0x3d4] ss:$8 sps:$4 sm:$0xff]   ;;  %v3465_v60 = vld [vmem:[%s4900_s1 + $0x3d0] ss:$8 sps:$4 sm:$0xff]  }
  0x19   : > { %1654 = vmatprep.subr.bf16.mxu0 %v3415_v21  ;;  %951 = vmatprep.mubr.bf16.mxu1 %v2853_v51  ;;  %v2963_v55 = vcombine.high %v172_v52, %v4054_v54  ;;  %v3460_v57 = vld [vmem:[%s4900_s1 + $0x1c0] ss:$8 sps:$4 sm:$0xff]   ;;  %v3463_v59 = vld [vmem:[%s4900_s1 + $0x1d4] ss:$8 sps:$4 sm:$0xff]   ;;  %v3466_v61 = vld [vmem:[%s4900_s1 + $0x1d0] ss:$8 sps:$4 sm:$0xff]   ;;  %v2962_v9 = vcombine.low %v172_v52, %v4054_v54 }
  0x1a   : > { %v3467_v62 = vld [vmem:[%s4900_s1 + $0x3e4] ss:$8 sps:$4 sm:$0xff]   ;;  %v3471_v0 = vld [vmem:[%s4900_s1 + $0x3e0] ss:$8 sps:$4 sm:$0xff]   ;;  %v3473_v2 = vld [vmem:[%s4900_s1 + $0x3f4] ss:$8 sps:$4 sm:$0xff]  }
  0x1b   : > { %930 = vmatpush1.bf16.msra.mxu1 %v3417_v22  ;;  %1676 = vmatprep.mubr.bf16.mxu0 %v2963_v55  ;;  %v3469_v63 = vld [vmem:[%s4900_s1 + $0x1e4] ss:$8 sps:$4 sm:$0xff]   ;;  %v3472_v1 = vld [vmem:[%s4900_s1 + $0x1e0] ss:$8 sps:$4 sm:$0xff]   ;;  %v3475_v3 = vld [vmem:[%s4900_s1 + $0x1f4] ss:$8 sps:$4 sm:$0xff]  }
  0x1c   : > { %1655 = vmatpush1.bf16.msra.mxu0 %v3418_v23  ;;  %931 = vmatprep.subr.bf16.mxu1 %v3419_v24  ;;  %v3477_v4 = vld [vmem:[%s4900_s1 + $0x3f0] ss:$8 sps:$4 sm:$0xff]   ;;  %v3482_v6 = vld [vmem:[%s4900_s1 + $0x404] ss:$8 sps:$4 sm:$0xff]   ;;  %v3480_v8 = vld [vmem:[%s4900_s1 + $0x400] ss:$8 sps:$4 sm:$0xff]  }
  0x1d   : > { %1656 = vmatprep.subr.bf16.mxu0 %v3421_v25  ;;  %v3478_v5 = vld [vmem:[%s4900_s1 + $0x1f0] ss:$8 sps:$4 sm:$0xff]   ;;  %v3488_v7 = vld [vmem:[%s4900_s1 + $0x204] ss:$8 sps:$4 sm:$0xff]   ;;  %v3486_v11 = vld [vmem:[%s4900_s1 + $0x200] ss:$8 sps:$4 sm:$0xff]  }
  0x1e   : > { %v3492_v12 = vld [vmem:[%s4900_s1 + $0x414] ss:$8 sps:$4 sm:$0xff]   ;;  %v3490_v14 = vld [vmem:[%s4900_s1 + $0x410] ss:$8 sps:$4 sm:$0xff]   ;;  %v3498_v16 = vld [vmem:[%s4900_s1 + $0x424] ss:$8 sps:$4 sm:$0xff]  }
  0x1f   : > { %932 = vmatpush1.bf16.msra.mxu1 %v3423_v26  ;;  %v3495_v13 = vld [vmem:[%s4900_s1 + $0x214] ss:$8 sps:$4 sm:$0xff]   ;;  %v3493_v15 = vld [vmem:[%s4900_s1 + $0x210] ss:$8 sps:$4 sm:$0xff]   ;;  %v3501_v17 = vld [vmem:[%s4900_s1 + $0x224] ss:$8 sps:$4 sm:$0xff]  }
  0x20   : > { %1657 = vmatpush1.bf16.msra.mxu0 %v3424_v27  ;;  %933 = vmatprep.subr.bf16.mxu1 %v3425_v28  ;;  %v3496_v18 = vld [vmem:[%s4900_s1 + $0x420] ss:$8 sps:$4 sm:$0xff]   ;;  %v3504_v20 = vld [vmem:[%s4900_s1 + $0x434] ss:$8 sps:$4 sm:$0xff]   ;;  %v3502_v22 = vld [vmem:[%s4900_s1 + $0x430] ss:$8 sps:$4 sm:$0xff]  }
  0x21   : > { %1658 = vmatprep.subr.bf16.mxu0 %v3427_v29  ;;  %v3499_v19 = vld [vmem:[%s4900_s1 + $0x220] ss:$8 sps:$4 sm:$0xff]   ;;  %v3507_v21 = vld [vmem:[%s4900_s1 + $0x234] ss:$8 sps:$4 sm:$0xff]   ;;  %v3505_v23 = vld [vmem:[%s4900_s1 + $0x230] ss:$8 sps:$4 sm:$0xff]  }
  0x22   : > { %v3510_v24 = vld [vmem:[%s4900_s1 + $0x444] ss:$8 sps:$4 sm:$0xff]   ;;  %v4156_v26 = vld [vmem:[%s4027_s30 + $0x38] sm:$0xff]  ;;  %v3508_v27 = vld [vmem:[%s4900_s1 + $0x440] ss:$8 sps:$4 sm:$0xff]  }
  0x23   : > { %934 = vmatpush1.bf16.msra.mxu1 %v3429_v30  ;;  %v3513_v25 = vld [vmem:[%s4900_s1 + $0x244] ss:$8 sps:$4 sm:$0xff]   ;;  %v3511_v28 = vld [vmem:[%s4900_s1 + $0x240] ss:$8 sps:$4 sm:$0xff]   ;;  %v3516_v29 = vld [vmem:[%s4900_s1 + $0x454] ss:$8 sps:$4 sm:$0xff]  }
  0x24   : > { %1659 = vmatpush1.bf16.msra.mxu0 %v3430_v31  ;;  %935 = vmatprep.subr.bf16.mxu1 %v3431_v32  ;;  %v3519_v30 = vld [vmem:[%s4900_s1 + $0x254] ss:$8 sps:$4 sm:$0xff]   ;;  %v4171_v31 = vld [vmem:[%s4027_s30 + $0x48] sm:$0xff]  ;;  %v4174_v32 = vld [vmem:[%s4027_s30 + $0x60] sm:$0xff] }
  0x25   : > { %1660 = vmatprep.subr.bf16.mxu0 %v3433_v33  ;;  %v4178_v33 = vcombine.low %v4040_v48, %v4171_v31  ;;  %v3531_v47 = vld [vmem:[%s4900_s1 + $0x274] ss:$8 sps:$4 sm:$0xff]   ;;  %v3526_v52 = vld [vmem:[%s4900_s1 + $0x470] ss:$8 sps:$4 sm:$0xff]   ;;  %v3534_v55 = vld [vmem:[%s4900_s1 + $0x484] ss:$8 sps:$4 sm:$0xff]  }
  0x27   : > { %936 = vmatpush1.bf16.msra.mxu1 %v3435_v34  ;;  %v3514_v34 = vld [vmem:[%s4900_s1 + $0x450] ss:$8 sps:$4 sm:$0xff]  }
  0x28   : > { %1661 = vmatpush1.bf16.msra.mxu0 %v3436_v35  ;;  %937 = vmatprep.subr.bf16.mxu1 %v3437_v36  ;;  %v3517_v35 = vld [vmem:[%s4900_s1 + $0x250] ss:$8 sps:$4 sm:$0xff]   ;;  %v2859_v36 = vcombine.high %v4171_v31, %v4174_v32 }
  0x29   : > { %1662 = vmatprep.subr.bf16.mxu0 %v3439_v37  ;;  %v4189_v37 = vld [vmem:[%s4027_s30 + $0x50] sm:$0xff] }
  0x2b   : > { %938 = vmatpush1.bf16.msra.mxu1 %v3441_v38  ;;  %v2858_v38 = vcombine.low %v4171_v31, %v4174_v32 }
  0x2c   : > { %1663 = vmatpush1.bf16.msra.mxu0 %v3442_v39  ;;  %939 = vmatprep.subr.bf16.mxu1 %v3443_v40  ;;  %v3522_v39 = vld [vmem:[%s4900_s1 + $0x464] ss:$8 sps:$4 sm:$0xff]   ;;  %v2969_v40 = vcombine.high %v4156_v26, %v4189_v37 }
  0x2d   : > { %1664 = vmatprep.subr.bf16.mxu0 %v3445_v41  ;;  %v2968_v41 = vcombine.low %v4156_v26, %v4189_v37 }
  0x2f   : > { %940 = vmatpush1.bf16.msra.mxu1 %v3447_v42  ;;  %v3525_v42 = vld [vmem:[%s4900_s1 + $0x264] ss:$8 sps:$4 sm:$0xff]  }
  0x30   : > { %1665 = vmatpush1.bf16.msra.mxu0 %v3448_v43  ;;  %941 = vmatprep.subr.bf16.mxu1 %v3449_v44  ;;  %v2855_v43 = vcombine.high %v4054_v54, %v4156_v26  ;;  %v3520_v44 = vld [vmem:[%s4900_s1 + $0x460] ss:$8 sps:$4 sm:$0xff]  }
  0x31   : > { %1666 = vmatprep.subr.bf16.mxu0 %v3451_v45  ;;  %v3523_v45 = vld [vmem:[%s4900_s1 + $0x260] ss:$8 sps:$4 sm:$0xff]  }
  0x33   : > { %942 = vmatpush1.bf16.msra.mxu1 %v3453_v46  ;;  %v3528_v46 = vld [vmem:[%s4900_s1 + $0x474] ss:$8 sps:$4 sm:$0xff]  }
  0x34   : > { %1667 = vmatpush1.bf16.msra.mxu0 %v3454_v49  ;;  %943 = vmatprep.subr.bf16.mxu1 %v3455_v50  ;;  %v4218_v49 = vld [vmem:[%s4027_s30 + $0x10] sm:$0xff]  ;;  %v4221_v50 = vld [vmem:[%s4027_s30 + $0x28] sm:$0xff] }
  0x35   : > { %1668 = vmatprep.subr.bf16.mxu0 %v3457_v53  ;;  %v2965_v51 = vcombine.high %v4218_v49, %v4221_v50  ;;  %v3529_v53 = vld [vmem:[%s4900_s1 + $0x270] ss:$8 sps:$4 sm:$0xff]  }
  0x37   : > { %944 = vmatpush1.bf16.msra.mxu1 %v3459_v56  ;;  %v3537_v56 = vld [vmem:[%s4900_s1 + $0x284] ss:$8 sps:$4 sm:$0xff]  }
  0x38   : > { %1669 = vmatpush1.bf16.msra.mxu0 %v3460_v57  ;;  %945 = vmatprep.subr.bf16.mxu1 %v3461_v58  ;;  %v3532_v57 = vld [vmem:[%s4900_s1 + $0x480] ss:$8 sps:$4 sm:$0xff]  }
  0x39   : > { %1670 = vmatprep.subr.bf16.mxu0 %v3463_v59  ;;  %v3535_v58 = vld [vmem:[%s4900_s1 + $0x280] ss:$8 sps:$4 sm:$0xff]   ;;  %v3540_v59 = vld [vmem:[%s4900_s1 + $0x494] ss:$8 sps:$4 sm:$0xff]  }
  0x3b   : > { %946 = vmatpush1.bf16.msra.mxu1 %v3465_v60  ;;  %v3543_v60 = vld [vmem:[%s4900_s1 + $0x294] ss:$8 sps:$4 sm:$0xff]  }
  0x3c   : > { %1671 = vmatpush1.bf16.msra.mxu0 %v3466_v61  ;;  %947 = vmatprep.subr.bf16.mxu1 %v3467_v62  ;;  %v3538_v61 = vld [vmem:[%s4900_s1 + $0x490] ss:$8 sps:$4 sm:$0xff]  }
  0x3d   : > { %1672 = vmatprep.subr.bf16.mxu0 %v3469_v63  ;;  %v3541_v62 = vld [vmem:[%s4900_s1 + $0x290] ss:$8 sps:$4 sm:$0xff]   ;;  %v3546_v63 = vld [vmem:[%s4900_s1 + $0x4a4] ss:$8 sps:$4 sm:$0xff]  }
  0x3f   : > { %948 = vmatpush1.bf16.msra.mxu1 %v3471_v0  ;;  %v3549_v0 = vld [vmem:[%s4900_s1 + $0x2a4] ss:$8 sps:$4 sm:$0xff]  }
  0x40   : > { %1673 = vmatpush1.bf16.msra.mxu0 %v3472_v1  ;;  %949 = vmatprep.subr.bf16.mxu1 %v3473_v2  ;;  %v3544_v1 = vld [vmem:[%s4900_s1 + $0x4a0] ss:$8 sps:$4 sm:$0xff]  }
  0x41   : > { %1674 = vmatprep.subr.bf16.mxu0 %v3475_v3  ;;  %v3547_v2 = vld [vmem:[%s4900_s1 + $0x2a0] ss:$8 sps:$4 sm:$0xff]   ;;  %v3552_v3 = vld [vmem:[%s4900_s1 + $0x4b4] ss:$8 sps:$4 sm:$0xff]  }
  0x43   : > { %950 = vmatpush1.bf16.msra.mxu1 %v3477_v4  ;;  %v3555_v4 = vld [vmem:[%s4900_s1 + $0x2b4] ss:$8 sps:$4 sm:$0xff]  }
  0x44   : > { %1675 = vmatpush1.bf16.msra.mxu0 %v3478_v5  ;;  %972 = vmatprep.subr.bf16.mxu1 %v3482_v6  ;;  %v3550_v5 = vld [vmem:[%s4900_s1 + $0x4b0] ss:$8 sps:$4 sm:$0xff]  }
  0x45   : > { %1697 = vmatprep.subr.bf16.mxu0 %v3488_v7  ;;  %v3553_v6 = vld [vmem:[%s4900_s1 + $0x2b0] ss:$8 sps:$4 sm:$0xff]   ;;  %v3558_v7 = vld [vmem:[%s4900_s1 + $0x4c4] ss:$8 sps:$4 sm:$0xff]  }
  0x46   : > { %952 = vmatmul.mubr.bf16.vlgmr.msra.gmra.mrb[0].mxu1 %v2852_v10  ;;  %v3559_v10 = vld [vmem:[%s4900_s1 + $0x2c0] ss:$8 sps:$4 sm:$0xff]  }
  0x47   : > { %1677 = vmatmul.mubr.bf16.vlgmr.msra.gmra.mrb[0].mxu0 %v2962_v9  ;;  %973 = vmatpush1.bf16.msra.mxu1 %v3480_v8  ;;  %v3561_v8 = vld [vmem:[%s4900_s1 + $0x2c4] ss:$8 sps:$4 sm:$0xff]   ;;  %v3556_v9 = vld [vmem:[%s4900_s1 + $0x4c0] ss:$8 sps:$4 sm:$0xff]  }
  0x48   : > { %1698 = vmatpush1.bf16.msra.mxu0 %v3486_v11  ;;  %974 = vmatprep.subr.bf16.mxu1 %v3492_v12  ;;  %v3564_v11 = vld [vmem:[%s4900_s1 + $0x4d4] ss:$8 sps:$4 sm:$0xff]  }
  0x49   : > { %1699 = vmatprep.subr.bf16.mxu0 %v3495_v13  ;;  %961 = vmatprep.mubr.bf16.mxu1 %v2859_v36  ;;  %v3567_v12 = vld [vmem:[%s4900_s1 + $0x2d4] ss:$8 sps:$4 sm:$0xff]   ;;  %v3562_v13 = vld [vmem:[%s4900_s1 + $0x4d0] ss:$8 sps:$4 sm:$0xff]  }
  0x4a   : > { %1686 = vmatprep.mubr.bf16.mxu0 %v2969_v40  ;;  %v3596_v40 = vld [vmem:[%s4900_s1 + $0x610] ss:$8 sps:$4 sm:$0xff]  }
  0x4b   : > { %975 = vmatpush1.bf16.msra.mxu1 %v3490_v14  ;;  %v3565_v14 = vld [vmem:[%s4900_s1 + $0x2d0] ss:$8 sps:$4 sm:$0xff]  }
  0x4c   : > { %1700 = vmatpush1.bf16.msra.mxu0 %v3493_v15  ;;  %976 = vmatprep.subr.bf16.mxu1 %v3498_v16  ;;  %v3571_v15 = vld [vmem:[%s4900_s1 + $0x4e4] ss:$8 sps:$4 sm:$0xff]  }
  0x4d   : > { %1701 = vmatprep.subr.bf16.mxu0 %v3501_v17  ;;  %v3575_v16 = vld [vmem:[%s4900_s1 + $0x2e4] ss:$8 sps:$4 sm:$0xff]   ;;  %v3569_v17 = vld [vmem:[%s4900_s1 + $0x4e0] ss:$8 sps:$4 sm:$0xff]  }
  0x4e   : > { %962 = vmatmul.mubr.bf16.gmra.mrb[4].mxu1 %v2858_v38 }
  0x4f   : > { %977 = vmatpush1.bf16.msra.mxu1 %v3496_v18  ;;  %1687 = vmatmul.mubr.bf16.gmra.mrb[4].mxu0 %v2968_v41  ;;  %v3573_v18 = vld [vmem:[%s4900_s1 + $0x2e0] ss:$8 sps:$4 sm:$0xff]   ;;  %v3601_v41 = vld [vmem:[%s4900_s1 + $0x524] ss:$8 sps:$4 sm:$0xff]  }
  0x50   : > { %1702 = vmatpush1.bf16.msra.mxu0 %v3499_v19  ;;  %978 = vmatprep.subr.bf16.mxu1 %v3504_v20  ;;  %v3580_v19 = vld [vmem:[%s4900_s1 + $0x4f4] ss:$8 sps:$4 sm:$0xff]  }
  0x51   : > { %1703 = vmatprep.subr.bf16.mxu0 %v3507_v21  ;;  %1004 = vmatprep.mubr.bf16.mxu1 %v2855_v43  ;;  %v3583_v20 = vld [vmem:[%s4900_s1 + $0x2f4] ss:$8 sps:$4 sm:$0xff]   ;;  %v3578_v21 = vld [vmem:[%s4900_s1 + $0x4f0] ss:$8 sps:$4 sm:$0xff]   ;;  %v3599_v43 = vld [vmem:[%s4900_s1 + $0x520] ss:$8 sps:$4 sm:$0xff]  }
  0x52   : > { %1729 = vmatprep.mubr.bf16.mxu0 %v2965_v51 }
  0x53   : > { %979 = vmatpush1.bf16.msra.mxu1 %v3502_v22  ;;  %v3581_v22 = vld [vmem:[%s4900_s1 + $0x2f0] ss:$8 sps:$4 sm:$0xff]  }
  0x54   : > { %1704 = vmatpush1.bf16.msra.mxu0 %v3505_v23  ;;  %980 = vmatprep.subr.bf16.mxu1 %v3510_v24  ;;  %v3587_v23 = vld [vmem:[%s4900_s1 + $0x504] ss:$8 sps:$4 sm:$0xff]  }
  0x55   : > { %1705 = vmatprep.subr.bf16.mxu0 %v3513_v25  ;;  %v3592_v24 = vld [vmem:[%s4900_s1 + $0x604] ss:$8 sps:$4 sm:$0xff]   ;;  %v3585_v25 = vld [vmem:[%s4900_s1 + $0x500] ss:$8 sps:$4 sm:$0xff]  }
  0x57   : > { %981 = vmatpush1.bf16.msra.mxu1 %v3508_v27  ;;  %v2854_v27 = vcombine.low %v4054_v54, %v4156_v26  ;;  %v3595_v54 = vld [vmem:[%s4900_s1 + $0x514] ss:$8 sps:$4 sm:$0xff]  }
  0x58   : > { %1706 = vmatpush1.bf16.msra.mxu0 %v3511_v28  ;;  %982 = vmatprep.subr.bf16.mxu1 %v3516_v29  ;;  %v2964_v28 = vcombine.low %v4218_v49, %v4221_v50  ;;  %v3590_v29 = vld [vmem:[%s4900_s1 + $0x600] ss:$8 sps:$4 sm:$0xff]   ;;  %v3598_v26 = vld [vmem:[%s4900_s1 + $0x614] ss:$8 sps:$4 sm:$0xff]  }
  0x59   : > { %1707 = vmatprep.subr.bf16.mxu0 %v3519_v30  ;;  %v4344_v30 = vld [vmem:[%s4027_s30 + $0x68] sm:$0xff]  ;;  %v3610_v49 = vld [vmem:[%s4900_s1 + $0x634] ss:$8 sps:$4 sm:$0xff]  }
  0x5a   : > { %v2861_v36 = vcombine.high %v4189_v37, %v4344_v30 }
  0x5b   : > { %983 = vmatpush1.bf16.msra.mxu1 %v3514_v34  ;;  %v4347_v34 = vld [vmem:[%s4027_s30 + $0x40] sm:$0xff] }
  0x5c   : > { %1708 = vmatpush1.bf16.msra.mxu0 %v3517_v35  ;;  %984 = vmatprep.subr.bf16.mxu1 %v3522_v39  ;;  %v4350_v35 = vld [vmem:[%s4027_s30 + $0x58] sm:$0xff]  ;;  %v2857_v51 = vcombine.high %v4221_v50, %v4347_v34 }
  0x5d   : > { %1709 = vmatprep.subr.bf16.mxu0 %v3525_v42  ;;  %v4362_v38 = vcombine.high %v4347_v34, %v4350_v35  ;;  %v3593_v39 = vld [vmem:[%s4900_s1 + $0x510] ss:$8 sps:$4 sm:$0xff]   ;;  %v3604_v42 = vld [vmem:[%s4900_s1 + $0x624] ss:$8 sps:$4 sm:$0xff]  }
  0x5f   : > { %985 = vmatpush1.bf16.msra.mxu1 %v3520_v44  ;;  %v2860_v44 = vcombine.low %v4189_v37, %v4344_v30 }
  0x60   : > { %1710 = vmatpush1.bf16.msra.mxu0 %v3523_v45  ;;  %986 = vmatprep.subr.bf16.mxu1 %v3528_v46  ;;  %v4384_v45 = vcombine.low %v4347_v34, %v4350_v35  ;;  %v3602_v46 = vld [vmem:[%s4900_s1 + $0x620] ss:$8 sps:$4 sm:$0xff]  }
  0x61   : > { %1711 = vmatprep.subr.bf16.mxu0 %v3531_v47  ;;  %v3607_v47 = vld [vmem:[%s4900_s1 + $0x534] ss:$8 sps:$4 sm:$0xff]  }
  0x63   : > { %987 = vmatpush1.bf16.msra.mxu1 %v3526_v52  ;;  %v4399_v52 = vcombine.high %v4040_v48, %v4171_v31  ;;  %v3613_v48 = vld [vmem:[%s4900_s1 + $0x544] ss:$8 sps:$4 sm:$0xff]  }
  0x64   : > { %1712 = vmatpush1.bf16.msra.mxu0 %v3529_v53  ;;  %988 = vmatprep.subr.bf16.mxu1 %v3534_v55  ;;  %v3605_v53 = vld [vmem:[%s4900_s1 + $0x530] ss:$8 sps:$4 sm:$0xff]   ;;  %v3616_v31 = vld [vmem:[%s4900_s1 + $0x644] ss:$8 sps:$4 sm:$0xff]  }
  0x65   : > { %1713 = vmatprep.subr.bf16.mxu0 %v3537_v56  ;;  %v3608_v55 = vld [vmem:[%s4900_s1 + $0x630] ss:$8 sps:$4 sm:$0xff]   ;;  %v3611_v56 = vld [vmem:[%s4900_s1 + $0x540] ss:$8 sps:$4 sm:$0xff]  }
  0x67   : > { %989 = vmatpush1.bf16.msra.mxu1 %v3532_v57  ;;  %v3614_v57 = vld [vmem:[%s4900_s1 + $0x640] ss:$8 sps:$4 sm:$0xff]  }
  0x68   : > { %1714 = vmatpush1.bf16.msra.mxu0 %v3535_v58  ;;  %990 = vmatprep.subr.bf16.mxu1 %v3540_v59  ;;  %v3619_v58 = vld [vmem:[%s4900_s1 + $0x554] ss:$8 sps:$4 sm:$0xff]  }
  0x69   : > { %1715 = vmatprep.subr.bf16.mxu0 %v3543_v60  ;;  %v3622_v59 = vld [vmem:[%s4900_s1 + $0x654] ss:$8 sps:$4 sm:$0xff]   ;;  %v3617_v60 = vld [vmem:[%s4900_s1 + $0x550] ss:$8 sps:$4 sm:$0xff]  }
  0x6b   : > { %991 = vmatpush1.bf16.msra.mxu1 %v3538_v61  ;;  %v3620_v61 = vld [vmem:[%s4900_s1 + $0x650] ss:$8 sps:$4 sm:$0xff]  }
  0x6c   : > { %1716 = vmatpush1.bf16.msra.mxu0 %v3541_v62  ;;  %992 = vmatprep.subr.bf16.mxu1 %v3546_v63  ;;  %v3625_v62 = vld [vmem:[%s4900_s1 + $0x564] ss:$8 sps:$4 sm:$0xff]  }
  0x6d   : > { %1717 = vmatprep.subr.bf16.mxu0 %v3549_v0  ;;  %v3628_v63 = vld [vmem:[%s4900_s1 + $0x664] ss:$8 sps:$4 sm:$0xff]   ;;  %v3623_v0 = vld [vmem:[%s4900_s1 + $0x560] ss:$8 sps:$4 sm:$0xff]  }
  0x6f   : > { %993 = vmatpush1.bf16.msra.mxu1 %v3544_v1  ;;  %v3626_v1 = vld [vmem:[%s4900_s1 + $0x660] ss:$8 sps:$4 sm:$0xff]  }
  0x70   : > { %1718 = vmatpush1.bf16.msra.mxu0 %v3547_v2  ;;  %994 = vmatprep.subr.bf16.mxu1 %v3552_v3  ;;  %v3631_v2 = vld [vmem:[%s4900_s1 + $0x574] ss:$8 sps:$4 sm:$0xff]  }
  0x71   : > { %1719 = vmatprep.subr.bf16.mxu0 %v3555_v4  ;;  %v3634_v3 = vld [vmem:[%s4900_s1 + $0x674] ss:$8 sps:$4 sm:$0xff]   ;;  %v3629_v4 = vld [vmem:[%s4900_s1 + $0x570] ss:$8 sps:$4 sm:$0xff]  }
  0x73   : > { %995 = vmatpush1.bf16.msra.mxu1 %v3550_v5  ;;  %v3632_v5 = vld [vmem:[%s4900_s1 + $0x670] ss:$8 sps:$4 sm:$0xff]  }
  0x74   : > { %1720 = vmatpush1.bf16.msra.mxu0 %v3553_v6  ;;  %996 = vmatprep.subr.bf16.mxu1 %v3558_v7  ;;  %v3637_v6 = vld [vmem:[%s4900_s1 + $0x584] ss:$8 sps:$4 sm:$0xff]  }
  0x75   : > { %1721 = vmatprep.subr.bf16.mxu0 %v3561_v8  ;;  %v3640_v7 = vld [vmem:[%s4900_s1 + $0x684] ss:$8 sps:$4 sm:$0xff]   ;;  %v3635_v8 = vld [vmem:[%s4900_s1 + $0x580] ss:$8 sps:$4 sm:$0xff]  }
  0x77   : > { %997 = vmatpush1.bf16.msra.mxu1 %v3556_v9  ;;  %v3638_v9 = vld [vmem:[%s4900_s1 + $0x680] ss:$8 sps:$4 sm:$0xff]  }
  0x78   : > { %1722 = vmatpush1.bf16.msra.mxu0 %v3559_v10  ;;  %998 = vmatprep.subr.bf16.mxu1 %v3564_v11  ;;  %v3643_v10 = vld [vmem:[%s4900_s1 + $0x594] ss:$8 sps:$4 sm:$0xff]  }
  0x79   : > { %1723 = vmatprep.subr.bf16.mxu0 %v3567_v12  ;;  %v3646_v11 = vld [vmem:[%s4900_s1 + $0x694] ss:$8 sps:$4 sm:$0xff]   ;;  %v3641_v12 = vld [vmem:[%s4900_s1 + $0x590] ss:$8 sps:$4 sm:$0xff]  }
  0x7b   : > { %999 = vmatpush1.bf16.msra.mxu1 %v3562_v13  ;;  %v3644_v13 = vld [vmem:[%s4900_s1 + $0x690] ss:$8 sps:$4 sm:$0xff]  }
  0x7c   : > { %1724 = vmatpush1.bf16.msra.mxu0 %v3565_v14  ;;  %1000 = vmatprep.subr.bf16.mxu1 %v3571_v15  ;;  %v3649_v14 = vld [vmem:[%s4900_s1 + $0x5a4] ss:$8 sps:$4 sm:$0xff]  }
  0x7d   : > { %1725 = vmatprep.subr.bf16.mxu0 %v3575_v16  ;;  %v3652_v15 = vld [vmem:[%s4900_s1 + $0x6a4] ss:$8 sps:$4 sm:$0xff]   ;;  %v3647_v16 = vld [vmem:[%s4900_s1 + $0x5a0] ss:$8 sps:$4 sm:$0xff]  }
  0x7f   : > { %1001 = vmatpush1.bf16.msra.mxu1 %v3569_v17  ;;  %v3650_v17 = vld [vmem:[%s4900_s1 + $0x6a0] ss:$8 sps:$4 sm:$0xff]  }
  0x80   : > { %1726 = vmatpush1.bf16.msra.mxu0 %v3573_v18  ;;  %1002 = vmatprep.subr.bf16.mxu1 %v3580_v19  ;;  %v3655_v18 = vld [vmem:[%s4900_s1 + $0x5b4] ss:$8 sps:$4 sm:$0xff]  }
  0x81   : > { %1727 = vmatprep.subr.bf16.mxu0 %v3583_v20  ;;  %v3658_v19 = vld [vmem:[%s4900_s1 + $0x6b4] ss:$8 sps:$4 sm:$0xff]   ;;  %v3653_v20 = vld [vmem:[%s4900_s1 + $0x5b0] ss:$8 sps:$4 sm:$0xff]  }
  0x83   : > { %1003 = vmatpush1.bf16.msra.mxu1 %v3578_v21  ;;  %v3656_v21 = vld [vmem:[%s4900_s1 + $0x6b0] ss:$8 sps:$4 sm:$0xff]  }
  0x84   : > { %1728 = vmatpush1.bf16.msra.mxu0 %v3581_v22  ;;  %1025 = vmatprep.subr.bf16.mxu1 %v3587_v23  ;;  %v3661_v22 = vld [vmem:[%s4900_s1 + $0x5c4] ss:$8 sps:$4 sm:$0xff]  }
  0x85   : > { %2399 = vmatprep.subr.bf16.mxu0 %v3592_v24  ;;  %v3664_v23 = vld [vmem:[%s4900_s1 + $0x6c4] ss:$8 sps:$4 sm:$0xff]   ;;  %v3659_v24 = vld [vmem:[%s4900_s1 + $0x5c0] ss:$8 sps:$4 sm:$0xff]  }
  0x86   : > { %1005 = vmatmul.mubr.bf16.vlgmr.msra.gmra.mrb[0].mxu1 %v2854_v27  ;;  %v3667_v27 = vld [vmem:[%s4900_s1 + $0x5d4] ss:$8 sps:$4 sm:$0xff]  }
  0x87   : > { %1730 = vmatmul.mubr.bf16.vlgmr.msra.gmra.mrb[0].mxu0 %v2964_v28  ;;  %1026 = vmatpush1.bf16.msra.mxu1 %v3585_v25  ;;  %v3662_v25 = vld [vmem:[%s4900_s1 + $0x6c0] ss:$8 sps:$4 sm:$0xff]   ;;  %v3670_v28 = vld [vmem:[%s4900_s1 + $0x6d4] ss:$8 sps:$4 sm:$0xff]  }
  0x88   : > { %2400 = vmatpush1.bf16.msra.mxu0 %v3590_v29  ;;  %1027 = vmatprep.subr.bf16.mxu1 %v3595_v54  ;;  %v3665_v29 = vld [vmem:[%s4900_s1 + $0x5d0] ss:$8 sps:$4 sm:$0xff]  }
  0x89   : > { %2401 = vmatprep.subr.bf16.mxu0 %v3598_v26  ;;  %1014 = vmatprep.mubr.bf16.mxu1 %v2861_v36  ;;  %v3668_v54 = vld [vmem:[%s4900_s1 + $0x6d0] ss:$8 sps:$4 sm:$0xff]   ;;  %v3674_v26 = vld [vmem:[%s4900_s1 + $0x5e4] ss:$8 sps:$4 sm:$0xff]  }
  0x8a   : > { %1739 = vmatprep.mubr.bf16.mxu0 %v4362_v38  ;;  %v3678_v36 = vld [vmem:[%s4900_s1 + $0x6e4] ss:$8 sps:$4 sm:$0xff]  }
  0x8b   : > { %1028 = vmatpush1.bf16.msra.mxu1 %v3593_v39  ;;  %v3672_v39 = vld [vmem:[%s4900_s1 + $0x5e0] ss:$8 sps:$4 sm:$0xff]  }
  0x8c   : > { %2402 = vmatpush1.bf16.msra.mxu0 %v3596_v40  ;;  %1029 = vmatprep.subr.bf16.mxu1 %v3601_v41  ;;  %v3676_v40 = vld [vmem:[%s4900_s1 + $0x6e0] ss:$8 sps:$4 sm:$0xff]   ;;  %v3683_v41 = vld [vmem:[%s4900_s1 + $0x5f4] ss:$8 sps:$4 sm:$0xff]  }
  0x8d   : > { %2403 = vmatprep.subr.bf16.mxu0 %v3604_v42  ;;  %v3686_v42 = vld [vmem:[%s4900_s1 + $0x6f4] ss:$8 sps:$4 sm:$0xff]  }
  0x8e   : > { %1015 = vmatmul.mubr.bf16.gmra.mrb[4].mxu1 %v2860_v44  ;;  %v3684_v44 = vld [vmem:[%s4900_s1 + $0x6f0] ss:$8 sps:$4 sm:$0xff]  }
  0x8f   : > { %1740 = vmatmul.mubr.bf16.gmra.mrb[4].mxu0 %v4384_v45  ;;  %1030 = vmatpush1.bf16.msra.mxu1 %v3599_v43  ;;  %v3681_v43 = vld [vmem:[%s4900_s1 + $0x5f0] ss:$8 sps:$4 sm:$0xff]  }
  0x90   : > { %2404 = vmatpush1.bf16.msra.mxu0 %v3602_v46  ;;  %1031 = vmatprep.subr.bf16.mxu1 %v3607_v47  ;;  %v3690_v46 = vld [vmem:[%s4900_s1 + $0x4] ss:$8 sps:$4 sm:$0xff]  }
  0x91   : > { %2405 = vmatprep.subr.bf16.mxu0 %v3610_v49  ;;  %1057 = vmatprep.mubr.bf16.mxu1 %v2857_v51  ;;  %v3695_v47 = vld [vmem:[%s4900_s1 + $0x704] ss:$8 sps:$4 sm:$0xff]   ;;  %v4560_v49 = vld [vmem:[%s4027_s30 + $0x70] sm:$0xff]  ;;  %v2856_v51 = vcombine.low %v4221_v50, %v4347_v34 }
  0x92   : > { %2431 = vmatprep.mubr.bf16.mxu0 %v4399_v52  ;;  %v3702_v50 = vld [vmem:[%s4900_s1 + $0x714] ss:$8 sps:$4 sm:$0xff]   ;;  %v2863_v34 = vcombine.high %v4350_v35, %v4560_v49 }
  0x93   : > { %1032 = vmatpush1.bf16.msra.mxu1 %v3605_v53  ;;  %v1759_v53 = vld [vmem:[%s4027_s30 + $0x78] sm:$0xff] }
  0x94   : > { %2406 = vmatpush1.bf16.msra.mxu0 %v3608_v55  ;;  %1033 = vmatprep.subr.bf16.mxu1 %v3613_v48  ;;  %v3688_v55 = vld [vmem:[%s4900_s1] ss:$8 sps:$4 sm:$0xff]  }
  0x95   : > { %2407 = vmatprep.subr.bf16.mxu0 %v3616_v31  ;;  %v3693_v48 = vld [vmem:[%s4900_s1 + $0x700] ss:$8 sps:$4 sm:$0xff]   ;;  %v3699_v31 = vld [vmem:[%s4900_s1 + $0x14] ss:$8 sps:$4 sm:$0xff]  }
  0x97   : > { %1034 = vmatpush1.bf16.msra.mxu1 %v3611_v56  ;;  %v3171_v56 = vcombine.high %v4174_v32, %v1759_v53 }
  0x98   : > { %2408 = vmatpush1.bf16.msra.mxu0 %v3614_v57  ;;  %1035 = vmatprep.subr.bf16.mxu1 %v3619_v58  ;;  %v3697_v57 = vld [vmem:[%s4900_s1 + $0x10] ss:$8 sps:$4 sm:$0xff]  }
  0x99   : > { %2409 = vmatprep.subr.bf16.mxu0 %v3622_v59  ;;  %v3700_v58 = vld [vmem:[%s4900_s1 + $0x710] ss:$8 sps:$4 sm:$0xff]   ;;  %v3705_v59 = vld [vmem:[%s4900_s1 + $0x24] ss:$8 sps:$4 sm:$0xff]  }
  0x9b   : > { %1036 = vmatpush1.bf16.msra.mxu1 %v3617_v60  ;;  %v3708_v60 = vld [vmem:[%s4900_s1 + $0x724] ss:$8 sps:$4 sm:$0xff]  }
  0x9c   : > { %2410 = vmatpush1.bf16.msra.mxu0 %v3620_v61  ;;  %1037 = vmatprep.subr.bf16.mxu1 %v3625_v62  ;;  %v2862_v61 = vcombine.low %v4350_v35, %v4560_v49  ;;  %v3170_v62 = vcombine.low %v4174_v32, %v1759_v53  ;;  %v3711_v32 = vld [vmem:[%s4900_s1 + $0x34] ss:$8 sps:$4 sm:$0xff]   ;;  %v3763_v53 = vld [vmem:[%s4900_s1 + $0xc0] ss:$8 sps:$4 sm:$0xff]  }
  0x9d   : > { %2411 = vmatprep.subr.bf16.mxu0 %v3628_v63  ;;  %v4597_v63 = vld [vmem:[%s4027_s30] sm:$0xff]  ;;  %v3714_v35 = vld [vmem:[%s4900_s1 + $0x734] ss:$8 sps:$4 sm:$0xff]  }
  0x9f   : > { %1038 = vmatpush1.bf16.msra.mxu1 %v3623_v0  ;;  %v4600_v0 = vld [vmem:[%s4027_s30 + $0x38] sm:$0xff] }
  0xa0   : > { %2412 = vmatpush1.bf16.msra.mxu0 %v3626_v1  ;;  %1039 = vmatprep.subr.bf16.mxu1 %v3631_v2  ;;  %v3703_v1 = vld [vmem:[%s4900_s1 + $0x20] ss:$8 sps:$4 sm:$0xff]  }
  0xa1   : > { %2413 = vmatprep.subr.bf16.mxu0 %v3634_v3  ;;  %v3706_v2 = vld [vmem:[%s4900_s1 + $0x720] ss:$8 sps:$4 sm:$0xff]   ;;  %v4615_v3 = vld [vmem:[%s4027_s30 + $0x18] sm:$0xff] }
  0xa3   : > { %1040 = vmatpush1.bf16.msra.mxu1 %v3629_v4  ;;  %v2961_v4 = vcombine.high %v4597_v63, %v4615_v3 }
  0xa4   : > { %2414 = vmatpush1.bf16.msra.mxu0 %v3632_v5  ;;  %1041 = vmatprep.subr.bf16.mxu1 %v3637_v6  ;;  %v3167_v5 = vcombine.high %v4600_v0, %v4189_v37  ;;  %v3709_v6 = vld [vmem:[%s4900_s1 + $0x30] ss:$8 sps:$4 sm:$0xff]   ;;  %v3720_v37 = vld [vmem:[%s4900_s1 + $0x744] ss:$8 sps:$4 sm:$0xff]  }
  0xa5   : > { %2415 = vmatprep.subr.bf16.mxu0 %v3640_v7  ;;  %v3712_v7 = vld [vmem:[%s4900_s1 + $0x730] ss:$8 sps:$4 sm:$0xff]  }
  0xa7   : > { %1042 = vmatpush1.bf16.msra.mxu1 %v3635_v8  ;;  %v3717_v8 = vld [vmem:[%s4900_s1 + $0x44] ss:$8 sps:$4 sm:$0xff]  }
  0xa8   : > { %2416 = vmatpush1.bf16.msra.mxu0 %v3638_v9  ;;  %1043 = vmatprep.subr.bf16.mxu1 %v3643_v10  ;;  %v3715_v9 = vld [vmem:[%s4900_s1 + $0x40] ss:$8 sps:$4 sm:$0xff]  }
  0xa9   : > { %2417 = vmatprep.subr.bf16.mxu0 %v3646_v11  ;;  %v3718_v10 = vld [vmem:[%s4900_s1 + $0x740] ss:$8 sps:$4 sm:$0xff]   ;;  %v3723_v11 = vld [vmem:[%s4900_s1 + $0x54] ss:$8 sps:$4 sm:$0xff]  }
  0xab   : > { %1044 = vmatpush1.bf16.msra.mxu1 %v3641_v12  ;;  %v3726_v12 = vld [vmem:[%s4900_s1 + $0x754] ss:$8 sps:$4 sm:$0xff]  }
  0xac   : > { %2418 = vmatpush1.bf16.msra.mxu0 %v3644_v13  ;;  %1045 = vmatprep.subr.bf16.mxu1 %v3649_v14  ;;  %v3721_v13 = vld [vmem:[%s4900_s1 + $0x50] ss:$8 sps:$4 sm:$0xff]  }
  0xad   : > { %2419 = vmatprep.subr.bf16.mxu0 %v3652_v15  ;;  %v3724_v14 = vld [vmem:[%s4900_s1 + $0x750] ss:$8 sps:$4 sm:$0xff]   ;;  %v3729_v15 = vld [vmem:[%s4900_s1 + $0x64] ss:$8 sps:$4 sm:$0xff]  }
  0xaf   : > { %1046 = vmatpush1.bf16.msra.mxu1 %v3647_v16  ;;  %v3732_v16 = vld [vmem:[%s4900_s1 + $0x764] ss:$8 sps:$4 sm:$0xff]  }
  0xb0   : > { %2420 = vmatpush1.bf16.msra.mxu0 %v3650_v17  ;;  %1047 = vmatprep.subr.bf16.mxu1 %v3655_v18  ;;  %v3727_v17 = vld [vmem:[%s4900_s1 + $0x60] ss:$8 sps:$4 sm:$0xff]  }
  0xb1   : > { %2421 = vmatprep.subr.bf16.mxu0 %v3658_v19  ;;  %v3730_v18 = vld [vmem:[%s4900_s1 + $0x760] ss:$8 sps:$4 sm:$0xff]   ;;  %v3735_v19 = vld [vmem:[%s4900_s1 + $0x74] ss:$8 sps:$4 sm:$0xff]  }
  0xb3   : > { %1048 = vmatpush1.bf16.msra.mxu1 %v3653_v20  ;;  %v3738_v20 = vld [vmem:[%s4900_s1 + $0x774] ss:$8 sps:$4 sm:$0xff]  }
  0xb4   : > { %2422 = vmatpush1.bf16.msra.mxu0 %v3656_v21  ;;  %1049 = vmatprep.subr.bf16.mxu1 %v3661_v22  ;;  %v3733_v21 = vld [vmem:[%s4900_s1 + $0x70] ss:$8 sps:$4 sm:$0xff]  }
  0xb5   : > { %2423 = vmatprep.subr.bf16.mxu0 %v3664_v23  ;;  %v3736_v22 = vld [vmem:[%s4900_s1 + $0x770] ss:$8 sps:$4 sm:$0xff]   ;;  %v3741_v23 = vld [vmem:[%s4900_s1 + $0x84] ss:$8 sps:$4 sm:$0xff]  }
  0xb7   : > { %1050 = vmatpush1.bf16.msra.mxu1 %v3659_v24  ;;  %v3744_v24 = vld [vmem:[%s4900_s1 + $0x784] ss:$8 sps:$4 sm:$0xff]  }
  0xb8   : > { %2424 = vmatpush1.bf16.msra.mxu0 %v3662_v25  ;;  %1051 = vmatprep.subr.bf16.mxu1 %v3667_v27  ;;  %v3739_v25 = vld [vmem:[%s4900_s1 + $0x80] ss:$8 sps:$4 sm:$0xff]  }
  0xb9   : > { %2425 = vmatprep.subr.bf16.mxu0 %v3670_v28  ;;  %v3742_v27 = vld [vmem:[%s4900_s1 + $0x780] ss:$8 sps:$4 sm:$0xff]   ;;  %v3747_v28 = vld [vmem:[%s4900_s1 + $0x94] ss:$8 sps:$4 sm:$0xff]  }
  0xbb   : > { %1052 = vmatpush1.bf16.msra.mxu1 %v3665_v29  ;;  %v3750_v29 = vld [vmem:[%s4900_s1 + $0x794] ss:$8 sps:$4 sm:$0xff]  }
  0xbc   : > { %2426 = vmatpush1.bf16.msra.mxu0 %v3668_v54  ;;  %1053 = vmatprep.subr.bf16.mxu1 %v3674_v26  ;;  %v3745_v54 = vld [vmem:[%s4900_s1 + $0x90] ss:$8 sps:$4 sm:$0xff]  }
  0xbd   : > { %2427 = vmatprep.subr.bf16.mxu0 %v3678_v36  ;;  %v3748_v26 = vld [vmem:[%s4900_s1 + $0x790] ss:$8 sps:$4 sm:$0xff]   ;;  %v3753_v36 = vld [vmem:[%s4900_s1 + $0xa4] ss:$8 sps:$4 sm:$0xff]  }
  0xbf   : > { %1054 = vmatpush1.bf16.msra.mxu1 %v3672_v39  ;;  %v3756_v39 = vld [vmem:[%s4900_s1 + $0x7a4] ss:$8 sps:$4 sm:$0xff]  }
  0xc0   : > { %2428 = vmatpush1.bf16.msra.mxu0 %v3676_v40  ;;  %1055 = vmatprep.subr.bf16.mxu1 %v3683_v41  ;;  %v3751_v40 = vld [vmem:[%s4900_s1 + $0xa0] ss:$8 sps:$4 sm:$0xff]  }
  0xc1   : > { %2429 = vmatprep.subr.bf16.mxu0 %v3686_v42  ;;  %v3754_v41 = vld [vmem:[%s4900_s1 + $0x7a0] ss:$8 sps:$4 sm:$0xff]   ;;  %v3759_v42 = vld [vmem:[%s4900_s1 + $0xb4] ss:$8 sps:$4 sm:$0xff]  }
  0xc3   : > { %1056 = vmatpush1.bf16.msra.mxu1 %v3681_v43  ;;  %v3762_v43 = vld [vmem:[%s4900_s1 + $0x7b4] ss:$8 sps:$4 sm:$0xff]  }
  0xc4   : > { %2430 = vmatpush1.bf16.msra.mxu0 %v3684_v44  ;;  %1591 = vmatprep.subr.bf16.mxu1 %v3690_v46  ;;  %v3757_v44 = vld [vmem:[%s4900_s1 + $0xb0] ss:$8 sps:$4 sm:$0xff]  }
  0xc5   : > { %2452 = vmatprep.subr.bf16.mxu0 %v3695_v47  ;;  %v3760_v46 = vld [vmem:[%s4900_s1 + $0x7b0] ss:$8 sps:$4 sm:$0xff]   ;;  %v3765_v47 = vld [vmem:[%s4900_s1 + $0xc4] ss:$8 sps:$4 sm:$0xff]  }
  0xc6   : > { %1058 = vmatmul.mubr.bf16.vlgmr.msra.gmra.mrb[0].mxu1 %v2856_v51  ;;  %v3768_v51 = vld [vmem:[%s4900_s1 + $0x7c4] ss:$8 sps:$4 sm:$0xff]  }
  0xc7   : > { %2432 = vmatmul.mubr.bf16.vlgmr.msra.gmra.mrb[0].mxu0 %v4178_v33  ;;  %1592 = vmatpush1.bf16.msra.mxu1 %v3688_v55  ;;  %v3766_v55 = vld [vmem:[%s4900_s1 + $0x7c0] ss:$8 sps:$4 sm:$0xff]  }
  0xc8   : > { %2453 = vmatpush1.bf16.msra.mxu0 %v3693_v48  ;;  %1593 = vmatprep.subr.bf16.mxu1 %v3699_v31  ;;  %v3771_v48 = vld [vmem:[%s4900_s1 + $0xd4] ss:$8 sps:$4 sm:$0xff]  }
  0xc9   : > { %2454 = vmatprep.subr.bf16.mxu0 %v3702_v50  ;;  %1067 = vmatprep.mubr.bf16.mxu1 %v2863_v34  ;;  %v3774_v31 = vld [vmem:[%s4900_s1 + $0x7d4] ss:$8 sps:$4 sm:$0xff]   ;;  %v3769_v50 = vld [vmem:[%s4900_s1 + $0xd0] ss:$8 sps:$4 sm:$0xff]  }
  0xca   : > { %2441 = vmatprep.mubr.bf16.mxu0 %v3171_v56  ;;  %v3772_v34 = vld [vmem:[%s4900_s1 + $0x7d0] ss:$8 sps:$4 sm:$0xff]   ;;  %v3780_v56 = vld [vmem:[%s4900_s1 + $0xe4] ss:$8 sps:$4 sm:$0xff]  }
  0xcb   : > { %1594 = vmatpush1.bf16.msra.mxu1 %v3697_v57  ;;  %v3784_v57 = vld [vmem:[%s4900_s1 + $0x7e4] ss:$8 sps:$4 sm:$0xff]  }
  0xcc   : > { %2455 = vmatpush1.bf16.msra.mxu0 %v3700_v58  ;;  %1595 = vmatprep.subr.bf16.mxu1 %v3705_v59  ;;  %v3778_v58 = vld [vmem:[%s4900_s1 + $0xe0] ss:$8 sps:$4 sm:$0xff]  }
  0xcd   : > { %2456 = vmatprep.subr.bf16.mxu0 %v3708_v60  ;;  %v3782_v59 = vld [vmem:[%s4900_s1 + $0x7e0] ss:$8 sps:$4 sm:$0xff]   ;;  %v3787_v60 = vld [vmem:[%s4900_s1 + $0xf4] ss:$8 sps:$4 sm:$0xff]  }
  0xce   : > { %1068 = vmatmul.mubr.bf16.gmra.mrb[4].mxu1 %v2862_v61  ;;  %v3790_v61 = vld [vmem:[%s4900_s1 + $0x7f4] ss:$8 sps:$4 sm:$0xff]  }
  0xcf   : > { %2442 = vmatmul.mubr.bf16.gmra.mrb[4].mxu0 %v3170_v62  ;;  %1596 = vmatpush1.bf16.msra.mxu1 %v3703_v1  ;;  %v3785_v62 = vld [vmem:[%s4900_s1 + $0xf0] ss:$8 sps:$4 sm:$0xff]  }
  0xd0   : > { %2457 = vmatpush1.bf16.msra.mxu0 %v3706_v2  ;;  %1597 = vmatprep.subr.bf16.mxu1 %v3711_v32  ;;  %v3788_v1 = vld [vmem:[%s4900_s1 + $0x7f0] ss:$8 sps:$4 sm:$0xff]   ;;  %v3797_v2 = vld [vmem:[%s4900_s1 + $0x804] ss:$8 sps:$4 sm:$0xff]   ;;  %v2960_v32 = vcombine.low %v4597_v63, %v4615_v3 }
  0xd1   : > { %2458 = vmatprep.subr.bf16.mxu0 %v3714_v35  ;;  %1623 = vmatprep.mubr.bf16.mxu1 %v2961_v4  ;;  %v3848_v35 = vld [vmem:[%s4027_s30 + $0x50] sm:$0xff] }
  0xd2   : > { %2484 = vmatprep.mubr.bf16.mxu0 %v3167_v5  ;;  %v3166_v4 = vcombine.low %v4600_v0, %v3848_v35  ;;  %v1760_v5 = vld [vmem:[%s4027_s30 + $0x80] sm:$0xff]  ;;  %v3798_v63 = vld [vmem:[%s4900_s1 + $0x810] ss:$8 sps:$4 sm:$0xff]  }
  0xd3   : > { %1598 = vmatpush1.bf16.msra.mxu1 %v3709_v6  ;;  %v3795_v6 = vld [vmem:[%s4900_s1 + $0x800] ss:$8 sps:$4 sm:$0xff]   ;;  %v3805_v0 = vld [vmem:[%s4900_s1 + $0x824] ss:$8 sps:$4 sm:$0xff]   ;;  %v3172_v3 = vcombine.low %v4344_v30, %v1760_v5 }
  0xd4   : > { %2459 = vmatpush1.bf16.msra.mxu0 %v3712_v7  ;;  %1599 = vmatprep.subr.bf16.mxu1 %v3717_v8  ;;  %v3800_v7 = vld [vmem:[%s4900_s1 + $0x814] ss:$8 sps:$4 sm:$0xff]   ;;  %v3173_v8 = vcombine.high %v4344_v30, %v1760_v5  ;;  %v3806_v30 = vld [vmem:[%s4900_s1 + $0x830] ss:$8 sps:$4 sm:$0xff]  }
  0xd5   : > { %2460 = vmatprep.subr.bf16.mxu0 %v3720_v37  ;;  %v4795_v37 = vld [vmem:[%s4027_s30 + $0x88] sm:$0xff] }
  0xd7   : > { %1600 = vmatpush1.bf16.msra.mxu1 %v3715_v9  ;;  %v3803_v9 = vld [vmem:[%s4900_s1 + $0x820] ss:$8 sps:$4 sm:$0xff]  }
  0xd8   : > { %2461 = vmatpush1.bf16.msra.mxu0 %v3718_v10  ;;  %1601 = vmatprep.subr.bf16.mxu1 %v3723_v11  ;;  %v3808_v10 = vld [vmem:[%s4900_s1 + $0x834] ss:$8 sps:$4 sm:$0xff]   ;;  %v3811_v11 = vld [vmem:[%s4900_s1 + $0x844] ss:$8 sps:$4 sm:$0xff]  }
  0xd9   : > { %2462 = vmatprep.subr.bf16.mxu0 %v3726_v12  ;;  %v3814_v12 = vld [vmem:[%s4900_s1 + $0x854] ss:$8 sps:$4 sm:$0xff]  }
  0xdb   : > { %1602 = vmatpush1.bf16.msra.mxu1 %v3721_v13  ;;  %v3812_v13 = vld [vmem:[%s4900_s1 + $0x850] ss:$8 sps:$4 sm:$0xff]  }
  0xdc   : > { %2463 = vmatpush1.bf16.msra.mxu0 %v3724_v14  ;;  %1603 = vmatprep.subr.bf16.mxu1 %v3729_v15  ;;  %v3815_v14 = vld [vmem:[%s4900_s1 + $0x860] ss:$8 sps:$4 sm:$0xff]   ;;  %v3820_v15 = vld [vmem:[%s4900_s1 + $0x874] ss:$8 sps:$4 sm:$0xff]  }
  0xdd   : > { %2464 = vmatprep.subr.bf16.mxu0 %v3732_v16  ;;  %v3818_v16 = vld [vmem:[%s4900_s1 + $0x870] ss:$8 sps:$4 sm:$0xff]  }
  0xdf   : > { %1604 = vmatpush1.bf16.msra.mxu1 %v3727_v17  ;;  %v3823_v17 = vld [vmem:[%s4900_s1 + $0x884] ss:$8 sps:$4 sm:$0xff]  }
  0xe0   : > { %2465 = vmatpush1.bf16.msra.mxu0 %v3730_v18  ;;  %1605 = vmatprep.subr.bf16.mxu1 %v3735_v19  ;;  %v3821_v18 = vld [vmem:[%s4900_s1 + $0x880] ss:$8 sps:$4 sm:$0xff]   ;;  %v3826_v19 = vld [vmem:[%s4900_s1 + $0x894] ss:$8 sps:$4 sm:$0xff]  }
  0xe1   : > { %2466 = vmatprep.subr.bf16.mxu0 %v3738_v20  ;;  %v3824_v20 = vld [vmem:[%s4900_s1 + $0x890] ss:$8 sps:$4 sm:$0xff]  }
  0xe3   : > { %1606 = vmatpush1.bf16.msra.mxu1 %v3733_v21  ;;  %v3829_v21 = vld [vmem:[%s4900_s1 + $0x8a4] ss:$8 sps:$4 sm:$0xff]  }
  0xe4   : > { %2467 = vmatpush1.bf16.msra.mxu0 %v3736_v22  ;;  %1607 = vmatprep.subr.bf16.mxu1 %v3741_v23  ;;  %v3827_v22 = vld [vmem:[%s4900_s1 + $0x8a0] ss:$8 sps:$4 sm:$0xff]   ;;  %v3832_v23 = vld [vmem:[%s4900_s1 + $0x8b4] ss:$8 sps:$4 sm:$0xff]  }
  0xe5   : > { %2468 = vmatprep.subr.bf16.mxu0 %v3744_v24  ;;  %v3830_v24 = vld [vmem:[%s4900_s1 + $0x8b0] ss:$8 sps:$4 sm:$0xff]  }
  0xe7   : > { %1608 = vmatpush1.bf16.msra.mxu1 %v3739_v25  ;;  %v3835_v25 = vld [vmem:[%s4900_s1 + $0x8c4] ss:$8 sps:$4 sm:$0xff]  }
  0xe8   : > { %2469 = vmatpush1.bf16.msra.mxu0 %v3742_v27  ;;  %1609 = vmatprep.subr.bf16.mxu1 %v3747_v28  ;;  %v3833_v27 = vld [vmem:[%s4900_s1 + $0x8c0] ss:$8 sps:$4 sm:$0xff]   ;;  %v3838_v28 = vld [vmem:[%s4900_s1 + $0x8d4] ss:$8 sps:$4 sm:$0xff]  }
  0xe9   : > { %2470 = vmatprep.subr.bf16.mxu0 %v3750_v29  ;;  %v3836_v29 = vld [vmem:[%s4900_s1 + $0x8d0] ss:$8 sps:$4 sm:$0xff]  }
  0xeb   : > { %1610 = vmatpush1.bf16.msra.mxu1 %v3745_v54  ;;  %v3841_v54 = vld [vmem:[%s4900_s1 + $0x8e4] ss:$8 sps:$4 sm:$0xff]  }
  0xec   : > { %2471 = vmatpush1.bf16.msra.mxu0 %v3748_v26  ;;  %1611 = vmatprep.subr.bf16.mxu1 %v3753_v36  ;;  %v3839_v26 = vld [vmem:[%s4900_s1 + $0x8e0] ss:$8 sps:$4 sm:$0xff]   ;;  %v3844_v36 = vld [vmem:[%s4900_s1 + $0x8f4] ss:$8 sps:$4 sm:$0xff]  }
  0xed   : > { %2472 = vmatprep.subr.bf16.mxu0 %v3756_v39  ;;  %v3842_v39 = vld [vmem:[%s4900_s1 + $0x8f0] ss:$8 sps:$4 sm:$0xff]  }
  0xef   : > { %1612 = vmatpush1.bf16.msra.mxu1 %v3751_v40  ;;  %v3174_v40 = vcombine.low %v4560_v49, %v4795_v37 }
  0xf0   : > { %2473 = vmatpush1.bf16.msra.mxu0 %v3754_v41  ;;  %1613 = vmatprep.subr.bf16.mxu1 %v3759_v42 }
  0xf1   : > { %2474 = vmatprep.subr.bf16.mxu0 %v3762_v43 }
  0xf3   : > { %1614 = vmatpush1.bf16.msra.mxu1 %v3757_v44 }
  0xf4   : > { %2475 = vmatpush1.bf16.msra.mxu0 %v3760_v46  ;;  %1615 = vmatprep.subr.bf16.mxu1 %v3765_v47 }
  0xf5   : > { %2476 = vmatprep.subr.bf16.mxu0 %v3768_v51 }
  0xf7   : > { %1616 = vmatpush1.bf16.msra.mxu1 %v3763_v53 }
  0xf8   : > { %2477 = vmatpush1.bf16.msra.mxu0 %v3766_v55  ;;  %1617 = vmatprep.subr.bf16.mxu1 %v3771_v48 }
  0xf9   : > { %2478 = vmatprep.subr.bf16.mxu0 %v3774_v31 }
  0xfb   : > { %1618 = vmatpush1.bf16.msra.mxu1 %v3769_v50 }
  0xfc   : > { %2479 = vmatpush1.bf16.msra.mxu0 %v3772_v34  ;;  %1619 = vmatprep.subr.bf16.mxu1 %v3780_v56 }
  0xfd   : > { %2480 = vmatprep.subr.bf16.mxu0 %v3784_v57 }
  0xff   : > { %1620 = vmatpush1.bf16.msra.mxu1 %v3778_v58  ;;  %v2568_v58 = vlaneseq }
 0x100   : > { %2481 = vmatpush1.bf16.msra.mxu0 %v3782_v59  ;;  %1621 = vmatprep.subr.bf16.mxu1 %v3787_v60  ;;  %v2566_v60 = vld [vmem:[%s4901_s2] sm:$0x3] }
 0x101   : > { %2482 = vmatprep.subr.bf16.mxu0 %v3790_v61  ;;  %v2569_v59 = vshrl.u32 %v2568_v58, 7 }
 0x103   : > { %1622 = vmatpush1.bf16.msra.mxu1 %v3785_v62  ;;  %v2574_v61 = vsub.s32 1, %v2569_v59 }
 0x104   : > { %2483 = vmatpush1.bf16.msra.mxu0 %v3788_v1  ;;  %3278 = vmatprep.subr.bf16.mxu1 %v3797_v2 }
 0x105   : > { %2505 = vmatprep.subr.bf16.mxu0 %v3797_v2 }
 0x106   : > { %1624 = vmatmul.mubr.bf16.vlgmr.msra.gmra.mrb[0].mxu1 %v2960_v32  ;;  %v2575_v32 = vrot.slane %v2566_v60, %v2574_v61 }
 0x107   : > { %2485 = vmatmul.mubr.bf16.vlgmr.msra.gmra.mrb[0].mxu0 %v3166_v4  ;;  %3294 = vmatpush1.bf16.msra.mxu1 %v3795_v6 }
 0x108   : > { %2506 = vmatpush1.bf16.msra.mxu0 %v3795_v6  ;;  %3279 = vmatprep.subr.bf16.mxu1 %v3800_v7 }
 0x109   : > { %2507 = vmatprep.subr.bf16.mxu0 %v3800_v7  ;;  %1633 = vmatprep.mubr.bf16.mxu1 %v4399_v52  ;;  %v3175_v52 = vcombine.high %v4560_v49, %v4795_v37 }
 0x10a   : > { %2494 = vmatprep.mubr.bf16.mxu0 %v3173_v8 }
 0x10b   : > { %3295 = vmatpush1.bf16.msra.mxu1 %v3798_v63 }
 0x10c   : > { %2508 = vmatpush1.bf16.msra.mxu0 %v3798_v63  ;;  %3280 = vmatprep.subr.bf16.mxu1 %v3805_v0 }
 0x10d   : > { %2509 = vmatprep.subr.bf16.mxu0 %v3805_v0 }
 0x10e   : > { %1634 = vmatmul.mubr.bf16.gmra.mrb[4].mxu1 %v4178_v33  ;;  %v3809_v33 = vld [vmem:[%s4900_s1 + $0x840] ss:$8 sps:$4 sm:$0xff]  }
 0x10f   : > { %2495 = vmatmul.mubr.bf16.gmra.mrb[4].mxu0 %v3172_v3  ;;  %3296 = vmatpush1.bf16.msra.mxu1 %v3803_v9 }
 0x110   : > { %2510 = vmatpush1.bf16.msra.mxu0 %v3803_v9  ;;  %3281 = vmatprep.subr.bf16.mxu1 %v3808_v10 }
 0x111   : > { %2511 = vmatprep.subr.bf16.mxu0 %v3808_v10  ;;  %2537 = vmatprep.mubr.bf16.mxu0 %v4362_v38  ;;  %v3817_v38 = vld [vmem:[%s4900_s1 + $0x864] ss:$8 sps:$4 sm:$0xff]  }
 0x112   : > { %2547 = vmatprep.mubr.bf16.mxu1 %v3175_v52 }
 0x113   : > { %3297 = vmatpush1.bf16.msra.mxu1 %v3806_v30 }
 0x114   : > { %2512 = vmatpush1.bf16.msra.mxu0 %v3806_v30  ;;  %3282 = vmatprep.subr.bf16.mxu1 %v3811_v11 }
 0x115   : > { %2513 = vmatprep.subr.bf16.mxu0 %v3811_v11 }
 0x117   : > { %3298 = vmatpush1.bf16.msra.mxu1 %v3809_v33 }
 0x118   : > { %2514 = vmatpush1.bf16.msra.mxu0 %v3809_v33  ;;  %3283 = vmatprep.subr.bf16.mxu1 %v3814_v12 }
 0x119   : > { %2515 = vmatprep.subr.bf16.mxu0 %v3814_v12 }
 0x11b   : > { %3299 = vmatpush1.bf16.msra.mxu1 %v3812_v13 }
 0x11c   : > { %2516 = vmatpush1.bf16.msra.mxu0 %v3812_v13  ;;  %3284 = vmatprep.subr.bf16.mxu1 %v3817_v38 }
 0x11d   : > { %2517 = vmatprep.subr.bf16.mxu0 %v3817_v38 }
 0x11f   : > { %3300 = vmatpush1.bf16.msra.mxu1 %v3815_v14 }
 0x120   : > { %2518 = vmatpush1.bf16.msra.mxu0 %v3815_v14  ;;  %3285 = vmatprep.subr.bf16.mxu1 %v3820_v15 }
 0x121   : > { %2519 = vmatprep.subr.bf16.mxu0 %v3820_v15 }
 0x123   : > { %3301 = vmatpush1.bf16.msra.mxu1 %v3818_v16 }
 0x124   : > { %2520 = vmatpush1.bf16.msra.mxu0 %v3818_v16  ;;  %3286 = vmatprep.subr.bf16.mxu1 %v3823_v17 }
 0x125   : > { %2521 = vmatprep.subr.bf16.mxu0 %v3823_v17 }
 0x127   : > { %3302 = vmatpush1.bf16.msra.mxu1 %v3821_v18 }
 0x128   : > { %2522 = vmatpush1.bf16.msra.mxu0 %v3821_v18  ;;  %3287 = vmatprep.subr.bf16.mxu1 %v3826_v19 }
 0x129   : > { %2523 = vmatprep.subr.bf16.mxu0 %v3826_v19 }
 0x12b   : > { %3303 = vmatpush1.bf16.msra.mxu1 %v3824_v20 }
 0x12c   : > { %2524 = vmatpush1.bf16.msra.mxu0 %v3824_v20  ;;  %3288 = vmatprep.subr.bf16.mxu1 %v3829_v21 }
 0x12d   : > { %2525 = vmatprep.subr.bf16.mxu0 %v3829_v21 }
 0x12f   : > { %3304 = vmatpush1.bf16.msra.mxu1 %v3827_v22 }
 0x130   : > { %2526 = vmatpush1.bf16.msra.mxu0 %v3827_v22  ;;  %3289 = vmatprep.subr.bf16.mxu1 %v3832_v23 }
 0x131   : > { %2527 = vmatprep.subr.bf16.mxu0 %v3832_v23 }
 0x133   : > { %3305 = vmatpush1.bf16.msra.mxu1 %v3830_v24 }
 0x134   : > { %2528 = vmatpush1.bf16.msra.mxu0 %v3830_v24  ;;  %3290 = vmatprep.subr.bf16.mxu1 %v3835_v25 }
 0x135   : > { %2529 = vmatprep.subr.bf16.mxu0 %v3835_v25 }
 0x137   : > { %3306 = vmatpush1.bf16.msra.mxu1 %v3833_v27 }
 0x138   : > { %2530 = vmatpush1.bf16.msra.mxu0 %v3833_v27  ;;  %3291 = vmatprep.subr.bf16.mxu1 %v3838_v28 }
 0x139   : > { %2531 = vmatprep.subr.bf16.mxu0 %v3838_v28 }
 0x13b   : > { %3307 = vmatpush1.bf16.msra.mxu1 %v3836_v29 }
 0x13c   : > { %2532 = vmatpush1.bf16.msra.mxu0 %v3836_v29  ;;  %3292 = vmatprep.subr.bf16.mxu1 %v3841_v54 }
 0x13d   : > { %2533 = vmatprep.subr.bf16.mxu0 %v3841_v54 }
 0x13f   : > { %3308 = vmatpush1.bf16.msra.mxu1 %v3839_v26 }
 0x140   : > { %2534 = vmatpush1.bf16.msra.mxu0 %v3839_v26  ;;  %3293 = vmatprep.subr.bf16.mxu1 %v3844_v36 }
 0x141   : > { %2535 = vmatprep.subr.bf16.mxu0 %v3844_v36 }
 0x143   : > { %3309 = vmatpush1.bf16.msra.mxu1 %v3842_v39 }
 0x144   : > { %2536 = vmatpush1.bf16.msra.mxu0 %v3842_v39 }
 0x146   : > { %2548 = vmatmul.mubr.bf16.vlgmr.msra.gmra.mrb[8].mxu1 %v3174_v40 }
 0x147   : > { %2538 = vmatmul.mubr.bf16.vlgmr.msra.gmra.mrb[0].mxu0 %v4384_v45  ;;  %v2570_v45 = vsub.s32 0, %v2569_v59 }
 0x149   : > { %v2571_v62 = vrot.slane %v2566_v60, %v2570_v45 }
 0x1d9   : > { %v1625_v41 = vpop.f32.mrb[0].mxu1 }
 0x1da   : > { %v1627_v42 = vpop.f32.mrb[1].mxu1 }
 0x1db   : > { %v1629_v43 = vpop.f32.mrb[2].mxu1 }
 0x1dc   : > { %v1631_v44 = vpop.f32.mrb[3].mxu1 }
 0x1e1   : > { %v1635_v46 = vpop.f32.mrb[4].mxu1 }
 0x1e2   : > { %v2496_v47 = vpop.f32.mrb[4].mxu0  ;;  %v1637_v53 = vpop.f32.mrb[5].mxu1 }
 0x1e3   : > { %v3314_v51 = vadd.f32 %v2496_v47, %v1635_v46  ;;  %v2498_v55 = vpop.f32.mrb[5].mxu0  ;;  %v1639_v31 = vpop.f32.mrb[6].mxu1 }
 0x1e4   : > { %v3316_v48 = vadd.f32 %v2498_v55, %v1637_v53  ;;  %v2500_v50 = vpop.f32.mrb[6].mxu0  ;;  %v1641_v56 = vpop.f32.mrb[7].mxu1 }
 0x1e5   : > { %v3318_v34 = vadd.f32 %v2500_v50, %v1639_v31  ;;  %v2502_v49 = vpop.f32.mrb[7].mxu0 }
 0x1e6   : > { %v3320_v57 = vadd.f32 %v2502_v49, %v1641_v56 }
 0x219   : > { %v2549_v2 = vpop.f32.mrb[8].mxu1 }
 0x21a   : > { %v2539_v1 = vpop.f32.mrb[0].mxu0  ;;  %v3315_v4 = vadd.f32 %v3314_v51, %v2549_v2  ;;  %v2551_v6 = vpop.f32.mrb[9].mxu1 }
 0x21b   : > { %v3310_v35 = vadd.f32 %v2539_v1, %v1625_v41  ;;  %v2541_v5 = vpop.f32.mrb[1].mxu0  ;;  %v3317_v8 = vadd.f32 %v3316_v48, %v2551_v6  ;;  %v2553_v0 = vpop.f32.mrb[10].mxu1 }
 0x21c   : > { %v3311_v7 = vadd.f32 %v2541_v5, %v1627_v42  ;;  %v2543_v63 = vpop.f32.mrb[2].mxu0  ;;  %v2582_v37 = vadd.f32 %v3315_v4, %v2571_v62  ;;  %v3319_v10 = vadd.f32 %v3318_v34, %v2553_v0  ;;  %v2555_v30 = vpop.f32.mrb[11].mxu1 }
 0x21d   : > { %v2578_v3 = vadd.f32 %v3310_v35, %v2571_v62  ;;  %v3312_v9 = vadd.f32 %v2543_v63, %v1629_v43  ;;  %v2545_v52 = vpop.f32.mrb[3].mxu0  ;;  %v2583_v33 = vadd.f32 %v3317_v8, %v2575_v32  ;;  %v3321_v13 = vadd.f32 %v3320_v57, %v2555_v30 }
 0x21e   : > { %v2579_v11 = vadd.f32 %v3311_v7, %v2575_v32  ;;  %v3313_v12 = vadd.f32 %v2545_v52, %v1631_v44  ;;  %v2584_v14 = vadd.f32 %v3319_v10, %v2571_v62  ;;  %v2590_v18 = vmax.f32 %v2582_v37, 0.0 }
 0x21f   : > { %v2580_v38 = vadd.f32 %v3312_v9, %v2571_v62  ;;  %v2585_v16 = vadd.f32 %v3321_v13, %v2575_v32  ;;  %v2586_v17 = vmax.f32 %v2578_v3, 0.0  ;;  %v2591_v22 = vmax.f32 %v2583_v33, 0.0 }
 0x220   : > { %v2581_v15 = vadd.f32 %v3313_v12, %v2575_v32  ;;  %v2592_v20 = vmax.f32 %v2584_v14, 0.0  ;;  %v2587_v21 = vmax.f32 %v2579_v11, 0.0 }
 0x221   : > { %v2588_v19 = vmax.f32 %v2580_v38, 0.0  ;;  %v2593_v24 = vmax.f32 %v2585_v16, 0.0 }
 0x222   : > { %v2589_v23 = vmax.f32 %v2581_v15, 0.0  ;;  %v2596_v27 = vpack.c.bf16 %v2592_v20, %v2590_v18 }
 0x223   : > { %v2594_v25 = vpack.c.bf16 %v2588_v19, %v2586_v17  ;;  %v2597_v29 = vpack.c.bf16 %v2593_v24, %v2591_v22 }
 0x224   : > { %v2595_v28 = vpack.c.bf16 %v2589_v23, %v2587_v21  ;;  %2600 = vst [vmem:[#allocation2 + $0x10] sm:$0xff] %v2596_v27 }
 0x225   : > { %2598 = vst [vmem:[#allocation2] sm:$0xff] %v2594_v25  ;;  %v2612_v54 = vshll.u32 %v2594_v25, 16  ;;  %2601 = vst [vmem:[#allocation2 + $0x18] sm:$0xff] %v2597_v29  ;;  %v2610_v39 = vshrl.u32 %v2594_v25, 16 }
 0x226   : > { %2599 = vst [vmem:[#allocation2 + $0x8] sm:$0xff] %v2595_v28  ;;  %v2624_v26 = vshll.u32 %v2595_v28, 16  ;;  %v2622_v51 = vshrl.u32 %v2595_v28, 16 }
 0x227   : > { %v2614_v36 = vrot.slane %v2612_v54, 1 }
 0x228   : > { %v2626_v42 = vrot.slane %v2624_v26, 1 }
 0x229   : > { %v2615_v46 = vor.u32 %v2614_v36, %v2610_v39 }
 0x22a   : > { %v2627_v34 = vor.u32 %v2626_v42, %v2622_v51 }
 0x22b   : > { %v2606_v41 = vld [vmem:[#allocation2 + $0x10] sm:$0x1f] }
 0x22c   : > { %v2647_v40 = vld [vmem:[#allocation2] sm:$0xfe]  ;;  %v2617_v43 = vshll.u32 %v2606_v41, 16  ;;  %v2607_v53 = vld [vmem:[#allocation2 + $0x18] sm:$0x1f]  ;;  %v2633_v48 = vshrl.u32 %v2606_v41, 16 }
 0x22d   : > { %v2648_v44 = vld [vmem:[#allocation2 + $0x8] sm:$0xfe]  ;;  %v2654_v47 = vrot.slane %v2647_v40, 1  ;;  %v2655_v31 = vrot.slane %v2606_v41, 1  ;;  %v2629_v50 = vshll.u32 %v2607_v53, 16  ;;  %v2636_v49 = vshrl.u32 %v2607_v53, 16 }
 0x22e   : > { %v2619_v55 = vrot.slane %v2617_v43, 1  ;;  %v2657_v56 = vrot.slane %v2648_v44, 1  ;;  %v2658_v45 = vrot.slane %v2607_v53, 1  ;;  %v2604_v60 = vld [vmem:[#allocation2 + $0x10] sm:$0xf] }
 0x22f   : > { %v2631_v59 = vrot.slane %v2629_v50, 1  ;;  %v2656_v1 = vsel %vm2653_vm1, %v2654_v47, %v2655_v31  ;;  %v2605_v4 = vld [vmem:[#allocation2 + $0x18] sm:$0xf] }
 0x230   : > { %v2620_v57 = vsel %vm2608_vm0, %v2615_v46, %v2619_v55  ;;  %v2635_v58 = vor.u32 %v2633_v48, %v2619_v55  ;;  %v2659_v8 = vsel %vm2653_vm1, %v2657_v56, %v2658_v45 }
 0x231   : > { %v2643_v61 = vmax.bf16 %v2620_v57, %v2594_v25  ;;  %v2632_v2 = vsel %vm2608_vm0, %v2627_v34, %v2631_v59  ;;  %v2638_v32 = vor.u32 %v2636_v49, %v2631_v59 }
 0x232   : > { %v2645_v62 = vmax.bf16 %v2635_v58, %v2604_v60  ;;  %v2644_v5 = vmax.bf16 %v2632_v2, %v2595_v28 }
 0x233   : > { %v2664_v35 = vmax.bf16 %v2656_v1, %v2643_v61  ;;  %v2646_v7 = vmax.bf16 %v2638_v32, %v2605_v4 }
 0x234   : > { %v2666_v6 = vmax.bf16 %v2655_v31, %v2645_v62  ;;  %v2665_v63 = vmax.bf16 %v2659_v8, %v2644_v5 }
 0x235   : > { %v2667_v0 = vmax.bf16 %v2658_v45, %v2646_v7 }
 0x236   : > { %v3272_v3 = vcombine.low %v2664_v35, %v2665_v63  ;;  %v3273_v37 = vcombine.high %v2664_v35, %v2665_v63 }
 0x237   : > { %v3274_v9 = vcombine.low %v2666_v6, %v2667_v0 }
 0x238   : > { %v2689_v10 = vmax.bf16 %v3273_v37, %v3272_v3 }
 0x23a   : > { %v2691_v52 = vmax.bf16 %v3274_v9, %v2689_v10 }
 0x23c   : > { %2692 = vst [vmem:[%s170_s16] sm:$0xff] %v2691_v52 }
 0x23d PF: > { %s13_s12 = sadd.s32 1, %s3855_s12  }
 0x23e   : > { %p10_p4 = scmp.ge.s32.totalorder %s13_s12, 4  }
 0x240   :  { %12 = sbr.rel (!%p10_p4) target bundleno = 1 (0x1), region = 64 }

// kernel: finetune_net_forward.11
= control target key start
LH: loop header
LB: loop body
LE: loop exit
PB: predicated region body
PF: predicated region fallthrough
CT: control target
= control target key end

     0   :  { %v429_v1 = vmov 0.0   ;;  %vm430_vm0 = vmmov 0   ;;  %s554_s1 = inlined_call_operand.vmem [shape: bf16[256,128], index: 1, kind: input, shape index: {}]   ;;  %s555_s0 = inlined_call_operand.vmem [shape: bf16[8,256], index: 0, kind: input, shape index: {}]   ;;  %s556_s3 = inlined_call_operand.vmem [shape: bf16[128,128], index: 3, kind: input, shape index: {}]   ;;  %s557_s2 = inlined_call_operand.vmem [shape: f32[1,128], index: 2, kind: input, shape index: {}]   ;;  %s558_s4 = inlined_call_operand.vmem [shape: f32[1,128], index: 4, kind: input, shape index: {}]   ;;  %s559_s5 = inlined_call_operand.vmem [shape: f32[8,128], index: 5, kind: output, shape index: {}]  }
   0x1   :  { %v403_v0 = vld [vmem:[%s554_s1 + $0x40] sm:$0xff]   ;;  %381 = vmatprep.subr.bf16.mxu1 %v429_v1  ;;  %v405_v3 = vld [vmem:[%s554_s1 + $0x48] sm:$0xff]   ;;  %v407_v5 = vld [vmem:[%s554_s1 + $0x50] sm:$0xff]   ;;  %397 = vmatprep.mubr.msk.bf16.mxu1 %vm430_vm0, %v429_v1 }
   0x2   :  { %v404_v2 = vld [vmem:[%s554_s1] sm:$0xff]   ;;  %350 = vmatprep.subr.bf16.mxu0 %v403_v0  ;;  %v406_v4 = vld [vmem:[%s554_s1 + $0x8] sm:$0xff]   ;;  %v408_v6 = vld [vmem:[%s554_s1 + $0x10] sm:$0xff]  }
   0x3   :  { %351 = vmatpush3.bf16.msra.mxu0 %v404_v2  ;;  %v409_v7 = vld [vmem:[%s554_s1 + $0x58] sm:$0xff]   ;;  %v411_v9 = vld [vmem:[%s554_s1 + $0x60] sm:$0xff]   ;;  %v413_v11 = vld [vmem:[%s554_s1 + $0x68] sm:$0xff]  }
   0x4   :  { %352 = vmatprep.subr.bf16.mxu0 %v405_v3  ;;  %v410_v8 = vld [vmem:[%s554_s1 + $0x18] sm:$0xff]   ;;  %v412_v10 = vld [vmem:[%s554_s1 + $0x20] sm:$0xff]   ;;  %v414_v15 = vld [vmem:[%s554_s1 + $0x28] sm:$0xff]  }
   0x5   :  { %v21_v12 = vld [vmem:[%s555_s0] sm:$0xff]  ;;  %v415_v16 = vld [vmem:[%s554_s1 + $0x70] sm:$0xff]   ;;  %v422_v17 = vld [vmem:[%s556_s3 + $0x8] sm:$0xff]  }
   0x6   :  { %v324_v13 = vcombine.high %v21_v12, %v21_v12  ;;  %v421_v14 = vld [vmem:[%s556_s3] sm:$0xff]   ;;  %v416_v18 = vld [vmem:[%s554_s1 + $0x30] sm:$0xff]   ;;  %v417_v19 = vld [vmem:[%s554_s1 + $0x78] sm:$0xff]   ;;  %v323_v23 = vcombine.low %v21_v12, %v21_v12 }
   0x7   :  { %353 = vmatpush3.bf16.msra.mxu0 %v406_v4  ;;  %382 = vmatpush3.bf16.msra.mxu1 %v421_v14  ;;  %v423_v20 = vld [vmem:[%s556_s3 + $0x10] sm:$0xff]   ;;  %v418_v21 = vld [vmem:[%s554_s1 + $0x38] sm:$0xff]   ;;  %v425_v24 = vld [vmem:[%s556_s3 + $0x20] sm:$0xff]  }
   0x8   :  { %354 = vmatprep.subr.bf16.mxu0 %v407_v5  ;;  %196 = vmatprep.mubr.bf16.mxu0 %v324_v13  ;;  %v424_v22 = vld [vmem:[%s556_s3 + $0x18] sm:$0xff]   ;;  %v426_v25 = vld [vmem:[%s556_s3 + $0x28] sm:$0xff]   ;;  %v427_v26 = vld [vmem:[%s556_s3 + $0x30] sm:$0xff]  }
   0x9   :  { %383 = vmatprep.subr.bf16.mxu1 %v429_v1  ;;  %v428_v27 = vld [vmem:[%s556_s3 + $0x38] sm:$0xff]   ;;  %v322_v29 = vld [vmem:[%s557_s2] ss:$0 sm:$0xff] }
   0xa   :  { %v341_v37 = vld [vmem:[%s558_s4] ss:$0 sm:$0xff] }
   0xb   :  { %355 = vmatpush3.bf16.msra.mxu0 %v408_v6  ;;  %384 = vmatpush3.bf16.msra.mxu1 %v422_v17 }
   0xc   :  { %356 = vmatprep.subr.bf16.mxu0 %v409_v7  ;;  %385 = vmatprep.subr.bf16.mxu1 %v429_v1 }
   0xf   :  { %357 = vmatpush3.bf16.msra.mxu0 %v410_v8  ;;  %386 = vmatpush3.bf16.msra.mxu1 %v423_v20 }
  0x10   :  { %358 = vmatprep.subr.bf16.mxu0 %v411_v9  ;;  %387 = vmatprep.subr.bf16.mxu1 %v429_v1 }
  0x13   :  { %359 = vmatpush3.bf16.msra.mxu0 %v412_v10  ;;  %388 = vmatpush3.bf16.msra.mxu1 %v424_v22 }
  0x14   :  { %360 = vmatprep.subr.bf16.mxu0 %v413_v11  ;;  %389 = vmatprep.subr.bf16.mxu1 %v429_v1 }
  0x17   :  { %361 = vmatpush3.bf16.msra.mxu0 %v414_v15  ;;  %390 = vmatpush3.bf16.msra.mxu1 %v425_v24 }
  0x18   :  { %362 = vmatprep.subr.bf16.mxu0 %v415_v16  ;;  %391 = vmatprep.subr.bf16.mxu1 %v429_v1 }
  0x1b   :  { %363 = vmatpush3.bf16.msra.mxu0 %v416_v18  ;;  %392 = vmatpush3.bf16.msra.mxu1 %v426_v25 }
  0x1c   :  { %364 = vmatprep.subr.bf16.mxu0 %v417_v19  ;;  %393 = vmatprep.subr.bf16.mxu1 %v429_v1 }
  0x1f   :  { %365 = vmatpush3.bf16.msra.mxu0 %v418_v21  ;;  %394 = vmatpush3.bf16.msra.mxu1 %v427_v26 }
  0x20   :  { %395 = vmatprep.subr.bf16.mxu1 %v429_v1 }
  0x22   :  { %197 = vmatmul.mubr.bf16.vlgmr.msra.gmra.mrb[0].mxu0 %v323_v23 }
  0x23   :  { %396 = vmatpush3.bf16.msra.mxu1 %v428_v27 }
  0xf5   :  { %v366_v28 = vpop.f32.mrb[0].mxu0 }
  0xf6   :  { %v367_v30 = vpop.f32.mrb[1].mxu0 }
  0xf7   :  { %v368_v31 = vadd.f32 %v367_v30, %v366_v28  ;;  %v369_v32 = vpop.f32.mrb[2].mxu0 }
  0xf8   :  { %v370_v33 = vpop.f32.mrb[3].mxu0 }
  0xf9   :  { %v199_v34 = vadd.f32 %v368_v31, %v322_v29 }
  0xfb   :  { %v204_v35 = vmax.f32 %v199_v34, 0.0 }
  0xfd   :  { %v205_v36 = vpack.c.bf16 %v204_v35, %v204_v35 }
  0xff   :  { %398 = vmatmul.mubr.bf16.vlgmr.msra.gmra.mrb[0].mxu1 %v205_v36 }
 0x1d2   :  { %v311_v38 = vpop.f32.mrb[0].mxu1 }
 0x1d3   :  { %v312_v39 = vadd.f32 %v341_v37, %v311_v38  ;;  %v399_v40 = vpop.f32.mrb[1].mxu1 }
 0x1d4   :  { %v314_v41 = vpop.f32.mrb[2].mxu1 }
 0x1d5   :  { %317 = vst [vmem:[%s559_s5] sm:$0xff] %v312_v39  ;;  %v400_v42 = vpop.f32.mrb[3].mxu1 }

</bundles_post_ra>
